<compile_context>
chip_gen: v7x
topology: tpu7x:2x2x1
jax: 0.10.0
libtpu: 0.0.40
codegen_flags: <defaults>
</compile_context>

<pallas_src>
import math
import functools

import jax
import jax.numpy as jnp
from jax import lax
from jax.experimental import pallas as pl
from jax.experimental.pallas import tpu as pltpu


# ----------------------------- Pallas kernel -----------------------------

def _layer_norm(z, g, b, eps=1e-5):
    mu = jnp.mean(z, axis=-1, keepdims=True)
    var = jnp.mean(jnp.square(z - mu), axis=-1, keepdims=True)
    return (z - mu) * lax.rsqrt(var + eps) * g + b


def fused_temporal_encoder_kernel(x_ref, vec_ref, wqkv_ref, wo_ref, w1_ref, w2_ref,
                                  o_ref, *, num_heads, seq_len):
    """All encoder layers + final LayerNorm in one invocation.

    x_ref:    (N*S, D) f32  flattened tokens (batch-major)
    vec_ref:  (L, 10, 4D) f32  packed small vectors:
              [g1, b1n, b_qkv(3D), b_o, g2, b2n, b_ff1(4D), b_ff2, norm_w*, norm_b*]
              (*final-norm params stored in layer 0's slab)
    wqkv_ref: (L, D, 3D) bf16   (Q columns pre-scaled by 1/sqrt(HD))
    wo_ref:   (L, D, D)  bf16
    w1_ref:   (L, D, 4D) bf16
    w2_ref:   (L, 4D, D) bf16
    o_ref:    (N, D) f32  normalized cls-token output
    """
    NS, D = x_ref.shape
    S = seq_len
    N = NS // S
    L = wqkv_ref.shape[0]
    H = num_heads
    HD = D // H

    # ---- block-diagonal causal mask, generated in-kernel (no HBM mask input) ----
    row = lax.broadcasted_iota(jnp.int32, (NS, NS), 0)
    col = lax.broadcasted_iota(jnp.int32, (NS, NS), 1)
    row_blk = jnp.zeros((NS, NS), jnp.int32)
    col_blk = jnp.zeros((NS, NS), jnp.int32)
    for b in range(1, N):                 # static unroll; avoids vector integer div
        row_blk = row_blk + jnp.where(row >= b * S, 1, 0)
        col_blk = col_blk + jnp.where(col >= b * S, 1, 0)
    allowed = (row_blk == col_blk) & (col <= row)
    mask = jnp.where(allowed, 0.0, -1e9)                          # (NS, NS) additive

    x = x_ref[...]                                                # (NS, D) f32

    for l in range(L):                    # static unroll; all weights already in VMEM
        g1   = vec_ref[l, 0:1, :D]
        b1n  = vec_ref[l, 1:2, :D]
        bqkv = vec_ref[l, 2:3, :3 * D]
        bo   = vec_ref[l, 3:4, :D]
        g2   = vec_ref[l, 4:5, :D]
        b2n  = vec_ref[l, 5:6, :D]
        bf1  = vec_ref[l, 6:7, :4 * D]
        bf2  = vec_ref[l, 7:8, :D]

        # ---------------- self-attention block (pre-norm) ----------------
        xn = _layer_norm(x, g1, b1n)
        # fused QKV projection: one (N*S, D) @ (D, 3D) bf16 MXU matmul, f32 accumulate
        qkv = jnp.dot(xn.astype(jnp.bfloat16), wqkv_ref[l],
                      preferred_element_type=jnp.float32) + bqkv          # (NS, 3D)

        # head split with tile-friendly relayouts only:
        #   (NS, 3D) --T--> (3D, NS) --reshape--> (3H, HD, NS); leading-axis slices.
        qkv_t = qkv.T.reshape(3 * H, HD, NS)
        q_t = qkv_t[0:H]                   # (H, HD, NS)  scale already folded into Wq
        k_t = qkv_t[H:2 * H]
        v_t = qkv_t[2 * H:3 * H]

        # head-batched score / context einsums (replace 16 tiny per-head matmuls)
        s = jnp.einsum('hdq,hdk->hqk', q_t, k_t,
                       preferred_element_type=jnp.float32) + mask         # (H, NS, NS)
        s = s - jnp.max(s, axis=-1, keepdims=True)
        p = jnp.exp(s)
        p = p * pl.reciprocal(jnp.sum(p, axis=-1, keepdims=True), approx=True)
        ctx_t = jnp.einsum('hdk,hqk->hdq', v_t, p,
                           preferred_element_type=jnp.float32)            # (H, HD, NS)
        ctx = ctx_t.reshape(D, NS).T                                      # (NS, D)

        # single full-width output projection over the merged heads
        attn_out = jnp.dot(ctx.astype(jnp.bfloat16), wo_ref[l],
                           preferred_element_type=jnp.float32) + bo
        x = x + attn_out                       # dropout1 == identity (eval mode)

        # ---------------- feed-forward block (pre-norm) ----------------
        xn2 = _layer_norm(x, g2, b2n)
        hidden = jnp.maximum(
            jnp.dot(xn2.astype(jnp.bfloat16), w1_ref[l],
                    preferred_element_type=jnp.float32) + bf1, 0.0)
        x = x + jnp.dot(hidden.astype(jnp.bfloat16), w2_ref[l],
                        preferred_element_type=jnp.float32) + bf2

    # ---- cls token (last position of each batch element) + final LayerNorm ----
    # TODO(synk): at large N, replace with a strided extraction / agent-tiled grid.
    cls_rows = [x[n * S + S - 1:n * S + S, :] for n in range(N)]
    cls = cls_rows[0] if N == 1 else jnp.concatenate(cls_rows, axis=0)    # (N, D)
    gfin = vec_ref[0, 8:9, :D]
    bfin = vec_ref[0, 9:10, :D]
    o_ref[...] = _layer_norm(cls, gfin, bfin)


# ----------------------------- wrapper -----------------------------

def temporal_encoder_forward(x, padding_mask, prepared, *, num_heads):
    """x: (T, N, D) f32, padding_mask: (N, T) bool  ->  (N, D) f32."""
    T, N, D = x.shape
    S = T + 1

    # preamble (matches TemporalEncoder.forward) -- cheap, stays in XLA
    x = jnp.where(padding_mask.T[:, :, None], prepared['padding_token'], x)
    cls_tok = jnp.broadcast_to(prepared['cls_token'], (1, N, D))
    x = jnp.concatenate([x, cls_tok], axis=0) + prepared['pos_embed']     # (S, N, D)
    x = jnp.transpose(x, (1, 0, 2)).astype(jnp.float32).reshape(N * S, D) # (N*S, D)

    kernel = functools.partial(fused_temporal_encoder_kernel,
                               num_heads=num_heads, seq_len=S)
    return pl.pallas_call(
        kernel,
        out_shape=jax.ShapeDtypeStruct((N, D), jnp.float32),
        compiler_params=pltpu.CompilerParams(vmem_limit_bytes=32 * 1024 * 1024),
    )(x, prepared['vecs'], prepared['wqkv'], prepared['wo'],
      prepared['w1'], prepared['w2'])


# ----------------------------- parameter init / packing -----------------------------

def _xavier_uniform(key, out_f, in_f):
    bound = math.sqrt(6.0 / (in_f + out_f))
    return jax.random.uniform(key, (out_f, in_f), jnp.float32, -bound, bound)


def make_layer_params(key, D):
    ks = jax.random.split(key, 4)
    bound = math.sqrt(6.0 / (D + D))                     # MHA in_proj init
    in_proj = jax.random.uniform(ks[0], (3 * D, D), jnp.float32, -bound, bound)
    wqkv = in_proj.T                                     # (D, 3D): cols = [Q | K | V]
    wo = _xavier_uniform(ks[1], D, D).T                  # out_proj, (D, D)
    w1 = _xavier_uniform(ks[2], 4 * D, D).T              # (D, 4D)
    w2 = _xavier_uniform(ks[3], D, 4 * D).T              # (4D, D)
    z = lambda n: jnp.zeros((n,), jnp.float32)
    return dict(
        g1=jnp.ones((D,), jnp.float32), b1n=z(D),
        wqkv=wqkv, bqkv=z(3 * D),
        wo=wo, bo=z(D),
        g2=jnp.ones((D,), jnp.float32), b2n=z(D),
        w1=w1, b1=z(4 * D),
        w2=w2, b2=z(D),
    )


def make_params(key, T, D, H, L):
    keys = jax.random.split(key, L + 3)
    layers = [make_layer_params(keys[i], D) for i in range(L)]
    stacked = {k: jnp.stack([lp[k] for lp in layers], axis=0) for k in layers[0]}
    return dict(
        stacked=stacked,
        cls_token=0.02 * jax.random.normal(keys[L], (1, 1, D), jnp.float32),
        pos_embed=0.02 * jax.random.normal(keys[L + 1], (T + 1, 1, D), jnp.float32),
        padding_token=0.02 * jax.random.normal(keys[L + 2], (T, 1, D), jnp.float32),
        norm_w=jnp.ones((D,), jnp.float32),
        norm_b=jnp.zeros((D,), jnp.float32),
    )


def prepare_params(params, num_heads):
    """One-time offline transform: scale fold, bf16 weights, vector-slab packing."""
    st = params['stacked']
    L, D, _ = st['wqkv'].shape
    HD = D // num_heads
    scale = 1.0 / math.sqrt(HD)

    # fold 1/sqrt(HD) into the Q columns of W_qkv / b_qkv (free, done once)
    q_scale = jnp.concatenate(
        [jnp.full((D,), scale, jnp.float32), jnp.ones((2 * D,), jnp.float32)])
    wqkv = st['wqkv'] * q_scale[None, None, :]
    bqkv = st['bqkv'] * q_scale[None, :]

    # pack the 8 tiny per-layer vectors + final-norm params into one (L, 10, 4D) slab
    vecs = jnp.zeros((L, 10, 4 * D), jnp.float32)
    vecs = vecs.at[:, 0, :D].set(st['g1'])
    vecs = vecs.at[:, 1, :D].set(st['b1n'])
    vecs = vecs.at[:, 2, :3 * D].set(bqkv)
    vecs = vecs.at[:, 3, :D].set(st['bo'])
    vecs = vecs.at[:, 4, :D].set(st['g2'])
    vecs = vecs.at[:, 5, :D].set(st['b2n'])
    vecs = vecs.at[:, 6, :4 * D].set(st['b1'])
    vecs = vecs.at[:, 7, :D].set(st['b2'])
    vecs = vecs.at[0, 8, :D].set(params['norm_w'])
    vecs = vecs.at[0, 9, :D].set(params['norm_b'])

    bf16 = lambda a: a.astype(jnp.bfloat16)
    return dict(
        cls_token=params['cls_token'],
        pos_embed=params['pos_embed'],
        padding_token=params['padding_token'],
        vecs=vecs,
        wqkv=bf16(wqkv), wo=bf16(st['wo']), w1=bf16(st['w1']), w2=bf16(st['w2']),
    )


# ----------------------------- main -----------------------------

if __name__ == "__main__":
    historical_steps = 8   # T
    embed_dim = 64         # D
    num_heads = 8
    num_layers = 4
    batch = 2              # N (number of agents)

    root = jax.random.PRNGKey(0)
    k_x, k_mask, k_params = jax.random.split(root, 3)

    x = jax.random.normal(k_x, (historical_steps, batch, embed_dim), jnp.float32)
    padding_mask = jax.random.bernoulli(k_mask, 0.3, (batch, historical_steps))

    params = make_params(k_params, historical_steps, embed_dim, num_heads, num_layers)
    prepared = prepare_params(params, num_heads)   # one-time packing, not per call

    out = temporal_encoder_forward(x, padding_mask, prepared, num_heads=num_heads)
    out = jax.block_until_ready(out)

    assert out.shape == (batch, embed_dim)
    assert bool(jnp.all(jnp.isfinite(out)))
    print("KERNEL_OK")
</pallas_src>

<mosaic_0001>
module attributes {stable_mosaic.version = 11 : i64} {
  func.func @fused_temporal_encoder_kernel(%arg0: memref<18x64xf32, #tpu.memory_space<vmem>>, %arg1: memref<4x10x256xf32, #tpu.memory_space<vmem>>, %arg2: memref<4x64x192xbf16, #tpu.memory_space<vmem>>, %arg3: memref<4x64x64xbf16, #tpu.memory_space<vmem>>, %arg4: memref<4x64x256xbf16, #tpu.memory_space<vmem>>, %arg5: memref<4x256x64xbf16, #tpu.memory_space<vmem>>, %arg6: memref<2x64xf32, #tpu.memory_space<vmem>>) attributes {dimension_semantics = [], scalar_prefetch = 0 : i64, scratch_operands = 0 : i64, tpu.core_type = #tpu.core_type<tc>} {
    %0 = tpu.iota {dimensions = array<i32: 0>} : vector<18x18xi32>
    %1 = tpu.iota {dimensions = array<i32: 1>} : vector<18x18xi32>
    %c0_i32 = arith.constant 0 : i32
    %2 = vector.broadcast %c0_i32 : i32 to vector<18x18xi32>
    %c0_i32_0 = arith.constant 0 : i32
    %3 = vector.broadcast %c0_i32_0 : i32 to vector<18x18xi32>
    %c9_i32 = arith.constant 9 : i32
    %4 = vector.broadcast %c9_i32 : i32 to vector<18x18xi32>
    %5 = arith.cmpi sge, %0, %4 : vector<18x18xi32>
    %c1_i32 = arith.constant 1 : i32
    %c0_i32_1 = arith.constant 0 : i32
    %6 = vector.broadcast %c1_i32 : i32 to vector<18x18xi32>
    %7 = vector.broadcast %c0_i32_1 : i32 to vector<18x18xi32>
    %8 = arith.select %5, %6, %7 : vector<18x18xi1>, vector<18x18xi32>
    %9 = arith.addi %2, %8 : vector<18x18xi32>
    %c9_i32_2 = arith.constant 9 : i32
    %10 = vector.broadcast %c9_i32_2 : i32 to vector<18x18xi32>
    %11 = arith.cmpi sge, %1, %10 : vector<18x18xi32>
    %c1_i32_3 = arith.constant 1 : i32
    %c0_i32_4 = arith.constant 0 : i32
    %12 = vector.broadcast %c1_i32_3 : i32 to vector<18x18xi32>
    %13 = vector.broadcast %c0_i32_4 : i32 to vector<18x18xi32>
    %14 = arith.select %11, %12, %13 : vector<18x18xi1>, vector<18x18xi32>
    %15 = arith.addi %3, %14 : vector<18x18xi32>
    %16 = arith.cmpi eq, %9, %15 : vector<18x18xi32>
    %17 = arith.cmpi sle, %1, %0 : vector<18x18xi32>
    %18 = arith.andi %16, %17 : vector<18x18xi1>
    %cst = arith.constant 0.000000e+00 : f32
    %cst_5 = arith.constant -1.000000e+09 : f32
    %19 = vector.broadcast %cst : f32 to vector<18x18xf32>
    %20 = vector.broadcast %cst_5 : f32 to vector<18x18xf32>
    %21 = arith.select %18, %19, %20 : vector<18x18xi1>, vector<18x18xf32>
    %c0 = arith.constant 0 : index
    %c0_6 = arith.constant 0 : index
    %22 = vector.load %arg0[%c0, %c0_6] : memref<18x64xf32, #tpu.memory_space<vmem>>, vector<18x64xf32>
    %c0_7 = arith.constant 0 : index
    %c0_8 = arith.constant 0 : index
    %c0_9 = arith.constant 0 : index
    %23 = vector.load %arg1[%c0_7, %c0_8, %c0_9] : memref<4x10x256xf32, #tpu.memory_space<vmem>>, vector<1x1x64xf32>
    %24 = vector.shape_cast %23 : vector<1x1x64xf32> to vector<1x64xf32>
    %c0_10 = arith.constant 0 : index
    %c1 = arith.constant 1 : index
    %c0_11 = arith.constant 0 : index
    %25 = vector.load %arg1[%c0_10, %c1, %c0_11] : memref<4x10x256xf32, #tpu.memory_space<vmem>>, vector<1x1x64xf32>
    %26 = vector.shape_cast %25 : vector<1x1x64xf32> to vector<1x64xf32>
    %c0_12 = arith.constant 0 : index
    %c2 = arith.constant 2 : index
    %c0_13 = arith.constant 0 : index
    %27 = vector.load %arg1[%c0_12, %c2, %c0_13] : memref<4x10x256xf32, #tpu.memory_space<vmem>>, vector<1x1x192xf32>
    %28 = vector.shape_cast %27 : vector<1x1x192xf32> to vector<1x192xf32>
    %c0_14 = arith.constant 0 : index
    %c3 = arith.constant 3 : index
    %c0_15 = arith.constant 0 : index
    %29 = vector.load %arg1[%c0_14, %c3, %c0_15] : memref<4x10x256xf32, #tpu.memory_space<vmem>>, vector<1x1x64xf32>
    %30 = vector.shape_cast %29 : vector<1x1x64xf32> to vector<1x64xf32>
    %c0_16 = arith.constant 0 : index
    %c4 = arith.constant 4 : index
    %c0_17 = arith.constant 0 : index
    %31 = vector.load %arg1[%c0_16, %c4, %c0_17] : memref<4x10x256xf32, #tpu.memory_space<vmem>>, vector<1x1x64xf32>
    %32 = vector.shape_cast %31 : vector<1x1x64xf32> to vector<1x64xf32>
    %c0_18 = arith.constant 0 : index
    %c5 = arith.constant 5 : index
    %c0_19 = arith.constant 0 : index
    %33 = vector.load %arg1[%c0_18, %c5, %c0_19] : memref<4x10x256xf32, #tpu.memory_space<vmem>>, vector<1x1x64xf32>
    %34 = vector.shape_cast %33 : vector<1x1x64xf32> to vector<1x64xf32>
    %c0_20 = arith.constant 0 : index
    %c6 = arith.constant 6 : index
    %c0_21 = arith.constant 0 : index
    %35 = vector.load %arg1[%c0_20, %c6, %c0_21] : memref<4x10x256xf32, #tpu.memory_space<vmem>>, vector<1x1x256xf32>
    %36 = vector.shape_cast %35 : vector<1x1x256xf32> to vector<1x256xf32>
    %c0_22 = arith.constant 0 : index
    %c7 = arith.constant 7 : index
    %c0_23 = arith.constant 0 : index
    %37 = vector.load %arg1[%c0_22, %c7, %c0_23] : memref<4x10x256xf32, #tpu.memory_space<vmem>>, vector<1x1x64xf32>
    %38 = vector.shape_cast %37 : vector<1x1x64xf32> to vector<1x64xf32>
    %cst_24 = arith.constant dense<0.000000e+00> : vector<18xf32>
    %39 = vector.multi_reduction <add>, %22, %cst_24 [1] : vector<18x64xf32> to vector<18xf32>
    %40 = vector.shape_cast %39 : vector<18xf32> to vector<18x1xf32>
    %cst_25 = arith.constant 6.400000e+01 : f32
    %41 = vector.broadcast %cst_25 : f32 to vector<18x1xf32>
    %42 = arith.divf %40, %41 : vector<18x1xf32>
    %43 = vector.broadcast %42 : vector<18x1xf32> to vector<18x64xf32>
    %44 = arith.subf %22, %43 : vector<18x64xf32>
    %45 = arith.mulf %44, %44 : vector<18x64xf32>
    %cst_26 = arith.constant dense<0.000000e+00> : vector<18xf32>
    %46 = vector.multi_reduction <add>, %45, %cst_26 [1] : vector<18x64xf32> to vector<18xf32>
    %47 = vector.shape_cast %46 : vector<18xf32> to vector<18x1xf32>
    %cst_27 = arith.constant 6.400000e+01 : f32
    %48 = vector.broadcast %cst_27 : f32 to vector<18x1xf32>
    %49 = arith.divf %47, %48 : vector<18x1xf32>
    %50 = vector.broadcast %42 : vector<18x1xf32> to vector<18x64xf32>
    %51 = arith.subf %22, %50 : vector<18x64xf32>
    %cst_28 = arith.constant 9.99999974E-6 : f32
    %52 = vector.broadcast %cst_28 : f32 to vector<18x1xf32>
    %53 = arith.addf %49, %52 : vector<18x1xf32>
    %54 = math.rsqrt %53 : vector<18x1xf32>
    %55 = vector.broadcast %54 : vector<18x1xf32> to vector<18x64xf32>
    %56 = arith.mulf %51, %55 : vector<18x64xf32>
    %57 = vector.broadcast %24 : vector<1x64xf32> to vector<18x64xf32>
    %58 = arith.mulf %56, %57 : vector<18x64xf32>
    %59 = vector.broadcast %26 : vector<1x64xf32> to vector<18x64xf32>
    %60 = arith.addf %58, %59 : vector<18x64xf32>
    %61 = arith.truncf %60 : vector<18x64xf32> to vector<18x64xbf16>
    %c0_29 = arith.constant 0 : index
    %c0_30 = arith.constant 0 : index
    %c0_31 = arith.constant 0 : index
    %62 = vector.load %arg2[%c0_29, %c0_30, %c0_31] : memref<4x64x192xbf16, #tpu.memory_space<vmem>>, vector<1x64x192xbf16>
    %63 = vector.shape_cast %62 : vector<1x64x192xbf16> to vector<64x192xbf16>
    %cst_32 = arith.constant dense<0.000000e+00> : vector<18x192xf32>
    %64 = tpu.matmul %61, %63, %cst_32 {dimension_numbers = #tpu.dot_dimension_numbers<[1], [0], [0], [1], [0, 0, 1, 1], [], []>} : vector<18x64xbf16>, vector<64x192xbf16>, vector<18x192xf32> -> vector<18x192xf32>
    %65 = vector.broadcast %28 : vector<1x192xf32> to vector<18x192xf32>
    %66 = arith.addf %64, %65 : vector<18x192xf32>
    %67 = tpu.transpose %66, [1, 0] : vector<18x192xf32> -> vector<192x18xf32>
    %68 = vector.shape_cast %67 : vector<192x18xf32> to vector<24x8x18xf32>
    %69 = vector.extract_strided_slice %68 {offsets = [0, 0, 0], sizes = [8, 8, 18], strides = [1, 1, 1]} : vector<24x8x18xf32> to vector<8x8x18xf32>
    %70 = vector.extract_strided_slice %68 {offsets = [8, 0, 0], sizes = [8, 8, 18], strides = [1, 1, 1]} : vector<24x8x18xf32> to vector<8x8x18xf32>
    %71 = vector.extract_strided_slice %68 {offsets = [16, 0, 0], sizes = [8, 8, 18], strides = [1, 1, 1]} : vector<24x8x18xf32> to vector<8x8x18xf32>
    "tpu.trace_start"() <{level = 10 : i32, message = "hdq,hdk->hqk"}> : () -> ()
    %cst_33 = arith.constant dense<0.000000e+00> : vector<8x18x18xf32>
    %72 = tpu.matmul %69, %70, %cst_33 {dimension_numbers = #tpu.dot_dimension_numbers<[1], [1], [2], [2], [0, 0, 0, 2, 1, 2], [0], [0]>} : vector<8x8x18xf32>, vector<8x8x18xf32>, vector<8x18x18xf32> -> vector<8x18x18xf32>
    "tpu.trace_stop"() : () -> ()
    %73 = vector.shape_cast %21 : vector<18x18xf32> to vector<1x18x18xf32>
    %74 = vector.broadcast %73 : vector<1x18x18xf32> to vector<8x18x18xf32>
    %75 = arith.addf %72, %74 : vector<8x18x18xf32>
    %cst_34 = arith.constant dense<0xFF800000> : vector<8x18xf32>
    %76 = vector.multi_reduction <maximumf>, %75, %cst_34 [2] : vector<8x18x18xf32> to vector<8x18xf32>
    %77 = vector.shape_cast %76 : vector<8x18xf32> to vector<8x18x1xf32>
    %78 = vector.broadcast %77 : vector<8x18x1xf32> to vector<8x18x18xf32>
    %79 = arith.subf %75, %78 : vector<8x18x18xf32>
    %80 = math.exp %79 : vector<8x18x18xf32>
    %cst_35 = arith.constant dense<0.000000e+00> : vector<8x18xf32>
    %81 = vector.multi_reduction <add>, %80, %cst_35 [2] : vector<8x18x18xf32> to vector<8x18xf32>
    %82 = vector.shape_cast %81 : vector<8x18xf32> to vector<8x18x1xf32>
    %83 = tpu.reciprocal %82 {approx = true} : vector<8x18x1xf32> -> vector<8x18x1xf32>
    %84 = vector.broadcast %83 : vector<8x18x1xf32> to vector<8x18x18xf32>
    %85 = arith.mulf %80, %84 : vector<8x18x18xf32>
    "tpu.trace_start"() <{level = 10 : i32, message = "hdk,hqk->hdq"}> : () -> ()
    %cst_36 = arith.constant dense<0.000000e+00> : vector<8x8x18xf32>
    %86 = tpu.matmul %71, %85, %cst_36 {dimension_numbers = #tpu.dot_dimension_numbers<[2], [2], [1], [1], [0, 0, 0, 1, 1, 1], [0], [0]>} : vector<8x8x18xf32>, vector<8x18x18xf32>, vector<8x8x18xf32> -> vector<8x8x18xf32>
    "tpu.trace_stop"() : () -> ()
    %87 = vector.shape_cast %86 : vector<8x8x18xf32> to vector<64x18xf32>
    %88 = tpu.transpose %87, [1, 0] : vector<64x18xf32> -> vector<18x64xf32>
    %89 = arith.truncf %88 : vector<18x64xf32> to vector<18x64xbf16>
    %c0_37 = arith.constant 0 : index
    %c0_38 = arith.constant 0 : index
    %c0_39 = arith.constant 0 : index
    %90 = vector.load %arg3[%c0_37, %c0_38, %c0_39] : memref<4x64x64xbf16, #tpu.memory_space<vmem>>, vector<1x64x64xbf16>
    %91 = vector.shape_cast %90 : vector<1x64x64xbf16> to vector<64x64xbf16>
    %cst_40 = arith.constant dense<0.000000e+00> : vector<18x64xf32>
    %92 = tpu.matmul %89, %91, %cst_40 {dimension_numbers = #tpu.dot_dimension_numbers<[1], [0], [0], [1], [0, 0, 1, 1], [], []>} : vector<18x64xbf16>, vector<64x64xbf16>, vector<18x64xf32> -> vector<18x64xf32>
    %93 = vector.broadcast %30 : vector<1x64xf32> to vector<18x64xf32>
    %94 = arith.addf %92, %93 : vector<18x64xf32>
    %95 = arith.addf %22, %94 : vector<18x64xf32>
    %cst_41 = arith.constant dense<0.000000e+00> : vector<18xf32>
    %96 = vector.multi_reduction <add>, %95, %cst_41 [1] : vector<18x64xf32> to vector<18xf32>
    %97 = vector.shape_cast %96 : vector<18xf32> to vector<18x1xf32>
    %cst_42 = arith.constant 6.400000e+01 : f32
    %98 = vector.broadcast %cst_42 : f32 to vector<18x1xf32>
    %99 = arith.divf %97, %98 : vector<18x1xf32>
    %100 = vector.broadcast %99 : vector<18x1xf32> to vector<18x64xf32>
    %101 = arith.subf %95, %100 : vector<18x64xf32>
    %102 = arith.mulf %101, %101 : vector<18x64xf32>
    %cst_43 = arith.constant dense<0.000000e+00> : vector<18xf32>
    %103 = vector.multi_reduction <add>, %102, %cst_43 [1] : vector<18x64xf32> to vector<18xf32>
    %104 = vector.shape_cast %103 : vector<18xf32> to vector<18x1xf32>
    %cst_44 = arith.constant 6.400000e+01 : f32
    %105 = vector.broadcast %cst_44 : f32 to vector<18x1xf32>
    %106 = arith.divf %104, %105 : vector<18x1xf32>
    %107 = vector.broadcast %99 : vector<18x1xf32> to vector<18x64xf32>
    %108 = arith.subf %95, %107 : vector<18x64xf32>
    %cst_45 = arith.constant 9.99999974E-6 : f32
    %109 = vector.broadcast %cst_45 : f32 to vector<18x1xf32>
    %110 = arith.addf %106, %109 : vector<18x1xf32>
    %111 = math.rsqrt %110 : vector<18x1xf32>
    %112 = vector.broadcast %111 : vector<18x1xf32> to vector<18x64xf32>
    %113 = arith.mulf %108, %112 : vector<18x64xf32>
    %114 = vector.broadcast %32 : vector<1x64xf32> to vector<18x64xf32>
    %115 = arith.mulf %113, %114 : vector<18x64xf32>
    %116 = vector.broadcast %34 : vector<1x64xf32> to vector<18x64xf32>
    %117 = arith.addf %115, %116 : vector<18x64xf32>
    %118 = arith.truncf %117 : vector<18x64xf32> to vector<18x64xbf16>
    %c0_46 = arith.constant 0 : index
    %c0_47 = arith.constant 0 : index
    %c0_48 = arith.constant 0 : index
    %119 = vector.load %arg4[%c0_46, %c0_47, %c0_48] : memref<4x64x256xbf16, #tpu.memory_space<vmem>>, vector<1x64x256xbf16>
    %120 = vector.shape_cast %119 : vector<1x64x256xbf16> to vector<64x256xbf16>
    %cst_49 = arith.constant dense<0.000000e+00> : vector<18x256xf32>
    %121 = tpu.matmul %118, %120, %cst_49 {dimension_numbers = #tpu.dot_dimension_numbers<[1], [0], [0], [1], [0, 0, 1, 1], [], []>} : vector<18x64xbf16>, vector<64x256xbf16>, vector<18x256xf32> -> vector<18x256xf32>
    %122 = vector.broadcast %36 : vector<1x256xf32> to vector<18x256xf32>
    %123 = arith.addf %121, %122 : vector<18x256xf32>
    %cst_50 = arith.constant 0.000000e+00 : f32
    %124 = vector.broadcast %cst_50 : f32 to vector<18x256xf32>
    %125 = arith.maximumf %123, %124 : vector<18x256xf32>
    %126 = arith.truncf %125 : vector<18x256xf32> to vector<18x256xbf16>
    %c0_51 = arith.constant 0 : index
    %c0_52 = arith.constant 0 : index
    %c0_53 = arith.constant 0 : index
    %127 = vector.load %arg5[%c0_51, %c0_52, %c0_53] : memref<4x256x64xbf16, #tpu.memory_space<vmem>>, vector<1x256x64xbf16>
    %128 = vector.shape_cast %127 : vector<1x256x64xbf16> to vector<256x64xbf16>
    %cst_54 = arith.constant dense<0.000000e+00> : vector<18x64xf32>
    %129 = tpu.matmul %126, %128, %cst_54 {dimension_numbers = #tpu.dot_dimension_numbers<[1], [0], [0], [1], [0, 0, 1, 1], [], []>} : vector<18x256xbf16>, vector<256x64xbf16>, vector<18x64xf32> -> vector<18x64xf32>
    %130 = arith.addf %95, %129 : vector<18x64xf32>
    %131 = vector.broadcast %38 : vector<1x64xf32> to vector<18x64xf32>
    %132 = arith.addf %130, %131 : vector<18x64xf32>
    %c1_55 = arith.constant 1 : index
    %c0_56 = arith.constant 0 : index
    %c0_57 = arith.constant 0 : index
    %133 = vector.load %arg1[%c1_55, %c0_56, %c0_57] : memref<4x10x256xf32, #tpu.memory_space<vmem>>, vector<1x1x64xf32>
    %134 = vector.shape_cast %133 : vector<1x1x64xf32> to vector<1x64xf32>
    %c1_58 = arith.constant 1 : index
    %c1_59 = arith.constant 1 : index
    %c0_60 = arith.constant 0 : index
    %135 = vector.load %arg1[%c1_58, %c1_59, %c0_60] : memref<4x10x256xf32, #tpu.memory_space<vmem>>, vector<1x1x64xf32>
    %136 = vector.shape_cast %135 : vector<1x1x64xf32> to vector<1x64xf32>
    %c1_61 = arith.constant 1 : index
    %c2_62 = arith.constant 2 : index
    %c0_63 = arith.constant 0 : index
    %137 = vector.load %arg1[%c1_61, %c2_62, %c0_63] : memref<4x10x256xf32, #tpu.memory_space<vmem>>, vector<1x1x192xf32>
    %138 = vector.shape_cast %137 : vector<1x1x192xf32> to vector<1x192xf32>
    %c1_64 = arith.constant 1 : index
    %c3_65 = arith.constant 3 : index
    %c0_66 = arith.constant 0 : index
    %139 = vector.load %arg1[%c1_64, %c3_65, %c0_66] : memref<4x10x256xf32, #tpu.memory_space<vmem>>, vector<1x1x64xf32>
    %140 = vector.shape_cast %139 : vector<1x1x64xf32> to vector<1x64xf32>
    %c1_67 = arith.constant 1 : index
    %c4_68 = arith.constant 4 : index
    %c0_69 = arith.constant 0 : index
    %141 = vector.load %arg1[%c1_67, %c4_68, %c0_69] : memref<4x10x256xf32, #tpu.memory_space<vmem>>, vector<1x1x64xf32>
    %142 = vector.shape_cast %141 : vector<1x1x64xf32> to vector<1x64xf32>
    %c1_70 = arith.constant 1 : index
    %c5_71 = arith.constant 5 : index
    %c0_72 = arith.constant 0 : index
    %143 = vector.load %arg1[%c1_70, %c5_71, %c0_72] : memref<4x10x256xf32, #tpu.memory_space<vmem>>, vector<1x1x64xf32>
    %144 = vector.shape_cast %143 : vector<1x1x64xf32> to vector<1x64xf32>
    %c1_73 = arith.constant 1 : index
    %c6_74 = arith.constant 6 : index
    %c0_75 = arith.constant 0 : index
    %145 = vector.load %arg1[%c1_73, %c6_74, %c0_75] : memref<4x10x256xf32, #tpu.memory_space<vmem>>, vector<1x1x256xf32>
    %146 = vector.shape_cast %145 : vector<1x1x256xf32> to vector<1x256xf32>
    %c1_76 = arith.constant 1 : index
    %c7_77 = arith.constant 7 : index
    %c0_78 = arith.constant 0 : index
    %147 = vector.load %arg1[%c1_76, %c7_77, %c0_78] : memref<4x10x256xf32, #tpu.memory_space<vmem>>, vector<1x1x64xf32>
    %148 = vector.shape_cast %147 : vector<1x1x64xf32> to vector<1x64xf32>
    %cst_79 = arith.constant dense<0.000000e+00> : vector<18xf32>
    %149 = vector.multi_reduction <add>, %132, %cst_79 [1] : vector<18x64xf32> to vector<18xf32>
    %150 = vector.shape_cast %149 : vector<18xf32> to vector<18x1xf32>
    %cst_80 = arith.constant 6.400000e+01 : f32
    %151 = vector.broadcast %cst_80 : f32 to vector<18x1xf32>
    %152 = arith.divf %150, %151 : vector<18x1xf32>
    %153 = vector.broadcast %152 : vector<18x1xf32> to vector<18x64xf32>
    %154 = arith.subf %132, %153 : vector<18x64xf32>
    %155 = arith.mulf %154, %154 : vector<18x64xf32>
    %cst_81 = arith.constant dense<0.000000e+00> : vector<18xf32>
    %156 = vector.multi_reduction <add>, %155, %cst_81 [1] : vector<18x64xf32> to vector<18xf32>
    %157 = vector.shape_cast %156 : vector<18xf32> to vector<18x1xf32>
    %cst_82 = arith.constant 6.400000e+01 : f32
    %158 = vector.broadcast %cst_82 : f32 to vector<18x1xf32>
    %159 = arith.divf %157, %158 : vector<18x1xf32>
    %160 = vector.broadcast %152 : vector<18x1xf32> to vector<18x64xf32>
    %161 = arith.subf %132, %160 : vector<18x64xf32>
    %cst_83 = arith.constant 9.99999974E-6 : f32
    %162 = vector.broadcast %cst_83 : f32 to vector<18x1xf32>
    %163 = arith.addf %159, %162 : vector<18x1xf32>
    %164 = math.rsqrt %163 : vector<18x1xf32>
    %165 = vector.broadcast %164 : vector<18x1xf32> to vector<18x64xf32>
    %166 = arith.mulf %161, %165 : vector<18x64xf32>
    %167 = vector.broadcast %134 : vector<1x64xf32> to vector<18x64xf32>
    %168 = arith.mulf %166, %167 : vector<18x64xf32>
    %169 = vector.broadcast %136 : vector<1x64xf32> to vector<18x64xf32>
    %170 = arith.addf %168, %169 : vector<18x64xf32>
    %171 = arith.truncf %170 : vector<18x64xf32> to vector<18x64xbf16>
    %c1_84 = arith.constant 1 : index
    %c0_85 = arith.constant 0 : index
    %c0_86 = arith.constant 0 : index
    %172 = vector.load %arg2[%c1_84, %c0_85, %c0_86] : memref<4x64x192xbf16, #tpu.memory_space<vmem>>, vector<1x64x192xbf16>
    %173 = vector.shape_cast %172 : vector<1x64x192xbf16> to vector<64x192xbf16>
    %cst_87 = arith.constant dense<0.000000e+00> : vector<18x192xf32>
    %174 = tpu.matmul %171, %173, %cst_87 {dimension_numbers = #tpu.dot_dimension_numbers<[1], [0], [0], [1], [0, 0, 1, 1], [], []>} : vector<18x64xbf16>, vector<64x192xbf16>, vector<18x192xf32> -> vector<18x192xf32>
    %175 = vector.broadcast %138 : vector<1x192xf32> to vector<18x192xf32>
    %176 = arith.addf %174, %175 : vector<18x192xf32>
    %177 = tpu.transpose %176, [1, 0] : vector<18x192xf32> -> vector<192x18xf32>
    %178 = vector.shape_cast %177 : vector<192x18xf32> to vector<24x8x18xf32>
    %179 = vector.extract_strided_slice %178 {offsets = [0, 0, 0], sizes = [8, 8, 18], strides = [1, 1, 1]} : vector<24x8x18xf32> to vector<8x8x18xf32>
    %180 = vector.extract_strided_slice %178 {offsets = [8, 0, 0], sizes = [8, 8, 18], strides = [1, 1, 1]} : vector<24x8x18xf32> to vector<8x8x18xf32>
    %181 = vector.extract_strided_slice %178 {offsets = [16, 0, 0], sizes = [8, 8, 18], strides = [1, 1, 1]} : vector<24x8x18xf32> to vector<8x8x18xf32>
    "tpu.trace_start"() <{level = 10 : i32, message = "hdq,hdk->hqk"}> : () -> ()
    %cst_88 = arith.constant dense<0.000000e+00> : vector<8x18x18xf32>
    %182 = tpu.matmul %179, %180, %cst_88 {dimension_numbers = #tpu.dot_dimension_numbers<[1], [1], [2], [2], [0, 0, 0, 2, 1, 2], [0], [0]>} : vector<8x8x18xf32>, vector<8x8x18xf32>, vector<8x18x18xf32> -> vector<8x18x18xf32>
    "tpu.trace_stop"() : () -> ()
    %183 = vector.shape_cast %21 : vector<18x18xf32> to vector<1x18x18xf32>
    %184 = vector.broadcast %183 : vector<1x18x18xf32> to vector<8x18x18xf32>
    %185 = arith.addf %182, %184 : vector<8x18x18xf32>
    %cst_89 = arith.constant dense<0xFF800000> : vector<8x18xf32>
    %186 = vector.multi_reduction <maximumf>, %185, %cst_89 [2] : vector<8x18x18xf32> to vector<8x18xf32>
    %187 = vector.shape_cast %186 : vector<8x18xf32> to vector<8x18x1xf32>
    %188 = vector.broadcast %187 : vector<8x18x1xf32> to vector<8x18x18xf32>
    %189 = arith.subf %185, %188 : vector<8x18x18xf32>
    %190 = math.exp %189 : vector<8x18x18xf32>
    %cst_90 = arith.constant dense<0.000000e+00> : vector<8x18xf32>
    %191 = vector.multi_reduction <add>, %190, %cst_90 [2] : vector<8x18x18xf32> to vector<8x18xf32>
    %192 = vector.shape_cast %191 : vector<8x18xf32> to vector<8x18x1xf32>
    %193 = tpu.reciprocal %192 {approx = true} : vector<8x18x1xf32> -> vector<8x18x1xf32>
    %194 = vector.broadcast %193 : vector<8x18x1xf32> to vector<8x18x18xf32>
    %195 = arith.mulf %190, %194 : vector<8x18x18xf32>
    "tpu.trace_start"() <{level = 10 : i32, message = "hdk,hqk->hdq"}> : () -> ()
    %cst_91 = arith.constant dense<0.000000e+00> : vector<8x8x18xf32>
    %196 = tpu.matmul %181, %195, %cst_91 {dimension_numbers = #tpu.dot_dimension_numbers<[2], [2], [1], [1], [0, 0, 0, 1, 1, 1], [0], [0]>} : vector<8x8x18xf32>, vector<8x18x18xf32>, vector<8x8x18xf32> -> vector<8x8x18xf32>
    "tpu.trace_stop"() : () -> ()
    %197 = vector.shape_cast %196 : vector<8x8x18xf32> to vector<64x18xf32>
    %198 = tpu.transpose %197, [1, 0] : vector<64x18xf32> -> vector<18x64xf32>
    %199 = arith.truncf %198 : vector<18x64xf32> to vector<18x64xbf16>
    %c1_92 = arith.constant 1 : index
    %c0_93 = arith.constant 0 : index
    %c0_94 = arith.constant 0 : index
    %200 = vector.load %arg3[%c1_92, %c0_93, %c0_94] : memref<4x64x64xbf16, #tpu.memory_space<vmem>>, vector<1x64x64xbf16>
    %201 = vector.shape_cast %200 : vector<1x64x64xbf16> to vector<64x64xbf16>
    %cst_95 = arith.constant dense<0.000000e+00> : vector<18x64xf32>
    %202 = tpu.matmul %199, %201, %cst_95 {dimension_numbers = #tpu.dot_dimension_numbers<[1], [0], [0], [1], [0, 0, 1, 1], [], []>} : vector<18x64xbf16>, vector<64x64xbf16>, vector<18x64xf32> -> vector<18x64xf32>
    %203 = vector.broadcast %140 : vector<1x64xf32> to vector<18x64xf32>
    %204 = arith.addf %202, %203 : vector<18x64xf32>
    %205 = arith.addf %132, %204 : vector<18x64xf32>
    %cst_96 = arith.constant dense<0.000000e+00> : vector<18xf32>
    %206 = vector.multi_reduction <add>, %205, %cst_96 [1] : vector<18x64xf32> to vector<18xf32>
    %207 = vector.shape_cast %206 : vector<18xf32> to vector<18x1xf32>
    %cst_97 = arith.constant 6.400000e+01 : f32
    %208 = vector.broadcast %cst_97 : f32 to vector<18x1xf32>
    %209 = arith.divf %207, %208 : vector<18x1xf32>
    %210 = vector.broadcast %209 : vector<18x1xf32> to vector<18x64xf32>
    %211 = arith.subf %205, %210 : vector<18x64xf32>
    %212 = arith.mulf %211, %211 : vector<18x64xf32>
    %cst_98 = arith.constant dense<0.000000e+00> : vector<18xf32>
    %213 = vector.multi_reduction <add>, %212, %cst_98 [1] : vector<18x64xf32> to vector<18xf32>
    %214 = vector.shape_cast %213 : vector<18xf32> to vector<18x1xf32>
    %cst_99 = arith.constant 6.400000e+01 : f32
    %215 = vector.broadcast %cst_99 : f32 to vector<18x1xf32>
    %216 = arith.divf %214, %215 : vector<18x1xf32>
    %217 = vector.broadcast %209 : vector<18x1xf32> to vector<18x64xf32>
    %218 = arith.subf %205, %217 : vector<18x64xf32>
    %cst_100 = arith.constant 9.99999974E-6 : f32
    %219 = vector.broadcast %cst_100 : f32 to vector<18x1xf32>
    %220 = arith.addf %216, %219 : vector<18x1xf32>
    %221 = math.rsqrt %220 : vector<18x1xf32>
    %222 = vector.broadcast %221 : vector<18x1xf32> to vector<18x64xf32>
    %223 = arith.mulf %218, %222 : vector<18x64xf32>
    %224 = vector.broadcast %142 : vector<1x64xf32> to vector<18x64xf32>
    %225 = arith.mulf %223, %224 : vector<18x64xf32>
    %226 = vector.broadcast %144 : vector<1x64xf32> to vector<18x64xf32>
    %227 = arith.addf %225, %226 : vector<18x64xf32>
    %228 = arith.truncf %227 : vector<18x64xf32> to vector<18x64xbf16>
    %c1_101 = arith.constant 1 : index
    %c0_102 = arith.constant 0 : index
    %c0_103 = arith.constant 0 : index
    %229 = vector.load %arg4[%c1_101, %c0_102, %c0_103] : memref<4x64x256xbf16, #tpu.memory_space<vmem>>, vector<1x64x256xbf16>
    %230 = vector.shape_cast %229 : vector<1x64x256xbf16> to vector<64x256xbf16>
    %cst_104 = arith.constant dense<0.000000e+00> : vector<18x256xf32>
    %231 = tpu.matmul %228, %230, %cst_104 {dimension_numbers = #tpu.dot_dimension_numbers<[1], [0], [0], [1], [0, 0, 1, 1], [], []>} : vector<18x64xbf16>, vector<64x256xbf16>, vector<18x256xf32> -> vector<18x256xf32>
    %232 = vector.broadcast %146 : vector<1x256xf32> to vector<18x256xf32>
    %233 = arith.addf %231, %232 : vector<18x256xf32>
    %cst_105 = arith.constant 0.000000e+00 : f32
    %234 = vector.broadcast %cst_105 : f32 to vector<18x256xf32>
    %235 = arith.maximumf %233, %234 : vector<18x256xf32>
    %236 = arith.truncf %235 : vector<18x256xf32> to vector<18x256xbf16>
    %c1_106 = arith.constant 1 : index
    %c0_107 = arith.constant 0 : index
    %c0_108 = arith.constant 0 : index
    %237 = vector.load %arg5[%c1_106, %c0_107, %c0_108] : memref<4x256x64xbf16, #tpu.memory_space<vmem>>, vector<1x256x64xbf16>
    %238 = vector.shape_cast %237 : vector<1x256x64xbf16> to vector<256x64xbf16>
    %cst_109 = arith.constant dense<0.000000e+00> : vector<18x64xf32>
    %239 = tpu.matmul %236, %238, %cst_109 {dimension_numbers = #tpu.dot_dimension_numbers<[1], [0], [0], [1], [0, 0, 1, 1], [], []>} : vector<18x256xbf16>, vector<256x64xbf16>, vector<18x64xf32> -> vector<18x64xf32>
    %240 = arith.addf %205, %239 : vector<18x64xf32>
    %241 = vector.broadcast %148 : vector<1x64xf32> to vector<18x64xf32>
    %242 = arith.addf %240, %241 : vector<18x64xf32>
    %c2_110 = arith.constant 2 : index
    %c0_111 = arith.constant 0 : index
    %c0_112 = arith.constant 0 : index
    %243 = vector.load %arg1[%c2_110, %c0_111, %c0_112] : memref<4x10x256xf32, #tpu.memory_space<vmem>>, vector<1x1x64xf32>
    %244 = vector.shape_cast %243 : vector<1x1x64xf32> to vector<1x64xf32>
    %c2_113 = arith.constant 2 : index
    %c1_114 = arith.constant 1 : index
    %c0_115 = arith.constant 0 : index
    %245 = vector.load %arg1[%c2_113, %c1_114, %c0_115] : memref<4x10x256xf32, #tpu.memory_space<vmem>>, vector<1x1x64xf32>
    %246 = vector.shape_cast %245 : vector<1x1x64xf32> to vector<1x64xf32>
    %c2_116 = arith.constant 2 : index
    %c2_117 = arith.constant 2 : index
    %c0_118 = arith.constant 0 : index
    %247 = vector.load %arg1[%c2_116, %c2_117, %c0_118] : memref<4x10x256xf32, #tpu.memory_space<vmem>>, vector<1x1x192xf32>
    %248 = vector.shape_cast %247 : vector<1x1x192xf32> to vector<1x192xf32>
    %c2_119 = arith.constant 2 : index
    %c3_120 = arith.constant 3 : index
    %c0_121 = arith.constant 0 : index
    %249 = vector.load %arg1[%c2_119, %c3_120, %c0_121] : memref<4x10x256xf32, #tpu.memory_space<vmem>>, vector<1x1x64xf32>
    %250 = vector.shape_cast %249 : vector<1x1x64xf32> to vector<1x64xf32>
    %c2_122 = arith.constant 2 : index
    %c4_123 = arith.constant 4 : index
    %c0_124 = arith.constant 0 : index
    %251 = vector.load %arg1[%c2_122, %c4_123, %c0_124] : memref<4x10x256xf32, #tpu.memory_space<vmem>>, vector<1x1x64xf32>
    %252 = vector.shape_cast %251 : vector<1x1x64xf32> to vector<1x64xf32>
    %c2_125 = arith.constant 2 : index
    %c5_126 = arith.constant 5 : index
    %c0_127 = arith.constant 0 : index
    %253 = vector.load %arg1[%c2_125, %c5_126, %c0_127] : memref<4x10x256xf32, #tpu.memory_space<vmem>>, vector<1x1x64xf32>
    %254 = vector.shape_cast %253 : vector<1x1x64xf32> to vector<1x64xf32>
    %c2_128 = arith.constant 2 : index
    %c6_129 = arith.constant 6 : index
    %c0_130 = arith.constant 0 : index
    %255 = vector.load %arg1[%c2_128, %c6_129, %c0_130] : memref<4x10x256xf32, #tpu.memory_space<vmem>>, vector<1x1x256xf32>
    %256 = vector.shape_cast %255 : vector<1x1x256xf32> to vector<1x256xf32>
    %c2_131 = arith.constant 2 : index
    %c7_132 = arith.constant 7 : index
    %c0_133 = arith.constant 0 : index
    %257 = vector.load %arg1[%c2_131, %c7_132, %c0_133] : memref<4x10x256xf32, #tpu.memory_space<vmem>>, vector<1x1x64xf32>
    %258 = vector.shape_cast %257 : vector<1x1x64xf32> to vector<1x64xf32>
    %cst_134 = arith.constant dense<0.000000e+00> : vector<18xf32>
    %259 = vector.multi_reduction <add>, %242, %cst_134 [1] : vector<18x64xf32> to vector<18xf32>
    %260 = vector.shape_cast %259 : vector<18xf32> to vector<18x1xf32>
    %cst_135 = arith.constant 6.400000e+01 : f32
    %261 = vector.broadcast %cst_135 : f32 to vector<18x1xf32>
    %262 = arith.divf %260, %261 : vector<18x1xf32>
    %263 = vector.broadcast %262 : vector<18x1xf32> to vector<18x64xf32>
    %264 = arith.subf %242, %263 : vector<18x64xf32>
    %265 = arith.mulf %264, %264 : vector<18x64xf32>
    %cst_136 = arith.constant dense<0.000000e+00> : vector<18xf32>
    %266 = vector.multi_reduction <add>, %265, %cst_136 [1] : vector<18x64xf32> to vector<18xf32>
    %267 = vector.shape_cast %266 : vector<18xf32> to vector<18x1xf32>
    %cst_137 = arith.constant 6.400000e+01 : f32
    %268 = vector.broadcast %cst_137 : f32 to vector<18x1xf32>
    %269 = arith.divf %267, %268 : vector<18x1xf32>
    %270 = vector.broadcast %262 : vector<18x1xf32> to vector<18x64xf32>
    %271 = arith.subf %242, %270 : vector<18x64xf32>
    %cst_138 = arith.constant 9.99999974E-6 : f32
    %272 = vector.broadcast %cst_138 : f32 to vector<18x1xf32>
    %273 = arith.addf %269, %272 : vector<18x1xf32>
    %274 = math.rsqrt %273 : vector<18x1xf32>
    %275 = vector.broadcast %274 : vector<18x1xf32> to vector<18x64xf32>
    %276 = arith.mulf %271, %275 : vector<18x64xf32>
    %277 = vector.broadcast %244 : vector<1x64xf32> to vector<18x64xf32>
    %278 = arith.mulf %276, %277 : vector<18x64xf32>
    %279 = vector.broadcast %246 : vector<1x64xf32> to vector<18x64xf32>
    %280 = arith.addf %278, %279 : vector<18x64xf32>
    %281 = arith.truncf %280 : vector<18x64xf32> to vector<18x64xbf16>
    %c2_139 = arith.constant 2 : index
    %c0_140 = arith.constant 0 : index
    %c0_141 = arith.constant 0 : index
    %282 = vector.load %arg2[%c2_139, %c0_140, %c0_141] : memref<4x64x192xbf16, #tpu.memory_space<vmem>>, vector<1x64x192xbf16>
    %283 = vector.shape_cast %282 : vector<1x64x192xbf16> to vector<64x192xbf16>
    %cst_142 = arith.constant dense<0.000000e+00> : vector<18x192xf32>
    %284 = tpu.matmul %281, %283, %cst_142 {dimension_numbers = #tpu.dot_dimension_numbers<[1], [0], [0], [1], [0, 0, 1, 1], [], []>} : vector<18x64xbf16>, vector<64x192xbf16>, vector<18x192xf32> -> vector<18x192xf32>
    %285 = vector.broadcast %248 : vector<1x192xf32> to vector<18x192xf32>
    %286 = arith.addf %284, %285 : vector<18x192xf32>
    %287 = tpu.transpose %286, [1, 0] : vector<18x192xf32> -> vector<192x18xf32>
    %288 = vector.shape_cast %287 : vector<192x18xf32> to vector<24x8x18xf32>
    %289 = vector.extract_strided_slice %288 {offsets = [0, 0, 0], sizes = [8, 8, 18], strides = [1, 1, 1]} : vector<24x8x18xf32> to vector<8x8x18xf32>
    %290 = vector.extract_strided_slice %288 {offsets = [8, 0, 0], sizes = [8, 8, 18], strides = [1, 1, 1]} : vector<24x8x18xf32> to vector<8x8x18xf32>
    %291 = vector.extract_strided_slice %288 {offsets = [16, 0, 0], sizes = [8, 8, 18], strides = [1, 1, 1]} : vector<24x8x18xf32> to vector<8x8x18xf32>
    "tpu.trace_start"() <{level = 10 : i32, message = "hdq,hdk->hqk"}> : () -> ()
    %cst_143 = arith.constant dense<0.000000e+00> : vector<8x18x18xf32>
    %292 = tpu.matmul %289, %290, %cst_143 {dimension_numbers = #tpu.dot_dimension_numbers<[1], [1], [2], [2], [0, 0, 0, 2, 1, 2], [0], [0]>} : vector<8x8x18xf32>, vector<8x8x18xf32>, vector<8x18x18xf32> -> vector<8x18x18xf32>
    "tpu.trace_stop"() : () -> ()
    %293 = vector.shape_cast %21 : vector<18x18xf32> to vector<1x18x18xf32>
    %294 = vector.broadcast %293 : vector<1x18x18xf32> to vector<8x18x18xf32>
    %295 = arith.addf %292, %294 : vector<8x18x18xf32>
    %cst_144 = arith.constant dense<0xFF800000> : vector<8x18xf32>
    %296 = vector.multi_reduction <maximumf>, %295, %cst_144 [2] : vector<8x18x18xf32> to vector<8x18xf32>
    %297 = vector.shape_cast %296 : vector<8x18xf32> to vector<8x18x1xf32>
    %298 = vector.broadcast %297 : vector<8x18x1xf32> to vector<8x18x18xf32>
    %299 = arith.subf %295, %298 : vector<8x18x18xf32>
    %300 = math.exp %299 : vector<8x18x18xf32>
    %cst_145 = arith.constant dense<0.000000e+00> : vector<8x18xf32>
    %301 = vector.multi_reduction <add>, %300, %cst_145 [2] : vector<8x18x18xf32> to vector<8x18xf32>
    %302 = vector.shape_cast %301 : vector<8x18xf32> to vector<8x18x1xf32>
    %303 = tpu.reciprocal %302 {approx = true} : vector<8x18x1xf32> -> vector<8x18x1xf32>
    %304 = vector.broadcast %303 : vector<8x18x1xf32> to vector<8x18x18xf32>
    %305 = arith.mulf %300, %304 : vector<8x18x18xf32>
    "tpu.trace_start"() <{level = 10 : i32, message = "hdk,hqk->hdq"}> : () -> ()
    %cst_146 = arith.constant dense<0.000000e+00> : vector<8x8x18xf32>
    %306 = tpu.matmul %291, %305, %cst_146 {dimension_numbers = #tpu.dot_dimension_numbers<[2], [2], [1], [1], [0, 0, 0, 1, 1, 1], [0], [0]>} : vector<8x8x18xf32>, vector<8x18x18xf32>, vector<8x8x18xf32> -> vector<8x8x18xf32>
    "tpu.trace_stop"() : () -> ()
    %307 = vector.shape_cast %306 : vector<8x8x18xf32> to vector<64x18xf32>
    %308 = tpu.transpose %307, [1, 0] : vector<64x18xf32> -> vector<18x64xf32>
    %309 = arith.truncf %308 : vector<18x64xf32> to vector<18x64xbf16>
    %c2_147 = arith.constant 2 : index
    %c0_148 = arith.constant 0 : index
    %c0_149 = arith.constant 0 : index
    %310 = vector.load %arg3[%c2_147, %c0_148, %c0_149] : memref<4x64x64xbf16, #tpu.memory_space<vmem>>, vector<1x64x64xbf16>
    %311 = vector.shape_cast %310 : vector<1x64x64xbf16> to vector<64x64xbf16>
    %cst_150 = arith.constant dense<0.000000e+00> : vector<18x64xf32>
    %312 = tpu.matmul %309, %311, %cst_150 {dimension_numbers = #tpu.dot_dimension_numbers<[1], [0], [0], [1], [0, 0, 1, 1], [], []>} : vector<18x64xbf16>, vector<64x64xbf16>, vector<18x64xf32> -> vector<18x64xf32>
    %313 = vector.broadcast %250 : vector<1x64xf32> to vector<18x64xf32>
    %314 = arith.addf %312, %313 : vector<18x64xf32>
    %315 = arith.addf %242, %314 : vector<18x64xf32>
    %cst_151 = arith.constant dense<0.000000e+00> : vector<18xf32>
    %316 = vector.multi_reduction <add>, %315, %cst_151 [1] : vector<18x64xf32> to vector<18xf32>
    %317 = vector.shape_cast %316 : vector<18xf32> to vector<18x1xf32>
    %cst_152 = arith.constant 6.400000e+01 : f32
    %318 = vector.broadcast %cst_152 : f32 to vector<18x1xf32>
    %319 = arith.divf %317, %318 : vector<18x1xf32>
    %320 = vector.broadcast %319 : vector<18x1xf32> to vector<18x64xf32>
    %321 = arith.subf %315, %320 : vector<18x64xf32>
    %322 = arith.mulf %321, %321 : vector<18x64xf32>
    %cst_153 = arith.constant dense<0.000000e+00> : vector<18xf32>
    %323 = vector.multi_reduction <add>, %322, %cst_153 [1] : vector<18x64xf32> to vector<18xf32>
    %324 = vector.shape_cast %323 : vector<18xf32> to vector<18x1xf32>
    %cst_154 = arith.constant 6.400000e+01 : f32
    %325 = vector.broadcast %cst_154 : f32 to vector<18x1xf32>
    %326 = arith.divf %324, %325 : vector<18x1xf32>
    %327 = vector.broadcast %319 : vector<18x1xf32> to vector<18x64xf32>
    %328 = arith.subf %315, %327 : vector<18x64xf32>
    %cst_155 = arith.constant 9.99999974E-6 : f32
    %329 = vector.broadcast %cst_155 : f32 to vector<18x1xf32>
    %330 = arith.addf %326, %329 : vector<18x1xf32>
    %331 = math.rsqrt %330 : vector<18x1xf32>
    %332 = vector.broadcast %331 : vector<18x1xf32> to vector<18x64xf32>
    %333 = arith.mulf %328, %332 : vector<18x64xf32>
    %334 = vector.broadcast %252 : vector<1x64xf32> to vector<18x64xf32>
    %335 = arith.mulf %333, %334 : vector<18x64xf32>
    %336 = vector.broadcast %254 : vector<1x64xf32> to vector<18x64xf32>
    %337 = arith.addf %335, %336 : vector<18x64xf32>
    %338 = arith.truncf %337 : vector<18x64xf32> to vector<18x64xbf16>
    %c2_156 = arith.constant 2 : index
    %c0_157 = arith.constant 0 : index
    %c0_158 = arith.constant 0 : index
    %339 = vector.load %arg4[%c2_156, %c0_157, %c0_158] : memref<4x64x256xbf16, #tpu.memory_space<vmem>>, vector<1x64x256xbf16>
    %340 = vector.shape_cast %339 : vector<1x64x256xbf16> to vector<64x256xbf16>
    %cst_159 = arith.constant dense<0.000000e+00> : vector<18x256xf32>
    %341 = tpu.matmul %338, %340, %cst_159 {dimension_numbers = #tpu.dot_dimension_numbers<[1], [0], [0], [1], [0, 0, 1, 1], [], []>} : vector<18x64xbf16>, vector<64x256xbf16>, vector<18x256xf32> -> vector<18x256xf32>
    %342 = vector.broadcast %256 : vector<1x256xf32> to vector<18x256xf32>
    %343 = arith.addf %341, %342 : vector<18x256xf32>
    %cst_160 = arith.constant 0.000000e+00 : f32
    %344 = vector.broadcast %cst_160 : f32 to vector<18x256xf32>
    %345 = arith.maximumf %343, %344 : vector<18x256xf32>
    %346 = arith.truncf %345 : vector<18x256xf32> to vector<18x256xbf16>
    %c2_161 = arith.constant 2 : index
    %c0_162 = arith.constant 0 : index
    %c0_163 = arith.constant 0 : index
    %347 = vector.load %arg5[%c2_161, %c0_162, %c0_163] : memref<4x256x64xbf16, #tpu.memory_space<vmem>>, vector<1x256x64xbf16>
    %348 = vector.shape_cast %347 : vector<1x256x64xbf16> to vector<256x64xbf16>
    %cst_164 = arith.constant dense<0.000000e+00> : vector<18x64xf32>
    %349 = tpu.matmul %346, %348, %cst_164 {dimension_numbers = #tpu.dot_dimension_numbers<[1], [0], [0], [1], [0, 0, 1, 1], [], []>} : vector<18x256xbf16>, vector<256x64xbf16>, vector<18x64xf32> -> vector<18x64xf32>
    %350 = arith.addf %315, %349 : vector<18x64xf32>
    %351 = vector.broadcast %258 : vector<1x64xf32> to vector<18x64xf32>
    %352 = arith.addf %350, %351 : vector<18x64xf32>
    %c3_165 = arith.constant 3 : index
    %c0_166 = arith.constant 0 : index
    %c0_167 = arith.constant 0 : index
    %353 = vector.load %arg1[%c3_165, %c0_166, %c0_167] : memref<4x10x256xf32, #tpu.memory_space<vmem>>, vector<1x1x64xf32>
    %354 = vector.shape_cast %353 : vector<1x1x64xf32> to vector<1x64xf32>
    %c3_168 = arith.constant 3 : index
    %c1_169 = arith.constant 1 : index
    %c0_170 = arith.constant 0 : index
    %355 = vector.load %arg1[%c3_168, %c1_169, %c0_170] : memref<4x10x256xf32, #tpu.memory_space<vmem>>, vector<1x1x64xf32>
    %356 = vector.shape_cast %355 : vector<1x1x64xf32> to vector<1x64xf32>
    %c3_171 = arith.constant 3 : index
    %c2_172 = arith.constant 2 : index
    %c0_173 = arith.constant 0 : index
    %357 = vector.load %arg1[%c3_171, %c2_172, %c0_173] : memref<4x10x256xf32, #tpu.memory_space<vmem>>, vector<1x1x192xf32>
    %358 = vector.shape_cast %357 : vector<1x1x192xf32> to vector<1x192xf32>
    %c3_174 = arith.constant 3 : index
    %c3_175 = arith.constant 3 : index
    %c0_176 = arith.constant 0 : index
    %359 = vector.load %arg1[%c3_174, %c3_175, %c0_176] : memref<4x10x256xf32, #tpu.memory_space<vmem>>, vector<1x1x64xf32>
    %360 = vector.shape_cast %359 : vector<1x1x64xf32> to vector<1x64xf32>
    %c3_177 = arith.constant 3 : index
    %c4_178 = arith.constant 4 : index
    %c0_179 = arith.constant 0 : index
    %361 = vector.load %arg1[%c3_177, %c4_178, %c0_179] : memref<4x10x256xf32, #tpu.memory_space<vmem>>, vector<1x1x64xf32>
    %362 = vector.shape_cast %361 : vector<1x1x64xf32> to vector<1x64xf32>
    %c3_180 = arith.constant 3 : index
    %c5_181 = arith.constant 5 : index
    %c0_182 = arith.constant 0 : index
    %363 = vector.load %arg1[%c3_180, %c5_181, %c0_182] : memref<4x10x256xf32, #tpu.memory_space<vmem>>, vector<1x1x64xf32>
    %364 = vector.shape_cast %363 : vector<1x1x64xf32> to vector<1x64xf32>
    %c3_183 = arith.constant 3 : index
    %c6_184 = arith.constant 6 : index
    %c0_185 = arith.constant 0 : index
    %365 = vector.load %arg1[%c3_183, %c6_184, %c0_185] : memref<4x10x256xf32, #tpu.memory_space<vmem>>, vector<1x1x256xf32>
    %366 = vector.shape_cast %365 : vector<1x1x256xf32> to vector<1x256xf32>
    %c3_186 = arith.constant 3 : index
    %c7_187 = arith.constant 7 : index
    %c0_188 = arith.constant 0 : index
    %367 = vector.load %arg1[%c3_186, %c7_187, %c0_188] : memref<4x10x256xf32, #tpu.memory_space<vmem>>, vector<1x1x64xf32>
    %368 = vector.shape_cast %367 : vector<1x1x64xf32> to vector<1x64xf32>
    %cst_189 = arith.constant dense<0.000000e+00> : vector<18xf32>
    %369 = vector.multi_reduction <add>, %352, %cst_189 [1] : vector<18x64xf32> to vector<18xf32>
    %370 = vector.shape_cast %369 : vector<18xf32> to vector<18x1xf32>
    %cst_190 = arith.constant 6.400000e+01 : f32
    %371 = vector.broadcast %cst_190 : f32 to vector<18x1xf32>
    %372 = arith.divf %370, %371 : vector<18x1xf32>
    %373 = vector.broadcast %372 : vector<18x1xf32> to vector<18x64xf32>
    %374 = arith.subf %352, %373 : vector<18x64xf32>
    %375 = arith.mulf %374, %374 : vector<18x64xf32>
    %cst_191 = arith.constant dense<0.000000e+00> : vector<18xf32>
    %376 = vector.multi_reduction <add>, %375, %cst_191 [1] : vector<18x64xf32> to vector<18xf32>
    %377 = vector.shape_cast %376 : vector<18xf32> to vector<18x1xf32>
    %cst_192 = arith.constant 6.400000e+01 : f32
    %378 = vector.broadcast %cst_192 : f32 to vector<18x1xf32>
    %379 = arith.divf %377, %378 : vector<18x1xf32>
    %380 = vector.broadcast %372 : vector<18x1xf32> to vector<18x64xf32>
    %381 = arith.subf %352, %380 : vector<18x64xf32>
    %cst_193 = arith.constant 9.99999974E-6 : f32
    %382 = vector.broadcast %cst_193 : f32 to vector<18x1xf32>
    %383 = arith.addf %379, %382 : vector<18x1xf32>
    %384 = math.rsqrt %383 : vector<18x1xf32>
    %385 = vector.broadcast %384 : vector<18x1xf32> to vector<18x64xf32>
    %386 = arith.mulf %381, %385 : vector<18x64xf32>
    %387 = vector.broadcast %354 : vector<1x64xf32> to vector<18x64xf32>
    %388 = arith.mulf %386, %387 : vector<18x64xf32>
    %389 = vector.broadcast %356 : vector<1x64xf32> to vector<18x64xf32>
    %390 = arith.addf %388, %389 : vector<18x64xf32>
    %391 = arith.truncf %390 : vector<18x64xf32> to vector<18x64xbf16>
    %c3_194 = arith.constant 3 : index
    %c0_195 = arith.constant 0 : index
    %c0_196 = arith.constant 0 : index
    %392 = vector.load %arg2[%c3_194, %c0_195, %c0_196] : memref<4x64x192xbf16, #tpu.memory_space<vmem>>, vector<1x64x192xbf16>
    %393 = vector.shape_cast %392 : vector<1x64x192xbf16> to vector<64x192xbf16>
    %cst_197 = arith.constant dense<0.000000e+00> : vector<18x192xf32>
    %394 = tpu.matmul %391, %393, %cst_197 {dimension_numbers = #tpu.dot_dimension_numbers<[1], [0], [0], [1], [0, 0, 1, 1], [], []>} : vector<18x64xbf16>, vector<64x192xbf16>, vector<18x192xf32> -> vector<18x192xf32>
    %395 = vector.broadcast %358 : vector<1x192xf32> to vector<18x192xf32>
    %396 = arith.addf %394, %395 : vector<18x192xf32>
    %397 = tpu.transpose %396, [1, 0] : vector<18x192xf32> -> vector<192x18xf32>
    %398 = vector.shape_cast %397 : vector<192x18xf32> to vector<24x8x18xf32>
    %399 = vector.extract_strided_slice %398 {offsets = [0, 0, 0], sizes = [8, 8, 18], strides = [1, 1, 1]} : vector<24x8x18xf32> to vector<8x8x18xf32>
    %400 = vector.extract_strided_slice %398 {offsets = [8, 0, 0], sizes = [8, 8, 18], strides = [1, 1, 1]} : vector<24x8x18xf32> to vector<8x8x18xf32>
    %401 = vector.extract_strided_slice %398 {offsets = [16, 0, 0], sizes = [8, 8, 18], strides = [1, 1, 1]} : vector<24x8x18xf32> to vector<8x8x18xf32>
    "tpu.trace_start"() <{level = 10 : i32, message = "hdq,hdk->hqk"}> : () -> ()
    %cst_198 = arith.constant dense<0.000000e+00> : vector<8x18x18xf32>
    %402 = tpu.matmul %399, %400, %cst_198 {dimension_numbers = #tpu.dot_dimension_numbers<[1], [1], [2], [2], [0, 0, 0, 2, 1, 2], [0], [0]>} : vector<8x8x18xf32>, vector<8x8x18xf32>, vector<8x18x18xf32> -> vector<8x18x18xf32>
    "tpu.trace_stop"() : () -> ()
    %403 = vector.shape_cast %21 : vector<18x18xf32> to vector<1x18x18xf32>
    %404 = vector.broadcast %403 : vector<1x18x18xf32> to vector<8x18x18xf32>
    %405 = arith.addf %402, %404 : vector<8x18x18xf32>
    %cst_199 = arith.constant dense<0xFF800000> : vector<8x18xf32>
    %406 = vector.multi_reduction <maximumf>, %405, %cst_199 [2] : vector<8x18x18xf32> to vector<8x18xf32>
    %407 = vector.shape_cast %406 : vector<8x18xf32> to vector<8x18x1xf32>
    %408 = vector.broadcast %407 : vector<8x18x1xf32> to vector<8x18x18xf32>
    %409 = arith.subf %405, %408 : vector<8x18x18xf32>
    %410 = math.exp %409 : vector<8x18x18xf32>
    %cst_200 = arith.constant dense<0.000000e+00> : vector<8x18xf32>
    %411 = vector.multi_reduction <add>, %410, %cst_200 [2] : vector<8x18x18xf32> to vector<8x18xf32>
    %412 = vector.shape_cast %411 : vector<8x18xf32> to vector<8x18x1xf32>
    %413 = tpu.reciprocal %412 {approx = true} : vector<8x18x1xf32> -> vector<8x18x1xf32>
    %414 = vector.broadcast %413 : vector<8x18x1xf32> to vector<8x18x18xf32>
    %415 = arith.mulf %410, %414 : vector<8x18x18xf32>
    "tpu.trace_start"() <{level = 10 : i32, message = "hdk,hqk->hdq"}> : () -> ()
    %cst_201 = arith.constant dense<0.000000e+00> : vector<8x8x18xf32>
    %416 = tpu.matmul %401, %415, %cst_201 {dimension_numbers = #tpu.dot_dimension_numbers<[2], [2], [1], [1], [0, 0, 0, 1, 1, 1], [0], [0]>} : vector<8x8x18xf32>, vector<8x18x18xf32>, vector<8x8x18xf32> -> vector<8x8x18xf32>
    "tpu.trace_stop"() : () -> ()
    %417 = vector.shape_cast %416 : vector<8x8x18xf32> to vector<64x18xf32>
    %418 = tpu.transpose %417, [1, 0] : vector<64x18xf32> -> vector<18x64xf32>
    %419 = arith.truncf %418 : vector<18x64xf32> to vector<18x64xbf16>
    %c3_202 = arith.constant 3 : index
    %c0_203 = arith.constant 0 : index
    %c0_204 = arith.constant 0 : index
    %420 = vector.load %arg3[%c3_202, %c0_203, %c0_204] : memref<4x64x64xbf16, #tpu.memory_space<vmem>>, vector<1x64x64xbf16>
    %421 = vector.shape_cast %420 : vector<1x64x64xbf16> to vector<64x64xbf16>
    %cst_205 = arith.constant dense<0.000000e+00> : vector<18x64xf32>
    %422 = tpu.matmul %419, %421, %cst_205 {dimension_numbers = #tpu.dot_dimension_numbers<[1], [0], [0], [1], [0, 0, 1, 1], [], []>} : vector<18x64xbf16>, vector<64x64xbf16>, vector<18x64xf32> -> vector<18x64xf32>
    %423 = vector.broadcast %360 : vector<1x64xf32> to vector<18x64xf32>
    %424 = arith.addf %422, %423 : vector<18x64xf32>
    %425 = arith.addf %352, %424 : vector<18x64xf32>
    %cst_206 = arith.constant dense<0.000000e+00> : vector<18xf32>
    %426 = vector.multi_reduction <add>, %425, %cst_206 [1] : vector<18x64xf32> to vector<18xf32>
    %427 = vector.shape_cast %426 : vector<18xf32> to vector<18x1xf32>
    %cst_207 = arith.constant 6.400000e+01 : f32
    %428 = vector.broadcast %cst_207 : f32 to vector<18x1xf32>
    %429 = arith.divf %427, %428 : vector<18x1xf32>
    %430 = vector.broadcast %429 : vector<18x1xf32> to vector<18x64xf32>
    %431 = arith.subf %425, %430 : vector<18x64xf32>
    %432 = arith.mulf %431, %431 : vector<18x64xf32>
    %cst_208 = arith.constant dense<0.000000e+00> : vector<18xf32>
    %433 = vector.multi_reduction <add>, %432, %cst_208 [1] : vector<18x64xf32> to vector<18xf32>
    %434 = vector.shape_cast %433 : vector<18xf32> to vector<18x1xf32>
    %cst_209 = arith.constant 6.400000e+01 : f32
    %435 = vector.broadcast %cst_209 : f32 to vector<18x1xf32>
    %436 = arith.divf %434, %435 : vector<18x1xf32>
    %437 = vector.broadcast %429 : vector<18x1xf32> to vector<18x64xf32>
    %438 = arith.subf %425, %437 : vector<18x64xf32>
    %cst_210 = arith.constant 9.99999974E-6 : f32
    %439 = vector.broadcast %cst_210 : f32 to vector<18x1xf32>
    %440 = arith.addf %436, %439 : vector<18x1xf32>
    %441 = math.rsqrt %440 : vector<18x1xf32>
    %442 = vector.broadcast %441 : vector<18x1xf32> to vector<18x64xf32>
    %443 = arith.mulf %438, %442 : vector<18x64xf32>
    %444 = vector.broadcast %362 : vector<1x64xf32> to vector<18x64xf32>
    %445 = arith.mulf %443, %444 : vector<18x64xf32>
    %446 = vector.broadcast %364 : vector<1x64xf32> to vector<18x64xf32>
    %447 = arith.addf %445, %446 : vector<18x64xf32>
    %448 = arith.truncf %447 : vector<18x64xf32> to vector<18x64xbf16>
    %c3_211 = arith.constant 3 : index
    %c0_212 = arith.constant 0 : index
    %c0_213 = arith.constant 0 : index
    %449 = vector.load %arg4[%c3_211, %c0_212, %c0_213] : memref<4x64x256xbf16, #tpu.memory_space<vmem>>, vector<1x64x256xbf16>
    %450 = vector.shape_cast %449 : vector<1x64x256xbf16> to vector<64x256xbf16>
    %cst_214 = arith.constant dense<0.000000e+00> : vector<18x256xf32>
    %451 = tpu.matmul %448, %450, %cst_214 {dimension_numbers = #tpu.dot_dimension_numbers<[1], [0], [0], [1], [0, 0, 1, 1], [], []>} : vector<18x64xbf16>, vector<64x256xbf16>, vector<18x256xf32> -> vector<18x256xf32>
    %452 = vector.broadcast %366 : vector<1x256xf32> to vector<18x256xf32>
    %453 = arith.addf %451, %452 : vector<18x256xf32>
    %cst_215 = arith.constant 0.000000e+00 : f32
    %454 = vector.broadcast %cst_215 : f32 to vector<18x256xf32>
    %455 = arith.maximumf %453, %454 : vector<18x256xf32>
    %456 = arith.truncf %455 : vector<18x256xf32> to vector<18x256xbf16>
    %c3_216 = arith.constant 3 : index
    %c0_217 = arith.constant 0 : index
    %c0_218 = arith.constant 0 : index
    %457 = vector.load %arg5[%c3_216, %c0_217, %c0_218] : memref<4x256x64xbf16, #tpu.memory_space<vmem>>, vector<1x256x64xbf16>
    %458 = vector.shape_cast %457 : vector<1x256x64xbf16> to vector<256x64xbf16>
    %cst_219 = arith.constant dense<0.000000e+00> : vector<18x64xf32>
    %459 = tpu.matmul %456, %458, %cst_219 {dimension_numbers = #tpu.dot_dimension_numbers<[1], [0], [0], [1], [0, 0, 1, 1], [], []>} : vector<18x256xbf16>, vector<256x64xbf16>, vector<18x64xf32> -> vector<18x64xf32>
    %460 = arith.addf %425, %459 : vector<18x64xf32>
    %461 = vector.broadcast %368 : vector<1x64xf32> to vector<18x64xf32>
    %462 = arith.addf %460, %461 : vector<18x64xf32>
    %463 = vector.extract_strided_slice %462 {offsets = [8, 0], sizes = [1, 64], strides = [1, 1]} : vector<18x64xf32> to vector<1x64xf32>
    %464 = vector.extract_strided_slice %462 {offsets = [17, 0], sizes = [1, 64], strides = [1, 1]} : vector<18x64xf32> to vector<1x64xf32>
    %465 = tpu.concatenate %463, %464 in 0 : vector<1x64xf32>, vector<1x64xf32> -> vector<2x64xf32>
    %c0_220 = arith.constant 0 : index
    %c8 = arith.constant 8 : index
    %c0_221 = arith.constant 0 : index
    %466 = vector.load %arg1[%c0_220, %c8, %c0_221] : memref<4x10x256xf32, #tpu.memory_space<vmem>>, vector<1x1x64xf32>
    %467 = vector.shape_cast %466 : vector<1x1x64xf32> to vector<1x64xf32>
    %c0_222 = arith.constant 0 : index
    %c9 = arith.constant 9 : index
    %c0_223 = arith.constant 0 : index
    %468 = vector.load %arg1[%c0_222, %c9, %c0_223] : memref<4x10x256xf32, #tpu.memory_space<vmem>>, vector<1x1x64xf32>
    %469 = vector.shape_cast %468 : vector<1x1x64xf32> to vector<1x64xf32>
    %cst_224 = arith.constant dense<0.000000e+00> : vector<2xf32>
    %470 = vector.multi_reduction <add>, %465, %cst_224 [1] : vector<2x64xf32> to vector<2xf32>
    %471 = vector.shape_cast %470 : vector<2xf32> to vector<2x1xf32>
    %cst_225 = arith.constant 6.400000e+01 : f32
    %472 = vector.broadcast %cst_225 : f32 to vector<2x1xf32>
    %473 = arith.divf %471, %472 : vector<2x1xf32>
    %474 = vector.broadcast %473 : vector<2x1xf32> to vector<2x64xf32>
    %475 = arith.subf %465, %474 : vector<2x64xf32>
    %476 = arith.mulf %475, %475 : vector<2x64xf32>
    %cst_226 = arith.constant dense<0.000000e+00> : vector<2xf32>
    %477 = vector.multi_reduction <add>, %476, %cst_226 [1] : vector<2x64xf32> to vector<2xf32>
    %478 = vector.shape_cast %477 : vector<2xf32> to vector<2x1xf32>
    %cst_227 = arith.constant 6.400000e+01 : f32
    %479 = vector.broadcast %cst_227 : f32 to vector<2x1xf32>
    %480 = arith.divf %478, %479 : vector<2x1xf32>
    %481 = vector.broadcast %473 : vector<2x1xf32> to vector<2x64xf32>
    %482 = arith.subf %465, %481 : vector<2x64xf32>
    %cst_228 = arith.constant 9.99999974E-6 : f32
    %483 = vector.broadcast %cst_228 : f32 to vector<2x1xf32>
    %484 = arith.addf %480, %483 : vector<2x1xf32>
    %485 = math.rsqrt %484 : vector<2x1xf32>
    %486 = vector.broadcast %485 : vector<2x1xf32> to vector<2x64xf32>
    %487 = arith.mulf %482, %486 : vector<2x64xf32>
    %488 = vector.broadcast %467 : vector<1x64xf32> to vector<2x64xf32>
    %489 = arith.mulf %487, %488 : vector<2x64xf32>
    %490 = vector.broadcast %469 : vector<1x64xf32> to vector<2x64xf32>
    %491 = arith.addf %489, %490 : vector<2x64xf32>
    %c0_229 = arith.constant 0 : index
    %c0_230 = arith.constant 0 : index
    %492 = vector.load %arg6[%c0_229, %c0_230] : memref<2x64xf32, #tpu.memory_space<vmem>>, vector<2x64xf32>
    tpu.vector_store %arg6[%c0_229, %c0_230], %491 {strides = array<i32>} : memref<2x64xf32, #tpu.memory_space<vmem>>, vector<2x64xf32>,
    return
  }
}

</mosaic_0001>

<bundles_post_ra>
// kernel: tpu_custom_call.1
= control target key start
LH: loop header
LB: loop body
LE: loop exit
PB: predicated region body
PF: predicated region fallthrough
CT: control target
= control target key end

     0   :  { %vm64_vm0 = vcmask 523264   ;;  %vm71_vm1 = vcmask 517120   ;;  %s15550_s0 = inlined_call_operand.vmem [shape: f32[18,64], index: 0, kind: input, shape index: {}]   ;;  %s15551_s1 = inlined_call_operand.vmem [shape: f32[4,10,256], index: 1, kind: input, shape index: {}]   ;;  %s15552_s2 = inlined_call_operand.vmem [shape: bf16[4,64,192], index: 2, kind: input, shape index: {}]   ;;  %s15553_s3 = inlined_call_operand.vmem [shape: bf16[4,64,64], index: 3, kind: input, shape index: {}]   ;;  %s15554_s4 = inlined_call_operand.vmem [shape: bf16[4,64,256], index: 4, kind: input, shape index: {}]   ;;  %s15555_s5 = inlined_call_operand.vmem [shape: bf16[4,256,64], index: 5, kind: input, shape index: {}]   ;;  %s15556_s6 = inlined_call_operand.hbm [shape: f32[2,64], index: 6, kind: output, shape index: {}]  }
   0x1   :  { %v51_v0 = vld [vmem:[%s15550_s0] sm:$0xff]  ;;  %v53_v1 = vld [vmem:[%s15550_s0 + $0x10] sm:$0x3]  ;;  %v52_v2 = vld [vmem:[%s15550_s0 + $0x8] sm:$0xff] }
   0x2   :  { %v65_v3 = vsel %vm64_vm0, %v51_v0, 0.0  ;;  %v72_v4 = vsel %vm71_vm1, %v53_v1, 0.0  ;;  %v68_v5 = vsel %vm64_vm0, %v52_v2, 0.0 }
   0x3   :  { %66 = vadd.xlane.f32.xlu0 %v65_v3  ;;  %73 = vadd.xlane.f32.xlu1 %v72_v4 }
   0x7   :  { %69 = vadd.xlane.f32.xlu0 %v68_v5 }
   0x8   :  { %11 = vsyncpa [#allocation3], 0  ;;  %v12327_v21 = vld [vmem:[%s15552_s2 + $0x4] ss:$8 sps:$4 sm:$0xff]   ;;  %v12329_v22 = vld [vmem:[%s15552_s2] ss:$8 sps:$4 sm:$0xff]   ;;  %v25_v55 = vlaneseq }
   0x9   :  { %179 = vmatprep.subr.bf16.mxu0 %v12327_v21  ;;  %v12330_v23 = vld [vmem:[%s15552_s2 + $0x14] ss:$8 sps:$4 sm:$0xff]   ;;  %v12332_v24 = vld [vmem:[%s15552_s2 + $0x10] ss:$8 sps:$4 sm:$0xff]   ;;  %v12333_v25 = vld [vmem:[%s15552_s2 + $0x24] ss:$8 sps:$4 sm:$0xff]  }
   0xa   :  { %180 = vmatpush1.bf16.msra.mxu0 %v12329_v22  ;;  %v12335_v26 = vld [vmem:[%s15552_s2 + $0x20] ss:$8 sps:$4 sm:$0xff]   ;;  %v12336_v27 = vld [vmem:[%s15552_s2 + $0x34] ss:$8 sps:$4 sm:$0xff]   ;;  %v12338_v28 = vld [vmem:[%s15552_s2 + $0x30] ss:$8 sps:$4 sm:$0xff]  }
   0xb   :  { %181 = vmatprep.subr.bf16.mxu0 %v12330_v23  ;;  %v12964_v29 = vmov 0   ;;  %v54_v41 = vld [vmem:[%s15551_s1] ss:$0 sm:$0xff]  ;;  %v55_v46 = vld [vmem:[%s15551_s1 + $0x1] ss:$0 sm:$0xff]  ;;  %v13055_v56 = vshrl.u32 %v25_v55, 7 }
   0xc   :  { %211 = vmatprep.mubr.bf16.mxu0 %v12964_v29  ;;  %v13063_v58 = vld [vmem:[%s15551_s1 + $0x2] ss:$8 sm:$0x3]  ;;  %vm12966_vm2 = vmmov 0   ;;  %vm326_vm3 = vcmask 64512   ;;  %vm1263_vm13 = vcmask 146432  }
   0xd   :  { %v13058_v57 = vsub.s32 0, %v13055_v56  ;;  %vm1270_vm15 = vcmask 140288   ;;  %s12969_s7 = smov [#allocation2]  }
   0xe   :  { %182 = vmatpush1.bf16.msra.mxu0 %v12332_v24  ;;  %s10510_s8 = sshll.u32 %s12969_s7, 4  ;;  %s10511_s8 = int_to_ptr.vmem [resolvable:$true] %s10510_s8 }
   0xf   :  { %183 = vmatprep.subr.bf16.mxu0 %v12333_v25  ;;  %v126_v59 = vrot.slane %v13063_v58, %v13058_v57  ;;  %s12940_s9 = scalar_lea.vmem %s10511_s8, 32  ;;  %p12945_p1 = scmp.lt.s32.totalorder %s10511_s8, %s10511_s8 }
  0x10   :  { %p12941_p0 = scmp.ne.s32.totalorder %s10511_s8, %s12940_s9  ;;  %p12946_p2 = scmp.lt.s32.totalorder %s12940_s9, %s12940_s9 }
  0x12   :  { %184 = vmatpush1.bf16.msra.mxu0 %v12335_v26  ;;  %p12947_p3 = por %p12946_p2, %p12945_p1 }
  0x13   :  { %185 = vmatprep.subr.bf16.mxu0 %v12336_v27 }
  0x14   :  { %p12948_p4 = pnand %p12947_p3, %p12941_p0 }
  0x16   :  { %186 = vmatpush1.bf16.msra.mxu0 %v12338_v28 }
  0x90   :  { %v67_v6 = vpop.xlane.xlu0 %66  ;;  %v74_v7 = vpop.xlane.xlu1 %73 }
  0x91   :  { %v76_v8 = vmul.f32 0.015625, %v67_v6  ;;  %v78_v9 = vmul.f32 0.015625, %v74_v7  ;;  %v12965_v7 = vmov 0.0  }
  0x92   :  { %11505 = vmatprep.subr.mxu1 %v12965_v7  ;;  %11507 = vmatprep.mubr.msk.f32.mxu1 %vm12966_vm2, %v12965_v7 }
  0x93   :  { %v79_v10 = vsub.f32 %v51_v0, %v76_v8  ;;  %v81_v11 = vsub.f32 %v53_v1, %v78_v9  ;;  %11560 = vmatprep.subr.mxu0 %v12965_v7 }
  0x94   :  { %v70_v12 = vpop.xlane.xlu0 %69 }
  0x95   :  { %v77_v13 = vmul.f32 0.015625, %v70_v12  ;;  %v82_v14 = vmul.f32 %v79_v10, %v79_v10  ;;  %v84_v15 = vmul.f32 %v81_v11, %v81_v11 }
  0x97   :  { %v80_v16 = vsub.f32 %v52_v2, %v77_v13  ;;  %v85_v17 = vsel %vm64_vm0, %v82_v14, 0.0  ;;  %v91_v18 = vsel %vm71_vm1, %v84_v15, 0.0 }
  0x98   :  { %86 = vadd.xlane.f32.xlu1 %v85_v17 }
  0x99   :  { %v83_v19 = vmul.f32 %v80_v16, %v80_v16 }
  0x9b   :  { %v88_v20 = vsel %vm64_vm0, %v83_v19, 0.0 }
  0x9c   :  { %92 = vadd.xlane.f32.xlu1 %v91_v18  ;;  %89 = vadd.xlane.f32.xlu0 %v88_v20 }
 0x125   :  { %v87_v30 = vpop.xlane.xlu1 %86 }
 0x126   :  { %v94_v31 = vmul.f32 0.015625, %v87_v30 }
 0x128   :  { %v97_v32 = vadd.f32 1e-05, %v94_v31 }
 0x129   :  { %v93_v33 = vpop.xlane.xlu1 %92  ;;  %v90_v34 = vpop.xlane.xlu0 %89 }
 0x12a   :  { %12503 = vrsqrt.f32 %v97_v32  ;;  %v96_v35 = vmul.f32 0.015625, %v93_v33  ;;  %v95_v36 = vmul.f32 0.015625, %v90_v34 }
 0x12c   :  { %v99_v37 = vadd.f32 1e-05, %v96_v35  ;;  %v98_v38 = vadd.f32 1e-05, %v95_v36 }
 0x12e   :  { %12505 = vrsqrt.f32 %v99_v37 }
 0x12f   :  { %12507 = vrsqrt.f32 %v98_v38 }
 0x134   :  { %v12504_v39 = vpop.eup %12503 }
 0x135   :  { %v103_v40 = vmul.f32 %v12504_v39, %v79_v10 }
 0x137   :  { %v106_v45 = vmul.f32 %v103_v40, %v54_v41 }
 0x138   :  { %v12506_v42 = vpop.eup %12505 }
 0x139   :  { %v12508_v43 = vpop.eup %12507  ;;  %v105_v48 = vmul.f32 %v12506_v42, %v81_v11  ;;  %v109_v49 = vadd.f32 %v106_v45, %v55_v46 }
 0x13a   :  { %v104_v44 = vmul.f32 %v12508_v43, %v80_v16 }
 0x13b   :  { %v108_v52 = vmul.f32 %v105_v48, %v54_v41 }
 0x13c   :  { %v107_v47 = vmul.f32 %v104_v44, %v54_v41 }
 0x13d   :  { %v111_v53 = vadd.f32 %v108_v52, %v55_v46 }
 0x13e   :  { %v110_v50 = vadd.f32 %v107_v47, %v55_v46 }
 0x13f   :  { %v113_v54 = vpack.c.bf16 %v111_v53, %v111_v53  ;;  %v28_v53 = vadd.s32 16, %v13055_v56 }
 0x140   :  { %v112_v51 = vpack.c.bf16 %v110_v50, %v109_v49  ;;  %v30_v49 = vand.u32 127, %v25_v55  ;;  %v27_v50 = vadd.s32 8, %v13055_v56 }
 0x142   :  { %10536 = vmatmul.mubr.msk.bf16.vlgmr.msra.gmra.mrb[0].mxu0 %vm64_vm0, %v112_v51  ;;  %vm37_vm4 = vcmp.ge.s32.totalorder %v30_v49, 9  ;;  %vm32_vm5 = vcmp.ge.s32.totalorder %v27_v50, 9  ;;  %vm42_vm7 = vcmp.le.s32.totalorder %v30_v49, %v13055_v56  ;;  %vm43_vm10 = vcmp.le.s32.totalorder %v30_v49, %v27_v50 }
 0x143   :  { %221 = vmatprep.mubr.bf16.mxu0 %v12964_v29  ;;  %vm11112_vm6 = vmneg %vm37_vm4  ;;  %v35_v51 = vsel %vm32_vm5, 1, %v12964_v29  ;;  %v38_v52 = vsel %vm37_vm4, 1, %v12964_v29  ;;  %vm44_vm12 = vcmp.le.s32.totalorder %v30_v49, %v28_v53 }
 0x144   :  { %vm45_vm8 = vmand %vm11112_vm6, %vm42_vm7  ;;  %vm40_vm9 = vcmp.eq.s32.totalorder %v35_v51, %v38_v52 }
 0x145   :  { %vm46_vm11 = vmand %vm40_vm9, %vm43_vm10 }
 0x146   :  { %vm47_vm14 = vmand %vm37_vm4, %vm44_vm12 }
 0x147   :  { %vm13426_vm4 = vmpackc.low %vm1263_vm13, %vm1263_vm13 }
 0x14a   :  { %10537 = vmatmul.mubr.msk.bf16.gmra.mrb[4].mxu0 %vm64_vm0, %v113_v54  ;;  %v12967_v54 = vmov -1e+09  }
 0x14b   :  { %11562 = vmatprep.mubr.msk.f32.mxu0 %vm12966_vm2, %v12965_v7  ;;  %v13165_v55 = vsel %vm45_vm8, 0.0, %v12967_v54 }
 0x215   :  { %v213_v60 = vpop.f32.mrb[0].mxu0 }
 0x216   :  { %v214_v61 = vadd.f32 %v213_v60, %v126_v59  ;;  %v13067_v62 = vpop.f32.mrb[1].mxu0 }
 0x217   :  { %v217_v63 = vpop.f32.mrb[2].mxu0 }
 0x218   :  { %v13069_v0 = vpop.f32.mrb[3].mxu0  ;;  %230 = vxpose.xlu0.b32.start [1/3] (short) %v214_v61, 128  ;;  %v218_v1 = vadd.f32 %v217_v63, %v126_v59  ;;  %v13170_v63 = vsel %vm46_vm11, 0.0, %v12967_v54 }
 0x21c   :  { %231 = vxpose.xlu0.b32.cont [2/3] (short) %v218_v1, 128 }
 0x21d   :  { %v223_v2 = vpop.f32.mrb[4].mxu0 }
 0x21e   :  { %v224_v3 = vadd.f32 %v223_v2, %v126_v59  ;;  %v13071_v4 = vpop.f32.mrb[5].mxu0 }
 0x21f   :  { %v227_v5 = vpop.f32.mrb[6].mxu0 }
 0x220   :  { %v228_v6 = vpop.f32.mrb[7].mxu0  ;;  %232 = vxpose.xlu0.b32.end [3/3] (short) %v224_v3, 128 }
 0x221   :  { %v13178_v6 = vsel %vm47_vm14, 0.0, %v12967_v54 }
 0x298   :  { %v246_v8 = vpop.trf.xlu0 }
 0x299   :  { %294 = vxpose.xlu1.b32.start.end [1/1] (short) (narrow) %v246_v8, 24 }
 0x29c   :  { %v247_v9 = vpop.trf.xlu0 }
 0x2a0   :  { %v248_v10 = vpop.trf.xlu0 }
 0x2a1   :  { %537 = vxpose.xlu0.b32.start.end [1/1] (short) (narrow) %v248_v10, 24 }
 0x2a2   :  { %416 = vxpose.xlu1.b32.start.end [1/1] (short) (narrow) %v247_v9, 24 }
 0x2a4   :  { %v249_v11 = vpop.trf.xlu0 }
 0x2a8   :  { %v250_v12 = vpop.trf.xlu0 }
 0x2ab   :  { %658 = vxpose.xlu1.b32.start.end [1/1] (short) (narrow) %v249_v11, 24 }
 0x2ac   :  { %v251_v13 = vpop.trf.xlu0 }
 0x2b0   :  { %v252_v14 = vpop.trf.xlu0 }
 0x2b4   :  { %779 = vxpose.xlu1.b32.start.end [1/1] (short) (narrow) %v250_v12, 24  ;;  %v253_v15 = vpop.trf.xlu0 }
 0x2b8   :  { %v254_v16 = vpop.trf.xlu0 }
 0x2b9   :  { %11506 = vmatpush3.msra.mxu1 %v254_v16 }
 0x2ba   :  { %11516 = vmatprep.subr.mxu1 %v12965_v7 }
 0x2bc   :  { %v255_v17 = vpop.trf.xlu0 }
 0x2bd   :  { %900 = vxpose.xlu1.b32.start.end [1/1] (short) (narrow) %v251_v13, 24 }
 0x2c0   :  { %v256_v18 = vpop.trf.xlu0 }
 0x2c4   :  { %v257_v19 = vpop.trf.xlu0 }
 0x2c6   :  { %1021 = vxpose.xlu1.b32.start.end [1/1] (short) (narrow) %v252_v14, 24 }
 0x2c8   :  { %v258_v20 = vpop.trf.xlu0 }
 0x2cc   :  { %v259_v21 = vpop.trf.xlu0 }
 0x2cd   :  { %11561 = vmatpush3.msra.mxu0 %v259_v21 }
 0x2ce   :  { %11582 = vmatprep.subr.mxu0 %v12965_v7 }
 0x2cf   :  { %1142 = vxpose.xlu1.b32.start.end [1/1] (short) (narrow) %v253_v15, 24 }
 0x2d0   :  { %v260_v24 = vpop.trf.xlu0 }
 0x2d4   :  { %v261_v27 = vpop.trf.xlu0 }
 0x319   :  { %v310_v22 = vpop.trf.xlu1 }
 0x31a   :  { %11508 = vmatmul.mubr.msk.f32.vlgmr.msra.gmra.mrb[0].mxu1 %vm326_vm3, %v310_v22 }
 0x31b   :  { %11517 = vmatpush3.msra.mxu1 %v255_v17  ;;  %11510 = vmatprep.mubr.msk.f32.mxu1 %vm12966_vm2, %v12965_v7 }
 0x31c   :  { %11527 = vmatprep.subr.mxu1 %v12965_v7 }
 0x31d   :  { %v311_v23 = vpop.trf.xlu1 }
 0x31e   :  { %11511 = vmatmul.mubr.msk.f32.gmra.mrb[2].mxu1 %vm326_vm3, %v311_v23 }
 0x31f   :  { %11513 = vmatprep.mubr.msk.f32.mxu1 %vm12966_vm2, %v12965_v7 }
 0x321   :  { %v312_v25 = vpop.trf.xlu1  ;;  %v553_v30 = vpop.trf.xlu0 }
 0x322   :  { %11514 = vmatmul.mubr.msk.f32.gmra.mrb[4].mxu1 %vm326_vm3, %v312_v25 }
 0x323   :  { %11518 = vmatprep.mubr.msk.f32.mxu1 %vm12966_vm2, %v12965_v7 }
 0x325   :  { %v432_v26 = vpop.trf.xlu1  ;;  %v554_v33 = vpop.trf.xlu0 }
 0x326   :  { %11519 = vmatmul.mubr.msk.f32.vlgmr.msra.gmra.mrb[6].mxu1 %vm326_vm3, %v432_v26 }
 0x327   :  { %11528 = vmatpush3.msra.mxu1 %v256_v18  ;;  %11521 = vmatprep.mubr.msk.f32.mxu1 %vm12966_vm2, %v12965_v7 }
 0x328   :  { %11538 = vmatprep.subr.mxu1 %v12965_v7 }
 0x329   :  { %v433_v28 = vpop.trf.xlu1  ;;  %v555_v35 = vpop.trf.xlu0 }
 0x32a   :  { %11522 = vmatmul.mubr.msk.f32.gmra.mrb[8].mxu1 %vm326_vm3, %v433_v28 }
 0x32b   :  { %11524 = vmatprep.mubr.msk.f32.mxu1 %vm12966_vm2, %v12965_v7 }
 0x32d   :  { %v434_v31 = vpop.trf.xlu1 }
 0x32e   :  { %11525 = vmatmul.mubr.msk.f32.gmra.mrb[10].mxu1 %vm326_vm3, %v434_v31 }
 0x32f   :  { %11529 = vmatprep.mubr.msk.f32.mxu1 %vm12966_vm2, %v12965_v7 }
 0x331   :  { %v674_v32 = vpop.trf.xlu1 }
 0x332   :  { %11530 = vmatmul.mubr.msk.f32.vlgmr.msra.gmra.mrb[12].mxu1 %vm326_vm3, %v553_v30 }
 0x333   :  { %11539 = vmatpush3.msra.mxu1 %v257_v19  ;;  %11532 = vmatprep.mubr.msk.f32.mxu1 %vm12966_vm2, %v12965_v7 }
 0x334   :  { %11549 = vmatprep.subr.mxu1 %v12965_v7 }
 0x335   :  { %v675_v34 = vpop.trf.xlu1 }
 0x336   :  { %11533 = vmatmul.mubr.msk.f32.gmra.mrb[14].mxu1 %vm326_vm3, %v554_v33 }
 0x337   :  { %11535 = vmatprep.mubr.msk.f32.mxu1 %vm12966_vm2, %v12965_v7 }
 0x339   :  { %v676_v36 = vpop.trf.xlu1 }
 0x33a   :  { %11536 = vmatmul.mubr.msk.f32.gmra.mrb[16].mxu1 %vm326_vm3, %v555_v35 }
 0x33b   :  { %11540 = vmatprep.mubr.msk.f32.mxu1 %vm12966_vm2, %v12965_v7 }
 0x33d   :  { %v795_v37 = vpop.trf.xlu1 }
 0x33e   :  { %11541 = vmatmul.mubr.msk.f32.vlgmr.msra.gmra.mrb[18].mxu1 %vm326_vm3, %v674_v32 }
 0x33f   :  { %11550 = vmatpush3.msra.mxu1 %v258_v20  ;;  %11543 = vmatprep.mubr.msk.f32.mxu1 %vm12966_vm2, %v12965_v7 }
 0x340   :  { %11571 = vmatprep.subr.mxu1 %v12965_v7 }
 0x341   :  { %v796_v38 = vpop.trf.xlu1 }
 0x342   :  { %11544 = vmatmul.mubr.msk.f32.gmra.mrb[20].mxu1 %vm326_vm3, %v675_v34 }
 0x343   :  { %11546 = vmatprep.mubr.msk.f32.mxu1 %vm12966_vm2, %v12965_v7 }
 0x345   :  { %v797_v39 = vpop.trf.xlu1 }
 0x346   :  { %11547 = vmatmul.mubr.msk.f32.gmra.mrb[22].mxu1 %vm326_vm3, %v676_v36 }
 0x347   :  { %11551 = vmatprep.mubr.msk.f32.mxu1 %vm12966_vm2, %v12965_v7 }
 0x349   :  { %v916_v40 = vpop.trf.xlu1 }
 0x34a   :  { %11552 = vmatmul.mubr.msk.f32.vlgmr.msra.gmra.mrb[24].mxu1 %vm326_vm3, %v795_v37  ;;  %11563 = vmatmul.mubr.msk.f32.vlgmr.msra.gmra.mrb[8].mxu0 %vm326_vm3, %v916_v40 }
 0x34b   :  { %11572 = vmatpush3.msra.mxu1 %v260_v24  ;;  %11583 = vmatpush3.msra.mxu0 %v261_v27 }
 0x34c   :  { %11554 = vmatprep.mubr.msk.f32.mxu1 %vm12966_vm2, %v12965_v7  ;;  %11565 = vmatprep.mubr.msk.f32.mxu0 %vm12966_vm2, %v12965_v7 }
 0x34d   :  { %v917_v41 = vpop.trf.xlu1 }
 0x34e   :  { %11555 = vmatmul.mubr.msk.f32.gmra.mrb[26].mxu1 %vm326_vm3, %v796_v38  ;;  %11566 = vmatmul.mubr.msk.f32.gmra.mrb[10].mxu0 %vm326_vm3, %v917_v41 }
 0x34f   :  { %11557 = vmatprep.mubr.msk.f32.mxu1 %vm12966_vm2, %v12965_v7  ;;  %11568 = vmatprep.mubr.msk.f32.mxu0 %vm12966_vm2, %v12965_v7 }
 0x351   :  { %v918_v42 = vpop.trf.xlu1 }
 0x352   :  { %11558 = vmatmul.mubr.msk.f32.gmra.mrb[28].mxu1 %vm326_vm3, %v797_v39  ;;  %11569 = vmatmul.mubr.msk.f32.gmra.mrb[12].mxu0 %vm326_vm3, %v918_v42 }
 0x353   :  { %11573 = vmatprep.mubr.msk.f32.mxu1 %vm12966_vm2, %v12965_v7  ;;  %11584 = vmatprep.mubr.msk.f32.mxu0 %vm12966_vm2, %v12965_v7 }
 0x355   :  { %v1037_v43 = vpop.trf.xlu1 }
 0x356   :  { %11574 = vmatmul.mubr.msk.f32.vlgmr.msra.gmra.mrb[30].mxu1 %vm326_vm3, %v1037_v43 }
 0x357   :  { %11576 = vmatprep.mubr.msk.f32.mxu1 %vm12966_vm2, %v12965_v7 }
 0x359   :  { %v1038_v44 = vpop.trf.xlu1 }
 0x35a   :  { %11577 = vmatmul.mubr.msk.f32.gmra.mrb[32].mxu1 %vm326_vm3, %v1038_v44 }
 0x35b   :  { %11579 = vmatprep.mubr.msk.f32.mxu1 %vm12966_vm2, %v12965_v7 }
 0x35d   :  { %v1039_v45 = vpop.trf.xlu1 }
 0x35e   :  { %11580 = vmatmul.mubr.msk.f32.gmra.mrb[34].mxu1 %vm326_vm3, %v1039_v45 }
 0x35f   :  { %11599 = vmatprep.mubr.msk.f32.mxu1 %vm12966_vm2, %v12965_v7 }
 0x361   :  { %v1158_v46 = vpop.trf.xlu1 }
 0x362   :  { %11585 = vmatmul.mubr.msk.f32.vlgmr.msra.gmra.mrb[14].mxu0 %vm326_vm3, %v1158_v46 }
 0x363   :  { %11587 = vmatprep.mubr.msk.f32.mxu0 %vm12966_vm2, %v12965_v7 }
 0x365   :  { %v1159_v47 = vpop.trf.xlu1 }
 0x366   :  { %11588 = vmatmul.mubr.msk.f32.gmra.mrb[16].mxu0 %vm326_vm3, %v1159_v47 }
 0x367   :  { %11590 = vmatprep.mubr.msk.f32.mxu0 %vm12966_vm2, %v12965_v7 }
 0x369   :  { %v1160_v48 = vpop.trf.xlu1 }
 0x36a   :  { %11591 = vmatmul.mubr.msk.f32.gmra.mrb[18].mxu0 %vm326_vm3, %v1160_v48 }
 0x36b   :  { %11608 = vmatprep.mubr.msk.f32.mxu0 %vm12966_vm2, %v12965_v7 }
 0x3ed   :  { %v402_v59 = vpop.f32.mrb[0].mxu1 }
 0x3ee   :  { %v13168_v60 = vadd.f32 %v402_v59, %v13165_v55  ;;  %v11509_v61 = vpop.f32.mrb[1].mxu1 }
 0x3f0   :  { %v1264_v1 = vsel %vm1263_vm13, %v13168_v60, -inf }
 0x3f1   :  { %v407_v2 = vpop.f32.mrb[2].mxu1  ;;  %1265 = vmax.xlane.f32.xlu1 %v1264_v1 }
 0x3f2   :  { %v13176_v3 = vadd.f32 %v407_v2, %v13170_v63  ;;  %v11512_v5 = vpop.f32.mrb[3].mxu1 }
 0x3f4   :  { %v1267_v8 = vsel %vm1263_vm13, %v13176_v3, -inf }
 0x3f5   :  { %v412_v9 = vpop.f32.mrb[4].mxu1  ;;  %1268 = vmax.xlane.f32.xlu0 %v1267_v8 }
 0x3f6   :  { %v13183_v10 = vadd.f32 %v412_v9, %v13178_v6  ;;  %v11515_v11 = vpop.f32.mrb[5].mxu1 }
 0x3f8   :  { %v1271_v12 = vsel %vm1270_vm15, %v13183_v10, -inf }
 0x3f9   :  { %v523_v13 = vpop.f32.mrb[6].mxu1  ;;  %1272 = vmax.xlane.f32.xlu0 %v1271_v12 }
 0x3fa   :  { %v13188_v14 = vadd.f32 %v523_v13, %v13165_v55  ;;  %v11520_v15 = vpop.f32.mrb[7].mxu1 }
 0x3fc   :  { %v1274_v16 = vsel %vm1263_vm13, %v13188_v14, -inf }
 0x3fd   :  { %v528_v17 = vpop.f32.mrb[8].mxu1  ;;  %1275 = vmax.xlane.f32.xlu1 %v1274_v16 }
 0x3fe   :  { %v13193_v18 = vadd.f32 %v528_v17, %v13170_v63  ;;  %v11523_v19 = vpop.f32.mrb[9].mxu1 }
 0x400   :  { %v1277_v20 = vsel %vm1263_vm13, %v13193_v18, -inf }
 0x401   :  { %v533_v21 = vpop.f32.mrb[10].mxu1  ;;  %1278 = vmax.xlane.f32.xlu1 %v1277_v20 }
 0x402   :  { %v13198_v22 = vadd.f32 %v533_v21, %v13178_v6  ;;  %v11526_v23 = vpop.f32.mrb[11].mxu1 }
 0x404   :  { %v1280_v24 = vsel %vm1270_vm15, %v13198_v22, -inf }
 0x405   :  { %v644_v25 = vpop.f32.mrb[12].mxu1  ;;  %1281 = vmax.xlane.f32.xlu1 %v1280_v24 }
 0x406   :  { %v13203_v26 = vadd.f32 %v644_v25, %v13165_v55  ;;  %v11531_v27 = vpop.f32.mrb[13].mxu1 }
 0x408   :  { %v1283_v28 = vsel %vm1263_vm13, %v13203_v26, -inf }
 0x409   :  { %v649_v30 = vpop.f32.mrb[14].mxu1  ;;  %1284 = vmax.xlane.f32.xlu0 %v1283_v28 }
 0x40a   :  { %v13208_v31 = vadd.f32 %v649_v30, %v13170_v63  ;;  %v11534_v32 = vpop.f32.mrb[15].mxu1 }
 0x40c   :  { %v1286_v33 = vsel %vm1263_vm13, %v13208_v31, -inf }
 0x40d   :  { %v654_v34 = vpop.f32.mrb[16].mxu1  ;;  %1287 = vmax.xlane.f32.xlu1 %v1286_v33 }
 0x40e   :  { %v11537_v35 = vpop.f32.mrb[17].mxu1  ;;  %v13216_v39 = vadd.f32 %v654_v34, %v13178_v6 }
 0x410   :  { %v1289_v45 = vsel %vm1270_vm15, %v13216_v39, -inf }
 0x411   :  { %v765_v36 = vpop.f32.mrb[18].mxu1 }
 0x412   :  { %v13213_v37 = vadd.f32 %v765_v36, %v13165_v55  ;;  %v11542_v38 = vpop.f32.mrb[19].mxu1 }
 0x414   :  { %v1292_v40 = vsel %vm1263_vm13, %v13213_v37, -inf }
 0x415   :  { %v770_v41 = vpop.f32.mrb[20].mxu1  ;;  %1293 = vmax.xlane.f32.xlu0 %v1292_v40 }
 0x416   :  { %v13221_v42 = vadd.f32 %v770_v41, %v13170_v63  ;;  %v11545_v43 = vpop.f32.mrb[21].mxu1 }
 0x418   :  { %v1295_v44 = vsel %vm1263_vm13, %v13221_v42, -inf }
 0x419   :  { %v775_v46 = vpop.f32.mrb[22].mxu1  ;;  %1296 = vmax.xlane.f32.xlu1 %v1295_v44  ;;  %1290 = vmax.xlane.f32.xlu0 %v1289_v45 }
 0x41a   :  { %v13228_v47 = vadd.f32 %v775_v46, %v13178_v6  ;;  %v11548_v48 = vpop.f32.mrb[23].mxu1 }
 0x41c   :  { %v1298_v49 = vsel %vm1270_vm15, %v13228_v47, -inf }
 0x41d   :  { %v886_v50 = vpop.f32.mrb[24].mxu1  ;;  %v1007_v51 = vpop.f32.mrb[8].mxu0  ;;  %1299 = vmax.xlane.f32.xlu1 %v1298_v49 }
 0x41e   :  { %v13233_v52 = vadd.f32 %v886_v50, %v13165_v55  ;;  %v11553_v53 = vpop.f32.mrb[25].mxu1  ;;  %v11564_v54 = vpop.f32.mrb[9].mxu0  ;;  %v13236_v59 = vadd.f32 %v1007_v51, %v13165_v55 }
 0x420   :  { %v1301_v61 = vsel %vm1263_vm13, %v13233_v52, -inf  ;;  %v1310_v13 = vsel %vm1263_vm13, %v13236_v59, -inf }
 0x421   :  { %v891_v1 = vpop.f32.mrb[26].mxu1  ;;  %v1012_v2 = vpop.f32.mrb[10].mxu0  ;;  %1302 = vmax.xlane.f32.xlu0 %v1301_v61 }
 0x422   :  { %v13241_v5 = vadd.f32 %v891_v1, %v13170_v63  ;;  %v11556_v8 = vpop.f32.mrb[27].mxu1  ;;  %v11567_v9 = vpop.f32.mrb[11].mxu0  ;;  %v13244_v11 = vadd.f32 %v1012_v2, %v13170_v63 }
 0x424   :  { %v1304_v12 = vsel %vm1263_vm13, %v13241_v5, -inf  ;;  %v1313_v23 = vsel %vm1263_vm13, %v13244_v11, -inf }
 0x425   :  { %v896_v15 = vpop.f32.mrb[28].mxu1  ;;  %v1017_v16 = vpop.f32.mrb[12].mxu0  ;;  %1305 = vmax.xlane.f32.xlu1 %v1304_v12  ;;  %1311 = vmax.xlane.f32.xlu0 %v1310_v13 }
 0x426   :  { %v13251_v17 = vadd.f32 %v896_v15, %v13178_v6  ;;  %v11559_v19 = vpop.f32.mrb[29].mxu1  ;;  %v11570_v20 = vpop.f32.mrb[13].mxu0  ;;  %v13254_v21 = vadd.f32 %v1017_v16, %v13178_v6 }
 0x428   :  { %v1307_v24 = vsel %vm1270_vm15, %v13251_v17, -inf  ;;  %v1316_v30 = vsel %vm1270_vm15, %v13254_v21, -inf }
 0x429   :  { %v1128_v25 = vpop.f32.mrb[30].mxu1  ;;  %1314 = vmax.xlane.f32.xlu1 %v1313_v23  ;;  %1308 = vmax.xlane.f32.xlu0 %v1307_v24 }
 0x42a   :  { %v13261_v27 = vadd.f32 %v1128_v25, %v13165_v55  ;;  %v11575_v28 = vpop.f32.mrb[31].mxu1 }
 0x42c   :  { %v1319_v32 = vsel %vm1263_vm13, %v13261_v27, -inf }
 0x42d   :  { %v1133_v33 = vpop.f32.mrb[32].mxu1  ;;  %1317 = vmax.xlane.f32.xlu1 %v1316_v30  ;;  %1320 = vmax.xlane.f32.xlu0 %v1319_v32 }
 0x42e   :  { %v13268_v34 = vadd.f32 %v1133_v33, %v13170_v63  ;;  %v11578_v35 = vpop.f32.mrb[33].mxu1 }
 0x430   :  { %v1322_v36 = vsel %vm1263_vm13, %v13268_v34, -inf }
 0x431   :  { %v1138_v38 = vpop.f32.mrb[34].mxu1  ;;  %1323 = vmax.xlane.f32.xlu1 %v1322_v36 }
 0x432   :  { %v11581_v40 = vpop.f32.mrb[35].mxu1  ;;  %v13276_v45 = vadd.f32 %v1138_v38, %v13178_v6 }
 0x434   :  { %v1325_v53 = vsel %vm1270_vm15, %v13276_v45, -inf }
 0x435   :  { %v1249_v41 = vpop.f32.mrb[14].mxu0 }
 0x436   :  { %v13273_v43 = vadd.f32 %v1249_v41, %v13165_v55  ;;  %v11586_v44 = vpop.f32.mrb[15].mxu0 }
 0x438   :  { %v1328_v46 = vsel %vm1263_vm13, %v13273_v43, -inf }
 0x439   :  { %v1254_v48 = vpop.f32.mrb[16].mxu0  ;;  %1329 = vmax.xlane.f32.xlu0 %v1328_v46 }
 0x43a   :  { %v13281_v49 = vadd.f32 %v1254_v48, %v13170_v63  ;;  %v11589_v50 = vpop.f32.mrb[17].mxu0 }
 0x43c   :  { %v1331_v51 = vsel %vm1263_vm13, %v13281_v49, -inf }
 0x43d   :  { %v1259_v54 = vpop.f32.mrb[18].mxu0  ;;  %1332 = vmax.xlane.f32.xlu1 %v1331_v51  ;;  %1326 = vmax.xlane.f32.xlu0 %v1325_v53 }
 0x43e   :  { %v13288_v61 = vadd.f32 %v1259_v54, %v13178_v6  ;;  %v11592_v1 = vpop.f32.mrb[19].mxu0 }
 0x440   :  { %v1334_v2 = vsel %vm1270_vm15, %v13288_v61, -inf }
 0x441   :  { %1335 = vmax.xlane.f32.xlu1 %v1334_v2 }
 0x47e   :  { %v1266_v8 = vpop.xlane.xlu1 %1265 }
 0x47f   :  { %v1337_v9 = vsub.f32 %v13168_v60, %v1266_v8 }
 0x481   :  { %v1361_v12 = vmul.f32 1.442695, %v1337_v9 }
 0x482   :  { %v1269_v13 = vpop.xlane.xlu0 %1268 }
 0x483   :  { %12509 = vpow2.f32 %v1361_v12  ;;  %v1338_v15 = vsub.f32 %v13176_v3, %v1269_v13 }
 0x485   :  { %v1363_v16 = vmul.f32 1.442695, %v1338_v15 }
 0x486   :  { %v1273_v19 = vpop.xlane.xlu0 %1272 }
 0x487   :  { %12511 = vpow2.f32 %v1363_v16  ;;  %v1339_v20 = vsub.f32 %v13183_v10, %v1273_v19 }
 0x489   :  { %v1365_v23 = vmul.f32 1.442695, %v1339_v20 }
 0x48a   :  { %v1276_v24 = vpop.xlane.xlu1 %1275 }
 0x48b   :  { %12513 = vpow2.f32 %v1365_v23  ;;  %v1340_v25 = vsub.f32 %v13188_v14, %v1276_v24  ;;  %v12968_v24 = vmov 0.0|0.0  }
 0x48c   :  { %12193 = vmatprep.subr.bf16.mxu1 %v12968_v24  ;;  %12197 = vmatprep.subr.bf16.mxu0 %v12968_v24 }
 0x48d   :  { %v13296_v28 = vpop.eup %12509  ;;  %v1367_v30 = vmul.f32 1.442695, %v1340_v25 }
 0x48e   :  { %v1279_v32 = vpop.xlane.xlu1 %1278  ;;  %v1409_v60 = vsel %vm1263_vm13, %v13296_v28, 0.0 }
 0x48f   :  { %12515 = vpow2.f32 %v1367_v30  ;;  %v1341_v3 = vsub.f32 %v13193_v18, %v1279_v32  ;;  %1410 = vadd.xlane.f32.xlu0 %v1409_v60 }
 0x491   :  { %v13301_v33 = vpop.eup %12511  ;;  %v1369_v35 = vmul.f32 1.442695, %v1341_v3 }
 0x492   :  { %v1282_v10 = vpop.xlane.xlu1 %1281  ;;  %v1412_v36 = vsel %vm1263_vm13, %v13301_v33, 0.0 }
 0x493   :  { %12517 = vpow2.f32 %v1369_v35  ;;  %v1342_v14 = vsub.f32 %v13198_v22, %v1282_v10  ;;  %1413 = vadd.xlane.f32.xlu1 %v1412_v36 }
 0x495   :  { %v13306_v38 = vpop.eup %12513  ;;  %v1371_v40 = vmul.f32 1.442695, %v1342_v14 }
 0x496   :  { %v1415_v41 = vsel %vm1270_vm15, %v13306_v38, 0.0  ;;  %v1285_v53 = vpop.xlane.xlu0 %1284 }
 0x497   :  { %12519 = vpow2.f32 %v1371_v40  ;;  %1416 = vadd.xlane.f32.xlu0 %v1415_v41 }
 0x499   :  { %v13310_v18 = vpop.eup %12515 }
 0x49a   :  { %v1288_v44 = vpop.xlane.xlu1 %1287  ;;  %v1418_v46 = vsel %vm1263_vm13, %v13310_v18, 0.0 }
 0x49b   :  { %v1344_v48 = vsub.f32 %v13208_v31, %v1288_v44  ;;  %1419 = vadd.xlane.f32.xlu0 %v1418_v46 }
 0x49d   :  { %v13315_v50 = vpop.eup %12517  ;;  %v1375_v22 = vmul.f32 1.442695, %v1344_v48 }
 0x49e   :  { %v1421_v51 = vsel %vm1263_vm13, %v13315_v50, 0.0 }
 0x49f   :  { %12521 = vpow2.f32 %v1375_v22  ;;  %1422 = vadd.xlane.f32.xlu1 %v1421_v51 }
 0x4a1   :  { %v13319_v54 = vpop.eup %12519 }
 0x4a2   :  { %v1424_v1 = vsel %vm1270_vm15, %v13319_v54, 0.0  ;;  %v1294_v2 = vpop.xlane.xlu0 %1293 }
 0x4a3   :  { %1425 = vadd.xlane.f32.xlu1 %v1424_v1 }
 0x4a6   :  { %v1297_v8 = vpop.xlane.xlu1 %1296  ;;  %v1291_v13 = vpop.xlane.xlu0 %1290 }
 0x4a7   :  { %v1347_v31 = vsub.f32 %v13221_v42, %v1297_v8  ;;  %v1343_v42 = vsub.f32 %v13203_v26, %v1285_v53  ;;  %v1345_v36 = vsub.f32 %v13216_v39, %v1291_v13 }
 0x4a9   :  { %v13324_v9 = vpop.eup %12521  ;;  %v1381_v12 = vmul.f32 1.442695, %v1347_v31  ;;  %v1373_v10 = vmul.f32 1.442695, %v1343_v42  ;;  %v1377_v44 = vmul.f32 1.442695, %v1345_v36 }
 0x4aa   :  { %v1300_v15 = vpop.xlane.xlu1 %1299  ;;  %v1430_v16 = vsel %vm1263_vm13, %v13324_v9, 0.0 }
 0x4ab   :  { %12523 = vpow2.f32 %v1381_v12  ;;  %v1348_v19 = vsub.f32 %v13228_v47, %v1300_v15  ;;  %1431 = vadd.xlane.f32.xlu1 %v1430_v16 }
 0x4ad   :  { %v1383_v20 = vmul.f32 1.442695, %v1348_v19 }
 0x4ae   :  { %v1303_v23 = vpop.xlane.xlu0 %1302 }
 0x4af   :  { %12525 = vpow2.f32 %v1383_v20  ;;  %v1349_v53 = vsub.f32 %v13233_v52, %v1303_v23 }
 0x4b1   :  { %v1385_v12 = vmul.f32 1.442695, %v1349_v53 }
 0x4b2   :  { %v1306_v25 = vpop.xlane.xlu1 %1305  ;;  %v1312_v30 = vpop.xlane.xlu0 %1311 }
 0x4b3   :  { %v1350_v32 = vsub.f32 %v13241_v5, %v1306_v25  ;;  %v1352_v60 = vsub.f32 %v13236_v59, %v1312_v30  ;;  %v1346_v59 = vsub.f32 %v13213_v37, %v1294_v2 }
 0x4b5   :  { %v13334_v3 = vpop.eup %12523  ;;  %v1387_v47 = vmul.f32 1.442695, %v1350_v32  ;;  %v1391_v35 = vmul.f32 1.442695, %v1352_v60 }
 0x4b6   :  { %v1315_v14 = vpop.xlane.xlu1 %1314  ;;  %v1439_v40 = vsel %vm1263_vm13, %v13334_v3, 0.0  ;;  %v1309_v22 = vpop.xlane.xlu0 %1308 }
 0x4b7   :  { %12527 = vpow2.f32 %v1387_v47  ;;  %v1353_v26 = vsub.f32 %v13244_v11, %v1315_v14  ;;  %1440 = vadd.xlane.f32.xlu1 %v1439_v40  ;;  %v1379_v11 = vmul.f32 1.442695, %v1346_v59  ;;  %v1351_v16 = vsub.f32 %v13251_v17, %v1309_v22 }
 0x4b8   :  { %12529 = vpow2.f32 %v1391_v35 }
 0x4b9   :  { %v13340_v41 = vpop.eup %12525  ;;  %v1393_v5 = vmul.f32 1.442695, %v1353_v26  ;;  %12531 = vpow2.f32 %v1373_v10  ;;  %v1389_v60 = vmul.f32 1.442695, %v1351_v16 }
 0x4ba   :  { %v1318_v46 = vpop.xlane.xlu1 %1317  ;;  %v1442_v39 = vsel %vm1270_vm15, %v13340_v41, 0.0  ;;  %v1321_v13 = vpop.xlane.xlu0 %1320 }
 0x4bb   :  { %12533 = vpow2.f32 %v1393_v5  ;;  %v1354_v48 = vsub.f32 %v13254_v21, %v1318_v46  ;;  %1443 = vadd.xlane.f32.xlu1 %v1442_v39  ;;  %v1355_v47 = vsub.f32 %v13261_v27, %v1321_v13 }
 0x4bc   :  { %12535 = vpow2.f32 %v1377_v44 }
 0x4bd   :  { %v1395_v51 = vmul.f32 1.442695, %v1354_v48  ;;  %v1397_v27 = vmul.f32 1.442695, %v1355_v47 }
 0x4be   :  { %v1324_v1 = vpop.xlane.xlu1 %1323 }
 0x4bf   :  { %12537 = vpow2.f32 %v1395_v51  ;;  %v1356_v8 = vsub.f32 %v13268_v34, %v1324_v1 }
 0x4c0   :  { %12539 = vpow2.f32 %v1379_v11 }
 0x4c1   :  { %v13348_v37 = vpop.eup %12527  ;;  %v1399_v2 = vmul.f32 1.442695, %v1356_v8 }
 0x4c2   :  { %v13350_v31 = vpop.eup %12529  ;;  %v1448_v21 = vsel %vm1263_vm13, %v13348_v37, 0.0 }
 0x4c3   :  { %12541 = vpow2.f32 %v1399_v2  ;;  %1449 = vadd.xlane.f32.xlu1 %v1448_v21  ;;  %v1454_v52 = vsel %vm1263_vm13, %v13350_v31, 0.0  ;;  %v13356_v15 = vpop.eup %12531 }
 0x4c4   :  { %1455 = vadd.xlane.f32.xlu0 %v1454_v52  ;;  %12543 = vpow2.f32 %v1385_v12  ;;  %v1427_v42 = vsel %vm1263_vm13, %v13356_v15, 0.0 }
 0x4c5   :  { %v13358_v34 = vpop.eup %12533 }
 0x4c6   :  { %v1330_v19 = vpop.xlane.xlu0 %1329  ;;  %v1457_v20 = vsel %vm1263_vm13, %v13358_v34, 0.0  ;;  %v13366_v25 = vpop.eup %12535 }
 0x4c7   :  { %v1358_v23 = vsub.f32 %v13273_v43, %v1330_v19  ;;  %1458 = vadd.xlane.f32.xlu1 %v1457_v20  ;;  %v1433_v36 = vsel %vm1270_vm15, %v13366_v25, 0.0  ;;  %v13415_v19 = vsub.s32 1, %v13055_v56 }
 0x4c8   :  { %1428 = vadd.xlane.f32.xlu0 %v1427_v42 }
 0x4c9   :  { %v13368_v30 = vpop.eup %12537  ;;  %v1403_v32 = vmul.f32 1.442695, %v1358_v23  ;;  %v130_v20 = vrot.slane %v13063_v58, %v13415_v19 }
 0x4ca   :  { %v1333_v17 = vpop.xlane.xlu1 %1332  ;;  %v1460_v35 = vsel %vm1270_vm15, %v13368_v30, 0.0  ;;  %v1327_v10 = vpop.xlane.xlu0 %1326 }
 0x4cb   :  { %12545 = vpow2.f32 %v1403_v32  ;;  %v1359_v43 = vsub.f32 %v13281_v49, %v1333_v17  ;;  %1461 = vadd.xlane.f32.xlu1 %v1460_v35  ;;  %v13376_v14 = vpop.eup %12539  ;;  %v1357_v5 = vsub.f32 %v13276_v45, %v1327_v10  ;;  %v216_v23 = vadd.f32 %v13067_v62, %v130_v20 }
 0x4cc   :  { %1434 = vadd.xlane.f32.xlu0 %v1433_v36  ;;  %12547 = vpow2.f32 %v1389_v60  ;;  %v1436_v46 = vsel %vm1263_vm13, %v13376_v14, 0.0  ;;  %v220_v42 = vadd.f32 %v13069_v0, %v130_v20  ;;  %v226_v32 = vadd.f32 %v13071_v4, %v130_v20  ;;  %v12472_v0 = vld [vmem:[%s15553_s3 + $0x68] sm:$0xff]  }
 0x4cd   :  { %v13378_v40 = vpop.eup %12541  ;;  %v1405_v26 = vmul.f32 1.442695, %v1359_v43  ;;  %v1401_v22 = vmul.f32 1.442695, %v1357_v5 }
 0x4ce   :  { %v1336_v59 = vpop.xlane.xlu1 %1335  ;;  %v1466_v44 = vsel %vm1263_vm13, %v13378_v40, 0.0  ;;  %v13386_v39 = vpop.eup %12543 }
 0x4cf   :  { %12549 = vpow2.f32 %v1405_v26  ;;  %v1360_v49 = vsub.f32 %v13288_v61, %v1336_v59  ;;  %1467 = vadd.xlane.f32.xlu1 %v1466_v44  ;;  %v1445_v45 = vsel %vm1263_vm13, %v13386_v39, 0.0 }
 0x4d0   :  { %1437 = vadd.xlane.f32.xlu0 %v1436_v46  ;;  %12551 = vpow2.f32 %v1397_v27 }
 0x4d1   :  { %v1407_v48 = vmul.f32 1.442695, %v1360_v49 }
 0x4d3   :  { %12553 = vpow2.f32 %v1407_v48 }
 0x4d4   :  { %1446 = vadd.xlane.f32.xlu0 %v1445_v45  ;;  %12555 = vpow2.f32 %v1401_v22 }
 0x4d5   :  { %v13390_v51 = vpop.eup %12545 }
 0x4d6   :  { %v1472_v61 = vsel %vm1263_vm13, %v13390_v51, 0.0  ;;  %v13394_v11 = vpop.eup %12547 }
 0x4d7   :  { %v1451_v8 = vsel %vm1270_vm15, %v13394_v11, 0.0 }
 0x4d8   :  { %1473 = vadd.xlane.f32.xlu0 %v1472_v61 }
 0x4d9   :  { %v13396_v53 = vpop.eup %12549 }
 0x4da   :  { %v1475_v1 = vsel %vm1263_vm13, %v13396_v53, 0.0  ;;  %v13402_v2 = vpop.eup %12551 }
 0x4db   :  { %1476 = vadd.xlane.f32.xlu1 %v1475_v1  ;;  %v1463_v21 = vsel %vm1263_vm13, %v13402_v2, 0.0 }
 0x4dc   :  { %1452 = vadd.xlane.f32.xlu0 %v1451_v8 }
 0x4dd   :  { %v13404_v12 = vpop.eup %12553 }
 0x4de   :  { %v1478_v13 = vsel %vm1270_vm15, %v13404_v12, 0.0  ;;  %v13410_v52 = vpop.eup %12555 }
 0x4df   :  { %1479 = vadd.xlane.f32.xlu1 %v1478_v13  ;;  %v1469_v16 = vsel %vm1270_vm15, %v13410_v52, 0.0 }
 0x4e0   :  { %1464 = vadd.xlane.f32.xlu0 %v1463_v21 }
 0x4e4   :  { %1470 = vadd.xlane.f32.xlu0 %v1469_v16 }
 0x511   :  { %262 = vxpose.xlu0.b32.start [1/3] (short) (narrow) %v216_v23, 64 }
 0x515   :  { %263 = vxpose.xlu0.b32.cont [2/3] (short) (narrow) %v220_v42, 64 }
 0x519   :  { %264 = vxpose.xlu0.b32.end [3/3] (short) (narrow) %v226_v32, 64 }
 0x51c   :  { %v1411_v60 = vpop.xlane.xlu0 %1410 }
 0x51d   :  { %12557 = vrcp.f32 %v1411_v60 }
 0x520   :  { %v1414_v47 = vpop.xlane.xlu1 %1413 }
 0x521   :  { %12559 = vrcp.f32 %v1414_v47 }
 0x524   :  { %v1417_v17 = vpop.xlane.xlu0 %1416 }
 0x525   :  { %12561 = vrcp.f32 %v1417_v17 }
 0x527   :  { %v12558_v56 = vpop.eup %12557 }
 0x528   :  { %v1420_v35 = vpop.xlane.xlu0 %1419  ;;  %v1505_v58 = vmul.f32 %v12558_v56, %v13296_v28 }
 0x529   :  { %12563 = vrcp.f32 %v1420_v35 }
 0x52b   :  { %v12560_v43 = vpop.eup %12559 }
 0x52c   :  { %v1506_v62 = vmul.f32 %v12560_v43, %v13301_v33  ;;  %v1423_v10 = vpop.xlane.xlu1 %1422 }
 0x52d   :  { %12565 = vrcp.f32 %v1423_v10 }
 0x52e   :  { %v12194_v4 = vpack.c.bf16 %v1506_v62, %v1505_v58 }
 0x52f   :  { %v12562_v26 = vpop.eup %12561 }
 0x530   :  { %12196 = vmatpush3.bf16.xpose.msk.msra.mxu1 %vm13426_vm4, %v12194_v4  ;;  %v1426_v36 = vpop.xlane.xlu1 %1425  ;;  %v1507_v28 = vmul.f32 %v12562_v26, %v13306_v38 }
 0x531   :  { %11597 = vmatprep.subr.mxu1 %v12965_v7  ;;  %12567 = vrcp.f32 %v1426_v36 }
 0x533   :  { %v12564_v27 = vpop.eup %12563 }
 0x534   :  { %v1508_v5 = vmul.f32 %v12564_v27, %v13310_v18 }
 0x537   :  { %v12566_v33 = vpop.eup %12565 }
 0x538   :  { %v1509_v59 = vmul.f32 %v12566_v33, %v13315_v50  ;;  %11598 = vmatpush3.xpose.msk.msra.mxu1 %vm1263_vm13, %v1507_v28  ;;  %v1432_v22 = vpop.xlane.xlu1 %1431 }
 0x539   :  { %12201 = vmatprep.subr.bf16.mxu1 %v12968_v24 }
 0x53a   :  { %v12198_v44 = vpack.c.bf16 %v1509_v59, %v1508_v5 }
 0x53b   :  { %v12568_v49 = vpop.eup %12567 }
 0x53c   :  { %12200 = vmatpush3.bf16.xpose.msk.msra.mxu0 %vm13426_vm4, %v12198_v44  ;;  %v1510_v46 = vmul.f32 %v12568_v49, %v13319_v54 }
 0x53d   :  { %11606 = vmatprep.subr.mxu0 %v12965_v7 }
 0x544   :  { %11607 = vmatpush3.xpose.msk.msra.mxu0 %vm1263_vm13, %v1510_v46  ;;  %v1441_v61 = vpop.xlane.xlu1 %1440 }
 0x545   :  { %12205 = vmatprep.subr.bf16.mxu0 %v12968_v24 }
 0x548   :  { %v1444_v8 = vpop.xlane.xlu1 %1443 }
 0x550   :  { %v1450_v21 = vpop.xlane.xlu1 %1449 }
 0x551   :  { %v1456_v38 = vpop.xlane.xlu0 %1455 }
 0x554   :  { %v1459_v16 = vpop.xlane.xlu1 %1458 }
 0x555   :  { %v1429_v18 = vpop.xlane.xlu0 %1428 }
 0x556   :  { %12569 = vrcp.f32 %v1429_v18 }
 0x557   :  { %12571 = vrcp.f32 %v1432_v22 }
 0x558   :  { %v1462_v17 = vpop.xlane.xlu1 %1461 }
 0x559   :  { %v1435_v50 = vpop.xlane.xlu0 %1434 }
 0x55d   :  { %v1438_v48 = vpop.xlane.xlu0 %1437 }
 0x55e   :  { %12573 = vrcp.f32 %v1438_v48 }
 0x55f   :  { %12575 = vrcp.f32 %v1441_v61 }
 0x560   :  { %v12570_v20 = vpop.eup %12569  ;;  %12577 = vrcp.f32 %v1435_v50 }
 0x561   :  { %v1447_v45 = vpop.xlane.xlu0 %1446  ;;  %v12572_v23 = vpop.eup %12571  ;;  %v1511_v42 = vmul.f32 %v12570_v20, %v13356_v15 }
 0x562   :  { %12579 = vrcp.f32 %v1447_v45  ;;  %v1512_v47 = vmul.f32 %v12572_v23, %v13324_v9  ;;  %v1468_v15 = vpop.xlane.xlu1 %1467 }
 0x563   :  { %12581 = vrcp.f32 %v1450_v21 }
 0x564   :  { %12583 = vrcp.f32 %v1444_v8  ;;  %v12202_v58 = vpack.c.bf16 %v1512_v47, %v1511_v42  ;;  %v12339_v42 = vld [vmem:[%s15553_s3] sm:$0xff]  }
 0x565   :  { %v1474_v1 = vpop.xlane.xlu0 %1473  ;;  %12585 = vrcp.f32 %v1459_v16 }
 0x566   :  { %12587 = vrcp.f32 %v1456_v38 }
 0x568   :  { %v12574_v60 = vpop.eup %12573  ;;  %v1477_v27 = vpop.xlane.xlu1 %1476 }
 0x569   :  { %v1453_v13 = vpop.xlane.xlu0 %1452  ;;  %v12576_v35 = vpop.eup %12575  ;;  %v1514_v56 = vmul.f32 %v12574_v60, %v13376_v14 }
 0x56a   :  { %v1515_v62 = vmul.f32 %v12576_v35, %v13334_v3  ;;  %v12578_v9 = vpop.eup %12577  ;;  %12589 = vrcp.f32 %v1453_v13 }
 0x56b   :  { %v1513_v28 = vmul.f32 %v12578_v9, %v13366_v25 }
 0x56c   :  { %v12206_v4 = vpack.c.bf16 %v1515_v62, %v1514_v56  ;;  %v12580_v14 = vpop.eup %12579  ;;  %v1480_v50 = vpop.xlane.xlu1 %1479  ;;  %v12341_v56 = vld [vmem:[%s15553_s3 + $0x10] sm:$0xff]   ;;  %v12342_v62 = vld [vmem:[%s15553_s3 + $0x18] sm:$0xff]  }
 0x56d   :  { %v1465_v54 = vpop.xlane.xlu0 %1464  ;;  %v12582_v3 = vpop.eup %12581  ;;  %v1517_v26 = vmul.f32 %v12580_v14, %v13386_v39 }
 0x56e   :  { %12591 = vrcp.f32 %v1465_v54  ;;  %v12584_v36 = vpop.eup %12583  ;;  %v1518_v59 = vmul.f32 %v12582_v3, %v13348_v37 }
 0x56f   :  { %v12586_v5 = vpop.eup %12585  ;;  %12593 = vrcp.f32 %v1468_v15  ;;  %v1516_v46 = vmul.f32 %v12584_v36, %v13340_v41 }
 0x570   :  { %12595 = vrcp.f32 %v1462_v17  ;;  %v12588_v44 = vpop.eup %12587  ;;  %v1521_v49 = vmul.f32 %v12586_v5, %v13358_v34  ;;  %v12210_v39 = vpack.c.bf16 %v1518_v59, %v1517_v26 }
 0x571   :  { %v1471_v32 = vpop.xlane.xlu0 %1470  ;;  %12597 = vrcp.f32 %v1477_v27  ;;  %v1520_v25 = vmul.f32 %v12588_v44, %v13350_v31  ;;  %v58_v44 = vld [vmem:[%s15551_s1 + $0x3] ss:$0 sm:$0xff] }
 0x572   :  { %12599 = vrcp.f32 %v1474_v1 }
 0x573   :  { %v12214_v34 = vpack.c.bf16 %v1521_v49, %v1520_v25  ;;  %12601 = vrcp.f32 %v1471_v32 }
 0x574   :  { %v12590_v38 = vpop.eup %12589  ;;  %12603 = vrcp.f32 %v1480_v50 }
 0x575   :  { %v1519_v22 = vmul.f32 %v12590_v38, %v13394_v11 }
 0x578   :  { %v12592_v41 = vpop.eup %12591 }
 0x579   :  { %v12594_v31 = vpop.eup %12593  ;;  %v1523_v48 = vmul.f32 %v12592_v41, %v13402_v2 }
 0x57a   :  { %v12596_v18 = vpop.eup %12595  ;;  %v1524_v1 = vmul.f32 %v12594_v31, %v13378_v40 }
 0x57b   :  { %v12598_v61 = vpop.eup %12597  ;;  %v1522_v21 = vmul.f32 %v12596_v18, %v13368_v30  ;;  %v12938_v18 = vld [vmem:[%s15550_s0 + $0x10] sm:$0x3] }
 0x57c   :  { %v12600_v8 = vpop.eup %12599  ;;  %v1527_v13 = vmul.f32 %v12598_v61, %v13396_v53  ;;  %v12218_v54 = vpack.c.bf16 %v1524_v1, %v1523_v48  ;;  %v12939_v48 = vld [vmem:[%s15550_s0 + $0x8] sm:$0xff] }
 0x57d   :  { %v1526_v2 = vmul.f32 %v12600_v8, %v13390_v51  ;;  %v12602_v30 = vpop.eup %12601 }
 0x57e   :  { %v1525_v51 = vmul.f32 %v12602_v30, %v13410_v52  ;;  %v12604_v16 = vpop.eup %12603  ;;  %v12340_v52 = vld [vmem:[%s15553_s3 + $0x8] sm:$0xff]  }
 0x57f   :  { %v12222_v11 = vpack.c.bf16 %v1527_v13, %v1526_v2  ;;  %v1528_v20 = vmul.f32 %v12604_v16, %v13404_v12 }
 0x591   :  { %v278_v43 = vpop.trf.xlu0 }
 0x592   :  { %11600 = vmatmul.mubr.msk.f32.vlgmr.msra.gmra.mrb[36].mxu1 %vm1263_vm13, %v278_v43 }
 0x593   :  { %12204 = vmatpush3.bf16.xpose.msk.msra.mxu1 %vm13426_vm4, %v12202_v58  ;;  %11617 = vmatprep.mubr.msk.f32.mxu1 %vm12966_vm2, %v12965_v7 }
 0x594   :  { %11615 = vmatprep.subr.mxu1 %v12965_v7 }
 0x595   :  { %v279_v10 = vpop.trf.xlu0 }
 0x596   :  { %11609 = vmatmul.mubr.msk.f32.vlgmr.msra.gmra.mrb[20].mxu0 %vm1263_vm13, %v279_v10 }
 0x597   :  { %12208 = vmatpush3.bf16.xpose.msk.msra.mxu0 %vm13426_vm4, %v12206_v4  ;;  %11626 = vmatprep.mubr.msk.f32.mxu0 %vm12966_vm2, %v12965_v7 }
 0x598   :  { %11624 = vmatprep.subr.mxu0 %v12965_v7 }
 0x599   :  { %v280_v33 = vpop.trf.xlu0 }
 0x59b   :  { %11616 = vmatpush3.xpose.msk.msra.mxu1 %vm1263_vm13, %v1513_v28 }
 0x59c   :  { %12209 = vmatprep.subr.bf16.mxu1 %v12968_v24 }
 0x59d   :  { %v281_v37 = vpop.trf.xlu0 }
 0x59e   :  { %11618 = vmatmul.mubr.msk.f32.vlgmr.msra.gmra.mrb[38].mxu1 %vm1263_vm13, %v280_v33 }
 0x59f   :  { %11625 = vmatpush3.xpose.msk.msra.mxu0 %vm1263_vm13, %v1516_v46  ;;  %12212 = vmatpush3.bf16.xpose.msk.msra.mxu1 %vm13426_vm4, %v12210_v39 }
 0x5a0   :  { %12213 = vmatprep.subr.bf16.mxu0 %v12968_v24  ;;  %11633 = vmatprep.subr.mxu1 %v12965_v7 }
 0x5a1   :  { %11635 = vmatprep.mubr.msk.f32.mxu1 %vm12966_vm2, %v12965_v7  ;;  %v282_v45 = vpop.trf.xlu0 }
 0x5a2   :  { %11627 = vmatmul.mubr.msk.f32.vlgmr.msra.gmra.mrb[22].mxu0 %vm1263_vm13, %v281_v37 }
 0x5a3   :  { %12216 = vmatpush3.bf16.xpose.msk.msra.mxu0 %vm13426_vm4, %v12214_v34  ;;  %11644 = vmatprep.mubr.msk.f32.mxu0 %vm12966_vm2, %v12965_v7  ;;  %v12937_v34 = vld [vmem:[%s15550_s0] sm:$0xff] }
 0x5a4   :  { %11642 = vmatprep.subr.mxu0 %v12965_v7 }
 0x5a5   :  { %v283_v40 = vpop.trf.xlu0 }
 0x5a7   :  { %11634 = vmatpush3.xpose.msk.msra.mxu1 %vm1263_vm13, %v1519_v22 }
 0x5a8   :  { %12217 = vmatprep.subr.bf16.mxu1 %v12968_v24 }
 0x5a9   :  { %v284_v53 = vpop.trf.xlu0 }
 0x5aa   :  { %11636 = vmatmul.mubr.msk.f32.vlgmr.msra.gmra.mrb[40].mxu1 %vm1263_vm13, %v282_v45 }
 0x5ab   :  { %11643 = vmatpush3.xpose.msk.msra.mxu0 %vm1263_vm13, %v1522_v21  ;;  %12220 = vmatpush3.bf16.xpose.msk.msra.mxu1 %vm13426_vm4, %v12218_v54 }
 0x5ac   :  { %12221 = vmatprep.subr.bf16.mxu0 %v12968_v24  ;;  %11651 = vmatprep.subr.mxu1 %v12965_v7 }
 0x5ad   :  { %11653 = vmatprep.mubr.msk.f32.mxu1 %vm12966_vm2, %v12965_v7  ;;  %v285_v23 = vpop.trf.xlu0 }
 0x5ae   :  { %11645 = vmatmul.mubr.msk.f32.vlgmr.msra.gmra.mrb[24].mxu0 %vm1263_vm13, %v283_v40 }
 0x5af   :  { %12224 = vmatpush3.bf16.xpose.msk.msra.mxu0 %vm13426_vm4, %v12222_v11  ;;  %11662 = vmatprep.mubr.msk.f32.mxu0 %vm12966_vm2, %v12965_v7 }
 0x5b0   :  { %11660 = vmatprep.subr.mxu0 %v12965_v7 }
 0x5b3   :  { %11652 = vmatpush3.xpose.msk.msra.mxu1 %vm1263_vm13, %v1525_v51 }
 0x5b4   :  { %11665 = vmatprep.subr.bf16.mxu1 %v12339_v42 }
 0x5b6   :  { %11654 = vmatmul.mubr.msk.f32.vlgmr.msra.gmra.mrb[42].mxu1 %vm1263_vm13, %v284_v53 }
 0x5b7   :  { %11661 = vmatpush3.xpose.msk.msra.mxu0 %vm1263_vm13, %v1528_v20  ;;  %11666 = vmatpush3.bf16.msra.mxu1 %v12339_v42 }
 0x5b8   :  { %11667 = vmatprep.subr.bf16.mxu1 %v12340_v52 }
 0x5ba   :  { %11663 = vmatmul.mubr.msk.f32.vlgmr.msra.gmra.mrb[26].mxu0 %vm1263_vm13, %v285_v23 }
 0x5bb   :  { %2452 = vmatprep.mubr.bf16.mxu0 %v12964_v29  ;;  %11668 = vmatpush3.bf16.msra.mxu1 %v12340_v52 }
 0x5bc   :  { %11669 = vmatprep.subr.bf16.mxu1 %v12341_v56 }
 0x5bf   :  { %11670 = vmatpush3.bf16.msra.mxu1 %v12341_v56  ;;  %v12352_v56 = vld [vmem:[%s15554_s4 + $0x30] ss:$8 sps:$4 sm:$0xff]  }
 0x5c0   :  { %11671 = vmatprep.subr.bf16.mxu1 %v12342_v62 }
 0x5c3   :  { %11672 = vmatpush3.bf16.msra.mxu1 %v12342_v62  ;;  %v12356_v62 = vld [vmem:[%s15555_s5] sm:$0xff]  }
 0x665   :  { %v1607_v12 = vpop.f32.mrb[36].mxu1 }
 0x666   :  { %2185 = vxpose.xlu1.b32.start [1/8] (short) (narrow) %v1607_v12, 24  ;;  %v11601_v32 = vpop.f32.mrb[37].mxu1  ;;  %v12345_v12 = vld [vmem:[%s15554_s4 + $0x4] ss:$8 sps:$4 sm:$0xff]  }
 0x667   :  { %v12343_v32 = vld [vmem:[%s15554_s4] ss:$8 sps:$4 sm:$0xff]   ;;  %2420 = vmatprep.subr.bf16.mxu0 %v12345_v12 }
 0x668   :  { %2421 = vmatpush1.bf16.msra.mxu0 %v12343_v32 }
 0x669   :  { %v1689_v60 = vpop.f32.mrb[20].mxu0 }
 0x66a   :  { %2186 = vxpose.xlu1.b32.cont [2/8] (short) (narrow) %v1689_v60, 24  ;;  %v11610_v47 = vpop.f32.mrb[21].mxu0  ;;  %v12348_v60 = vld [vmem:[%s15554_s4 + $0x14] ss:$8 sps:$4 sm:$0xff]  }
 0x66b   :  { %v12346_v47 = vld [vmem:[%s15554_s4 + $0x10] ss:$8 sps:$4 sm:$0xff]   ;;  %2422 = vmatprep.subr.bf16.mxu0 %v12348_v60 }
 0x66c   :  { %2423 = vmatpush1.bf16.msra.mxu0 %v12346_v47 }
 0x671   :  { %v1771_v17 = vpop.f32.mrb[38].mxu1 }
 0x672   :  { %v11619_v35 = vpop.f32.mrb[39].mxu1  ;;  %2187 = vxpose.xlu1.b32.cont [3/8] (short) (narrow) %v1771_v17, 24  ;;  %v12351_v17 = vld [vmem:[%s15554_s4 + $0x24] ss:$8 sps:$4 sm:$0xff]  }
 0x673   :  { %v12349_v35 = vld [vmem:[%s15554_s4 + $0x20] ss:$8 sps:$4 sm:$0xff]   ;;  %2424 = vmatprep.subr.bf16.mxu0 %v12351_v17 }
 0x674   :  { %2425 = vmatpush1.bf16.msra.mxu0 %v12349_v35 }
 0x675   :  { %v1853_v43 = vpop.f32.mrb[22].mxu0 }
 0x676   :  { %v11628_v58 = vpop.f32.mrb[23].mxu0  ;;  %2188 = vxpose.xlu1.b32.cont [4/8] (short) (narrow) %v1853_v43, 24  ;;  %v12354_v43 = vld [vmem:[%s15554_s4 + $0x34] ss:$8 sps:$4 sm:$0xff]  }
 0x677   :  { %2426 = vmatprep.subr.bf16.mxu0 %v12354_v43  ;;  %v12355_v58 = vld [vmem:[%s15555_s5 + $0x40] sm:$0xff]  }
 0x678   :  { %2427 = vmatpush1.bf16.msra.mxu0 %v12352_v56  ;;  %11183 = vmatprep.subr.bf16.mxu1 %v12355_v58 }
 0x67d   :  { %v1935_v9 = vpop.f32.mrb[40].mxu1 }
 0x67e   :  { %v11637_v15 = vpop.f32.mrb[41].mxu1  ;;  %2189 = vxpose.xlu1.b32.cont [5/8] (short) (narrow) %v1935_v9, 24  ;;  %v12357_v9 = vld [vmem:[%s15555_s5 + $0x48] sm:$0xff]  }
 0x67f   :  { %v12358_v15 = vld [vmem:[%s15555_s5 + $0x8] sm:$0xff]  }
 0x681   :  { %v2017_v10 = vpop.f32.mrb[24].mxu0 }
 0x682   :  { %v11646_v4 = vpop.f32.mrb[25].mxu0  ;;  %2190 = vxpose.xlu1.b32.cont [6/8] (short) (narrow) %v2017_v10, 24  ;;  %v12359_v10 = vld [vmem:[%s15555_s5 + $0x50] sm:$0xff]  }
 0x683   :  { %v12360_v4 = vld [vmem:[%s15555_s5 + $0x10] sm:$0xff]  }
 0x689   :  { %v2099_v14 = vpop.f32.mrb[42].mxu1 }
 0x68a   :  { %2191 = vxpose.xlu1.b32.cont [7/8] (short) (narrow) %v2099_v14, 24  ;;  %v11655_v3 = vpop.f32.mrb[43].mxu1  ;;  %v12361_v14 = vld [vmem:[%s15555_s5 + $0x58] sm:$0xff]  }
 0x68b   :  { %v12362_v3 = vld [vmem:[%s15555_s5 + $0x18] sm:$0xff]  }
 0x68d   :  { %v2181_v36 = vpop.f32.mrb[26].mxu0 }
 0x68e   :  { %2192 = vxpose.xlu1.b32.end [8/8] (short) (narrow) %v2181_v36, 24  ;;  %v11664_v26 = vpop.f32.mrb[27].mxu0  ;;  %v12363_v36 = vld [vmem:[%s15555_s5 + $0x60] sm:$0xff]  }
 0x68f   :  { %v12364_v26 = vld [vmem:[%s15555_s5 + $0x20] sm:$0xff]  }
 0x6f2   :  { %v2201_v27 = vpop.trf.xlu1 }
 0x6f6   :  { %v2202_v28 = vpop.trf.xlu1 }
 0x6f7   :  { %v2217_v33 = vpack.c.bf16 %v2202_v28, %v2201_v27  ;;  %v12365_v27 = vld [vmem:[%s15555_s5 + $0x68] sm:$0xff]  }
 0x6f9   :  { %11673 = vmatprep.mubr.msk.bf16.mxu1 %vm64_vm0, %v2217_v33 }
 0x6fa   :  { %v2203_v5 = vpop.trf.xlu1 }
 0x6fb   :  { %v2218_v59 = vpack.c.bf16 %v2203_v5, %v2203_v5 }
 0x6fd   :  { %11674 = vmatmul.mubr.msk.bf16.vlgmr.msra.gmra.mrb[44].mxu1 %vm64_vm0, %v2218_v59 }
 0x6fe   :  { %11184 = vmatpush3.bf16.msra.mxu1 %v12356_v62 }
 0x6ff   :  { %11185 = vmatprep.subr.bf16.mxu1 %v12357_v9 }
 0x702   :  { %11186 = vmatpush3.bf16.msra.mxu1 %v12358_v15 }
 0x703   :  { %11187 = vmatprep.subr.bf16.mxu1 %v12359_v10 }
 0x706   :  { %11188 = vmatpush3.bf16.msra.mxu1 %v12360_v4 }
 0x707   :  { %11189 = vmatprep.subr.bf16.mxu1 %v12361_v14 }
 0x70a   :  { %11190 = vmatpush3.bf16.msra.mxu1 %v12362_v3 }
 0x70b   :  { %11191 = vmatprep.subr.bf16.mxu1 %v12363_v36 }
 0x70e   :  { %11192 = vmatpush3.bf16.msra.mxu1 %v12364_v26 }
 0x70f   :  { %11193 = vmatprep.subr.bf16.mxu1 %v12365_v27 }
 0x7d0   :  { %v11675_v49 = vpop.f32.mrb[44].mxu1 }
 0x7d1   :  { %v2291_v46 = vpop.f32.mrb[45].mxu1  ;;  %v2300_v39 = vadd.f32 %v11675_v49, %v58_v44 }
 0x7d2   :  { %v2292_v25 = vadd.f32 %v2291_v46, %v58_v44  ;;  %v11676_v37 = vpop.f32.mrb[46].mxu1 }
 0x7d3   :  { %v2294_v38 = vpop.f32.mrb[47].mxu1  ;;  %v13536_v50 = vadd.f32 %v12938_v18, %v2300_v39 }
 0x7d4   :  { %v13531_v41 = vadd.f32 %v12937_v34, %v2292_v25  ;;  %v2295_v31 = vadd.f32 %v2294_v38, %v58_v44  ;;  %v59_v38 = vld [vmem:[%s15551_s1 + $0x4] ss:$0 sm:$0xff] }
 0x7d5   :  { %v2314_v1 = vsel %vm71_vm1, %v13536_v50, 0.0 }
 0x7d6   :  { %v13541_v22 = vadd.f32 %v12939_v48, %v2295_v31  ;;  %v2308_v45 = vsel %vm64_vm0, %v13531_v41, 0.0 }
 0x7d7   :  { %2309 = vadd.xlane.f32.xlu0 %v2308_v45 }
 0x7d8   :  { %v2311_v61 = vsel %vm64_vm0, %v13541_v22, 0.0 }
 0x7d9   :  { %2312 = vadd.xlane.f32.xlu1 %v2311_v61  ;;  %v60_v61 = vld [vmem:[%s15551_s1 + $0x5] ss:$0 sm:$0xff] }
 0x7db   :  { %2315 = vadd.xlane.f32.xlu0 %v2314_v1 }
 0x864   :  { %v2310_v8 = vpop.xlane.xlu0 %2309 }
 0x865   :  { %v2317_v13 = vmul.f32 0.015625, %v2310_v8 }
 0x866   :  { %v2313_v21 = vpop.xlane.xlu1 %2312 }
 0x867   :  { %v13550_v54 = vsub.f32 %v13531_v41, %v2317_v13  ;;  %v2318_v2 = vmul.f32 0.015625, %v2313_v21 }
 0x868   :  { %v2316_v40 = vpop.xlane.xlu0 %2315 }
 0x869   :  { %v13553_v11 = vsub.f32 %v13541_v22, %v2318_v2  ;;  %v2319_v30 = vmul.f32 0.015625, %v2316_v40  ;;  %v2323_v51 = vmul.f32 %v13550_v54, %v13550_v54 }
 0x86b   :  { %v13558_v53 = vsub.f32 %v13536_v50, %v2319_v30  ;;  %v2326_v16 = vsel %vm64_vm0, %v2323_v51, 0.0  ;;  %v2324_v20 = vmul.f32 %v13553_v11, %v13553_v11  ;;  %v12367_v51 = vld [vmem:[%s15555_s5 + $0x70] sm:$0xff]  }
 0x86c   :  { %2327 = vadd.xlane.f32.xlu1 %v2326_v16  ;;  %v12369_v16 = vld [vmem:[%s15555_s5 + $0x78] sm:$0xff]  }
 0x86d   :  { %v2329_v23 = vsel %vm64_vm0, %v2324_v20, 0.0  ;;  %v2325_v42 = vmul.f32 %v13558_v53, %v13558_v53  ;;  %v12370_v20 = vld [vmem:[%s15555_s5 + $0x38] sm:$0xff]  }
 0x86e   :  { %2330 = vadd.xlane.f32.xlu0 %v2329_v23  ;;  %v10527_v23 = vld [vmem:[%s15551_s1 + $0x6] ss:$8 sm:$0x3] }
 0x86f   :  { %v2332_v52 = vsel %vm71_vm1, %v2325_v42, 0.0  ;;  %v2367_v42 = vrot.slane %v10527_v23, %v13058_v57 }
 0x870   :  { %2333 = vadd.xlane.f32.xlu1 %v2332_v52  ;;  %v2371_v52 = vrot.slane %v10527_v23, %v13415_v19 }
 0x8f9   :  { %v2328_v28 = vpop.xlane.xlu1 %2327 }
 0x8fa   :  { %v2335_v33 = vmul.f32 0.015625, %v2328_v28 }
 0x8fb   :  { %v2331_v5 = vpop.xlane.xlu0 %2330 }
 0x8fc   :  { %v2338_v59 = vadd.f32 1e-05, %v2335_v33  ;;  %v2336_v44 = vmul.f32 0.015625, %v2331_v5 }
 0x8fd   :  { %v2334_v49 = vpop.xlane.xlu1 %2333 }
 0x8fe   :  { %12605 = vrsqrt.f32 %v2338_v59  ;;  %v2339_v46 = vadd.f32 1e-05, %v2336_v44  ;;  %v2337_v39 = vmul.f32 0.015625, %v2334_v49 }
 0x900   :  { %12607 = vrsqrt.f32 %v2339_v46  ;;  %v2340_v25 = vadd.f32 1e-05, %v2337_v39 }
 0x902   :  { %12609 = vrsqrt.f32 %v2340_v25 }
 0x908   :  { %v12606_v37 = vpop.eup %12605 }
 0x909   :  { %v2344_v34 = vmul.f32 %v12606_v37, %v13550_v54  ;;  %v63_v37 = vld [vmem:[%s15551_s1 + $0x7] ss:$0 sm:$0xff] }
 0x90a   :  { %v12608_v31 = vpop.eup %12607 }
 0x90b   :  { %v2347_v18 = vmul.f32 %v2344_v34, %v59_v38  ;;  %v2345_v48 = vmul.f32 %v12608_v31, %v13553_v11  ;;  %v12366_v11 = vld [vmem:[%s15555_s5 + $0x28] sm:$0xff]  }
 0x90c   :  { %v12610_v45 = vpop.eup %12609  ;;  %11194 = vmatpush3.bf16.msra.mxu1 %v12366_v11 }
 0x90d   :  { %v2348_v1 = vmul.f32 %v2345_v48, %v59_v38  ;;  %v2346_v8 = vmul.f32 %v12610_v45, %v13558_v53  ;;  %v2350_v13 = vadd.f32 %v2347_v18, %v60_v61  ;;  %v12368_v53 = vld [vmem:[%s15555_s5 + $0x30] sm:$0xff]   ;;  %11195 = vmatprep.subr.bf16.mxu1 %v12367_v51 }
 0x90f   :  { %v2351_v21 = vadd.f32 %v2348_v1, %v60_v61  ;;  %v2349_v40 = vmul.f32 %v2346_v8, %v59_v38 }
 0x910   :  { %11196 = vmatpush3.bf16.msra.mxu1 %v12368_v53 }
 0x911   :  { %v2353_v2 = vpack.c.bf16 %v2351_v21, %v2350_v13  ;;  %v2352_v54 = vadd.f32 %v2349_v40, %v60_v61  ;;  %11197 = vmatprep.subr.bf16.mxu1 %v12369_v16 }
 0x913   :  { %10608 = vmatmul.mubr.msk.bf16.vlgmr.msra.gmra.mrb[28].mxu0 %vm64_vm0, %v2353_v2  ;;  %v2354_v30 = vpack.c.bf16 %v2352_v54, %v2352_v54 }
 0x914   :  { %2462 = vmatprep.mubr.bf16.mxu0 %v12964_v29  ;;  %11198 = vmatpush3.bf16.msra.mxu1 %v12370_v20 }
 0x915   :  { %11688 = vmatprep.subr.mxu1 %v12965_v7 }
 0x91b   :  { %10609 = vmatmul.mubr.msk.bf16.gmra.mrb[32].mxu0 %vm64_vm0, %v2354_v30 }
 0x91c   :  { %2819 = vmatprep.mubr.bf16.mxu0 %v12964_v29 }
 0x9e6   :  { %v2454_v12 = vpop.f32.mrb[28].mxu0 }
 0x9e7   :  { %v2455_v32 = vadd.f32 %v2454_v12, %v2367_v42  ;;  %v2456_v60 = vpop.f32.mrb[29].mxu0 }
 0x9e8   :  { %v2457_v47 = vadd.f32 %v2456_v60, %v2371_v52  ;;  %v2458_v17 = vpop.f32.mrb[30].mxu0 }
 0x9e9   :  { %v2459_v35 = vadd.f32 %v2458_v17, %v2367_v42  ;;  %v2460_v56 = vpop.f32.mrb[31].mxu0  ;;  %v2471_v58 = vmax.f32 %v2455_v32, 0.0 }
 0x9ea   :  { %v2461_v43 = vadd.f32 %v2460_v56, %v2371_v52  ;;  %v2472_v9 = vmax.f32 %v2457_v47, 0.0  ;;  %v12371_v56 = vld [vmem:[%s15552_s2 + $0x40] ss:$8 sps:$4 sm:$0xff]  }
 0x9eb   :  { %v2473_v62 = vmax.f32 %v2459_v35, 0.0  ;;  %v12373_v35 = vld [vmem:[%s15552_s2 + $0x44] ss:$8 sps:$4 sm:$0xff]  }
 0x9ec   :  { %v2474_v15 = vmax.f32 %v2461_v43, 0.0  ;;  %2787 = vmatprep.subr.bf16.mxu0 %v12373_v35  ;;  %v12376_v43 = vld [vmem:[%s15552_s2 + $0x54] ss:$8 sps:$4 sm:$0xff]  }
 0x9ed   :  { %v2477_v10 = vpack.c.bf16 %v2473_v62, %v2471_v58  ;;  %2788 = vmatpush1.bf16.msra.mxu0 %v12371_v56  ;;  %v12374_v58 = vld [vmem:[%s15552_s2 + $0x50] ss:$8 sps:$4 sm:$0xff]   ;;  %v12379_v62 = vld [vmem:[%s15552_s2 + $0x64] ss:$8 sps:$4 sm:$0xff]  }
 0x9ee   :  { %v2478_v4 = vpack.c.bf16 %v2474_v15, %v2472_v9  ;;  %v2464_v14 = vpop.f32.mrb[32].mxu0  ;;  %2789 = vmatprep.subr.bf16.mxu0 %v12376_v43  ;;  %v12377_v9 = vld [vmem:[%s15552_s2 + $0x60] ss:$8 sps:$4 sm:$0xff]   ;;  %v12382_v15 = vld [vmem:[%s15552_s2 + $0x74] ss:$8 sps:$4 sm:$0xff]  }
 0x9ef   :  { %v2465_v3 = vadd.f32 %v2464_v14, %v2367_v42  ;;  %v2466_v36 = vpop.f32.mrb[33].mxu0 }
 0x9f0   :  { %v2467_v26 = vadd.f32 %v2466_v36, %v2371_v52  ;;  %v2468_v27 = vpop.f32.mrb[34].mxu0  ;;  %2641 = vmatprep.mubr.bf16.mxu1 %v2478_v4 }
 0x9f1   :  { %v2469_v28 = vpop.f32.mrb[35].mxu0  ;;  %2642 = vmatmul.mubr.bf16.vlgmr.msra.gmra.mrb[48].mxu1 %v2477_v10  ;;  %v2475_v5 = vmax.f32 %v2465_v3, 0.0  ;;  %2790 = vmatpush1.bf16.msra.mxu0 %v12374_v58  ;;  %v12380_v10 = vld [vmem:[%s15552_s2 + $0x70] ss:$8 sps:$4 sm:$0xff]  }
 0x9f2   :  { %v2476_v33 = vmax.f32 %v2467_v26, 0.0  ;;  %2791 = vmatprep.subr.bf16.mxu0 %v12379_v62 }
 0x9f3   :  { %v2479_v44 = vpack.c.bf16 %v2475_v5, %v2475_v5 }
 0x9f4   :  { %v2480_v59 = vpack.c.bf16 %v2476_v33, %v2476_v33 }
 0x9f5   :  { %2792 = vmatpush1.bf16.msra.mxu0 %v12377_v9 }
 0x9f6   :  { %2649 = vmatprep.mubr.bf16.mxu1 %v2480_v59  ;;  %2793 = vmatprep.subr.bf16.mxu0 %v12382_v15 }
 0x9f9   :  { %2650 = vmatmul.mubr.bf16.gmra.mrb[52].mxu1 %v2479_v44  ;;  %2794 = vmatpush1.bf16.msra.mxu0 %v12380_v10  ;;  %v10626_v44 = vld [vmem:[%s15551_s1 + $0x20] ss:$0 sm:$0xff] }
 0x9fa   :  { %11690 = vmatprep.mubr.msk.f32.mxu1 %vm12966_vm2, %v12965_v7  ;;  %11677 = vmatprep.subr.mxu0 %v12965_v7 }
 0xac4   :  { %v11199_v49 = vpop.f32.mrb[48].mxu1 }
 0xac5   :  { %v11200_v46 = vpop.f32.mrb[49].mxu1 }
 0xac6   :  { %v11201_v39 = vadd.f32 %v11200_v46, %v11199_v49  ;;  %v11202_v25 = vpop.f32.mrb[50].mxu1 }
 0xac7   :  { %v11203_v38 = vpop.f32.mrb[51].mxu1 }
 0xac8   :  { %v2657_v34 = vadd.f32 %v11201_v39, %v13531_v41  ;;  %v11204_v31 = vadd.f32 %v11203_v38, %v11202_v25 }
 0xaca   :  { %v13664_v18 = vadd.f32 %v2657_v34, %v63_v37  ;;  %v2658_v48 = vadd.f32 %v11204_v31, %v13541_v22 }
 0xacc   :  { %v13667_v45 = vadd.f32 %v2658_v48, %v63_v37  ;;  %v11205_v61 = vpop.f32.mrb[52].mxu1  ;;  %v2674_v1 = vsel %vm64_vm0, %v13664_v18, 0.0 }
 0xacd   :  { %v11206_v8 = vpop.f32.mrb[53].mxu1  ;;  %2675 = vadd.xlane.f32.xlu0 %v2674_v1 }
 0xace   :  { %v11207_v13 = vadd.f32 %v11206_v8, %v11205_v61  ;;  %v11208_v21 = vpop.f32.mrb[54].mxu1  ;;  %v2677_v2 = vsel %vm64_vm0, %v13667_v45, 0.0 }
 0xacf   :  { %v11209_v40 = vpop.f32.mrb[55].mxu1  ;;  %2678 = vadd.xlane.f32.xlu1 %v2677_v2  ;;  %v13723_v2 = vld [vmem:[%s15551_s1 + $0x22] ss:$8 sm:$0x3] }
 0xad0   :  { %v2659_v41 = vadd.f32 %v11207_v13, %v13536_v50  ;;  %v2734_v40 = vrot.slane %v13723_v2, %v13058_v57 }
 0xad2   :  { %v13674_v54 = vadd.f32 %v2659_v41, %v63_v37  ;;  %v10627_v37 = vld [vmem:[%s15551_s1 + $0x21] ss:$0 sm:$0xff] }
 0xad4   :  { %v2680_v22 = vsel %vm71_vm1, %v13674_v54, 0.0 }
 0xad5   :  { %2681 = vadd.xlane.f32.xlu0 %v2680_v22 }
 0xb5a   :  { %v2676_v30 = vpop.xlane.xlu0 %2675 }
 0xb5b   :  { %v2683_v11 = vmul.f32 0.015625, %v2676_v30 }
 0xb5c   :  { %v2679_v51 = vpop.xlane.xlu1 %2678 }
 0xb5d   :  { %v2686_v53 = vsub.f32 %v13664_v18, %v2683_v11  ;;  %v2684_v16 = vmul.f32 0.015625, %v2679_v51 }
 0xb5f   :  { %v2687_v20 = vsub.f32 %v13667_v45, %v2684_v16  ;;  %v2689_v23 = vmul.f32 %v2686_v53, %v2686_v53 }
 0xb61   :  { %v2692_v42 = vsel %vm64_vm0, %v2689_v23, 0.0  ;;  %v2690_v52 = vmul.f32 %v2687_v20, %v2687_v20 }
 0xb62   :  { %2693 = vadd.xlane.f32.xlu1 %v2692_v42  ;;  %v2682_v50 = vpop.xlane.xlu0 %2681 }
 0xb63   :  { %v2685_v12 = vmul.f32 0.015625, %v2682_v50  ;;  %v2695_v32 = vsel %vm64_vm0, %v2690_v52, 0.0 }
 0xb64   :  { %2696 = vadd.xlane.f32.xlu0 %v2695_v32 }
 0xb65   :  { %v2688_v60 = vsub.f32 %v13674_v54, %v2685_v12 }
 0xb67   :  { %v2691_v47 = vmul.f32 %v2688_v60, %v2688_v60 }
 0xb69   :  { %v2698_v17 = vsel %vm71_vm1, %v2691_v47, 0.0 }
 0xb6a   :  { %2699 = vadd.xlane.f32.xlu1 %v2698_v17 }
 0xbef   :  { %v2694_v4 = vpop.xlane.xlu1 %2693 }
 0xbf0   :  { %v2701_v14 = vmul.f32 0.015625, %v2694_v4 }
 0xbf1   :  { %v2697_v3 = vpop.xlane.xlu0 %2696 }
 0xbf2   :  { %v2704_v36 = vadd.f32 1e-05, %v2701_v14  ;;  %v2702_v26 = vmul.f32 0.015625, %v2697_v3 }
 0xbf4   :  { %12611 = vrsqrt.f32 %v2704_v36  ;;  %v2705_v27 = vadd.f32 1e-05, %v2702_v26 }
 0xbf6   :  { %12613 = vrsqrt.f32 %v2705_v27 }
 0xbf7   :  { %v2700_v28 = vpop.xlane.xlu1 %2699 }
 0xbf8   :  { %v2703_v33 = vmul.f32 0.015625, %v2700_v28 }
 0xbfa   :  { %v2706_v5 = vadd.f32 1e-05, %v2703_v33 }
 0xbfc   :  { %12615 = vrsqrt.f32 %v2706_v5 }
 0xbfe   :  { %v12612_v59 = vpop.eup %12611 }
 0xbff   :  { %v2710_v49 = vmul.f32 %v12612_v59, %v2686_v53 }
 0xc00   :  { %v12614_v46 = vpop.eup %12613 }
 0xc01   :  { %v2713_v39 = vmul.f32 %v10626_v44, %v2710_v49  ;;  %v2711_v25 = vmul.f32 %v12614_v46, %v2687_v20 }
 0xc03   :  { %v2714_v38 = vmul.f32 %v10626_v44, %v2711_v25  ;;  %v2716_v34 = vadd.f32 %v10627_v37, %v2713_v39 }
 0xc05   :  { %v2717_v31 = vadd.f32 %v10627_v37, %v2714_v38 }
 0xc06   :  { %v12616_v48 = vpop.eup %12615 }
 0xc07   :  { %v2719_v61 = vpack.c.bf16 %v2717_v31, %v2716_v34  ;;  %v2712_v1 = vmul.f32 %v12616_v48, %v2688_v60 }
 0xc09   :  { %10650 = vmatmul.mubr.msk.bf16.vlgmr.msra.gmra.mrb[36].mxu0 %vm64_vm0, %v2719_v61  ;;  %v2715_v8 = vmul.f32 %v10626_v44, %v2712_v1 }
 0xc0a   :  { %2829 = vmatprep.mubr.bf16.mxu0 %v12964_v29 }
 0xc0b   :  { %v2718_v13 = vadd.f32 %v10627_v37, %v2715_v8 }
 0xc0d   :  { %v2720_v21 = vpack.c.bf16 %v2718_v13, %v2718_v13 }
 0xc11   :  { %10651 = vmatmul.mubr.msk.bf16.gmra.mrb[40].mxu0 %vm64_vm0, %v2720_v21 }
 0xc12   :  { %11679 = vmatprep.mubr.msk.f32.mxu0 %vm12966_vm2, %v12965_v7 }
 0xcdc   :  { %v2821_v41 = vpop.f32.mrb[36].mxu0 }
 0xcdd   :  { %v2822_v22 = vadd.f32 %v2821_v41, %v2734_v40  ;;  %v13727_v30 = vpop.f32.mrb[37].mxu0 }
 0xcde   :  { %v2825_v11 = vpop.f32.mrb[38].mxu0 }
 0xcdf   :  { %v13729_v51 = vpop.f32.mrb[39].mxu0  ;;  %2838 = vxpose.xlu0.b32.start [1/3] (short) %v2822_v22, 128  ;;  %v2826_v53 = vadd.f32 %v2825_v11, %v2734_v40 }
 0xce3   :  { %2839 = vxpose.xlu0.b32.cont [2/3] (short) %v2826_v53, 128 }
 0xce4   :  { %v2831_v16 = vpop.f32.mrb[40].mxu0 }
 0xce5   :  { %v2832_v20 = vadd.f32 %v2831_v16, %v2734_v40  ;;  %v13731_v23 = vpop.f32.mrb[41].mxu0 }
 0xce6   :  { %v2835_v42 = vpop.f32.mrb[42].mxu0 }
 0xce7   :  { %v2836_v52 = vpop.f32.mrb[43].mxu0  ;;  %2840 = vxpose.xlu0.b32.end [3/3] (short) %v2832_v20, 128 }
 0xd5f   :  { %v2854_v50 = vpop.trf.xlu0 }
 0xd60   :  { %2902 = vxpose.xlu1.b32.start.end [1/1] (short) (narrow) %v2854_v50, 24 }
 0xd63   :  { %v2855_v12 = vpop.trf.xlu0 }
 0xd67   :  { %v2856_v32 = vpop.trf.xlu0 }
 0xd68   :  { %3144 = vxpose.xlu0.b32.start.end [1/1] (short) (narrow) %v2856_v32, 24 }
 0xd69   :  { %3023 = vxpose.xlu1.b32.start.end [1/1] (short) (narrow) %v2855_v12, 24 }
 0xd6b   :  { %v2857_v60 = vpop.trf.xlu0 }
 0xd6f   :  { %v2858_v47 = vpop.trf.xlu0 }
 0xd72   :  { %3265 = vxpose.xlu1.b32.start.end [1/1] (short) (narrow) %v2857_v60, 24 }
 0xd73   :  { %v2859_v17 = vpop.trf.xlu0 }
 0xd77   :  { %v2860_v35 = vpop.trf.xlu0 }
 0xd7b   :  { %3386 = vxpose.xlu1.b32.start.end [1/1] (short) (narrow) %v2858_v47, 24  ;;  %v2861_v56 = vpop.trf.xlu0 }
 0xd7f   :  { %v2862_v43 = vpop.trf.xlu0 }
 0xd80   :  { %11678 = vmatpush3.msra.mxu0 %v2862_v43 }
 0xd81   :  { %11699 = vmatprep.subr.mxu0 %v12965_v7 }
 0xd83   :  { %v2863_v58 = vpop.trf.xlu0 }
 0xd84   :  { %3507 = vxpose.xlu1.b32.start.end [1/1] (short) (narrow) %v2859_v17, 24  ;;  %11689 = vmatpush3.msra.mxu1 %v2863_v58 }
 0xd85   :  { %11710 = vmatprep.subr.mxu1 %v12965_v7 }
 0xd87   :  { %v2864_v62 = vpop.trf.xlu0 }
 0xd8b   :  { %v2865_v9 = vpop.trf.xlu0 }
 0xd8d   :  { %3628 = vxpose.xlu1.b32.start.end [1/1] (short) (narrow) %v2860_v35, 24 }
 0xd8f   :  { %v2866_v15 = vpop.trf.xlu0 }
 0xd93   :  { %v2867_v10 = vpop.trf.xlu0 }
 0xd96   :  { %3749 = vxpose.xlu1.b32.start.end [1/1] (short) (narrow) %v2861_v56, 24 }
 0xd97   :  { %v2868_v4 = vpop.trf.xlu0 }
 0xd9b   :  { %v2869_v3 = vpop.trf.xlu0 }
 0xde0   :  { %v2918_v14 = vpop.trf.xlu1 }
 0xde1   :  { %11680 = vmatmul.mubr.msk.f32.vlgmr.msra.gmra.mrb[44].mxu0 %vm326_vm3, %v2918_v14 }
 0xde2   :  { %11682 = vmatprep.mubr.msk.f32.mxu0 %vm12966_vm2, %v12965_v7  ;;  %11700 = vmatpush3.msra.mxu0 %v2864_v62 }
 0xde3   :  { %11721 = vmatprep.subr.mxu0 %v12965_v7 }
 0xde4   :  { %v2919_v36 = vpop.trf.xlu1 }
 0xde5   :  { %11683 = vmatmul.mubr.msk.f32.gmra.mrb[46].mxu0 %vm326_vm3, %v2919_v36 }
 0xde6   :  { %11685 = vmatprep.mubr.msk.f32.mxu0 %vm12966_vm2, %v12965_v7 }
 0xde8   :  { %v2920_v26 = vpop.trf.xlu1  ;;  %v3160_v27 = vpop.trf.xlu0 }
 0xde9   :  { %11686 = vmatmul.mubr.msk.f32.gmra.mrb[48].mxu0 %vm326_vm3, %v2920_v26 }
 0xdea   :  { %11701 = vmatprep.mubr.msk.f32.mxu0 %vm12966_vm2, %v12965_v7 }
 0xdec   :  { %v3039_v28 = vpop.trf.xlu1  ;;  %v3161_v33 = vpop.trf.xlu0 }
 0xded   :  { %11691 = vmatmul.mubr.msk.f32.vlgmr.msra.gmra.mrb[56].mxu1 %vm326_vm3, %v3039_v28  ;;  %11702 = vmatmul.mubr.msk.f32.vlgmr.msra.gmra.mrb[50].mxu0 %vm326_vm3, %v3160_v27 }
 0xdee   :  { %11693 = vmatprep.mubr.msk.f32.mxu1 %vm12966_vm2, %v12965_v7  ;;  %11704 = vmatprep.mubr.msk.f32.mxu0 %vm12966_vm2, %v12965_v7 }
 0xdef   :  { %11711 = vmatpush3.msra.mxu1 %v2865_v9  ;;  %11722 = vmatpush3.msra.mxu0 %v2866_v15 }
 0xdf0   :  { %v3040_v5 = vpop.trf.xlu1  ;;  %11732 = vmatprep.subr.mxu1 %v12965_v7  ;;  %11743 = vmatprep.subr.mxu0 %v12965_v7  ;;  %v3162_v59 = vpop.trf.xlu0 }
 0xdf1   :  { %11694 = vmatmul.mubr.msk.f32.gmra.mrb[58].mxu1 %vm326_vm3, %v3040_v5  ;;  %11705 = vmatmul.mubr.msk.f32.gmra.mrb[52].mxu0 %vm326_vm3, %v3161_v33 }
 0xdf2   :  { %11696 = vmatprep.mubr.msk.f32.mxu1 %vm12966_vm2, %v12965_v7  ;;  %11707 = vmatprep.mubr.msk.f32.mxu0 %vm12966_vm2, %v12965_v7 }
 0xdf4   :  { %v3041_v44 = vpop.trf.xlu1 }
 0xdf5   :  { %11697 = vmatmul.mubr.msk.f32.gmra.mrb[60].mxu1 %vm326_vm3, %v3041_v44  ;;  %11708 = vmatmul.mubr.msk.f32.gmra.mrb[54].mxu0 %vm326_vm3, %v3162_v59 }
 0xdf6   :  { %11712 = vmatprep.mubr.msk.f32.mxu1 %vm12966_vm2, %v12965_v7  ;;  %11723 = vmatprep.mubr.msk.f32.mxu0 %vm12966_vm2, %v12965_v7 }
 0xdf8   :  { %v3281_v49 = vpop.trf.xlu1 }
 0xdf9   :  { %11713 = vmatmul.mubr.msk.f32.vlgmr.msra.gmra.mrb[62].mxu1 %vm326_vm3, %v3281_v49 }
 0xdfa   :  { %11715 = vmatprep.mubr.msk.f32.mxu1 %vm12966_vm2, %v12965_v7  ;;  %11733 = vmatpush3.msra.mxu1 %v2867_v10 }
 0xdfb   :  { %11754 = vmatprep.subr.mxu1 %v12965_v7 }
 0xdfc   :  { %v3282_v46 = vpop.trf.xlu1 }
 0xdfd   :  { %11716 = vmatmul.mubr.msk.f32.gmra.mrb[64].mxu1 %vm326_vm3, %v3282_v46 }
 0xdfe   :  { %11718 = vmatprep.mubr.msk.f32.mxu1 %vm12966_vm2, %v12965_v7 }
 0xe00   :  { %v3283_v39 = vpop.trf.xlu1 }
 0xe01   :  { %11719 = vmatmul.mubr.msk.f32.gmra.mrb[66].mxu1 %vm326_vm3, %v3283_v39 }
 0xe02   :  { %11734 = vmatprep.mubr.msk.f32.mxu1 %vm12966_vm2, %v12965_v7 }
 0xe04   :  { %v3402_v25 = vpop.trf.xlu1 }
 0xe05   :  { %11724 = vmatmul.mubr.msk.f32.vlgmr.msra.gmra.mrb[56].mxu0 %vm326_vm3, %v3402_v25 }
 0xe06   :  { %11744 = vmatpush3.msra.mxu0 %v2868_v4  ;;  %11726 = vmatprep.mubr.msk.f32.mxu0 %vm12966_vm2, %v12965_v7 }
 0xe07   :  { %12225 = vmatprep.subr.bf16.mxu0 %v12968_v24 }
 0xe08   :  { %v3403_v37 = vpop.trf.xlu1 }
 0xe09   :  { %11727 = vmatmul.mubr.msk.f32.gmra.mrb[58].mxu0 %vm326_vm3, %v3403_v37 }
 0xe0a   :  { %11729 = vmatprep.mubr.msk.f32.mxu0 %vm12966_vm2, %v12965_v7 }
 0xe0c   :  { %v3404_v38 = vpop.trf.xlu1 }
 0xe0d   :  { %11730 = vmatmul.mubr.msk.f32.gmra.mrb[60].mxu0 %vm326_vm3, %v3404_v38 }
 0xe0e   :  { %11745 = vmatprep.mubr.msk.f32.mxu0 %vm12966_vm2, %v12965_v7 }
 0xe10   :  { %v3523_v34 = vpop.trf.xlu1 }
 0xe11   :  { %11735 = vmatmul.mubr.msk.f32.vlgmr.msra.gmra.mrb[68].mxu1 %vm326_vm3, %v3523_v34 }
 0xe12   :  { %11755 = vmatpush3.msra.mxu1 %v2869_v3  ;;  %11737 = vmatprep.mubr.msk.f32.mxu1 %vm12966_vm2, %v12965_v7 }
 0xe13   :  { %12229 = vmatprep.subr.bf16.mxu1 %v12968_v24 }
 0xe14   :  { %v3524_v31 = vpop.trf.xlu1 }
 0xe15   :  { %11738 = vmatmul.mubr.msk.f32.gmra.mrb[70].mxu1 %vm326_vm3, %v3524_v31 }
 0xe16   :  { %11740 = vmatprep.mubr.msk.f32.mxu1 %vm12966_vm2, %v12965_v7 }
 0xe18   :  { %v3525_v48 = vpop.trf.xlu1 }
 0xe19   :  { %11741 = vmatmul.mubr.msk.f32.gmra.mrb[72].mxu1 %vm326_vm3, %v3525_v48 }
 0xe1a   :  { %11756 = vmatprep.mubr.msk.f32.mxu1 %vm12966_vm2, %v12965_v7 }
 0xe1c   :  { %v3644_v61 = vpop.trf.xlu1 }
 0xe1d   :  { %11746 = vmatmul.mubr.msk.f32.vlgmr.msra.gmra.mrb[62].mxu0 %vm326_vm3, %v3644_v61 }
 0xe1e   :  { %11748 = vmatprep.mubr.msk.f32.mxu0 %vm12966_vm2, %v12965_v7 }
 0xe20   :  { %v3645_v1 = vpop.trf.xlu1 }
 0xe21   :  { %11749 = vmatmul.mubr.msk.f32.gmra.mrb[64].mxu0 %vm326_vm3, %v3645_v1 }
 0xe22   :  { %11751 = vmatprep.mubr.msk.f32.mxu0 %vm12966_vm2, %v12965_v7 }
 0xe24   :  { %v3646_v8 = vpop.trf.xlu1 }
 0xe25   :  { %11752 = vmatmul.mubr.msk.f32.gmra.mrb[66].mxu0 %vm326_vm3, %v3646_v8 }
 0xe26   :  { %11771 = vmatprep.mubr.msk.f32.mxu0 %vm12966_vm2, %v12965_v7 }
 0xe28   :  { %v3765_v13 = vpop.trf.xlu1 }
 0xe29   :  { %11757 = vmatmul.mubr.msk.f32.vlgmr.msra.gmra.mrb[74].mxu1 %vm326_vm3, %v3765_v13 }
 0xe2a   :  { %11759 = vmatprep.mubr.msk.f32.mxu1 %vm12966_vm2, %v12965_v7 }
 0xe2c   :  { %v3766_v21 = vpop.trf.xlu1 }
 0xe2d   :  { %11760 = vmatmul.mubr.msk.f32.gmra.mrb[76].mxu1 %vm326_vm3, %v3766_v21 }
 0xe2e   :  { %11762 = vmatprep.mubr.msk.f32.mxu1 %vm12966_vm2, %v12965_v7 }
 0xe30   :  { %v3767_v40 = vpop.trf.xlu1 }
 0xe31   :  { %11763 = vmatmul.mubr.msk.f32.gmra.mrb[78].mxu1 %vm326_vm3, %v3767_v40 }
 0xe32   :  { %11780 = vmatprep.mubr.msk.f32.mxu1 %vm12966_vm2, %v12965_v7 }
 0xeb4   :  { %v3009_v41 = vpop.f32.mrb[44].mxu0 }
 0xeb5   :  { %v13814_v22 = vadd.f32 %v3009_v41, %v13165_v55  ;;  %v11681_v11 = vpop.f32.mrb[45].mxu0 }
 0xeb7   :  { %v3870_v53 = vsel %vm1263_vm13, %v13814_v22, -inf }
 0xeb8   :  { %3871 = vmax.xlane.f32.xlu0 %v3870_v53  ;;  %v3014_v16 = vpop.f32.mrb[46].mxu0 }
 0xeb9   :  { %v13819_v20 = vadd.f32 %v3014_v16, %v13170_v63  ;;  %v11684_v42 = vpop.f32.mrb[47].mxu0 }
 0xebb   :  { %v3873_v52 = vsel %vm1263_vm13, %v13819_v20, -inf }
 0xebc   :  { %3874 = vmax.xlane.f32.xlu1 %v3873_v52  ;;  %v3019_v50 = vpop.f32.mrb[48].mxu0 }
 0xebd   :  { %v13824_v12 = vadd.f32 %v3019_v50, %v13178_v6  ;;  %v11687_v32 = vpop.f32.mrb[49].mxu0 }
 0xebf   :  { %v3876_v60 = vsel %vm1270_vm15, %v13824_v12, -inf }
 0xec0   :  { %3877 = vmax.xlane.f32.xlu0 %v3876_v60  ;;  %v3130_v47 = vpop.f32.mrb[56].mxu1  ;;  %v3251_v17 = vpop.f32.mrb[50].mxu0 }
 0xec1   :  { %v13829_v35 = vadd.f32 %v3130_v47, %v13165_v55  ;;  %v13832_v56 = vadd.f32 %v3251_v17, %v13165_v55  ;;  %v11692_v43 = vpop.f32.mrb[57].mxu1  ;;  %v11703_v58 = vpop.f32.mrb[51].mxu0 }
 0xec3   :  { %v3879_v62 = vsel %vm1263_vm13, %v13829_v35, -inf  ;;  %v3888_v9 = vsel %vm1263_vm13, %v13832_v56, -inf }
 0xec4   :  { %3880 = vmax.xlane.f32.xlu1 %v3879_v62  ;;  %v3135_v15 = vpop.f32.mrb[58].mxu1  ;;  %3889 = vmax.xlane.f32.xlu0 %v3888_v9  ;;  %v3256_v10 = vpop.f32.mrb[52].mxu0 }
 0xec5   :  { %v13839_v4 = vadd.f32 %v3135_v15, %v13170_v63  ;;  %v11695_v14 = vpop.f32.mrb[59].mxu1  ;;  %v11706_v3 = vpop.f32.mrb[53].mxu0  ;;  %v13847_v5 = vadd.f32 %v3256_v10, %v13170_v63 }
 0xec7   :  { %v3882_v36 = vsel %vm1263_vm13, %v13839_v4, -inf  ;;  %v3891_v25 = vsel %vm1263_vm13, %v13847_v5, -inf }
 0xec8   :  { %3883 = vmax.xlane.f32.xlu1 %v3882_v36  ;;  %v3140_v26 = vpop.f32.mrb[60].mxu1  ;;  %v3261_v27 = vpop.f32.mrb[54].mxu0 }
 0xec9   :  { %v13844_v28 = vadd.f32 %v3140_v26, %v13178_v6  ;;  %v11698_v33 = vpop.f32.mrb[61].mxu1  ;;  %v11709_v59 = vpop.f32.mrb[55].mxu0  ;;  %v13857_v37 = vadd.f32 %v3261_v27, %v13178_v6 }
 0xecb   :  { %v3885_v44 = vsel %vm1270_vm15, %v13844_v28, -inf  ;;  %v3894_v61 = vsel %vm1270_vm15, %v13857_v37, -inf }
 0xecc   :  { %3886 = vmax.xlane.f32.xlu1 %v3885_v44  ;;  %v3372_v49 = vpop.f32.mrb[62].mxu1 }
 0xecd   :  { %v13852_v46 = vadd.f32 %v3372_v49, %v13165_v55  ;;  %v11714_v39 = vpop.f32.mrb[63].mxu1 }
 0xecf   :  { %v3897_v38 = vsel %vm1263_vm13, %v13852_v46, -inf }
 0xed0   :  { %v3377_v34 = vpop.f32.mrb[64].mxu1  ;;  %3898 = vmax.xlane.f32.xlu0 %v3897_v38  ;;  %3892 = vmax.xlane.f32.xlu1 %v3891_v25 }
 0xed1   :  { %v13862_v31 = vadd.f32 %v3377_v34, %v13170_v63  ;;  %v11717_v48 = vpop.f32.mrb[65].mxu1 }
 0xed3   :  { %v3900_v1 = vsel %vm1263_vm13, %v13862_v31, -inf }
 0xed4   :  { %v3382_v8 = vpop.f32.mrb[66].mxu1  ;;  %3901 = vmax.xlane.f32.xlu1 %v3900_v1  ;;  %3895 = vmax.xlane.f32.xlu0 %v3894_v61 }
 0xed5   :  { %v13869_v13 = vadd.f32 %v3382_v8, %v13178_v6  ;;  %v11720_v21 = vpop.f32.mrb[67].mxu1 }
 0xed7   :  { %v3903_v40 = vsel %vm1270_vm15, %v13869_v13, -inf }
 0xed8   :  { %3904 = vmax.xlane.f32.xlu1 %v3903_v40  ;;  %v3493_v41 = vpop.f32.mrb[56].mxu0 }
 0xed9   :  { %v13874_v11 = vadd.f32 %v3493_v41, %v13165_v55  ;;  %v11725_v53 = vpop.f32.mrb[57].mxu0 }
 0xedb   :  { %v3906_v16 = vsel %vm1263_vm13, %v13874_v11, -inf }
 0xedc   :  { %3907 = vmax.xlane.f32.xlu0 %v3906_v16  ;;  %v3498_v42 = vpop.f32.mrb[58].mxu0 }
 0xedd   :  { %v13879_v52 = vadd.f32 %v3498_v42, %v13170_v63  ;;  %v11728_v50 = vpop.f32.mrb[59].mxu0 }
 0xedf   :  { %v3909_v32 = vsel %vm1263_vm13, %v13879_v52, -inf }
 0xee0   :  { %3910 = vmax.xlane.f32.xlu1 %v3909_v32  ;;  %v3503_v60 = vpop.f32.mrb[60].mxu0 }
 0xee1   :  { %v11731_v47 = vpop.f32.mrb[61].mxu0  ;;  %v13887_v62 = vadd.f32 %v3503_v60, %v13178_v6 }
 0xee3   :  { %v3912_v36 = vsel %vm1270_vm15, %v13887_v62, -inf }
 0xee4   :  { %v3614_v17 = vpop.f32.mrb[68].mxu1 }
 0xee5   :  { %v13884_v43 = vadd.f32 %v3614_v17, %v13165_v55  ;;  %v11736_v58 = vpop.f32.mrb[69].mxu1 }
 0xee7   :  { %v3915_v9 = vsel %vm1263_vm13, %v13884_v43, -inf }
 0xee8   :  { %v3619_v15 = vpop.f32.mrb[70].mxu1  ;;  %3916 = vmax.xlane.f32.xlu0 %v3915_v9 }
 0xee9   :  { %v13892_v10 = vadd.f32 %v3619_v15, %v13170_v63  ;;  %v11739_v14 = vpop.f32.mrb[71].mxu1 }
 0xeeb   :  { %v3918_v3 = vsel %vm1263_vm13, %v13892_v10, -inf }
 0xeec   :  { %v3624_v26 = vpop.f32.mrb[72].mxu1  ;;  %3919 = vmax.xlane.f32.xlu1 %v3918_v3  ;;  %3913 = vmax.xlane.f32.xlu0 %v3912_v36 }
 0xeed   :  { %v13899_v27 = vadd.f32 %v3624_v26, %v13178_v6  ;;  %v11742_v33 = vpop.f32.mrb[73].mxu1 }
 0xeef   :  { %v3921_v59 = vsel %vm1270_vm15, %v13899_v27, -inf }
 0xef0   :  { %3922 = vmax.xlane.f32.xlu1 %v3921_v59  ;;  %v3735_v44 = vpop.f32.mrb[62].mxu0 }
 0xef1   :  { %v13904_v49 = vadd.f32 %v3735_v44, %v13165_v55  ;;  %v11747_v39 = vpop.f32.mrb[63].mxu0 }
 0xef3   :  { %v3924_v25 = vsel %vm1263_vm13, %v13904_v49, -inf }
 0xef4   :  { %3925 = vmax.xlane.f32.xlu0 %v3924_v25  ;;  %v3740_v38 = vpop.f32.mrb[64].mxu0 }
 0xef5   :  { %v13909_v34 = vadd.f32 %v3740_v38, %v13170_v63  ;;  %v11750_v48 = vpop.f32.mrb[65].mxu0 }
 0xef7   :  { %v3927_v61 = vsel %vm1263_vm13, %v13909_v34, -inf }
 0xef8   :  { %3928 = vmax.xlane.f32.xlu1 %v3927_v61  ;;  %v3745_v1 = vpop.f32.mrb[66].mxu0 }
 0xef9   :  { %v11753_v8 = vpop.f32.mrb[67].mxu0  ;;  %v13917_v53 = vadd.f32 %v3745_v1, %v13178_v6 }
 0xefb   :  { %v3930_v47 = vsel %vm1270_vm15, %v13917_v53, -inf }
 0xefc   :  { %v3856_v21 = vpop.f32.mrb[74].mxu1 }
 0xefd   :  { %v13914_v40 = vadd.f32 %v3856_v21, %v13165_v55  ;;  %v11758_v41 = vpop.f32.mrb[75].mxu1 }
 0xeff   :  { %v3933_v16 = vsel %vm1263_vm13, %v13914_v40, -inf }
 0xf00   :  { %v3861_v42 = vpop.f32.mrb[76].mxu1  ;;  %3934 = vmax.xlane.f32.xlu0 %v3933_v16 }
 0xf01   :  { %v13922_v50 = vadd.f32 %v3861_v42, %v13170_v63  ;;  %v11761_v32 = vpop.f32.mrb[77].mxu1 }
 0xf03   :  { %v3936_v60 = vsel %vm1263_vm13, %v13922_v50, -inf }
 0xf04   :  { %v3866_v17 = vpop.f32.mrb[78].mxu1  ;;  %3937 = vmax.xlane.f32.xlu1 %v3936_v60  ;;  %3931 = vmax.xlane.f32.xlu0 %v3930_v47 }
 0xf05   :  { %v13929_v58 = vadd.f32 %v3866_v17, %v13178_v6  ;;  %v11764_v9 = vpop.f32.mrb[79].mxu1 }
 0xf07   :  { %v3939_v15 = vsel %vm1270_vm15, %v13929_v58, -inf }
 0xf08   :  { %3940 = vmax.xlane.f32.xlu1 %v3939_v15 }
 0xf45   :  { %v3872_v14 = vpop.xlane.xlu0 %3871 }
 0xf46   :  { %v3942_v3 = vsub.f32 %v13814_v22, %v3872_v14 }
 0xf48   :  { %v3966_v36 = vmul.f32 1.442695, %v3942_v3 }
 0xf49   :  { %v3875_v26 = vpop.xlane.xlu1 %3874 }
 0xf4a   :  { %12617 = vpow2.f32 %v3966_v36  ;;  %v3943_v33 = vsub.f32 %v13819_v20, %v3875_v26 }
 0xf4c   :  { %v3968_v59 = vmul.f32 1.442695, %v3943_v33 }
 0xf4d   :  { %v3878_v44 = vpop.xlane.xlu0 %3877 }
 0xf4e   :  { %12619 = vpow2.f32 %v3968_v59  ;;  %v3944_v39 = vsub.f32 %v13824_v12, %v3878_v44 }
 0xf50   :  { %v3970_v1 = vmul.f32 1.442695, %v3944_v39 }
 0xf51   :  { %v3881_v25 = vpop.xlane.xlu1 %3880  ;;  %v3890_v38 = vpop.xlane.xlu0 %3889 }
 0xf52   :  { %v3945_v48 = vsub.f32 %v13829_v35, %v3881_v25  ;;  %v3948_v22 = vsub.f32 %v13832_v56, %v3890_v38 }
 0xf54   :  { %v13937_v61 = vpop.eup %12617  ;;  %v3972_v8 = vmul.f32 1.442695, %v3945_v48  ;;  %v3978_v12 = vmul.f32 1.442695, %v3948_v22 }
 0xf55   :  { %v3884_v21 = vpop.xlane.xlu1 %3883  ;;  %v4014_v41 = vsel %vm1263_vm13, %v13937_v61, 0.0 }
 0xf56   :  { %12621 = vpow2.f32 %v3972_v8  ;;  %v3946_v20 = vsub.f32 %v13839_v4, %v3884_v21  ;;  %4015 = vadd.xlane.f32.xlu0 %v4014_v41 }
 0xf57   :  { %12623 = vpow2.f32 %v3970_v1 }
 0xf58   :  { %v13943_v16 = vpop.eup %12619  ;;  %v3974_v42 = vmul.f32 1.442695, %v3946_v20 }
 0xf59   :  { %v3887_v35 = vpop.xlane.xlu1 %3886  ;;  %v4017_v32 = vsel %vm1263_vm13, %v13943_v16, 0.0 }
 0xf5a   :  { %12625 = vpow2.f32 %v3974_v42  ;;  %v3947_v56 = vsub.f32 %v13844_v28, %v3887_v35  ;;  %4018 = vadd.xlane.f32.xlu1 %v4017_v32 }
 0xf5b   :  { %12627 = vpow2.f32 %v3978_v12 }
 0xf5c   :  { %v3976_v60 = vmul.f32 1.442695, %v3947_v56 }
 0xf5d   :  { %v3893_v47 = vpop.xlane.xlu1 %3892  ;;  %v3899_v17 = vpop.xlane.xlu0 %3898 }
 0xf5e   :  { %12629 = vpow2.f32 %v3976_v60  ;;  %v3949_v4 = vsub.f32 %v13847_v5, %v3893_v47  ;;  %v3951_v9 = vsub.f32 %v13852_v46, %v3899_v17 }
 0xf60   :  { %v13950_v15 = vpop.eup %12621  ;;  %v3980_v14 = vmul.f32 1.442695, %v3949_v4  ;;  %v3984_v3 = vmul.f32 1.442695, %v3951_v9 }
 0xf61   :  { %v3902_v36 = vpop.xlane.xlu1 %3901  ;;  %v3896_v26 = vpop.xlane.xlu0 %3895  ;;  %v4023_v33 = vsel %vm1263_vm13, %v13950_v15, 0.0 }
 0xf62   :  { %v13954_v28 = vpop.eup %12623  ;;  %12631 = vpow2.f32 %v3980_v14  ;;  %v3952_v59 = vsub.f32 %v13862_v31, %v3902_v36  ;;  %v3950_v44 = vsub.f32 %v13857_v37, %v3896_v26  ;;  %4024 = vadd.xlane.f32.xlu0 %v4023_v33 }
 0xf63   :  { %12633 = vpow2.f32 %v3984_v3  ;;  %v4020_v48 = vsel %vm1270_vm15, %v13954_v28, 0.0 }
 0xf64   :  { %v13958_v5 = vpop.eup %12625  ;;  %v3986_v46 = vmul.f32 1.442695, %v3952_v59  ;;  %v3982_v39 = vmul.f32 1.442695, %v3950_v44 }
 0xf65   :  { %v3905_v25 = vpop.xlane.xlu1 %3904  ;;  %v4026_v38 = vsel %vm1263_vm13, %v13958_v5, 0.0  ;;  %v13964_v1 = vpop.eup %12627 }
 0xf66   :  { %12635 = vpow2.f32 %v3986_v46  ;;  %v3953_v31 = vsub.f32 %v13869_v13, %v3905_v25  ;;  %4027 = vadd.xlane.f32.xlu1 %v4026_v38  ;;  %4021 = vadd.xlane.f32.xlu0 %v4020_v48  ;;  %v4032_v41 = vsel %vm1263_vm13, %v13964_v1, 0.0 }
 0xf67   :  { %12637 = vpow2.f32 %v3982_v39 }
 0xf68   :  { %v13967_v37 = vpop.eup %12629  ;;  %v3988_v8 = vmul.f32 1.442695, %v3953_v31 }
 0xf69   :  { %v3908_v22 = vpop.xlane.xlu0 %3907  ;;  %v4029_v21 = vsel %vm1270_vm15, %v13967_v37, 0.0 }
 0xf6a   :  { %12639 = vpow2.f32 %v3988_v8  ;;  %v3954_v20 = vsub.f32 %v13874_v11, %v3908_v22  ;;  %4030 = vadd.xlane.f32.xlu1 %v4029_v21  ;;  %4033 = vadd.xlane.f32.xlu0 %v4032_v41 }
 0xf6c   :  { %v13974_v12 = vpop.eup %12631  ;;  %v3990_v13 = vmul.f32 1.442695, %v3954_v20 }
 0xf6d   :  { %v13976_v42 = vpop.eup %12633  ;;  %v3911_v35 = vpop.xlane.xlu1 %3910  ;;  %v4035_v32 = vsel %vm1263_vm13, %v13974_v12, 0.0 }
 0xf6e   :  { %12641 = vpow2.f32 %v3990_v13  ;;  %v3955_v56 = vsub.f32 %v13879_v52, %v3911_v35  ;;  %4036 = vadd.xlane.f32.xlu1 %v4035_v32  ;;  %v4041_v60 = vsel %vm1263_vm13, %v13976_v42, 0.0 }
 0xf6f   :  { %4042 = vadd.xlane.f32.xlu0 %v4041_v60 }
 0xf70   :  { %v13983_v11 = vpop.eup %12635  ;;  %v3992_v47 = vmul.f32 1.442695, %v3955_v56 }
 0xf71   :  { %v13985_v17 = vpop.eup %12637  ;;  %v4044_v4 = vsel %vm1263_vm13, %v13983_v11, 0.0 }
 0xf72   :  { %12643 = vpow2.f32 %v3992_v47  ;;  %4045 = vadd.xlane.f32.xlu1 %v4044_v4  ;;  %v4038_v9 = vsel %vm1270_vm15, %v13985_v17, 0.0 }
 0xf73   :  { %4039 = vadd.xlane.f32.xlu0 %v4038_v9 }
 0xf74   :  { %v13991_v52 = vpop.eup %12639 }
 0xf75   :  { %v3917_v14 = vpop.xlane.xlu0 %3916  ;;  %v4047_v3 = vsel %vm1270_vm15, %v13991_v52, 0.0 }
 0xf76   :  { %v3957_v36 = vsub.f32 %v13884_v43, %v3917_v14  ;;  %4048 = vadd.xlane.f32.xlu1 %v4047_v3 }
 0xf78   :  { %v13996_v26 = vpop.eup %12641  ;;  %v3996_v33 = vmul.f32 1.442695, %v3957_v36 }
 0xf79   :  { %v3920_v59 = vpop.xlane.xlu1 %3919  ;;  %v3914_v44 = vpop.xlane.xlu0 %3913  ;;  %v4050_v46 = vsel %vm1263_vm13, %v13996_v26, 0.0 }
 0xf7a   :  { %12645 = vpow2.f32 %v3996_v33  ;;  %v3958_v39 = vsub.f32 %v13892_v10, %v3920_v59  ;;  %v3956_v25 = vsub.f32 %v13887_v62, %v3914_v44  ;;  %4051 = vadd.xlane.f32.xlu0 %v4050_v46 }
 0xf7c   :  { %v14002_v38 = vpop.eup %12643  ;;  %v3998_v48 = vmul.f32 1.442695, %v3958_v39  ;;  %v3994_v31 = vmul.f32 1.442695, %v3956_v25 }
 0xf7d   :  { %v3923_v43 = vpop.xlane.xlu1 %3922  ;;  %v4053_v8 = vsel %vm1263_vm13, %v14002_v38, 0.0 }
 0xf7e   :  { %12647 = vpow2.f32 %v3998_v48  ;;  %v3959_v22 = vsub.f32 %v13899_v27, %v3923_v43  ;;  %4054 = vadd.xlane.f32.xlu1 %v4053_v8 }
 0xf7f   :  { %12649 = vpow2.f32 %v3994_v31 }
 0xf80   :  { %v4000_v21 = vmul.f32 1.442695, %v3959_v22 }
 0xf81   :  { %v3926_v41 = vpop.xlane.xlu0 %3925 }
 0xf82   :  { %12651 = vpow2.f32 %v4000_v21  ;;  %v3960_v10 = vsub.f32 %v13904_v49, %v3926_v41 }
 0xf84   :  { %v14008_v62 = vpop.eup %12645  ;;  %v4002_v20 = vmul.f32 1.442695, %v3960_v10 }
 0xf85   :  { %v3929_v13 = vpop.xlane.xlu1 %3928  ;;  %v4059_v35 = vsel %vm1263_vm13, %v14008_v62, 0.0 }
 0xf86   :  { %12653 = vpow2.f32 %v4002_v20  ;;  %v3961_v32 = vsub.f32 %v13909_v34, %v3929_v13  ;;  %4060 = vadd.xlane.f32.xlu0 %v4059_v35  ;;  %v2738_v35 = vrot.slane %v13723_v2, %v13415_v19 }
 0xf88   :  { %v14013_v56 = vpop.eup %12647  ;;  %v4004_v27 = vmul.f32 1.442695, %v3961_v32  ;;  %v2824_v32 = vadd.f32 %v13727_v30, %v2738_v35 }
 0xf89   :  { %v14015_v60 = vpop.eup %12649  ;;  %v4062_v47 = vsel %vm1263_vm13, %v14013_v56, 0.0 }
 0xf8a   :  { %12655 = vpow2.f32 %v4004_v27  ;;  %4063 = vadd.xlane.f32.xlu1 %v4062_v47  ;;  %v4056_v49 = vsel %vm1270_vm15, %v14015_v60, 0.0  ;;  %v2828_v27 = vadd.f32 %v13729_v51, %v2738_v35  ;;  %v2834_v47 = vadd.f32 %v13731_v23, %v2738_v35 }
 0xf8b   :  { %4057 = vadd.xlane.f32.xlu0 %v4056_v49 }
 0xf8c   :  { %v14021_v4 = vpop.eup %12651 }
 0xf8d   :  { %v3935_v9 = vpop.xlane.xlu0 %3934  ;;  %v4065_v34 = vsel %vm1270_vm15, %v14021_v4, 0.0 }
 0xf8e   :  { %v3963_v14 = vsub.f32 %v13914_v40, %v3935_v9  ;;  %4066 = vadd.xlane.f32.xlu1 %v4065_v34 }
 0xf90   :  { %v14026_v3 = vpop.eup %12653  ;;  %v4008_v36 = vmul.f32 1.442695, %v3963_v14 }
 0xf91   :  { %v3938_v33 = vpop.xlane.xlu1 %3937  ;;  %v3932_v59 = vpop.xlane.xlu0 %3931  ;;  %v4068_v44 = vsel %vm1263_vm13, %v14026_v3, 0.0 }
 0xf92   :  { %12657 = vpow2.f32 %v4008_v36  ;;  %v3964_v46 = vsub.f32 %v13922_v50, %v3938_v33  ;;  %v3962_v39 = vsub.f32 %v13917_v53, %v3932_v59  ;;  %4069 = vadd.xlane.f32.xlu0 %v4068_v44 }
 0xf94   :  { %v14032_v25 = vpop.eup %12655  ;;  %v4010_v48 = vmul.f32 1.442695, %v3964_v46  ;;  %v4006_v31 = vmul.f32 1.442695, %v3962_v39 }
 0xf95   :  { %v3941_v40 = vpop.xlane.xlu1 %3940  ;;  %v4071_v43 = vsel %vm1263_vm13, %v14032_v25, 0.0 }
 0xf96   :  { %12659 = vpow2.f32 %v4010_v48  ;;  %v3965_v8 = vsub.f32 %v13929_v58, %v3941_v40  ;;  %4072 = vadd.xlane.f32.xlu1 %v4071_v43 }
 0xf97   :  { %12661 = vpow2.f32 %v4006_v31 }
 0xf98   :  { %v4012_v22 = vmul.f32 1.442695, %v3965_v8 }
 0xf9a   :  { %12663 = vpow2.f32 %v4012_v22 }
 0xf9c   :  { %v14037_v21 = vpop.eup %12657 }
 0xf9d   :  { %v4077_v53 = vsel %vm1263_vm13, %v14037_v21, 0.0 }
 0xf9e   :  { %4078 = vadd.xlane.f32.xlu0 %v4077_v53 }
 0xfa0   :  { %v14041_v50 = vpop.eup %12659 }
 0xfa1   :  { %v14043_v41 = vpop.eup %12661  ;;  %v4080_v10 = vsel %vm1263_vm13, %v14041_v50, 0.0 }
 0xfa2   :  { %4081 = vadd.xlane.f32.xlu1 %v4080_v10  ;;  %v4074_v58 = vsel %vm1270_vm15, %v14043_v41, 0.0 }
 0xfa3   :  { %4075 = vadd.xlane.f32.xlu0 %v4074_v58 }
 0xfa4   :  { %v14049_v20 = vpop.eup %12663 }
 0xfa5   :  { %v4083_v13 = vsel %vm1270_vm15, %v14049_v20, 0.0 }
 0xfa6   :  { %4084 = vadd.xlane.f32.xlu1 %v4083_v13 }
 0xfd0   :  { %2870 = vxpose.xlu0.b32.start [1/3] (short) (narrow) %v2824_v32, 64 }
 0xfd4   :  { %2871 = vxpose.xlu0.b32.cont [2/3] (short) (narrow) %v2828_v27, 64 }
 0xfd8   :  { %2872 = vxpose.xlu0.b32.end [3/3] (short) (narrow) %v2834_v47, 64 }
 0xfe3   :  { %v4016_v49 = vpop.xlane.xlu0 %4015 }
 0xfe4   :  { %12665 = vrcp.f32 %v4016_v49 }
 0xfe7   :  { %v4019_v9 = vpop.xlane.xlu1 %4018 }
 0xfe8   :  { %12667 = vrcp.f32 %v4019_v9 }
 0xfee   :  { %v12666_v14 = vpop.eup %12665 }
 0xfef   :  { %v4025_v34 = vpop.xlane.xlu0 %4024  ;;  %v4110_v33 = vmul.f32 %v12666_v14, %v13937_v61 }
 0xff0   :  { %12669 = vrcp.f32 %v4025_v34 }
 0xff2   :  { %v12668_v36 = vpop.eup %12667 }
 0xff3   :  { %v4111_v2 = vmul.f32 %v12668_v36, %v13943_v16  ;;  %v4028_v30 = vpop.xlane.xlu1 %4027  ;;  %v4022_v59 = vpop.xlane.xlu0 %4021 }
 0xff4   :  { %12671 = vrcp.f32 %v4028_v30 }
 0xff5   :  { %12673 = vrcp.f32 %v4022_v59  ;;  %v12226_v51 = vpack.c.bf16 %v4111_v2, %v4110_v33 }
 0xff7   :  { %12228 = vmatpush3.bf16.xpose.msk.msra.mxu0 %vm13426_vm4, %v12226_v51  ;;  %v4031_v23 = vpop.xlane.xlu1 %4030 }
 0xff8   :  { %11769 = vmatprep.subr.mxu0 %v12965_v7  ;;  %12675 = vrcp.f32 %v4031_v23 }
 0xffa   :  { %v12670_v44 = vpop.eup %12669 }
 0xffb   :  { %v4113_v48 = vmul.f32 %v12670_v44, %v13950_v15  ;;  %v4034_v15 = vpop.xlane.xlu0 %4033  ;;  %v4037_v22 = vpop.xlane.xlu1 %4036 }
 0xffc   :  { %12677 = vrcp.f32 %v4037_v22 }
 0xffd   :  { %12679 = vrcp.f32 %v4034_v15 }
 0xffe   :  { %v12672_v46 = vpop.eup %12671 }
 0xfff   :  { %v12674_v39 = vpop.eup %12673  ;;  %v4114_v61 = vmul.f32 %v12672_v46, %v13958_v5  ;;  %v4043_v5 = vpop.xlane.xlu0 %4042 }
0x1000   :  { %v4112_v16 = vmul.f32 %v12674_v39, %v13954_v28  ;;  %v4046_v10 = vpop.xlane.xlu1 %4045 }
0x1001   :  { %v12230_v31 = vpack.c.bf16 %v4114_v61, %v4113_v48  ;;  %12681 = vrcp.f32 %v4046_v10 }
0x1002   :  { %11770 = vmatpush3.xpose.msk.msra.mxu0 %vm1263_vm13, %v4112_v16  ;;  %v12676_v40 = vpop.eup %12675  ;;  %12683 = vrcp.f32 %v4043_v5 }
0x1003   :  { %12232 = vmatpush3.bf16.xpose.msk.msra.mxu1 %vm13426_vm4, %v12230_v31  ;;  %12233 = vmatprep.subr.bf16.mxu0 %v12968_v24  ;;  %v4115_v43 = vmul.f32 %v12676_v40, %v13967_v37  ;;  %v4040_v28 = vpop.xlane.xlu0 %4039 }
0x1004   :  { %11778 = vmatprep.subr.mxu1 %v12965_v7  ;;  %v4049_v13 = vpop.xlane.xlu1 %4048  ;;  %12685 = vrcp.f32 %v4040_v28 }
0x1006   :  { %v12678_v27 = vpop.eup %12677 }
0x1007   :  { %v4052_v8 = vpop.xlane.xlu0 %4051  ;;  %v12680_v49 = vpop.eup %12679  ;;  %v4117_v9 = vmul.f32 %v12678_v27, %v13974_v12 }
0x1008   :  { %v4116_v36 = vmul.f32 %v12680_v49, %v13964_v1 }
0x100a   :  { %v12234_v51 = vpack.c.bf16 %v4117_v9, %v4116_v36  ;;  %v12383_v36 = vld [vmem:[%s15553_s3 + $0x20] sm:$0xff]  }
0x100b   :  { %11779 = vmatpush3.xpose.msk.msra.mxu1 %vm1263_vm13, %v4115_v43  ;;  %v4055_v32 = vpop.xlane.xlu1 %4054  ;;  %v12682_v14 = vpop.eup %12681 }
0x100c   :  { %12237 = vmatprep.subr.bf16.mxu1 %v12968_v24  ;;  %12687 = vrcp.f32 %v4055_v32  ;;  %v12684_v33 = vpop.eup %12683  ;;  %v4120_v2 = vmul.f32 %v12682_v14, %v13983_v11 }
0x100d   :  { %12689 = vrcp.f32 %v4052_v8  ;;  %v4119_v23 = vmul.f32 %v12684_v33, %v13976_v42 }
0x100e   :  { %12691 = vrcp.f32 %v4049_v13  ;;  %v12686_v1 = vpop.eup %12685 }
0x100f   :  { %v12238_v11 = vpack.c.bf16 %v4120_v2, %v4119_v23  ;;  %v4118_v16 = vmul.f32 %v12686_v1, %v13985_v17  ;;  %v12385_v23 = vld [vmem:[%s15553_s3 + $0x30] sm:$0xff]  }
0x1013   :  { %v4061_v53 = vpop.xlane.xlu0 %4060 }
0x1016   :  { %v12688_v46 = vpop.eup %12687 }
0x1017   :  { %v4064_v47 = vpop.xlane.xlu1 %4063  ;;  %v12690_v42 = vpop.eup %12689  ;;  %v4123_v48 = vmul.f32 %v12688_v46, %v14002_v38 }
0x1018   :  { %v4058_v58 = vpop.xlane.xlu0 %4057  ;;  %12693 = vrcp.f32 %v4064_v47  ;;  %v12692_v39 = vpop.eup %12691  ;;  %v4122_v43 = vmul.f32 %v12690_v42, %v13996_v26 }
0x1019   :  { %12695 = vrcp.f32 %v4061_v53  ;;  %v4121_v28 = vmul.f32 %v12692_v39, %v13991_v52 }
0x101a   :  { %12697 = vrcp.f32 %v4058_v58  ;;  %v12242_v38 = vpack.c.bf16 %v4123_v48, %v4122_v43 }
0x101b   :  { %v4067_v30 = vpop.xlane.xlu1 %4066 }
0x101f   :  { %v4070_v35 = vpop.xlane.xlu0 %4069 }
0x1022   :  { %v12694_v40 = vpop.eup %12693 }
0x1023   :  { %v4073_v12 = vpop.xlane.xlu1 %4072  ;;  %v12696_v15 = vpop.eup %12695  ;;  %v4126_v5 = vmul.f32 %v12694_v40, %v14013_v56 }
0x1024   :  { %12699 = vrcp.f32 %v4073_v12  ;;  %v4125_v17 = vmul.f32 %v12696_v15, %v14008_v62  ;;  %v12698_v8 = vpop.eup %12697 }
0x1025   :  { %12701 = vrcp.f32 %v4070_v35  ;;  %v4124_v58 = vmul.f32 %v12698_v8, %v14015_v60 }
0x1026   :  { %12703 = vrcp.f32 %v4067_v30  ;;  %v12246_v56 = vpack.c.bf16 %v4126_v5, %v4125_v17 }
0x102b   :  { %v4079_v37 = vpop.xlane.xlu0 %4078 }
0x102e   :  { %v12700_v52 = vpop.eup %12699 }
0x102f   :  { %v4082_v61 = vpop.xlane.xlu1 %4081  ;;  %v12702_v62 = vpop.eup %12701  ;;  %v4129_v53 = vmul.f32 %v12700_v52, %v14032_v25 }
0x1030   :  { %v4076_v34 = vpop.xlane.xlu0 %4075  ;;  %12705 = vrcp.f32 %v4082_v61  ;;  %v12704_v22 = vpop.eup %12703  ;;  %v4128_v32 = vmul.f32 %v12702_v62, %v14026_v3 }
0x1031   :  { %12707 = vrcp.f32 %v4079_v37  ;;  %v4127_v47 = vmul.f32 %v12704_v22, %v14021_v4 }
0x1032   :  { %12709 = vrcp.f32 %v4076_v34  ;;  %v12250_v49 = vpack.c.bf16 %v4129_v53, %v4128_v32 }
0x1033   :  { %v4085_v10 = vpop.xlane.xlu1 %4084 }
0x1034   :  { %12711 = vrcp.f32 %v4085_v10 }
0x103a   :  { %v12706_v35 = vpop.eup %12705 }
0x103b   :  { %v12708_v37 = vpop.eup %12707  ;;  %v4132_v27 = vmul.f32 %v12706_v35, %v14041_v50 }
0x103c   :  { %v4131_v25 = vmul.f32 %v12708_v37, %v14037_v21  ;;  %v12710_v4 = vpop.eup %12709 }
0x103d   :  { %v4130_v21 = vmul.f32 %v12710_v4, %v14043_v41  ;;  %v12384_v41 = vld [vmem:[%s15553_s3 + $0x28] sm:$0xff]  }
0x103e   :  { %v12254_v3 = vpack.c.bf16 %v4132_v27, %v4131_v25  ;;  %v12712_v9 = vpop.eup %12711 }
0x103f   :  { %v4133_v34 = vmul.f32 %v12712_v9, %v14049_v20 }
0x1050   :  { %v2886_v59 = vpop.trf.xlu0 }
0x1051   :  { %11772 = vmatmul.mubr.msk.f32.vlgmr.msra.gmra.mrb[68].mxu0 %vm1263_vm13, %v2886_v59 }
0x1052   :  { %12236 = vmatpush3.bf16.xpose.msk.msra.mxu0 %vm13426_vm4, %v12234_v51  ;;  %11789 = vmatprep.mubr.msk.f32.mxu0 %vm12966_vm2, %v12965_v7 }
0x1053   :  { %11787 = vmatprep.subr.mxu0 %v12965_v7 }
0x1054   :  { %v2887_v44 = vpop.trf.xlu0 }
0x1055   :  { %11781 = vmatmul.mubr.msk.f32.vlgmr.msra.gmra.mrb[80].mxu1 %vm1263_vm13, %v2887_v44  ;;  %v12386_v44 = vld [vmem:[%s15553_s3 + $0x38] sm:$0xff]  }
0x1056   :  { %12240 = vmatpush3.bf16.xpose.msk.msra.mxu1 %vm13426_vm4, %v12238_v11  ;;  %11798 = vmatprep.mubr.msk.f32.mxu1 %vm12966_vm2, %v12965_v7 }
0x1057   :  { %11796 = vmatprep.subr.mxu1 %v12965_v7 }
0x1058   :  { %v2888_v31 = vpop.trf.xlu0 }
0x105a   :  { %11788 = vmatpush3.xpose.msk.msra.mxu0 %vm1263_vm13, %v4118_v16 }
0x105b   :  { %12241 = vmatprep.subr.bf16.mxu0 %v12968_v24 }
0x105c   :  { %v2889_v26 = vpop.trf.xlu0 }
0x105d   :  { %11790 = vmatmul.mubr.msk.f32.vlgmr.msra.gmra.mrb[70].mxu0 %vm1263_vm13, %v2888_v31 }
0x105e   :  { %11797 = vmatpush3.xpose.msk.msra.mxu1 %vm1263_vm13, %v4121_v28  ;;  %12244 = vmatpush3.bf16.xpose.msk.msra.mxu0 %vm13426_vm4, %v12242_v38  ;;  %v10629_v38 = vld [vmem:[%s15551_s1 + $0x23] ss:$0 sm:$0xff] }
0x105f   :  { %12245 = vmatprep.subr.bf16.mxu1 %v12968_v24  ;;  %11805 = vmatprep.subr.mxu0 %v12965_v7 }
0x1060   :  { %11807 = vmatprep.mubr.msk.f32.mxu0 %vm12966_vm2, %v12965_v7  ;;  %v2890_v13 = vpop.trf.xlu0 }
0x1061   :  { %11799 = vmatmul.mubr.msk.f32.vlgmr.msra.gmra.mrb[82].mxu1 %vm1263_vm13, %v2889_v26 }
0x1062   :  { %12248 = vmatpush3.bf16.xpose.msk.msra.mxu1 %vm13426_vm4, %v12246_v56  ;;  %11816 = vmatprep.mubr.msk.f32.mxu1 %vm12966_vm2, %v12965_v7 }
0x1063   :  { %11814 = vmatprep.subr.mxu1 %v12965_v7 }
0x1064   :  { %v2891_v60 = vpop.trf.xlu0 }
0x1066   :  { %11806 = vmatpush3.xpose.msk.msra.mxu0 %vm1263_vm13, %v4124_v58 }
0x1067   :  { %12249 = vmatprep.subr.bf16.mxu0 %v12968_v24 }
0x1068   :  { %v2892_v50 = vpop.trf.xlu0 }
0x1069   :  { %11808 = vmatmul.mubr.msk.f32.vlgmr.msra.gmra.mrb[72].mxu0 %vm1263_vm13, %v2890_v13 }
0x106a   :  { %11815 = vmatpush3.xpose.msk.msra.mxu1 %vm1263_vm13, %v4127_v47  ;;  %12252 = vmatpush3.bf16.xpose.msk.msra.mxu0 %vm13426_vm4, %v12250_v49 }
0x106b   :  { %12253 = vmatprep.subr.bf16.mxu1 %v12968_v24  ;;  %11823 = vmatprep.subr.mxu0 %v12965_v7 }
0x106c   :  { %11825 = vmatprep.mubr.msk.f32.mxu0 %vm12966_vm2, %v12965_v7  ;;  %v2893_v14 = vpop.trf.xlu0 }
0x106d   :  { %11817 = vmatmul.mubr.msk.f32.vlgmr.msra.gmra.mrb[84].mxu1 %vm1263_vm13, %v2891_v60 }
0x106e   :  { %12256 = vmatpush3.bf16.xpose.msk.msra.mxu1 %vm13426_vm4, %v12254_v3  ;;  %11834 = vmatprep.mubr.msk.f32.mxu1 %vm12966_vm2, %v12965_v7 }
0x106f   :  { %11832 = vmatprep.subr.mxu1 %v12965_v7 }
0x1072   :  { %11824 = vmatpush3.xpose.msk.msra.mxu0 %vm1263_vm13, %v4130_v21 }
0x1073   :  { %11837 = vmatprep.subr.bf16.mxu0 %v12383_v36 }
0x1075   :  { %11826 = vmatmul.mubr.msk.f32.vlgmr.msra.gmra.mrb[74].mxu0 %vm1263_vm13, %v2892_v50 }
0x1076   :  { %11833 = vmatpush3.xpose.msk.msra.mxu1 %vm1263_vm13, %v4133_v34  ;;  %11838 = vmatpush3.bf16.msra.mxu0 %v12383_v36  ;;  %v12387_v36 = vld [vmem:[%s15554_s4 + $0x40] ss:$8 sps:$4 sm:$0xff]  }
0x1077   :  { %11839 = vmatprep.subr.bf16.mxu0 %v12384_v41 }
0x1079   :  { %11835 = vmatmul.mubr.msk.f32.vlgmr.msra.gmra.mrb[86].mxu1 %vm1263_vm13, %v2893_v14  ;;  %v12389_v14 = vld [vmem:[%s15554_s4 + $0x44] ss:$8 sps:$4 sm:$0xff]  }
0x107a   :  { %5059 = vmatprep.mubr.bf16.mxu1 %v12964_v29  ;;  %11840 = vmatpush3.bf16.msra.mxu0 %v12384_v41  ;;  %v12392_v41 = vld [vmem:[%s15554_s4 + $0x54] ss:$8 sps:$4 sm:$0xff]  }
0x107b   :  { %11841 = vmatprep.subr.bf16.mxu0 %v12385_v23  ;;  %5027 = vmatprep.subr.bf16.mxu1 %v12389_v14 }
0x107c   :  { %5028 = vmatpush1.bf16.msra.mxu1 %v12387_v36 }
0x107d   :  { %5029 = vmatprep.subr.bf16.mxu1 %v12392_v41 }
0x107e   :  { %11842 = vmatpush3.bf16.msra.mxu0 %v12385_v23  ;;  %v12400_v23 = vld [vmem:[%s15555_s5 + $0x80] sm:$0xff]  }
0x107f   :  { %11843 = vmatprep.subr.bf16.mxu0 %v12386_v44 }
0x1082   :  { %11844 = vmatpush3.bf16.msra.mxu0 %v12386_v44  ;;  %v12403_v44 = vld [vmem:[%s15555_s5 + $0xd0] sm:$0xff]  }
0x1124   :  { %v4212_v20 = vpop.f32.mrb[68].mxu0 }
0x1125   :  { %4790 = vxpose.xlu1.b32.start [1/8] (short) (narrow) %v4212_v20, 24  ;;  %v11773_v33 = vpop.f32.mrb[69].mxu0  ;;  %v12390_v20 = vld [vmem:[%s15554_s4 + $0x50] ss:$8 sps:$4 sm:$0xff]  }
0x1126   :  { %5030 = vmatpush1.bf16.msra.mxu1 %v12390_v20  ;;  %v12395_v33 = vld [vmem:[%s15554_s4 + $0x64] ss:$8 sps:$4 sm:$0xff]  }
0x1127   :  { %5031 = vmatprep.subr.bf16.mxu1 %v12395_v33 }
0x1128   :  { %v4294_v2 = vpop.f32.mrb[80].mxu1 }
0x1129   :  { %4791 = vxpose.xlu1.b32.cont [2/8] (short) (narrow) %v4294_v2, 24  ;;  %v11782_v30 = vpop.f32.mrb[81].mxu1  ;;  %v12393_v2 = vld [vmem:[%s15554_s4 + $0x60] ss:$8 sps:$4 sm:$0xff]  }
0x112a   :  { %5032 = vmatpush1.bf16.msra.mxu1 %v12393_v2  ;;  %v12396_v30 = vld [vmem:[%s15554_s4 + $0x70] ss:$8 sps:$4 sm:$0xff]  }
0x1130   :  { %v4376_v59 = vpop.f32.mrb[70].mxu0 }
0x1131   :  { %v11791_v51 = vpop.f32.mrb[71].mxu0  ;;  %4792 = vxpose.xlu1.b32.cont [3/8] (short) (narrow) %v4376_v59, 24  ;;  %v12398_v59 = vld [vmem:[%s15554_s4 + $0x74] ss:$8 sps:$4 sm:$0xff]  }
0x1132   :  { %5033 = vmatprep.subr.bf16.mxu1 %v12398_v59  ;;  %v12399_v51 = vld [vmem:[%s15555_s5 + $0xc0] sm:$0xff]  }
0x1133   :  { %5034 = vmatpush1.bf16.msra.mxu1 %v12396_v30  ;;  %11281 = vmatprep.subr.bf16.mxu0 %v12399_v51 }
0x1134   :  { %v4458_v1 = vpop.f32.mrb[82].mxu1 }
0x1135   :  { %v11800_v12 = vpop.f32.mrb[83].mxu1  ;;  %4793 = vxpose.xlu1.b32.cont [4/8] (short) (narrow) %v4458_v1, 24  ;;  %v12401_v1 = vld [vmem:[%s15555_s5 + $0xc8] sm:$0xff]  }
0x1136   :  { %v12402_v12 = vld [vmem:[%s15555_s5 + $0x88] sm:$0xff]  }
0x113c   :  { %v4540_v11 = vpop.f32.mrb[72].mxu0 }
0x113d   :  { %v11809_v46 = vpop.f32.mrb[73].mxu0  ;;  %4794 = vxpose.xlu1.b32.cont [5/8] (short) (narrow) %v4540_v11, 24  ;;  %v12404_v11 = vld [vmem:[%s15555_s5 + $0x90] sm:$0xff]  }
0x113e   :  { %v12405_v46 = vld [vmem:[%s15555_s5 + $0xd8] sm:$0xff]  }
0x1140   :  { %v4622_v42 = vpop.f32.mrb[84].mxu1 }
0x1141   :  { %v11818_v39 = vpop.f32.mrb[85].mxu1  ;;  %4795 = vxpose.xlu1.b32.cont [6/8] (short) (narrow) %v4622_v42, 24  ;;  %v12406_v42 = vld [vmem:[%s15555_s5 + $0x98] sm:$0xff]  }
0x1142   :  { %v12407_v39 = vld [vmem:[%s15555_s5 + $0xe0] sm:$0xff]  }
0x1148   :  { %v4704_v48 = vpop.f32.mrb[74].mxu0 }
0x1149   :  { %4796 = vxpose.xlu1.b32.cont [7/8] (short) (narrow) %v4704_v48, 24  ;;  %v11827_v61 = vpop.f32.mrb[75].mxu0  ;;  %v12408_v48 = vld [vmem:[%s15555_s5 + $0xa0] sm:$0xff]  }
0x114a   :  { %v12409_v61 = vld [vmem:[%s15555_s5 + $0xe8] sm:$0xff]  }
0x114c   :  { %v4786_v16 = vpop.f32.mrb[86].mxu1 }
0x114d   :  { %4797 = vxpose.xlu1.b32.end [8/8] (short) (narrow) %v4786_v16, 24  ;;  %v11836_v31 = vpop.f32.mrb[87].mxu1 }
0x11b1   :  { %v4806_v40 = vpop.trf.xlu1 }
0x11b5   :  { %v4807_v43 = vpop.trf.xlu1 }
0x11b6   :  { %v4822_v15 = vpack.c.bf16 %v4807_v43, %v4806_v40 }
0x11b8   :  { %11845 = vmatprep.mubr.msk.bf16.mxu0 %vm64_vm0, %v4822_v15 }
0x11b9   :  { %v4808_v5 = vpop.trf.xlu1 }
0x11ba   :  { %v4823_v28 = vpack.c.bf16 %v4808_v5, %v4808_v5 }
0x11bc   :  { %11846 = vmatmul.mubr.msk.bf16.vlgmr.msra.gmra.mrb[76].mxu0 %vm64_vm0, %v4823_v28 }
0x11bd   :  { %11282 = vmatpush3.bf16.msra.mxu0 %v12400_v23 }
0x11be   :  { %11283 = vmatprep.subr.bf16.mxu0 %v12401_v1 }
0x11c1   :  { %11284 = vmatpush3.bf16.msra.mxu0 %v12402_v12 }
0x11c2   :  { %11285 = vmatprep.subr.bf16.mxu0 %v12403_v44 }
0x11c5   :  { %11286 = vmatpush3.bf16.msra.mxu0 %v12404_v11 }
0x11c6   :  { %11287 = vmatprep.subr.bf16.mxu0 %v12405_v46 }
0x11c9   :  { %11288 = vmatpush3.bf16.msra.mxu0 %v12406_v42 }
0x11ca   :  { %11289 = vmatprep.subr.bf16.mxu0 %v12407_v39 }
0x11cd   :  { %11290 = vmatpush3.bf16.msra.mxu0 %v12408_v48 }
0x11ce   :  { %11291 = vmatprep.subr.bf16.mxu0 %v12409_v61 }
0x128f   :  { %v11847_v17 = vpop.f32.mrb[76].mxu0 }
0x1290   :  { %v4897_v26 = vpop.f32.mrb[77].mxu0  ;;  %v4906_v8 = vadd.f32 %v11847_v17, %v10629_v38 }
0x1291   :  { %v4898_v56 = vadd.f32 %v10629_v38, %v4897_v26  ;;  %v11848_v52 = vpop.f32.mrb[78].mxu0 }
0x1292   :  { %v4900_v62 = vpop.f32.mrb[79].mxu0  ;;  %v14162_v10 = vadd.f32 %v4906_v8, %v13674_v54  ;;  %v10630_v8 = vld [vmem:[%s15551_s1 + $0x24] ss:$0 sm:$0xff] }
0x1293   :  { %v14159_v22 = vadd.f32 %v4898_v56, %v13664_v18  ;;  %v4901_v53 = vadd.f32 %v10629_v38, %v4900_v62 }
0x1294   :  { %v4920_v32 = vsel %vm71_vm1, %v14162_v10, 0.0 }
0x1295   :  { %v14165_v58 = vadd.f32 %v4901_v53, %v13667_v45  ;;  %v4914_v13 = vsel %vm64_vm0, %v14159_v22, 0.0 }
0x1296   :  { %4915 = vadd.xlane.f32.xlu0 %v4914_v13 }
0x1297   :  { %v4917_v35 = vsel %vm64_vm0, %v14165_v58, 0.0 }
0x1298   :  { %4918 = vadd.xlane.f32.xlu1 %v4917_v35  ;;  %v10631_v35 = vld [vmem:[%s15551_s1 + $0x25] ss:$0 sm:$0xff] }
0x129a   :  { %4921 = vadd.xlane.f32.xlu0 %v4920_v32 }
0x1323   :  { %v4916_v18 = vpop.xlane.xlu0 %4915 }
0x1324   :  { %v4923_v37 = vmul.f32 0.015625, %v4916_v18 }
0x1325   :  { %v4919_v27 = vpop.xlane.xlu1 %4918 }
0x1326   :  { %v14174_v54 = vsub.f32 %v14159_v22, %v4923_v37  ;;  %v4924_v45 = vmul.f32 0.015625, %v4919_v27 }
0x1327   :  { %v4922_v47 = vpop.xlane.xlu0 %4921 }
0x1328   :  { %v14177_v49 = vsub.f32 %v14165_v58, %v4924_v45  ;;  %v4925_v25 = vmul.f32 0.015625, %v4922_v47  ;;  %v4929_v60 = vmul.f32 %v14174_v54, %v14174_v54 }
0x132a   :  { %v14182_v3 = vsub.f32 %v14162_v10, %v4925_v25  ;;  %v4932_v4 = vsel %vm64_vm0, %v4929_v60, 0.0  ;;  %v4930_v21 = vmul.f32 %v14177_v49, %v14177_v49  ;;  %v12411_v60 = vld [vmem:[%s15555_s5 + $0xf0] sm:$0xff]  }
0x132b   :  { %4933 = vadd.xlane.f32.xlu1 %v4932_v4  ;;  %v12413_v4 = vld [vmem:[%s15555_s5 + $0xf8] sm:$0xff]  }
0x132c   :  { %v4935_v50 = vsel %vm64_vm0, %v4930_v21, 0.0  ;;  %v4931_v9 = vmul.f32 %v14182_v3, %v14182_v3  ;;  %v12414_v21 = vld [vmem:[%s15555_s5 + $0xb8] sm:$0xff]  }
0x132d   :  { %4936 = vadd.xlane.f32.xlu0 %v4935_v50  ;;  %v10632_v50 = vld [vmem:[%s15551_s1 + $0x26] ss:$8 sm:$0x3] }
0x132e   :  { %v4938_v34 = vsel %vm71_vm1, %v4931_v9, 0.0  ;;  %v4974_v9 = vrot.slane %v10632_v50, %v13058_v57 }
0x132f   :  { %4939 = vadd.xlane.f32.xlu1 %v4938_v34  ;;  %v4978_v34 = vrot.slane %v10632_v50, %v13415_v19 }
0x13b8   :  { %v4934_v16 = vpop.xlane.xlu1 %4933 }
0x13b9   :  { %v4941_v31 = vmul.f32 0.015625, %v4934_v16 }
0x13ba   :  { %v4937_v40 = vpop.xlane.xlu0 %4936 }
0x13bb   :  { %v4944_v43 = vadd.f32 1e-05, %v4941_v31  ;;  %v4942_v15 = vmul.f32 0.015625, %v4937_v40 }
0x13bc   :  { %v4940_v5 = vpop.xlane.xlu1 %4939 }
0x13bd   :  { %12713 = vrsqrt.f32 %v4944_v43  ;;  %v4945_v28 = vadd.f32 1e-05, %v4942_v15  ;;  %v4943_v38 = vmul.f32 0.015625, %v4940_v5 }
0x13bf   :  { %12715 = vrsqrt.f32 %v4945_v28  ;;  %v4946_v17 = vadd.f32 1e-05, %v4943_v38 }
0x13c1   :  { %12717 = vrsqrt.f32 %v4946_v17 }
0x13c7   :  { %v12714_v26 = vpop.eup %12713 }
0x13c8   :  { %v4950_v56 = vmul.f32 %v12714_v26, %v14174_v54  ;;  %v10633_v26 = vld [vmem:[%s15551_s1 + $0x27] ss:$0 sm:$0xff] }
0x13c9   :  { %v12716_v52 = vpop.eup %12715 }
0x13ca   :  { %v4953_v62 = vmul.f32 %v10630_v8, %v4950_v56  ;;  %v4951_v53 = vmul.f32 %v12716_v52, %v14177_v49  ;;  %v12410_v49 = vld [vmem:[%s15555_s5 + $0xa8] sm:$0xff]  }
0x13cb   :  { %v12718_v13 = vpop.eup %12717  ;;  %11292 = vmatpush3.bf16.msra.mxu0 %v12410_v49 }
0x13cc   :  { %v4954_v32 = vmul.f32 %v10630_v8, %v4951_v53  ;;  %v4952_v18 = vmul.f32 %v12718_v13, %v14182_v3  ;;  %v4956_v37 = vadd.f32 %v10631_v35, %v4953_v62  ;;  %v12412_v3 = vld [vmem:[%s15555_s5 + $0xb0] sm:$0xff]   ;;  %11293 = vmatprep.subr.bf16.mxu0 %v12411_v60 }
0x13ce   :  { %v4957_v27 = vadd.f32 %v10631_v35, %v4954_v32  ;;  %v4955_v47 = vmul.f32 %v10630_v8, %v4952_v18 }
0x13cf   :  { %11294 = vmatpush3.bf16.msra.mxu0 %v12412_v3 }
0x13d0   :  { %v4959_v45 = vpack.c.bf16 %v4957_v27, %v4956_v37  ;;  %v4958_v54 = vadd.f32 %v10631_v35, %v4955_v47  ;;  %11295 = vmatprep.subr.bf16.mxu0 %v12413_v4 }
0x13d2   :  { %10738 = vmatmul.mubr.msk.bf16.vlgmr.msra.gmra.mrb[88].mxu1 %vm64_vm0, %v4959_v45  ;;  %v4960_v25 = vpack.c.bf16 %v4958_v54, %v4958_v54 }
0x13d3   :  { %5069 = vmatprep.mubr.bf16.mxu1 %v12964_v29  ;;  %11296 = vmatpush3.bf16.msra.mxu0 %v12414_v21 }
0x13d4   :  { %11860 = vmatprep.subr.mxu0 %v12965_v7 }
0x13da   :  { %10739 = vmatmul.mubr.msk.bf16.gmra.mrb[92].mxu1 %vm64_vm0, %v4960_v25 }
0x13db   :  { %5427 = vmatprep.mubr.bf16.mxu1 %v12964_v29 }
0x14a5   :  { %v5061_v14 = vpop.f32.mrb[88].mxu1 }
0x14a6   :  { %v5062_v36 = vadd.f32 %v5061_v14, %v4974_v9  ;;  %v5063_v41 = vpop.f32.mrb[89].mxu1 }
0x14a7   :  { %v5064_v20 = vadd.f32 %v5063_v41, %v4978_v34  ;;  %v5065_v33 = vpop.f32.mrb[90].mxu1 }
0x14a8   :  { %v5066_v2 = vadd.f32 %v5065_v33, %v4974_v9  ;;  %v5067_v30 = vpop.f32.mrb[91].mxu1  ;;  %v5078_v51 = vmax.f32 %v5062_v36, 0.0 }
0x14a9   :  { %v5068_v59 = vadd.f32 %v5067_v30, %v4978_v34  ;;  %v5079_v1 = vmax.f32 %v5064_v20, 0.0  ;;  %v12415_v30 = vld [vmem:[%s15552_s2 + $0x80] ss:$8 sps:$4 sm:$0xff]  }
0x14aa   :  { %v5080_v23 = vmax.f32 %v5066_v2, 0.0  ;;  %v12417_v2 = vld [vmem:[%s15552_s2 + $0x84] ss:$8 sps:$4 sm:$0xff]  }
0x14ab   :  { %v5081_v12 = vmax.f32 %v5068_v59, 0.0  ;;  %5395 = vmatprep.subr.bf16.mxu1 %v12417_v2  ;;  %v12420_v59 = vld [vmem:[%s15552_s2 + $0x94] ss:$8 sps:$4 sm:$0xff]  }
0x14ac   :  { %v5084_v44 = vpack.c.bf16 %v5080_v23, %v5078_v51  ;;  %5396 = vmatpush1.bf16.msra.mxu1 %v12415_v30  ;;  %v12418_v51 = vld [vmem:[%s15552_s2 + $0x90] ss:$8 sps:$4 sm:$0xff]   ;;  %v12423_v23 = vld [vmem:[%s15552_s2 + $0xa4] ss:$8 sps:$4 sm:$0xff]  }
0x14ad   :  { %v5085_v11 = vpack.c.bf16 %v5081_v12, %v5079_v1  ;;  %v5071_v46 = vpop.f32.mrb[92].mxu1  ;;  %5397 = vmatprep.subr.bf16.mxu1 %v12420_v59  ;;  %v12421_v1 = vld [vmem:[%s15552_s2 + $0xa0] ss:$8 sps:$4 sm:$0xff]   ;;  %v12426_v12 = vld [vmem:[%s15552_s2 + $0xb4] ss:$8 sps:$4 sm:$0xff]  }
0x14ae   :  { %v5072_v42 = vadd.f32 %v5071_v46, %v4974_v9  ;;  %v5073_v39 = vpop.f32.mrb[93].mxu1 }
0x14af   :  { %v5074_v48 = vadd.f32 %v5073_v39, %v4978_v34  ;;  %v5075_v61 = vpop.f32.mrb[94].mxu1  ;;  %5249 = vmatprep.mubr.bf16.mxu0 %v5085_v11 }
0x14b0   :  { %v5076_v16 = vpop.f32.mrb[95].mxu1  ;;  %5250 = vmatmul.mubr.bf16.vlgmr.msra.gmra.mrb[80].mxu0 %v5084_v44  ;;  %v5082_v40 = vmax.f32 %v5072_v42, 0.0  ;;  %5398 = vmatpush1.bf16.msra.mxu1 %v12418_v51  ;;  %v12424_v44 = vld [vmem:[%s15552_s2 + $0xb0] ss:$8 sps:$4 sm:$0xff]  }
0x14b1   :  { %v5083_v31 = vmax.f32 %v5074_v48, 0.0  ;;  %5399 = vmatprep.subr.bf16.mxu1 %v12423_v23 }
0x14b2   :  { %v5086_v15 = vpack.c.bf16 %v5082_v40, %v5082_v40 }
0x14b3   :  { %v5087_v43 = vpack.c.bf16 %v5083_v31, %v5083_v31 }
0x14b4   :  { %5400 = vmatpush1.bf16.msra.mxu1 %v12421_v1 }
0x14b5   :  { %5257 = vmatprep.mubr.bf16.mxu0 %v5087_v43  ;;  %5401 = vmatprep.subr.bf16.mxu1 %v12426_v12 }
0x14b8   :  { %5258 = vmatmul.mubr.bf16.gmra.mrb[84].mxu0 %v5086_v15  ;;  %5402 = vmatpush1.bf16.msra.mxu1 %v12424_v44  ;;  %v10788_v15 = vld [vmem:[%s15551_s1 + $0x40] ss:$0 sm:$0xff] }
0x14b9   :  { %11862 = vmatprep.mubr.msk.f32.mxu0 %vm12966_vm2, %v12965_v7  ;;  %11849 = vmatprep.subr.mxu1 %v12965_v7 }
0x1583   :  { %v11297_v5 = vpop.f32.mrb[80].mxu0 }
0x1584   :  { %v11298_v28 = vpop.f32.mrb[81].mxu0 }
0x1585   :  { %v11299_v38 = vadd.f32 %v11298_v28, %v11297_v5  ;;  %v11300_v17 = vpop.f32.mrb[82].mxu0 }
0x1586   :  { %v11301_v8 = vpop.f32.mrb[83].mxu0 }
0x1587   :  { %v5265_v56 = vadd.f32 %v11299_v38, %v14159_v22  ;;  %v11302_v52 = vadd.f32 %v11301_v8, %v11300_v17 }
0x1589   :  { %v14288_v62 = vadd.f32 %v10633_v26, %v5265_v56  ;;  %v5266_v53 = vadd.f32 %v11302_v52, %v14165_v58 }
0x158b   :  { %v14291_v13 = vadd.f32 %v10633_v26, %v5266_v53  ;;  %v11303_v35 = vpop.f32.mrb[84].mxu0  ;;  %v5282_v32 = vsel %vm64_vm0, %v14288_v62, 0.0 }
0x158c   :  { %v11304_v18 = vpop.f32.mrb[85].mxu0  ;;  %5283 = vadd.xlane.f32.xlu0 %v5282_v32 }
0x158d   :  { %v11305_v37 = vadd.f32 %v11304_v18, %v11303_v35  ;;  %v11306_v27 = vpop.f32.mrb[86].mxu0  ;;  %v5285_v45 = vsel %vm64_vm0, %v14291_v13, 0.0 }
0x158e   :  { %v11307_v47 = vpop.f32.mrb[87].mxu0  ;;  %5286 = vadd.xlane.f32.xlu1 %v5285_v45  ;;  %v14347_v45 = vld [vmem:[%s15551_s1 + $0x42] ss:$8 sm:$0x3] }
0x158f   :  { %v5267_v22 = vadd.f32 %v11305_v37, %v14162_v10  ;;  %v5342_v47 = vrot.slane %v14347_v45, %v13058_v57 }
0x1591   :  { %v14298_v54 = vadd.f32 %v10633_v26, %v5267_v22  ;;  %v10789_v26 = vld [vmem:[%s15551_s1 + $0x41] ss:$0 sm:$0xff] }
0x1593   :  { %v5288_v58 = vsel %vm71_vm1, %v14298_v54, 0.0 }
0x1594   :  { %5289 = vadd.xlane.f32.xlu0 %v5288_v58 }
0x1619   :  { %v5284_v25 = vpop.xlane.xlu0 %5283 }
0x161a   :  { %v5291_v49 = vmul.f32 0.015625, %v5284_v25 }
0x161b   :  { %v5287_v60 = vpop.xlane.xlu1 %5286 }
0x161c   :  { %v5294_v3 = vsub.f32 %v14288_v62, %v5291_v49  ;;  %v5292_v4 = vmul.f32 0.015625, %v5287_v60 }
0x161e   :  { %v5295_v21 = vsub.f32 %v14291_v13, %v5292_v4  ;;  %v5297_v50 = vmul.f32 %v5294_v3, %v5294_v3 }
0x1620   :  { %v5300_v9 = vsel %vm64_vm0, %v5297_v50, 0.0  ;;  %v5298_v34 = vmul.f32 %v5295_v21, %v5295_v21 }
0x1621   :  { %5301 = vadd.xlane.f32.xlu1 %v5300_v9  ;;  %v5290_v10 = vpop.xlane.xlu0 %5289 }
0x1622   :  { %v5293_v14 = vmul.f32 0.015625, %v5290_v10  ;;  %v5303_v36 = vsel %vm64_vm0, %v5298_v34, 0.0 }
0x1623   :  { %5304 = vadd.xlane.f32.xlu0 %v5303_v36 }
0x1624   :  { %v5296_v41 = vsub.f32 %v14298_v54, %v5293_v14 }
0x1626   :  { %v5299_v20 = vmul.f32 %v5296_v41, %v5296_v41 }
0x1628   :  { %v5306_v33 = vsel %vm71_vm1, %v5299_v20, 0.0 }
0x1629   :  { %5307 = vadd.xlane.f32.xlu1 %v5306_v33 }
0x16ae   :  { %v5302_v11 = vpop.xlane.xlu1 %5301 }
0x16af   :  { %v5309_v46 = vmul.f32 0.015625, %v5302_v11 }
0x16b0   :  { %v5305_v42 = vpop.xlane.xlu0 %5304 }
0x16b1   :  { %v5312_v39 = vadd.f32 1e-05, %v5309_v46  ;;  %v5310_v48 = vmul.f32 0.015625, %v5305_v42 }
0x16b3   :  { %12719 = vrsqrt.f32 %v5312_v39  ;;  %v5313_v61 = vadd.f32 1e-05, %v5310_v48 }
0x16b5   :  { %12721 = vrsqrt.f32 %v5313_v61 }
0x16b6   :  { %v5308_v16 = vpop.xlane.xlu1 %5307 }
0x16b7   :  { %v5311_v31 = vmul.f32 0.015625, %v5308_v16 }
0x16b9   :  { %v5314_v40 = vadd.f32 1e-05, %v5311_v31 }
0x16bb   :  { %12723 = vrsqrt.f32 %v5314_v40 }
0x16bd   :  { %v12720_v43 = vpop.eup %12719 }
0x16be   :  { %v5318_v5 = vmul.f32 %v12720_v43, %v5294_v3 }
0x16bf   :  { %v12722_v28 = vpop.eup %12721 }
0x16c0   :  { %v5321_v38 = vmul.f32 %v10788_v15, %v5318_v5  ;;  %v5319_v17 = vmul.f32 %v12722_v28, %v5295_v21 }
0x16c2   :  { %v5322_v8 = vmul.f32 %v10788_v15, %v5319_v17  ;;  %v5324_v56 = vadd.f32 %v10789_v26, %v5321_v38 }
0x16c4   :  { %v5325_v52 = vadd.f32 %v10789_v26, %v5322_v8 }
0x16c5   :  { %v12724_v53 = vpop.eup %12723 }
0x16c6   :  { %v5327_v35 = vpack.c.bf16 %v5325_v52, %v5324_v56  ;;  %v5320_v32 = vmul.f32 %v12724_v53, %v5296_v41 }
0x16c8   :  { %10812 = vmatmul.mubr.msk.bf16.vlgmr.msra.gmra.mrb[96].mxu1 %vm64_vm0, %v5327_v35  ;;  %v5323_v18 = vmul.f32 %v10788_v15, %v5320_v32 }
0x16c9   :  { %5437 = vmatprep.mubr.bf16.mxu1 %v12964_v29 }
0x16ca   :  { %v5326_v37 = vadd.f32 %v10789_v26, %v5323_v18 }
0x16cc   :  { %v5328_v27 = vpack.c.bf16 %v5326_v37, %v5326_v37 }
0x16d0   :  { %10813 = vmatmul.mubr.msk.bf16.gmra.mrb[100].mxu1 %vm64_vm0, %v5328_v27 }
0x16d1   :  { %11851 = vmatprep.mubr.msk.f32.mxu1 %vm12966_vm2, %v12965_v7 }
0x179b   :  { %v5429_v22 = vpop.f32.mrb[96].mxu1 }
0x179c   :  { %v5430_v58 = vadd.f32 %v5429_v22, %v5342_v47  ;;  %v14351_v25 = vpop.f32.mrb[97].mxu1 }
0x179d   :  { %v5433_v49 = vpop.f32.mrb[98].mxu1 }
0x179e   :  { %v14353_v60 = vpop.f32.mrb[99].mxu1  ;;  %5446 = vxpose.xlu0.b32.start [1/3] (short) %v5430_v58, 128  ;;  %v5434_v3 = vadd.f32 %v5433_v49, %v5342_v47 }
0x17a2   :  { %5447 = vxpose.xlu0.b32.cont [2/3] (short) %v5434_v3, 128 }
0x17a3   :  { %v5439_v4 = vpop.f32.mrb[100].mxu1 }
0x17a4   :  { %v5440_v21 = vadd.f32 %v5439_v4, %v5342_v47  ;;  %v14355_v50 = vpop.f32.mrb[101].mxu1 }
0x17a5   :  { %v5443_v9 = vpop.f32.mrb[102].mxu1 }
0x17a6   :  { %v5444_v34 = vpop.f32.mrb[103].mxu1  ;;  %5448 = vxpose.xlu0.b32.end [3/3] (short) %v5440_v21, 128 }
0x181e   :  { %v5462_v10 = vpop.trf.xlu0 }
0x181f   :  { %5510 = vxpose.xlu1.b32.start.end [1/1] (short) (narrow) %v5462_v10, 24 }
0x1822   :  { %v5463_v14 = vpop.trf.xlu0 }
0x1823   :  { %5631 = vxpose.xlu0.b32.start.end [1/1] (short) (narrow) %v5463_v14, 24 }
0x1826   :  { %v5464_v36 = vpop.trf.xlu0 }
0x1828   :  { %5752 = vxpose.xlu1.b32.start.end [1/1] (short) (narrow) %v5464_v36, 24 }
0x182a   :  { %v5465_v41 = vpop.trf.xlu0 }
0x182e   :  { %v5466_v20 = vpop.trf.xlu0 }
0x1831   :  { %5873 = vxpose.xlu1.b32.start.end [1/1] (short) (narrow) %v5465_v41, 24 }
0x1832   :  { %v5467_v33 = vpop.trf.xlu0 }
0x1836   :  { %v5468_v2 = vpop.trf.xlu0 }
0x183a   :  { %5994 = vxpose.xlu1.b32.start.end [1/1] (short) (narrow) %v5466_v20, 24  ;;  %v5469_v30 = vpop.trf.xlu0 }
0x183e   :  { %v5470_v59 = vpop.trf.xlu0 }
0x183f   :  { %11850 = vmatpush3.msra.mxu1 %v5470_v59 }
0x1840   :  { %11871 = vmatprep.subr.mxu1 %v12965_v7 }
0x1842   :  { %v5471_v51 = vpop.trf.xlu0 }
0x1843   :  { %6115 = vxpose.xlu1.b32.start.end [1/1] (short) (narrow) %v5467_v33, 24  ;;  %11861 = vmatpush3.msra.mxu0 %v5471_v51 }
0x1844   :  { %11882 = vmatprep.subr.mxu0 %v12965_v7 }
0x1846   :  { %v5472_v23 = vpop.trf.xlu0 }
0x184a   :  { %v5473_v1 = vpop.trf.xlu0 }
0x184c   :  { %6236 = vxpose.xlu1.b32.start.end [1/1] (short) (narrow) %v5468_v2, 24 }
0x184e   :  { %v5474_v12 = vpop.trf.xlu0 }
0x1852   :  { %v5475_v44 = vpop.trf.xlu0 }
0x1855   :  { %6357 = vxpose.xlu1.b32.start.end [1/1] (short) (narrow) %v5469_v30, 24 }
0x1856   :  { %v5476_v11 = vpop.trf.xlu0 }
0x185a   :  { %v5477_v46 = vpop.trf.xlu0 }
0x189f   :  { %v5526_v42 = vpop.trf.xlu1 }
0x18a0   :  { %11852 = vmatmul.mubr.msk.f32.vlgmr.msra.gmra.mrb[104].mxu1 %vm326_vm3, %v5526_v42 }
0x18a1   :  { %11854 = vmatprep.mubr.msk.f32.mxu1 %vm12966_vm2, %v12965_v7  ;;  %11872 = vmatpush3.msra.mxu1 %v5472_v23 }
0x18a2   :  { %11893 = vmatprep.subr.mxu1 %v12965_v7 }
0x18a3   :  { %v5527_v39 = vpop.trf.xlu1  ;;  %v5647_v48 = vpop.trf.xlu0 }
0x18a4   :  { %11855 = vmatmul.mubr.msk.f32.gmra.mrb[106].mxu1 %vm326_vm3, %v5527_v39  ;;  %11863 = vmatmul.mubr.msk.f32.vlgmr.msra.gmra.mrb[88].mxu0 %vm326_vm3, %v5647_v48 }
0x18a5   :  { %11857 = vmatprep.mubr.msk.f32.mxu1 %vm12966_vm2, %v12965_v7  ;;  %11865 = vmatprep.mubr.msk.f32.mxu0 %vm12966_vm2, %v12965_v7 }
0x18a6   :  { %11883 = vmatpush3.msra.mxu0 %v5473_v1 }
0x18a7   :  { %v5528_v61 = vpop.trf.xlu1  ;;  %v5648_v16 = vpop.trf.xlu0  ;;  %11904 = vmatprep.subr.mxu0 %v12965_v7 }
0x18a8   :  { %11858 = vmatmul.mubr.msk.f32.gmra.mrb[108].mxu1 %vm326_vm3, %v5528_v61  ;;  %11866 = vmatmul.mubr.msk.f32.gmra.mrb[90].mxu0 %vm326_vm3, %v5648_v16 }
0x18a9   :  { %11873 = vmatprep.mubr.msk.f32.mxu1 %vm12966_vm2, %v12965_v7  ;;  %11868 = vmatprep.mubr.msk.f32.mxu0 %vm12966_vm2, %v12965_v7 }
0x18ab   :  { %v5768_v31 = vpop.trf.xlu1  ;;  %v5649_v40 = vpop.trf.xlu0 }
0x18ac   :  { %11874 = vmatmul.mubr.msk.f32.vlgmr.msra.gmra.mrb[110].mxu1 %vm326_vm3, %v5768_v31  ;;  %11869 = vmatmul.mubr.msk.f32.gmra.mrb[92].mxu0 %vm326_vm3, %v5649_v40 }
0x18ad   :  { %11876 = vmatprep.mubr.msk.f32.mxu1 %vm12966_vm2, %v12965_v7  ;;  %11894 = vmatpush3.msra.mxu1 %v5474_v12 }
0x18ae   :  { %11884 = vmatprep.mubr.msk.f32.mxu0 %vm12966_vm2, %v12965_v7  ;;  %11915 = vmatprep.subr.mxu1 %v12965_v7 }
0x18af   :  { %v5769_v43 = vpop.trf.xlu1 }
0x18b0   :  { %11877 = vmatmul.mubr.msk.f32.gmra.mrb[112].mxu1 %vm326_vm3, %v5769_v43 }
0x18b1   :  { %11879 = vmatprep.mubr.msk.f32.mxu1 %vm12966_vm2, %v12965_v7 }
0x18b3   :  { %v5770_v15 = vpop.trf.xlu1 }
0x18b4   :  { %11880 = vmatmul.mubr.msk.f32.gmra.mrb[114].mxu1 %vm326_vm3, %v5770_v15 }
0x18b5   :  { %11895 = vmatprep.mubr.msk.f32.mxu1 %vm12966_vm2, %v12965_v7 }
0x18b7   :  { %v5889_v5 = vpop.trf.xlu1 }
0x18b8   :  { %11885 = vmatmul.mubr.msk.f32.vlgmr.msra.gmra.mrb[94].mxu0 %vm326_vm3, %v5889_v5 }
0x18b9   :  { %11905 = vmatpush3.msra.mxu0 %v5475_v44  ;;  %11887 = vmatprep.mubr.msk.f32.mxu0 %vm12966_vm2, %v12965_v7 }
0x18ba   :  { %11926 = vmatprep.subr.mxu0 %v12965_v7 }
0x18bb   :  { %v5890_v28 = vpop.trf.xlu1 }
0x18bc   :  { %11888 = vmatmul.mubr.msk.f32.gmra.mrb[96].mxu0 %vm326_vm3, %v5890_v28 }
0x18bd   :  { %11890 = vmatprep.mubr.msk.f32.mxu0 %vm12966_vm2, %v12965_v7 }
0x18bf   :  { %v5891_v38 = vpop.trf.xlu1 }
0x18c0   :  { %11891 = vmatmul.mubr.msk.f32.gmra.mrb[98].mxu0 %vm326_vm3, %v5891_v38 }
0x18c1   :  { %11906 = vmatprep.mubr.msk.f32.mxu0 %vm12966_vm2, %v12965_v7 }
0x18c3   :  { %v6010_v17 = vpop.trf.xlu1 }
0x18c4   :  { %11896 = vmatmul.mubr.msk.f32.vlgmr.msra.gmra.mrb[116].mxu1 %vm326_vm3, %v6010_v17 }
0x18c5   :  { %11916 = vmatpush3.msra.mxu1 %v5476_v11  ;;  %11898 = vmatprep.mubr.msk.f32.mxu1 %vm12966_vm2, %v12965_v7 }
0x18c6   :  { %12257 = vmatprep.subr.bf16.mxu1 %v12968_v24 }
0x18c7   :  { %v6011_v26 = vpop.trf.xlu1 }
0x18c8   :  { %11899 = vmatmul.mubr.msk.f32.gmra.mrb[118].mxu1 %vm326_vm3, %v6011_v26 }
0x18c9   :  { %11901 = vmatprep.mubr.msk.f32.mxu1 %vm12966_vm2, %v12965_v7 }
0x18cb   :  { %v6012_v8 = vpop.trf.xlu1 }
0x18cc   :  { %11902 = vmatmul.mubr.msk.f32.gmra.mrb[120].mxu1 %vm326_vm3, %v6012_v8 }
0x18cd   :  { %11917 = vmatprep.mubr.msk.f32.mxu1 %vm12966_vm2, %v12965_v7 }
0x18cf   :  { %v6131_v56 = vpop.trf.xlu1 }
0x18d0   :  { %11907 = vmatmul.mubr.msk.f32.vlgmr.msra.gmra.mrb[100].mxu0 %vm326_vm3, %v6131_v56 }
0x18d1   :  { %11927 = vmatpush3.msra.mxu0 %v5477_v46  ;;  %11909 = vmatprep.mubr.msk.f32.mxu0 %vm12966_vm2, %v12965_v7 }
0x18d2   :  { %12261 = vmatprep.subr.bf16.mxu0 %v12968_v24 }
0x18d3   :  { %v6132_v52 = vpop.trf.xlu1 }
0x18d4   :  { %11910 = vmatmul.mubr.msk.f32.gmra.mrb[102].mxu0 %vm326_vm3, %v6132_v52 }
0x18d5   :  { %11912 = vmatprep.mubr.msk.f32.mxu0 %vm12966_vm2, %v12965_v7 }
0x18d7   :  { %v6133_v53 = vpop.trf.xlu1 }
0x18d8   :  { %11913 = vmatmul.mubr.msk.f32.gmra.mrb[104].mxu0 %vm326_vm3, %v6133_v53 }
0x18d9   :  { %11928 = vmatprep.mubr.msk.f32.mxu0 %vm12966_vm2, %v12965_v7 }
0x18db   :  { %v6252_v35 = vpop.trf.xlu1 }
0x18dc   :  { %11918 = vmatmul.mubr.msk.f32.vlgmr.msra.gmra.mrb[122].mxu1 %vm326_vm3, %v6252_v35 }
0x18dd   :  { %11920 = vmatprep.mubr.msk.f32.mxu1 %vm12966_vm2, %v12965_v7 }
0x18df   :  { %v6253_v32 = vpop.trf.xlu1 }
0x18e0   :  { %11921 = vmatmul.mubr.msk.f32.gmra.mrb[124].mxu1 %vm326_vm3, %v6253_v32 }
0x18e1   :  { %11923 = vmatprep.mubr.msk.f32.mxu1 %vm12966_vm2, %v12965_v7 }
0x18e3   :  { %v6254_v18 = vpop.trf.xlu1 }
0x18e4   :  { %11924 = vmatmul.mubr.msk.f32.gmra.mrb[126].mxu1 %vm326_vm3, %v6254_v18 }
0x18e5   :  { %11943 = vmatprep.mubr.msk.f32.mxu1 %vm12966_vm2, %v12965_v7 }
0x18e7   :  { %v6373_v37 = vpop.trf.xlu1 }
0x18e8   :  { %11929 = vmatmul.mubr.msk.f32.vlgmr.msra.gmra.mrb[106].mxu0 %vm326_vm3, %v6373_v37 }
0x18e9   :  { %11931 = vmatprep.mubr.msk.f32.mxu0 %vm12966_vm2, %v12965_v7 }
0x18eb   :  { %v6374_v27 = vpop.trf.xlu1 }
0x18ec   :  { %11932 = vmatmul.mubr.msk.f32.gmra.mrb[108].mxu0 %vm326_vm3, %v6374_v27 }
0x18ed   :  { %11934 = vmatprep.mubr.msk.f32.mxu0 %vm12966_vm2, %v12965_v7 }
0x18ef   :  { %v6375_v47 = vpop.trf.xlu1 }
0x18f0   :  { %11935 = vmatmul.mubr.msk.f32.gmra.mrb[110].mxu0 %vm326_vm3, %v6375_v47 }
0x18f1   :  { %11952 = vmatprep.mubr.msk.f32.mxu0 %vm12966_vm2, %v12965_v7 }
0x1973   :  { %v5617_v22 = vpop.f32.mrb[104].mxu1 }
0x1974   :  { %v14438_v58 = vadd.f32 %v5617_v22, %v13165_v55  ;;  %v11853_v49 = vpop.f32.mrb[105].mxu1 }
0x1976   :  { %v6478_v3 = vsel %vm1263_vm13, %v14438_v58, -inf }
0x1977   :  { %6479 = vmax.xlane.f32.xlu0 %v6478_v3  ;;  %v5622_v4 = vpop.f32.mrb[106].mxu1  ;;  %v5738_v21 = vpop.f32.mrb[88].mxu0 }
0x1978   :  { %v14443_v9 = vadd.f32 %v5622_v4, %v13170_v63  ;;  %v11856_v34 = vpop.f32.mrb[107].mxu1  ;;  %v14446_v10 = vadd.f32 %v5738_v21, %v13165_v55  ;;  %v11864_v14 = vpop.f32.mrb[89].mxu0 }
0x197a   :  { %v6481_v36 = vsel %vm1263_vm13, %v14443_v9, -inf  ;;  %v6487_v30 = vsel %vm1263_vm13, %v14446_v10, -inf }
0x197b   :  { %6482 = vmax.xlane.f32.xlu1 %v6481_v36  ;;  %v5627_v41 = vpop.f32.mrb[108].mxu1  ;;  %v5743_v20 = vpop.f32.mrb[90].mxu0 }
0x197c   :  { %v14451_v33 = vadd.f32 %v5627_v41, %v13178_v6  ;;  %v11859_v2 = vpop.f32.mrb[109].mxu1  ;;  %v14456_v59 = vadd.f32 %v5743_v20, %v13170_v63  ;;  %v11867_v51 = vpop.f32.mrb[91].mxu0 }
0x197e   :  { %v6484_v23 = vsel %vm1270_vm15, %v14451_v33, -inf  ;;  %v6490_v46 = vsel %vm1263_vm13, %v14456_v59, -inf }
0x197f   :  { %6485 = vmax.xlane.f32.xlu0 %v6484_v23  ;;  %v5859_v1 = vpop.f32.mrb[110].mxu1  ;;  %6488 = vmax.xlane.f32.xlu1 %v6487_v30  ;;  %v5748_v12 = vpop.f32.mrb[92].mxu0 }
0x1980   :  { %v14461_v44 = vadd.f32 %v5859_v1, %v13165_v55  ;;  %v11875_v11 = vpop.f32.mrb[111].mxu1  ;;  %v14466_v42 = vadd.f32 %v5748_v12, %v13178_v6  ;;  %v11870_v39 = vpop.f32.mrb[93].mxu0 }
0x1982   :  { %v6496_v48 = vsel %vm1263_vm13, %v14461_v44, -inf  ;;  %v6493_v31 = vsel %vm1270_vm15, %v14466_v42, -inf }
0x1983   :  { %6497 = vmax.xlane.f32.xlu0 %v6496_v48  ;;  %v5864_v61 = vpop.f32.mrb[112].mxu1  ;;  %6491 = vmax.xlane.f32.xlu1 %v6490_v46 }
0x1984   :  { %v11878_v16 = vpop.f32.mrb[113].mxu1  ;;  %v14473_v40 = vadd.f32 %v5864_v61, %v13170_v63 }
0x1986   :  { %v6499_v5 = vsel %vm1263_vm13, %v14473_v40, -inf }
0x1987   :  { %v5869_v43 = vpop.f32.mrb[114].mxu1  ;;  %6494 = vmax.xlane.f32.xlu1 %v6493_v31 }
0x1988   :  { %v11881_v15 = vpop.f32.mrb[115].mxu1  ;;  %v14481_v26 = vadd.f32 %v5869_v43, %v13178_v6 }
0x198a   :  { %v6502_v35 = vsel %vm1270_vm15, %v14481_v26, -inf }
0x198b   :  { %6500 = vmax.xlane.f32.xlu1 %v6499_v5  ;;  %v5980_v28 = vpop.f32.mrb[94].mxu0 }
0x198c   :  { %v14478_v38 = vadd.f32 %v5980_v28, %v13165_v55  ;;  %v11886_v17 = vpop.f32.mrb[95].mxu0 }
0x198e   :  { %v6505_v8 = vsel %vm1263_vm13, %v14478_v38, -inf }
0x198f   :  { %6506 = vmax.xlane.f32.xlu0 %v6505_v8  ;;  %v5985_v56 = vpop.f32.mrb[96].mxu0 }
0x1990   :  { %v14486_v52 = vadd.f32 %v5985_v56, %v13170_v63  ;;  %v11889_v53 = vpop.f32.mrb[97].mxu0 }
0x1992   :  { %v6508_v32 = vsel %vm1263_vm13, %v14486_v52, -inf }
0x1993   :  { %6503 = vmax.xlane.f32.xlu0 %v6502_v35  ;;  %6509 = vmax.xlane.f32.xlu1 %v6508_v32  ;;  %v5990_v18 = vpop.f32.mrb[98].mxu0 }
0x1994   :  { %v14493_v37 = vadd.f32 %v5990_v18, %v13178_v6  ;;  %v11892_v27 = vpop.f32.mrb[99].mxu0 }
0x1996   :  { %v6511_v47 = vsel %vm1270_vm15, %v14493_v37, -inf }
0x1997   :  { %v6101_v22 = vpop.f32.mrb[116].mxu1  ;;  %6512 = vmax.xlane.f32.xlu1 %v6511_v47 }
0x1998   :  { %v14498_v49 = vadd.f32 %v6101_v22, %v13165_v55  ;;  %v11897_v3 = vpop.f32.mrb[117].mxu1 }
0x199a   :  { %v6514_v4 = vsel %vm1263_vm13, %v14498_v49, -inf }
0x199b   :  { %v6106_v21 = vpop.f32.mrb[118].mxu1  ;;  %6515 = vmax.xlane.f32.xlu0 %v6514_v4 }
0x199c   :  { %v14503_v34 = vadd.f32 %v6106_v21, %v13170_v63  ;;  %v11900_v14 = vpop.f32.mrb[119].mxu1 }
0x199e   :  { %v6517_v36 = vsel %vm1263_vm13, %v14503_v34, -inf }
0x199f   :  { %v6111_v41 = vpop.f32.mrb[120].mxu1  ;;  %6518 = vmax.xlane.f32.xlu1 %v6517_v36 }
0x19a0   :  { %v11903_v20 = vpop.f32.mrb[121].mxu1  ;;  %v14511_v23 = vadd.f32 %v6111_v41, %v13178_v6 }
0x19a2   :  { %v6520_v39 = vsel %vm1270_vm15, %v14511_v23, -inf }
0x19a3   :  { %v6222_v2 = vpop.f32.mrb[100].mxu0 }
0x19a4   :  { %v14508_v30 = vadd.f32 %v6222_v2, %v13165_v55  ;;  %v11908_v51 = vpop.f32.mrb[101].mxu0 }
0x19a6   :  { %v6523_v1 = vsel %vm1263_vm13, %v14508_v30, -inf }
0x19a7   :  { %6524 = vmax.xlane.f32.xlu0 %v6523_v1  ;;  %v6227_v12 = vpop.f32.mrb[102].mxu0 }
0x19a8   :  { %v14516_v11 = vadd.f32 %v6227_v12, %v13170_v63  ;;  %v11911_v46 = vpop.f32.mrb[103].mxu0 }
0x19aa   :  { %v6526_v48 = vsel %vm1263_vm13, %v14516_v11, -inf }
0x19ab   :  { %6521 = vmax.xlane.f32.xlu0 %v6520_v39  ;;  %6527 = vmax.xlane.f32.xlu1 %v6526_v48  ;;  %v6232_v61 = vpop.f32.mrb[104].mxu0 }
0x19ac   :  { %v14523_v16 = vadd.f32 %v6232_v61, %v13178_v6  ;;  %v11914_v31 = vpop.f32.mrb[105].mxu0 }
0x19ae   :  { %v6529_v43 = vsel %vm1270_vm15, %v14523_v16, -inf }
0x19af   :  { %v6343_v15 = vpop.f32.mrb[122].mxu1  ;;  %6530 = vmax.xlane.f32.xlu1 %v6529_v43 }
0x19b0   :  { %v14528_v5 = vadd.f32 %v6343_v15, %v13165_v55  ;;  %v11919_v28 = vpop.f32.mrb[123].mxu1 }
0x19b2   :  { %v6532_v17 = vsel %vm1263_vm13, %v14528_v5, -inf }
0x19b3   :  { %v6348_v8 = vpop.f32.mrb[124].mxu1  ;;  %6533 = vmax.xlane.f32.xlu0 %v6532_v17 }
0x19b4   :  { %v14533_v56 = vadd.f32 %v6348_v8, %v13170_v63  ;;  %v11922_v53 = vpop.f32.mrb[125].mxu1 }
0x19b6   :  { %v6535_v35 = vsel %vm1263_vm13, %v14533_v56, -inf }
0x19b7   :  { %v6353_v32 = vpop.f32.mrb[126].mxu1  ;;  %6536 = vmax.xlane.f32.xlu1 %v6535_v35 }
0x19b8   :  { %v11925_v18 = vpop.f32.mrb[127].mxu1  ;;  %v14541_v3 = vadd.f32 %v6353_v32, %v13178_v6 }
0x19ba   :  { %v6538_v41 = vsel %vm1270_vm15, %v14541_v3, -inf }
0x19bb   :  { %v6464_v27 = vpop.f32.mrb[106].mxu0 }
0x19bc   :  { %v14538_v47 = vadd.f32 %v6464_v27, %v13165_v55  ;;  %v11930_v22 = vpop.f32.mrb[107].mxu0 }
0x19be   :  { %v6541_v4 = vsel %vm1263_vm13, %v14538_v47, -inf }
0x19bf   :  { %6542 = vmax.xlane.f32.xlu0 %v6541_v4  ;;  %v6469_v21 = vpop.f32.mrb[108].mxu0 }
0x19c0   :  { %v14546_v14 = vadd.f32 %v6469_v21, %v13170_v63  ;;  %v11933_v36 = vpop.f32.mrb[109].mxu0 }
0x19c2   :  { %v6544_v20 = vsel %vm1263_vm13, %v14546_v14, -inf }
0x19c3   :  { %6539 = vmax.xlane.f32.xlu0 %v6538_v41  ;;  %6545 = vmax.xlane.f32.xlu1 %v6544_v20  ;;  %v6474_v2 = vpop.f32.mrb[110].mxu0 }
0x19c4   :  { %v14553_v51 = vadd.f32 %v6474_v2, %v13178_v6  ;;  %v11936_v1 = vpop.f32.mrb[111].mxu0 }
0x19c6   :  { %v6547_v12 = vsel %vm1270_vm15, %v14553_v51, -inf }
0x19c7   :  { %6548 = vmax.xlane.f32.xlu1 %v6547_v12 }
0x1a04   :  { %v6480_v46 = vpop.xlane.xlu0 %6479 }
0x1a05   :  { %v6550_v39 = vsub.f32 %v14438_v58, %v6480_v46 }
0x1a07   :  { %v6574_v48 = vmul.f32 1.442695, %v6550_v39 }
0x1a08   :  { %v6483_v61 = vpop.xlane.xlu1 %6482 }
0x1a09   :  { %12725 = vpow2.f32 %v6574_v48  ;;  %v6551_v31 = vsub.f32 %v14443_v9, %v6483_v61 }
0x1a0b   :  { %v6576_v43 = vmul.f32 1.442695, %v6551_v31 }
0x1a0c   :  { %v6489_v15 = vpop.xlane.xlu1 %6488  ;;  %v6486_v28 = vpop.xlane.xlu0 %6485 }
0x1a0d   :  { %12727 = vpow2.f32 %v6576_v43  ;;  %v6553_v17 = vsub.f32 %v14446_v10, %v6489_v15  ;;  %v6552_v8 = vsub.f32 %v14451_v33, %v6486_v28 }
0x1a0f   :  { %v6580_v53 = vmul.f32 1.442695, %v6553_v17  ;;  %v6578_v35 = vmul.f32 1.442695, %v6552_v8 }
0x1a10   :  { %v6492_v32 = vpop.xlane.xlu1 %6491  ;;  %v6498_v18 = vpop.xlane.xlu0 %6497 }
0x1a11   :  { %12729 = vpow2.f32 %v6580_v53  ;;  %v6554_v58 = vsub.f32 %v14456_v59, %v6492_v32  ;;  %v6556_v27 = vsub.f32 %v14461_v44, %v6498_v18 }
0x1a12   :  { %12731 = vpow2.f32 %v6578_v35 }
0x1a13   :  { %v14563_v22 = vpop.eup %12725  ;;  %v6582_v9 = vmul.f32 1.442695, %v6554_v58  ;;  %v6586_v4 = vmul.f32 1.442695, %v6556_v27 }
0x1a14   :  { %v6495_v21 = vpop.xlane.xlu1 %6494  ;;  %v6622_v10 = vsel %vm1263_vm13, %v14563_v22, 0.0 }
0x1a15   :  { %12733 = vpow2.f32 %v6582_v9  ;;  %v6555_v33 = vsub.f32 %v14466_v42, %v6495_v21  ;;  %6623 = vadd.xlane.f32.xlu0 %v6622_v10 }
0x1a16   :  { %12735 = vpow2.f32 %v6586_v4 }
0x1a17   :  { %v14568_v36 = vpop.eup %12727  ;;  %v6584_v41 = vmul.f32 1.442695, %v6555_v33 }
0x1a18   :  { %v6501_v59 = vpop.xlane.xlu1 %6500  ;;  %v6625_v44 = vsel %vm1263_vm13, %v14568_v36, 0.0 }
0x1a19   :  { %12737 = vpow2.f32 %v6584_v41  ;;  %v6557_v20 = vsub.f32 %v14473_v40, %v6501_v59  ;;  %6626 = vadd.xlane.f32.xlu1 %v6625_v44 }
0x1a1b   :  { %v14573_v2 = vpop.eup %12729  ;;  %v6588_v1 = vmul.f32 1.442695, %v6557_v20 }
0x1a1c   :  { %v6507_v12 = vpop.xlane.xlu0 %6506  ;;  %v6631_v42 = vsel %vm1263_vm13, %v14573_v2, 0.0  ;;  %v14577_v46 = vpop.eup %12731 }
0x1a1d   :  { %12739 = vpow2.f32 %v6588_v1  ;;  %v6559_v39 = vsub.f32 %v14478_v38, %v6507_v12  ;;  %6632 = vadd.xlane.f32.xlu0 %v6631_v42  ;;  %v6628_v15 = vsel %vm1270_vm15, %v14577_v46, 0.0 }
0x1a1f   :  { %v14580_v48 = vpop.eup %12733  ;;  %v6592_v61 = vmul.f32 1.442695, %v6559_v39 }
0x1a20   :  { %v6510_v31 = vpop.xlane.xlu1 %6509  ;;  %v6504_v43 = vpop.xlane.xlu0 %6503  ;;  %v6634_v40 = vsel %vm1263_vm13, %v14580_v48, 0.0 }
0x1a21   :  { %v14586_v28 = vpop.eup %12735  ;;  %12741 = vpow2.f32 %v6592_v61  ;;  %v6560_v17 = vsub.f32 %v14486_v52, %v6510_v31  ;;  %v6558_v8 = vsub.f32 %v14481_v26, %v6504_v43  ;;  %6635 = vadd.xlane.f32.xlu1 %v6634_v40  ;;  %6629 = vadd.xlane.f32.xlu0 %v6628_v15 }
0x1a22   :  { %v6640_v58 = vsel %vm1263_vm13, %v14586_v28, 0.0 }
0x1a23   :  { %v14590_v38 = vpop.eup %12737  ;;  %v6594_v53 = vmul.f32 1.442695, %v6560_v17  ;;  %v6590_v35 = vmul.f32 1.442695, %v6558_v8 }
0x1a24   :  { %v6513_v32 = vpop.xlane.xlu1 %6512  ;;  %v6637_v18 = vsel %vm1270_vm15, %v14590_v38, 0.0 }
0x1a25   :  { %12743 = vpow2.f32 %v6594_v53  ;;  %v6561_v27 = vsub.f32 %v14493_v37, %v6513_v32  ;;  %6638 = vadd.xlane.f32.xlu1 %v6637_v18  ;;  %6641 = vadd.xlane.f32.xlu0 %v6640_v58 }
0x1a26   :  { %12745 = vpow2.f32 %v6590_v35 }
0x1a27   :  { %v14597_v26 = vpop.eup %12739  ;;  %v6596_v52 = vmul.f32 1.442695, %v6561_v27 }
0x1a28   :  { %v6516_v9 = vpop.xlane.xlu0 %6515  ;;  %v6643_v4 = vsel %vm1263_vm13, %v14597_v26, 0.0 }
0x1a29   :  { %12747 = vpow2.f32 %v6596_v52  ;;  %v6562_v21 = vsub.f32 %v14498_v49, %v6516_v9  ;;  %6644 = vadd.xlane.f32.xlu1 %v6643_v4 }
0x1a2b   :  { %v14602_v10 = vpop.eup %12741  ;;  %v6598_v33 = vmul.f32 1.442695, %v6562_v21 }
0x1a2c   :  { %v6519_v41 = vpop.xlane.xlu1 %6518  ;;  %v6649_v37 = vsel %vm1263_vm13, %v14602_v10, 0.0 }
0x1a2d   :  { %12749 = vpow2.f32 %v6598_v33  ;;  %v6563_v59 = vsub.f32 %v14503_v34, %v6519_v41  ;;  %6650 = vadd.xlane.f32.xlu0 %v6649_v37 }
0x1a2f   :  { %v14607_v44 = vpop.eup %12743  ;;  %v6600_v20 = vmul.f32 1.442695, %v6563_v59 }
0x1a30   :  { %v14609_v1 = vpop.eup %12745  ;;  %v6652_v49 = vsel %vm1263_vm13, %v14607_v44, 0.0 }
0x1a31   :  { %12751 = vpow2.f32 %v6600_v20  ;;  %6653 = vadd.xlane.f32.xlu1 %v6652_v49  ;;  %v6646_v12 = vsel %vm1270_vm15, %v14609_v1, 0.0 }
0x1a32   :  { %6647 = vadd.xlane.f32.xlu0 %v6646_v12 }
0x1a33   :  { %v14615_v42 = vpop.eup %12747 }
0x1a34   :  { %v6525_v39 = vpop.xlane.xlu0 %6524  ;;  %v6655_v34 = vsel %vm1270_vm15, %v14615_v42, 0.0 }
0x1a35   :  { %v6565_v61 = vsub.f32 %v14508_v30, %v6525_v39  ;;  %6656 = vadd.xlane.f32.xlu1 %v6655_v34 }
0x1a37   :  { %v14620_v31 = vpop.eup %12749  ;;  %v6604_v43 = vmul.f32 1.442695, %v6565_v61 }
0x1a38   :  { %v6528_v40 = vpop.xlane.xlu1 %6527  ;;  %v6522_v15 = vpop.xlane.xlu0 %6521  ;;  %v6658_v17 = vsel %vm1263_vm13, %v14620_v31, 0.0 }
0x1a39   :  { %12753 = vpow2.f32 %v6604_v43  ;;  %v6566_v8 = vsub.f32 %v14516_v11, %v6528_v40  ;;  %v6564_v53 = vsub.f32 %v14511_v23, %v6522_v15  ;;  %6659 = vadd.xlane.f32.xlu0 %v6658_v17 }
0x1a3b   :  { %v14626_v35 = vpop.eup %12751  ;;  %v6606_v32 = vmul.f32 1.442695, %v6566_v8  ;;  %v6602_v18 = vmul.f32 1.442695, %v6564_v53 }
0x1a3c   :  { %v6531_v30 = vpop.xlane.xlu1 %6530  ;;  %v6661_v58 = vsel %vm1263_vm13, %v14626_v35, 0.0 }
0x1a3d   :  { %12755 = vpow2.f32 %v6606_v32  ;;  %v6567_v27 = vsub.f32 %v14523_v16, %v6531_v30  ;;  %6662 = vadd.xlane.f32.xlu1 %v6661_v58 }
0x1a3e   :  { %12757 = vpow2.f32 %v6602_v18 }
0x1a3f   :  { %v6608_v52 = vmul.f32 1.442695, %v6567_v27 }
0x1a40   :  { %v6534_v9 = vpop.xlane.xlu0 %6533 }
0x1a41   :  { %12759 = vpow2.f32 %v6608_v52  ;;  %v6568_v11 = vsub.f32 %v14528_v5, %v6534_v9 }
0x1a43   :  { %v14632_v23 = vpop.eup %12753  ;;  %v6610_v4 = vmul.f32 1.442695, %v6568_v11 }
0x1a44   :  { %v6537_v21 = vpop.xlane.xlu1 %6536  ;;  %v6667_v33 = vsel %vm1263_vm13, %v14632_v23, 0.0 }
0x1a45   :  { %12761 = vpow2.f32 %v6610_v4  ;;  %v6569_v41 = vsub.f32 %v14533_v56, %v6537_v21  ;;  %6668 = vadd.xlane.f32.xlu0 %v6667_v33  ;;  %v5346_v33 = vrot.slane %v14347_v45, %v13415_v19 }
0x1a47   :  { %v14637_v37 = vpop.eup %12755  ;;  %v6612_v16 = vmul.f32 1.442695, %v6569_v41  ;;  %v5432_v41 = vadd.f32 %v14351_v25, %v5346_v33 }
0x1a48   :  { %v14639_v59 = vpop.eup %12757  ;;  %v6670_v20 = vsel %vm1263_vm13, %v14637_v37, 0.0 }
0x1a49   :  { %12763 = vpow2.f32 %v6612_v16  ;;  %6671 = vadd.xlane.f32.xlu1 %v6670_v20  ;;  %v6664_v5 = vsel %vm1270_vm15, %v14639_v59, 0.0  ;;  %v5436_v16 = vadd.f32 %v14353_v60, %v5346_v33  ;;  %v5442_v20 = vadd.f32 %v14355_v50, %v5346_v33 }
0x1a4a   :  { %6665 = vadd.xlane.f32.xlu0 %v6664_v5 }
0x1a4b   :  { %v14645_v49 = vpop.eup %12759 }
0x1a4c   :  { %v6543_v12 = vpop.xlane.xlu0 %6542  ;;  %v6673_v56 = vsel %vm1270_vm15, %v14645_v49, 0.0 }
0x1a4d   :  { %v6571_v39 = vsub.f32 %v14538_v47, %v6543_v12  ;;  %6674 = vadd.xlane.f32.xlu1 %v6673_v56 }
0x1a4f   :  { %v14650_v34 = vpop.eup %12761  ;;  %v6616_v61 = vmul.f32 1.442695, %v6571_v39 }
0x1a50   :  { %v6546_v43 = vpop.xlane.xlu1 %6545  ;;  %v6540_v40 = vpop.xlane.xlu0 %6539  ;;  %v6676_v15 = vsel %vm1263_vm13, %v14650_v34, 0.0 }
0x1a51   :  { %12765 = vpow2.f32 %v6616_v61  ;;  %v6572_v17 = vsub.f32 %v14546_v14, %v6546_v43  ;;  %v6570_v8 = vsub.f32 %v14541_v3, %v6540_v40  ;;  %6677 = vadd.xlane.f32.xlu0 %v6676_v15 }
0x1a53   :  { %v14656_v53 = vpop.eup %12763  ;;  %v6618_v32 = vmul.f32 1.442695, %v6572_v17  ;;  %v6614_v18 = vmul.f32 1.442695, %v6570_v8 }
0x1a54   :  { %v6549_v47 = vpop.xlane.xlu1 %6548  ;;  %v6679_v30 = vsel %vm1263_vm13, %v14656_v53, 0.0 }
0x1a55   :  { %12767 = vpow2.f32 %v6618_v32  ;;  %v6573_v58 = vsub.f32 %v14553_v51, %v6549_v47  ;;  %6680 = vadd.xlane.f32.xlu1 %v6679_v30 }
0x1a56   :  { %12769 = vpow2.f32 %v6614_v18 }
0x1a57   :  { %v6620_v27 = vmul.f32 1.442695, %v6573_v58 }
0x1a59   :  { %12771 = vpow2.f32 %v6620_v27 }
0x1a5b   :  { %v14661_v52 = vpop.eup %12765 }
0x1a5c   :  { %v6685_v3 = vsel %vm1263_vm13, %v14661_v52, 0.0 }
0x1a5d   :  { %6686 = vadd.xlane.f32.xlu0 %v6685_v3 }
0x1a5f   :  { %v14665_v14 = vpop.eup %12767 }
0x1a60   :  { %v14667_v9 = vpop.eup %12769  ;;  %v6688_v11 = vsel %vm1263_vm13, %v14665_v14, 0.0 }
0x1a61   :  { %6689 = vadd.xlane.f32.xlu1 %v6688_v11  ;;  %v6682_v51 = vsel %vm1270_vm15, %v14667_v9, 0.0 }
0x1a62   :  { %6683 = vadd.xlane.f32.xlu0 %v6682_v51 }
0x1a63   :  { %v14673_v4 = vpop.eup %12771 }
0x1a64   :  { %v6691_v21 = vsel %vm1270_vm15, %v14673_v4, 0.0 }
0x1a65   :  { %6692 = vadd.xlane.f32.xlu1 %v6691_v21 }
0x1a8f   :  { %5478 = vxpose.xlu0.b32.start [1/3] (short) (narrow) %v5432_v41, 64 }
0x1a93   :  { %5479 = vxpose.xlu0.b32.cont [2/3] (short) (narrow) %v5436_v16, 64 }
0x1a97   :  { %5480 = vxpose.xlu0.b32.end [3/3] (short) (narrow) %v5442_v20, 64 }
0x1aa2   :  { %v6624_v5 = vpop.xlane.xlu0 %6623 }
0x1aa3   :  { %12773 = vrcp.f32 %v6624_v5 }
0x1aa6   :  { %v6627_v12 = vpop.xlane.xlu1 %6626 }
0x1aa7   :  { %12775 = vrcp.f32 %v6627_v12 }
0x1aaa   :  { %v6633_v56 = vpop.xlane.xlu0 %6632 }
0x1aab   :  { %12777 = vrcp.f32 %v6633_v56 }
0x1aad   :  { %v12774_v43 = vpop.eup %12773 }
0x1aae   :  { %v6636_v39 = vpop.xlane.xlu1 %6635  ;;  %v6630_v61 = vpop.xlane.xlu0 %6629  ;;  %v6718_v25 = vmul.f32 %v12774_v43, %v14563_v22 }
0x1aaf   :  { %12779 = vrcp.f32 %v6636_v39 }
0x1ab0   :  { %12781 = vrcp.f32 %v6630_v61 }
0x1ab1   :  { %v12776_v45 = vpop.eup %12775 }
0x1ab2   :  { %v6719_v60 = vmul.f32 %v12776_v45, %v14568_v36  ;;  %v6639_v40 = vpop.xlane.xlu1 %6638 }
0x1ab3   :  { %12783 = vrcp.f32 %v6639_v40 }
0x1ab4   :  { %v12258_v15 = vpack.c.bf16 %v6719_v60, %v6718_v25 }
0x1ab5   :  { %v12778_v50 = vpop.eup %12777 }
0x1ab6   :  { %12260 = vmatpush3.bf16.xpose.msk.msra.mxu1 %vm13426_vm4, %v12258_v15  ;;  %v6721_v32 = vmul.f32 %v12778_v50, %v14573_v2  ;;  %v6642_v2 = vpop.xlane.xlu0 %6641  ;;  %v6645_v27 = vpop.xlane.xlu1 %6644 }
0x1ab7   :  { %11941 = vmatprep.subr.mxu1 %v12965_v7  ;;  %12785 = vrcp.f32 %v6645_v27 }
0x1ab8   :  { %12787 = vrcp.f32 %v6642_v2 }
0x1ab9   :  { %v12780_v17 = vpop.eup %12779 }
0x1aba   :  { %v12782_v8 = vpop.eup %12781  ;;  %v6722_v18 = vmul.f32 %v12780_v17, %v14580_v48  ;;  %v6651_v48 = vpop.xlane.xlu0 %6650 }
0x1abb   :  { %v6720_v47 = vmul.f32 %v12782_v8, %v14577_v46 }
0x1abc   :  { %v12262_v22 = vpack.c.bf16 %v6722_v18, %v6721_v32 }
0x1abd   :  { %v12784_v36 = vpop.eup %12783 }
0x1abe   :  { %11942 = vmatpush3.xpose.msk.msra.mxu1 %vm1263_vm13, %v6720_v47  ;;  %12264 = vmatpush3.bf16.xpose.msk.msra.mxu0 %vm13426_vm4, %v12262_v22  ;;  %v6723_v30 = vmul.f32 %v12784_v36, %v14590_v38  ;;  %v6654_v11 = vpop.xlane.xlu1 %6653 }
0x1abf   :  { %11950 = vmatprep.subr.mxu0 %v12965_v7  ;;  %12265 = vmatprep.subr.bf16.mxu1 %v12968_v24  ;;  %v6648_v46 = vpop.xlane.xlu0 %6647  ;;  %12789 = vrcp.f32 %v6654_v11 }
0x1ac0   :  { %12791 = vrcp.f32 %v6651_v48 }
0x1ac1   :  { %v12786_v16 = vpop.eup %12785  ;;  %12793 = vrcp.f32 %v6648_v46 }
0x1ac2   :  { %v6657_v21 = vpop.xlane.xlu1 %6656  ;;  %v12788_v5 = vpop.eup %12787  ;;  %v6725_v12 = vmul.f32 %v12786_v16, %v14597_v26 }
0x1ac3   :  { %v6724_v61 = vmul.f32 %v12788_v5, %v14586_v28 }
0x1ac5   :  { %v12266_v40 = vpack.c.bf16 %v6725_v12, %v6724_v61  ;;  %v12427_v61 = vld [vmem:[%s15553_s3 + $0x40] sm:$0xff]  }
0x1ac6   :  { %11951 = vmatpush3.xpose.msk.msra.mxu0 %vm1263_vm13, %v6723_v30  ;;  %v6660_v58 = vpop.xlane.xlu0 %6659 }
0x1ac7   :  { %12269 = vmatprep.subr.bf16.mxu0 %v12968_v24 }
0x1ac9   :  { %v12790_v39 = vpop.eup %12789 }
0x1aca   :  { %v6663_v41 = vpop.xlane.xlu1 %6662  ;;  %v12792_v43 = vpop.eup %12791  ;;  %v6728_v45 = vmul.f32 %v12790_v39, %v14607_v44 }
0x1acb   :  { %12795 = vrcp.f32 %v6663_v41  ;;  %v6727_v15 = vmul.f32 %v12792_v43, %v14602_v10  ;;  %v12794_v28 = vpop.eup %12793 }
0x1acc   :  { %12797 = vrcp.f32 %v6660_v58  ;;  %v6726_v47 = vmul.f32 %v12794_v28, %v14609_v1 }
0x1acd   :  { %12799 = vrcp.f32 %v6657_v21  ;;  %v12270_v44 = vpack.c.bf16 %v6728_v45, %v6727_v15  ;;  %v12429_v15 = vld [vmem:[%s15553_s3 + $0x50] sm:$0xff]  }
0x1ad2   :  { %v6669_v3 = vpop.xlane.xlu0 %6668 }
0x1ad5   :  { %v12796_v17 = vpop.eup %12795 }
0x1ad6   :  { %v6672_v20 = vpop.xlane.xlu1 %6671  ;;  %v12798_v10 = vpop.eup %12797  ;;  %v6731_v32 = vmul.f32 %v12796_v17, %v14626_v35 }
0x1ad7   :  { %v6666_v51 = vpop.xlane.xlu0 %6665  ;;  %12801 = vrcp.f32 %v6672_v20  ;;  %v12800_v8 = vpop.eup %12799  ;;  %v6730_v30 = vmul.f32 %v12798_v10, %v14620_v31 }
0x1ad8   :  { %12803 = vrcp.f32 %v6669_v3  ;;  %v6729_v46 = vmul.f32 %v12800_v8, %v14615_v42 }
0x1ad9   :  { %12805 = vrcp.f32 %v6666_v51  ;;  %v12274_v35 = vpack.c.bf16 %v6731_v32, %v6730_v30 }
0x1ada   :  { %v6675_v25 = vpop.xlane.xlu1 %6674 }
0x1ade   :  { %v6678_v33 = vpop.xlane.xlu0 %6677 }
0x1ae1   :  { %v12802_v36 = vpop.eup %12801 }
0x1ae2   :  { %v6681_v26 = vpop.xlane.xlu1 %6680  ;;  %v12804_v2 = vpop.eup %12803  ;;  %v6734_v48 = vmul.f32 %v12802_v36, %v14637_v37 }
0x1ae3   :  { %12807 = vrcp.f32 %v6681_v26  ;;  %v6733_v1 = vmul.f32 %v12804_v2, %v14632_v23  ;;  %v12806_v58 = vpop.eup %12805 }
0x1ae4   :  { %12809 = vrcp.f32 %v6678_v33  ;;  %v6732_v51 = vmul.f32 %v12806_v58, %v14639_v59 }
0x1ae5   :  { %12811 = vrcp.f32 %v6675_v25  ;;  %v12278_v37 = vpack.c.bf16 %v6734_v48, %v6733_v1 }
0x1aea   :  { %v6687_v38 = vpop.xlane.xlu0 %6686 }
0x1aed   :  { %v12808_v42 = vpop.eup %12807 }
0x1aee   :  { %v6690_v18 = vpop.xlane.xlu1 %6689  ;;  %v12810_v23 = vpop.eup %12809  ;;  %v6737_v3 = vmul.f32 %v12808_v42, %v14656_v53 }
0x1aef   :  { %v6684_v56 = vpop.xlane.xlu0 %6683  ;;  %12813 = vrcp.f32 %v6690_v18  ;;  %v12812_v27 = vpop.eup %12811  ;;  %v6736_v41 = vmul.f32 %v12810_v23, %v14650_v34 }
0x1af0   :  { %12815 = vrcp.f32 %v6687_v38  ;;  %v6735_v20 = vmul.f32 %v12812_v27, %v14645_v49 }
0x1af1   :  { %12817 = vrcp.f32 %v6684_v56  ;;  %v12282_v5 = vpack.c.bf16 %v6737_v3, %v6736_v41 }
0x1af2   :  { %v6693_v11 = vpop.xlane.xlu1 %6692 }
0x1af3   :  { %12819 = vrcp.f32 %v6693_v11 }
0x1af9   :  { %v12814_v33 = vpop.eup %12813 }
0x1afa   :  { %v12816_v38 = vpop.eup %12815  ;;  %v6740_v16 = vmul.f32 %v12814_v33, %v14665_v14 }
0x1afb   :  { %v6739_v53 = vmul.f32 %v12816_v38, %v14661_v52  ;;  %v12818_v49 = vpop.eup %12817 }
0x1afc   :  { %v6738_v52 = vmul.f32 %v12818_v49, %v14667_v9  ;;  %v12428_v9 = vld [vmem:[%s15553_s3 + $0x48] sm:$0xff]  }
0x1afd   :  { %v12286_v34 = vpack.c.bf16 %v6740_v16, %v6739_v53  ;;  %v12820_v12 = vpop.eup %12819 }
0x1afe   :  { %v6741_v56 = vmul.f32 %v12820_v12, %v14673_v4 }
0x1b0f   :  { %v5494_v60 = vpop.trf.xlu0 }
0x1b10   :  { %11944 = vmatmul.mubr.msk.f32.vlgmr.msra.gmra.mrb[128].mxu1 %vm1263_vm13, %v5494_v60 }
0x1b11   :  { %12268 = vmatpush3.bf16.xpose.msk.msra.mxu1 %vm13426_vm4, %v12266_v40  ;;  %11961 = vmatprep.mubr.msk.f32.mxu1 %vm12966_vm2, %v12965_v7 }
0x1b12   :  { %11959 = vmatprep.subr.mxu1 %v12965_v7 }
0x1b13   :  { %v5495_v50 = vpop.trf.xlu0 }
0x1b14   :  { %11953 = vmatmul.mubr.msk.f32.vlgmr.msra.gmra.mrb[112].mxu0 %vm1263_vm13, %v5495_v50  ;;  %v12430_v50 = vld [vmem:[%s15553_s3 + $0x58] sm:$0xff]  }
0x1b15   :  { %12272 = vmatpush3.bf16.xpose.msk.msra.mxu0 %vm13426_vm4, %v12270_v44  ;;  %11970 = vmatprep.mubr.msk.f32.mxu0 %vm12966_vm2, %v12965_v7 }
0x1b16   :  { %11968 = vmatprep.subr.mxu0 %v12965_v7 }
0x1b17   :  { %v5496_v22 = vpop.trf.xlu0 }
0x1b19   :  { %11960 = vmatpush3.xpose.msk.msra.mxu1 %vm1263_vm13, %v6726_v47 }
0x1b1a   :  { %12273 = vmatprep.subr.bf16.mxu1 %v12968_v24 }
0x1b1b   :  { %v5497_v31 = vpop.trf.xlu0 }
0x1b1c   :  { %11962 = vmatmul.mubr.msk.f32.vlgmr.msra.gmra.mrb[130].mxu1 %vm1263_vm13, %v5496_v22 }
0x1b1d   :  { %11969 = vmatpush3.xpose.msk.msra.mxu0 %vm1263_vm13, %v6729_v46  ;;  %12276 = vmatpush3.bf16.xpose.msk.msra.mxu1 %vm13426_vm4, %v12274_v35  ;;  %v10791_v35 = vld [vmem:[%s15551_s1 + $0x43] ss:$0 sm:$0xff] }
0x1b1e   :  { %12277 = vmatprep.subr.bf16.mxu0 %v12968_v24  ;;  %11977 = vmatprep.subr.mxu1 %v12965_v7 }
0x1b1f   :  { %11979 = vmatprep.mubr.msk.f32.mxu1 %vm12966_vm2, %v12965_v7  ;;  %v5498_v21 = vpop.trf.xlu0 }
0x1b20   :  { %11971 = vmatmul.mubr.msk.f32.vlgmr.msra.gmra.mrb[114].mxu0 %vm1263_vm13, %v5497_v31 }
0x1b21   :  { %12280 = vmatpush3.bf16.xpose.msk.msra.mxu0 %vm13426_vm4, %v12278_v37  ;;  %11988 = vmatprep.mubr.msk.f32.mxu0 %vm12966_vm2, %v12965_v7 }
0x1b22   :  { %11986 = vmatprep.subr.mxu0 %v12965_v7 }
0x1b23   :  { %v5499_v59 = vpop.trf.xlu0 }
0x1b25   :  { %11978 = vmatpush3.xpose.msk.msra.mxu1 %vm1263_vm13, %v6732_v51 }
0x1b26   :  { %12281 = vmatprep.subr.bf16.mxu1 %v12968_v24 }
0x1b27   :  { %v5500_v14 = vpop.trf.xlu0 }
0x1b28   :  { %11980 = vmatmul.mubr.msk.f32.vlgmr.msra.gmra.mrb[132].mxu1 %vm1263_vm13, %v5498_v21 }
0x1b29   :  { %11987 = vmatpush3.xpose.msk.msra.mxu0 %vm1263_vm13, %v6735_v20  ;;  %12284 = vmatpush3.bf16.xpose.msk.msra.mxu1 %vm13426_vm4, %v12282_v5 }
0x1b2a   :  { %12285 = vmatprep.subr.bf16.mxu0 %v12968_v24  ;;  %11995 = vmatprep.subr.mxu1 %v12965_v7 }
0x1b2b   :  { %11997 = vmatprep.mubr.msk.f32.mxu1 %vm12966_vm2, %v12965_v7  ;;  %v5501_v39 = vpop.trf.xlu0 }
0x1b2c   :  { %11989 = vmatmul.mubr.msk.f32.vlgmr.msra.gmra.mrb[116].mxu0 %vm1263_vm13, %v5499_v59 }
0x1b2d   :  { %12288 = vmatpush3.bf16.xpose.msk.msra.mxu0 %vm13426_vm4, %v12286_v34  ;;  %12006 = vmatprep.mubr.msk.f32.mxu0 %vm12966_vm2, %v12965_v7 }
0x1b2e   :  { %12004 = vmatprep.subr.mxu0 %v12965_v7 }
0x1b31   :  { %11996 = vmatpush3.xpose.msk.msra.mxu1 %vm1263_vm13, %v6738_v52 }
0x1b32   :  { %12009 = vmatprep.subr.bf16.mxu1 %v12427_v61 }
0x1b34   :  { %11998 = vmatmul.mubr.msk.f32.vlgmr.msra.gmra.mrb[134].mxu1 %vm1263_vm13, %v5500_v14 }
0x1b35   :  { %12005 = vmatpush3.xpose.msk.msra.mxu0 %vm1263_vm13, %v6741_v56  ;;  %12010 = vmatpush3.bf16.msra.mxu1 %v12427_v61  ;;  %v12431_v61 = vld [vmem:[%s15554_s4 + $0x80] ss:$8 sps:$4 sm:$0xff]  }
0x1b36   :  { %12011 = vmatprep.subr.bf16.mxu1 %v12428_v9 }
0x1b38   :  { %12007 = vmatmul.mubr.msk.f32.vlgmr.msra.gmra.mrb[118].mxu0 %vm1263_vm13, %v5501_v39  ;;  %v12433_v39 = vld [vmem:[%s15554_s4 + $0x84] ss:$8 sps:$4 sm:$0xff]  }
0x1b39   :  { %7667 = vmatprep.mubr.bf16.mxu0 %v12964_v29  ;;  %12012 = vmatpush3.bf16.msra.mxu1 %v12428_v9  ;;  %v12436_v9 = vld [vmem:[%s15554_s4 + $0x94] ss:$8 sps:$4 sm:$0xff]  }
0x1b3a   :  { %12013 = vmatprep.subr.bf16.mxu1 %v12429_v15  ;;  %7635 = vmatprep.subr.bf16.mxu0 %v12433_v39 }
0x1b3b   :  { %7636 = vmatpush1.bf16.msra.mxu0 %v12431_v61 }
0x1b3c   :  { %7637 = vmatprep.subr.bf16.mxu0 %v12436_v9 }
0x1b3d   :  { %12014 = vmatpush3.bf16.msra.mxu1 %v12429_v15  ;;  %v12444_v15 = vld [vmem:[%s15555_s5 + $0x100] sm:$0xff]  }
0x1b3e   :  { %12015 = vmatprep.subr.bf16.mxu1 %v12430_v50 }
0x1b41   :  { %12016 = vmatpush3.bf16.msra.mxu1 %v12430_v50  ;;  %v12447_v50 = vld [vmem:[%s15555_s5 + $0x150] sm:$0xff]  }
0x1be3   :  { %v6820_v4 = vpop.f32.mrb[128].mxu1 }
0x1be4   :  { %7398 = vxpose.xlu1.b32.start [1/8] (short) (narrow) %v6820_v4, 24  ;;  %v11945_v43 = vpop.f32.mrb[129].mxu1  ;;  %v12434_v4 = vld [vmem:[%s15554_s4 + $0x90] ss:$8 sps:$4 sm:$0xff]  }
0x1be5   :  { %7638 = vmatpush1.bf16.msra.mxu0 %v12434_v4  ;;  %v12439_v43 = vld [vmem:[%s15554_s4 + $0xa4] ss:$8 sps:$4 sm:$0xff]  }
0x1be6   :  { %7639 = vmatprep.subr.bf16.mxu0 %v12439_v43 }
0x1be7   :  { %v6902_v45 = vpop.f32.mrb[112].mxu0 }
0x1be8   :  { %7399 = vxpose.xlu1.b32.cont [2/8] (short) (narrow) %v6902_v45, 24  ;;  %v11954_v25 = vpop.f32.mrb[113].mxu0  ;;  %v12437_v45 = vld [vmem:[%s15554_s4 + $0xa0] ss:$8 sps:$4 sm:$0xff]  }
0x1be9   :  { %7640 = vmatpush1.bf16.msra.mxu0 %v12437_v45  ;;  %v12440_v25 = vld [vmem:[%s15554_s4 + $0xb0] ss:$8 sps:$4 sm:$0xff]  }
0x1bef   :  { %v6984_v60 = vpop.f32.mrb[130].mxu1 }
0x1bf0   :  { %v11963_v40 = vpop.f32.mrb[131].mxu1  ;;  %7400 = vxpose.xlu1.b32.cont [3/8] (short) (narrow) %v6984_v60, 24  ;;  %v12442_v60 = vld [vmem:[%s15554_s4 + $0xb4] ss:$8 sps:$4 sm:$0xff]  }
0x1bf1   :  { %7641 = vmatprep.subr.bf16.mxu0 %v12442_v60  ;;  %v12443_v40 = vld [vmem:[%s15555_s5 + $0x140] sm:$0xff]  }
0x1bf2   :  { %7642 = vmatpush1.bf16.msra.mxu0 %v12440_v25  ;;  %11379 = vmatprep.subr.bf16.mxu1 %v12443_v40 }
0x1bf3   :  { %v7066_v28 = vpop.f32.mrb[114].mxu0 }
0x1bf4   :  { %v11972_v26 = vpop.f32.mrb[115].mxu0  ;;  %7401 = vxpose.xlu1.b32.cont [4/8] (short) (narrow) %v7066_v28, 24  ;;  %v12445_v28 = vld [vmem:[%s15555_s5 + $0x148] sm:$0xff]  }
0x1bf5   :  { %v12446_v26 = vld [vmem:[%s15555_s5 + $0x108] sm:$0xff]  }
0x1bfb   :  { %v7148_v44 = vpop.f32.mrb[132].mxu1 }
0x1bfc   :  { %v11981_v17 = vpop.f32.mrb[133].mxu1  ;;  %7402 = vxpose.xlu1.b32.cont [5/8] (short) (narrow) %v7148_v44, 24  ;;  %v12448_v44 = vld [vmem:[%s15555_s5 + $0x110] sm:$0xff]  }
0x1bfd   :  { %v12449_v17 = vld [vmem:[%s15555_s5 + $0x158] sm:$0xff]  }
0x1bff   :  { %v7230_v10 = vpop.f32.mrb[116].mxu0 }
0x1c00   :  { %v11990_v8 = vpop.f32.mrb[117].mxu0  ;;  %7403 = vxpose.xlu1.b32.cont [6/8] (short) (narrow) %v7230_v10, 24  ;;  %v12450_v10 = vld [vmem:[%s15555_s5 + $0x118] sm:$0xff]  }
0x1c01   :  { %v12451_v8 = vld [vmem:[%s15555_s5 + $0x160] sm:$0xff]  }
0x1c07   :  { %v7312_v32 = vpop.f32.mrb[134].mxu1 }
0x1c08   :  { %7404 = vxpose.xlu1.b32.cont [7/8] (short) (narrow) %v7312_v32, 24  ;;  %v11999_v18 = vpop.f32.mrb[135].mxu1  ;;  %v12452_v32 = vld [vmem:[%s15555_s5 + $0x120] sm:$0xff]  }
0x1c09   :  { %v12453_v18 = vld [vmem:[%s15555_s5 + $0x168] sm:$0xff]  }
0x1c0b   :  { %v7394_v47 = vpop.f32.mrb[118].mxu0 }
0x1c0c   :  { %7405 = vxpose.xlu1.b32.end [8/8] (short) (narrow) %v7394_v47, 24  ;;  %v12008_v22 = vpop.f32.mrb[119].mxu0 }
0x1c70   :  { %v7414_v36 = vpop.trf.xlu1 }
0x1c74   :  { %v7415_v30 = vpop.trf.xlu1 }
0x1c75   :  { %v7430_v2 = vpack.c.bf16 %v7415_v30, %v7414_v36 }
0x1c77   :  { %12017 = vmatprep.mubr.msk.bf16.mxu1 %vm64_vm0, %v7430_v2 }
0x1c78   :  { %v7416_v48 = vpop.trf.xlu1 }
0x1c79   :  { %v7431_v46 = vpack.c.bf16 %v7416_v48, %v7416_v48 }
0x1c7b   :  { %12018 = vmatmul.mubr.msk.bf16.vlgmr.msra.gmra.mrb[136].mxu1 %vm64_vm0, %v7431_v46 }
0x1c7c   :  { %11380 = vmatpush3.bf16.msra.mxu1 %v12444_v15 }
0x1c7d   :  { %11381 = vmatprep.subr.bf16.mxu1 %v12445_v28 }
0x1c80   :  { %11382 = vmatpush3.bf16.msra.mxu1 %v12446_v26 }
0x1c81   :  { %11383 = vmatprep.subr.bf16.mxu1 %v12447_v50 }
0x1c84   :  { %11384 = vmatpush3.bf16.msra.mxu1 %v12448_v44 }
0x1c85   :  { %11385 = vmatprep.subr.bf16.mxu1 %v12449_v17 }
0x1c88   :  { %11386 = vmatpush3.bf16.msra.mxu1 %v12450_v10 }
0x1c89   :  { %11387 = vmatprep.subr.bf16.mxu1 %v12451_v8 }
0x1c8c   :  { %11388 = vmatpush3.bf16.msra.mxu1 %v12452_v32 }
0x1c8d   :  { %11389 = vmatprep.subr.bf16.mxu1 %v12453_v18 }
0x1d4e   :  { %v12019_v1 = vpop.f32.mrb[136].mxu1 }
0x1d4f   :  { %v7505_v31 = vpop.f32.mrb[137].mxu1  ;;  %v7514_v58 = vadd.f32 %v12019_v1, %v10791_v35 }
0x1d50   :  { %v7506_v37 = vadd.f32 %v10791_v35, %v7505_v31  ;;  %v12020_v42 = vpop.f32.mrb[138].mxu1 }
0x1d51   :  { %v7508_v23 = vpop.f32.mrb[139].mxu1  ;;  %v14786_v11 = vadd.f32 %v7514_v58, %v14298_v54  ;;  %v10792_v58 = vld [vmem:[%s15551_s1 + $0x44] ss:$0 sm:$0xff] }
0x1d52   :  { %v14783_v27 = vadd.f32 %v7506_v37, %v14288_v62  ;;  %v7509_v3 = vadd.f32 %v10791_v35, %v7508_v23 }
0x1d53   :  { %v7528_v41 = vsel %vm71_vm1, %v14786_v11, 0.0 }
0x1d54   :  { %v14789_v51 = vadd.f32 %v7509_v3, %v14291_v13  ;;  %v7522_v21 = vsel %vm64_vm0, %v14783_v27, 0.0 }
0x1d55   :  { %7523 = vadd.xlane.f32.xlu0 %v7522_v21 }
0x1d56   :  { %v7525_v33 = vsel %vm64_vm0, %v14789_v51, 0.0 }
0x1d57   :  { %7526 = vadd.xlane.f32.xlu1 %v7525_v33  ;;  %v10793_v33 = vld [vmem:[%s15551_s1 + $0x45] ss:$0 sm:$0xff] }
0x1d59   :  { %7529 = vadd.xlane.f32.xlu0 %v7528_v41 }
0x1de2   :  { %v7524_v62 = vpop.xlane.xlu0 %7523 }
0x1de3   :  { %v7531_v38 = vmul.f32 0.015625, %v7524_v62 }
0x1de4   :  { %v7527_v16 = vpop.xlane.xlu1 %7526 }
0x1de5   :  { %v14798_v54 = vsub.f32 %v14783_v27, %v7531_v38  ;;  %v7532_v13 = vmul.f32 0.015625, %v7527_v16 }
0x1de6   :  { %v7530_v20 = vpop.xlane.xlu0 %7529 }
0x1de7   :  { %v14801_v5 = vsub.f32 %v14789_v51, %v7532_v13  ;;  %v7533_v53 = vmul.f32 0.015625, %v7530_v20  ;;  %v7537_v59 = vmul.f32 %v14798_v54, %v14798_v54 }
0x1de9   :  { %v14806_v34 = vsub.f32 %v14786_v11, %v7533_v53  ;;  %v7540_v49 = vsel %vm64_vm0, %v7537_v59, 0.0  ;;  %v7538_v52 = vmul.f32 %v14801_v5, %v14801_v5  ;;  %v12455_v59 = vld [vmem:[%s15555_s5 + $0x170] sm:$0xff]  }
0x1dea   :  { %7541 = vadd.xlane.f32.xlu1 %v7540_v49  ;;  %v12457_v49 = vld [vmem:[%s15555_s5 + $0x178] sm:$0xff]  }
0x1deb   :  { %v7543_v14 = vsel %vm64_vm0, %v7538_v52, 0.0  ;;  %v7539_v12 = vmul.f32 %v14806_v34, %v14806_v34  ;;  %v12458_v52 = vld [vmem:[%s15555_s5 + $0x138] sm:$0xff]  }
0x1dec   :  { %7544 = vadd.xlane.f32.xlu0 %v7543_v14  ;;  %v10794_v14 = vld [vmem:[%s15551_s1 + $0x46] ss:$8 sm:$0x3] }
0x1ded   :  { %v7546_v56 = vsel %vm71_vm1, %v7539_v12, 0.0  ;;  %v7582_v12 = vrot.slane %v10794_v14, %v13058_v57 }
0x1dee   :  { %7547 = vadd.xlane.f32.xlu1 %v7546_v56  ;;  %v7586_v56 = vrot.slane %v10794_v14, %v13415_v19 }
0x1e77   :  { %v7542_v47 = vpop.xlane.xlu1 %7541 }
0x1e78   :  { %v7549_v22 = vmul.f32 0.015625, %v7542_v47 }
0x1e79   :  { %v7545_v36 = vpop.xlane.xlu0 %7544 }
0x1e7a   :  { %v7552_v30 = vadd.f32 1e-05, %v7549_v22  ;;  %v7550_v2 = vmul.f32 0.015625, %v7545_v36 }
0x1e7b   :  { %v7548_v48 = vpop.xlane.xlu1 %7547 }
0x1e7c   :  { %12821 = vrsqrt.f32 %v7552_v30  ;;  %v7553_v46 = vadd.f32 1e-05, %v7550_v2  ;;  %v7551_v35 = vmul.f32 0.015625, %v7548_v48 }
0x1e7e   :  { %12823 = vrsqrt.f32 %v7553_v46  ;;  %v7554_v1 = vadd.f32 1e-05, %v7551_v35 }
0x1e80   :  { %12825 = vrsqrt.f32 %v7554_v1 }
0x1e86   :  { %v12822_v31 = vpop.eup %12821 }
0x1e87   :  { %v7558_v37 = vmul.f32 %v12822_v31, %v14798_v54  ;;  %v10795_v31 = vld [vmem:[%s15551_s1 + $0x47] ss:$0 sm:$0xff] }
0x1e88   :  { %v12824_v42 = vpop.eup %12823 }
0x1e89   :  { %v7561_v23 = vmul.f32 %v10792_v58, %v7558_v37  ;;  %v7559_v3 = vmul.f32 %v12824_v42, %v14801_v5  ;;  %v12454_v5 = vld [vmem:[%s15555_s5 + $0x128] sm:$0xff]  }
0x1e8a   :  { %v12826_v21 = vpop.eup %12825  ;;  %11390 = vmatpush3.bf16.msra.mxu1 %v12454_v5 }
0x1e8b   :  { %v7562_v41 = vmul.f32 %v10792_v58, %v7559_v3  ;;  %v7560_v62 = vmul.f32 %v12826_v21, %v14806_v34  ;;  %v7564_v38 = vadd.f32 %v10793_v33, %v7561_v23  ;;  %v12456_v34 = vld [vmem:[%s15555_s5 + $0x130] sm:$0xff]   ;;  %11391 = vmatprep.subr.bf16.mxu1 %v12455_v59 }
0x1e8d   :  { %v7565_v16 = vadd.f32 %v10793_v33, %v7562_v41  ;;  %v7563_v20 = vmul.f32 %v10792_v58, %v7560_v62 }
0x1e8e   :  { %11392 = vmatpush3.bf16.msra.mxu1 %v12456_v34 }
0x1e8f   :  { %v7567_v13 = vpack.c.bf16 %v7565_v16, %v7564_v38  ;;  %v7566_v54 = vadd.f32 %v10793_v33, %v7563_v20  ;;  %11393 = vmatprep.subr.bf16.mxu1 %v12457_v49 }
0x1e91   :  { %10900 = vmatmul.mubr.msk.bf16.vlgmr.msra.gmra.mrb[120].mxu0 %vm64_vm0, %v7567_v13  ;;  %v7568_v53 = vpack.c.bf16 %v7566_v54, %v7566_v54 }
0x1e92   :  { %7677 = vmatprep.mubr.bf16.mxu0 %v12964_v29  ;;  %11394 = vmatpush3.bf16.msra.mxu1 %v12458_v52 }
0x1e93   :  { %12032 = vmatprep.subr.mxu1 %v12965_v7 }
0x1e99   :  { %10901 = vmatmul.mubr.msk.bf16.gmra.mrb[124].mxu0 %vm64_vm0, %v7568_v53 }
0x1e9a   :  { %8035 = vmatprep.mubr.bf16.mxu0 %v12964_v29 }
0x1f64   :  { %v7669_v39 = vpop.f32.mrb[120].mxu0 }
0x1f65   :  { %v7670_v61 = vadd.f32 %v7669_v39, %v7582_v12  ;;  %v7671_v9 = vpop.f32.mrb[121].mxu0 }
0x1f66   :  { %v7672_v4 = vadd.f32 %v7671_v9, %v7586_v56  ;;  %v7673_v43 = vpop.f32.mrb[122].mxu0 }
0x1f67   :  { %v7674_v45 = vadd.f32 %v7673_v43, %v7582_v12  ;;  %v7675_v25 = vpop.f32.mrb[123].mxu0  ;;  %v7686_v40 = vmax.f32 %v7670_v61, 0.0 }
0x1f68   :  { %v7676_v60 = vadd.f32 %v7675_v25, %v7586_v56  ;;  %v7687_v28 = vmax.f32 %v7672_v4, 0.0  ;;  %v12459_v25 = vld [vmem:[%s15552_s2 + $0xc0] ss:$8 sps:$4 sm:$0xff]  }
0x1f69   :  { %v7688_v15 = vmax.f32 %v7674_v45, 0.0  ;;  %v12461_v45 = vld [vmem:[%s15552_s2 + $0xc4] ss:$8 sps:$4 sm:$0xff]  }
0x1f6a   :  { %v7689_v26 = vmax.f32 %v7676_v60, 0.0  ;;  %8003 = vmatprep.subr.bf16.mxu0 %v12461_v45  ;;  %v12464_v60 = vld [vmem:[%s15552_s2 + $0xd4] ss:$8 sps:$4 sm:$0xff]  }
0x1f6b   :  { %v7692_v50 = vpack.c.bf16 %v7688_v15, %v7686_v40  ;;  %8004 = vmatpush1.bf16.msra.mxu0 %v12459_v25  ;;  %v12462_v40 = vld [vmem:[%s15552_s2 + $0xd0] ss:$8 sps:$4 sm:$0xff]   ;;  %v12467_v15 = vld [vmem:[%s15552_s2 + $0xe4] ss:$8 sps:$4 sm:$0xff]  }
0x1f6c   :  { %v7693_v44 = vpack.c.bf16 %v7689_v26, %v7687_v28  ;;  %v7679_v17 = vpop.f32.mrb[124].mxu0  ;;  %8005 = vmatprep.subr.bf16.mxu0 %v12464_v60  ;;  %v12465_v28 = vld [vmem:[%s15552_s2 + $0xe0] ss:$8 sps:$4 sm:$0xff]   ;;  %v12470_v26 = vld [vmem:[%s15552_s2 + $0xf4] ss:$8 sps:$4 sm:$0xff]  }
0x1f6d   :  { %v7680_v10 = vadd.f32 %v7679_v17, %v7582_v12  ;;  %v7681_v8 = vpop.f32.mrb[125].mxu0 }
0x1f6e   :  { %v7682_v32 = vadd.f32 %v7681_v8, %v7586_v56  ;;  %v7683_v18 = vpop.f32.mrb[126].mxu0  ;;  %7857 = vmatprep.mubr.bf16.mxu1 %v7693_v44 }
0x1f6f   :  { %v7684_v47 = vpop.f32.mrb[127].mxu0  ;;  %7858 = vmatmul.mubr.bf16.vlgmr.msra.gmra.mrb[140].mxu1 %v7692_v50  ;;  %v7690_v36 = vmax.f32 %v7680_v10, 0.0  ;;  %8006 = vmatpush1.bf16.msra.mxu0 %v12462_v40  ;;  %v12468_v50 = vld [vmem:[%s15552_s2 + $0xf0] ss:$8 sps:$4 sm:$0xff]  }
0x1f70   :  { %v7691_v22 = vmax.f32 %v7682_v32, 0.0  ;;  %8007 = vmatprep.subr.bf16.mxu0 %v12467_v15 }
0x1f71   :  { %v7694_v2 = vpack.c.bf16 %v7690_v36, %v7690_v36 }
0x1f72   :  { %v7695_v30 = vpack.c.bf16 %v7691_v22, %v7691_v22 }
0x1f73   :  { %8008 = vmatpush1.bf16.msra.mxu0 %v12465_v28 }
0x1f74   :  { %7865 = vmatprep.mubr.bf16.mxu1 %v7695_v30  ;;  %8009 = vmatprep.subr.bf16.mxu0 %v12470_v26 }
0x1f77   :  { %7866 = vmatmul.mubr.bf16.gmra.mrb[144].mxu1 %v7694_v2  ;;  %8010 = vmatpush1.bf16.msra.mxu0 %v12468_v50  ;;  %v10950_v2 = vld [vmem:[%s15551_s1 + $0x60] ss:$0 sm:$0xff] }
0x1f78   :  { %12034 = vmatprep.mubr.msk.f32.mxu1 %vm12966_vm2, %v12965_v7  ;;  %12021 = vmatprep.subr.mxu0 %v12965_v7 }
0x2042   :  { %v11395_v48 = vpop.f32.mrb[140].mxu1 }
0x2043   :  { %v11396_v46 = vpop.f32.mrb[141].mxu1 }
0x2044   :  { %v11397_v35 = vadd.f32 %v11396_v46, %v11395_v48  ;;  %v11398_v1 = vpop.f32.mrb[142].mxu1 }
0x2045   :  { %v11399_v58 = vpop.f32.mrb[143].mxu1 }
0x2046   :  { %v7873_v37 = vadd.f32 %v11397_v35, %v14783_v27  ;;  %v11400_v42 = vadd.f32 %v11399_v58, %v11398_v1 }
0x2048   :  { %v14912_v23 = vadd.f32 %v10795_v31, %v7873_v37  ;;  %v7874_v3 = vadd.f32 %v11400_v42, %v14789_v51 }
0x204a   :  { %v14915_v21 = vadd.f32 %v10795_v31, %v7874_v3  ;;  %v11401_v33 = vpop.f32.mrb[144].mxu1  ;;  %v7890_v41 = vsel %vm64_vm0, %v14912_v23, 0.0 }
0x204b   :  { %v11402_v62 = vpop.f32.mrb[145].mxu1  ;;  %7891 = vadd.xlane.f32.xlu0 %v7890_v41 }
0x204c   :  { %v11403_v38 = vadd.f32 %v11402_v62, %v11401_v33  ;;  %v11404_v16 = vpop.f32.mrb[146].mxu1  ;;  %v7893_v13 = vsel %vm64_vm0, %v14915_v21, 0.0 }
0x204d   :  { %v11405_v20 = vpop.f32.mrb[147].mxu1  ;;  %7894 = vadd.xlane.f32.xlu1 %v7893_v13  ;;  %v14971_v13 = vld [vmem:[%s15551_s1 + $0x62] ss:$8 sm:$0x3] }
0x204e   :  { %v7875_v27 = vadd.f32 %v11403_v38, %v14786_v11  ;;  %v7950_v20 = vrot.slane %v14971_v13, %v13058_v57 }
0x2050   :  { %v14922_v54 = vadd.f32 %v10795_v31, %v7875_v27  ;;  %v10951_v31 = vld [vmem:[%s15551_s1 + $0x61] ss:$0 sm:$0xff] }
0x2052   :  { %v7896_v51 = vsel %vm71_vm1, %v14922_v54, 0.0 }
0x2053   :  { %7897 = vadd.xlane.f32.xlu0 %v7896_v51 }
0x20d8   :  { %v7892_v53 = vpop.xlane.xlu0 %7891 }
0x20d9   :  { %v7899_v5 = vmul.f32 0.015625, %v7892_v53 }
0x20da   :  { %v7895_v59 = vpop.xlane.xlu1 %7894 }
0x20db   :  { %v7902_v34 = vsub.f32 %v14912_v23, %v7899_v5  ;;  %v7900_v49 = vmul.f32 0.015625, %v7895_v59 }
0x20dd   :  { %v7903_v52 = vsub.f32 %v14915_v21, %v7900_v49  ;;  %v7905_v14 = vmul.f32 %v7902_v34, %v7902_v34 }
0x20df   :  { %v7908_v12 = vsel %vm64_vm0, %v7905_v14, 0.0  ;;  %v7906_v56 = vmul.f32 %v7903_v52, %v7903_v52 }
0x20e0   :  { %7909 = vadd.xlane.f32.xlu1 %v7908_v12  ;;  %v7898_v11 = vpop.xlane.xlu0 %7897 }
0x20e1   :  { %v7901_v39 = vmul.f32 0.015625, %v7898_v11  ;;  %v7911_v61 = vsel %vm64_vm0, %v7906_v56, 0.0 }
0x20e2   :  { %7912 = vadd.xlane.f32.xlu0 %v7911_v61 }
0x20e3   :  { %v7904_v9 = vsub.f32 %v14922_v54, %v7901_v39 }
0x20e5   :  { %v7907_v4 = vmul.f32 %v7904_v9, %v7904_v9 }
0x20e7   :  { %v7914_v43 = vsel %vm71_vm1, %v7907_v4, 0.0 }
0x20e8   :  { %7915 = vadd.xlane.f32.xlu1 %v7914_v43 }
0x216d   :  { %v7910_v44 = vpop.xlane.xlu1 %7909 }
0x216e   :  { %v7917_v17 = vmul.f32 0.015625, %v7910_v44 }
0x216f   :  { %v7913_v10 = vpop.xlane.xlu0 %7912 }
0x2170   :  { %v7920_v8 = vadd.f32 1e-05, %v7917_v17  ;;  %v7918_v32 = vmul.f32 0.015625, %v7913_v10 }
0x2172   :  { %12827 = vrsqrt.f32 %v7920_v8  ;;  %v7921_v18 = vadd.f32 1e-05, %v7918_v32 }
0x2174   :  { %12829 = vrsqrt.f32 %v7921_v18 }
0x2175   :  { %v7916_v47 = vpop.xlane.xlu1 %7915 }
0x2176   :  { %v7919_v22 = vmul.f32 0.015625, %v7916_v47 }
0x2178   :  { %v7922_v36 = vadd.f32 1e-05, %v7919_v22 }
0x217a   :  { %12831 = vrsqrt.f32 %v7922_v36 }
0x217c   :  { %v12828_v30 = vpop.eup %12827 }
0x217d   :  { %v7926_v48 = vmul.f32 %v12828_v30, %v7902_v34 }
0x217e   :  { %v12830_v46 = vpop.eup %12829 }
0x217f   :  { %v7929_v35 = vmul.f32 %v10950_v2, %v7926_v48  ;;  %v7927_v1 = vmul.f32 %v12830_v46, %v7903_v52 }
0x2181   :  { %v7930_v58 = vmul.f32 %v10950_v2, %v7927_v1  ;;  %v7932_v37 = vadd.f32 %v10951_v31, %v7929_v35 }
0x2183   :  { %v7933_v42 = vadd.f32 %v10951_v31, %v7930_v58 }
0x2184   :  { %v12832_v3 = vpop.eup %12831 }
0x2185   :  { %v7935_v33 = vpack.c.bf16 %v7933_v42, %v7932_v37  ;;  %v7928_v41 = vmul.f32 %v12832_v3, %v7904_v9 }
0x2187   :  { %10974 = vmatmul.mubr.msk.bf16.vlgmr.msra.gmra.mrb[128].mxu0 %vm64_vm0, %v7935_v33  ;;  %v7931_v62 = vmul.f32 %v10950_v2, %v7928_v41 }
0x2188   :  { %8045 = vmatprep.mubr.bf16.mxu0 %v12964_v29 }
0x2189   :  { %v7934_v38 = vadd.f32 %v10951_v31, %v7931_v62 }
0x218b   :  { %v7936_v16 = vpack.c.bf16 %v7934_v38, %v7934_v38 }
0x218f   :  { %10975 = vmatmul.mubr.msk.bf16.gmra.mrb[132].mxu0 %vm64_vm0, %v7936_v16 }
0x2190   :  { %12023 = vmatprep.mubr.msk.f32.mxu0 %vm12966_vm2, %v12965_v7 }
0x225a   :  { %v8037_v27 = vpop.f32.mrb[128].mxu0 }
0x225b   :  { %v8038_v51 = vadd.f32 %v8037_v27, %v7950_v20  ;;  %v14975_v53 = vpop.f32.mrb[129].mxu0 }
0x225c   :  { %v8041_v5 = vpop.f32.mrb[130].mxu0 }
0x225d   :  { %v14977_v59 = vpop.f32.mrb[131].mxu0  ;;  %8054 = vxpose.xlu0.b32.start [1/3] (short) %v8038_v51, 128  ;;  %v8042_v34 = vadd.f32 %v8041_v5, %v7950_v20 }
0x2261   :  { %8055 = vxpose.xlu0.b32.cont [2/3] (short) %v8042_v34, 128 }
0x2262   :  { %v8047_v49 = vpop.f32.mrb[132].mxu0 }
0x2263   :  { %v8048_v52 = vadd.f32 %v8047_v49, %v7950_v20  ;;  %v14979_v14 = vpop.f32.mrb[133].mxu0 }
0x2264   :  { %v8051_v12 = vpop.f32.mrb[134].mxu0 }
0x2265   :  { %v8052_v56 = vpop.f32.mrb[135].mxu0  ;;  %8056 = vxpose.xlu0.b32.end [3/3] (short) %v8048_v52, 128 }
0x22dd   :  { %v8070_v11 = vpop.trf.xlu0 }
0x22de   :  { %8118 = vxpose.xlu1.b32.start.end [1/1] (short) (narrow) %v8070_v11, 24 }
0x22e1   :  { %v8071_v39 = vpop.trf.xlu0 }
0x22e2   :  { %8239 = vxpose.xlu0.b32.start.end [1/1] (short) (narrow) %v8071_v39, 24 }
0x22e5   :  { %v8072_v61 = vpop.trf.xlu0 }
0x22e7   :  { %8360 = vxpose.xlu1.b32.start.end [1/1] (short) (narrow) %v8072_v61, 24 }
0x22e9   :  { %v8073_v9 = vpop.trf.xlu0 }
0x22ed   :  { %v8074_v4 = vpop.trf.xlu0 }
0x22f0   :  { %8481 = vxpose.xlu1.b32.start.end [1/1] (short) (narrow) %v8073_v9, 24 }
0x22f1   :  { %v8075_v43 = vpop.trf.xlu0 }
0x22f5   :  { %v8076_v45 = vpop.trf.xlu0 }
0x22f9   :  { %8602 = vxpose.xlu1.b32.start.end [1/1] (short) (narrow) %v8074_v4, 24  ;;  %v8077_v25 = vpop.trf.xlu0 }
0x22fd   :  { %v8078_v60 = vpop.trf.xlu0 }
0x22fe   :  { %12022 = vmatpush3.msra.mxu0 %v8078_v60 }
0x22ff   :  { %12043 = vmatprep.subr.mxu0 %v12965_v7 }
0x2301   :  { %v8079_v40 = vpop.trf.xlu0 }
0x2302   :  { %8723 = vxpose.xlu1.b32.start.end [1/1] (short) (narrow) %v8075_v43, 24  ;;  %12033 = vmatpush3.msra.mxu1 %v8079_v40 }
0x2303   :  { %12054 = vmatprep.subr.mxu1 %v12965_v7 }
0x2305   :  { %v8080_v15 = vpop.trf.xlu0 }
0x2309   :  { %v8081_v28 = vpop.trf.xlu0 }
0x230b   :  { %8844 = vxpose.xlu1.b32.start.end [1/1] (short) (narrow) %v8076_v45, 24 }
0x230d   :  { %v8082_v26 = vpop.trf.xlu0 }
0x2311   :  { %v8083_v50 = vpop.trf.xlu0 }
0x2314   :  { %8965 = vxpose.xlu1.b32.start.end [1/1] (short) (narrow) %v8077_v25, 24 }
0x2315   :  { %v8084_v44 = vpop.trf.xlu0 }
0x2319   :  { %v8085_v17 = vpop.trf.xlu0 }
0x235e   :  { %v8134_v10 = vpop.trf.xlu1 }
0x235f   :  { %12024 = vmatmul.mubr.msk.f32.vlgmr.msra.gmra.mrb[136].mxu0 %vm326_vm3, %v8134_v10 }
0x2360   :  { %12026 = vmatprep.mubr.msk.f32.mxu0 %vm12966_vm2, %v12965_v7  ;;  %12044 = vmatpush3.msra.mxu0 %v8080_v15 }
0x2361   :  { %12065 = vmatprep.subr.mxu0 %v12965_v7 }
0x2362   :  { %v8135_v8 = vpop.trf.xlu1  ;;  %v8255_v32 = vpop.trf.xlu0 }
0x2363   :  { %12027 = vmatmul.mubr.msk.f32.gmra.mrb[138].mxu0 %vm326_vm3, %v8135_v8  ;;  %12035 = vmatmul.mubr.msk.f32.vlgmr.msra.gmra.mrb[148].mxu1 %vm326_vm3, %v8255_v32 }
0x2364   :  { %12029 = vmatprep.mubr.msk.f32.mxu0 %vm12966_vm2, %v12965_v7  ;;  %12037 = vmatprep.mubr.msk.f32.mxu1 %vm12966_vm2, %v12965_v7 }
0x2365   :  { %12055 = vmatpush3.msra.mxu1 %v8081_v28 }
0x2366   :  { %v8136_v18 = vpop.trf.xlu1  ;;  %v8256_v47 = vpop.trf.xlu0  ;;  %12076 = vmatprep.subr.mxu1 %v12965_v7 }
0x2367   :  { %12030 = vmatmul.mubr.msk.f32.gmra.mrb[140].mxu0 %vm326_vm3, %v8136_v18  ;;  %12038 = vmatmul.mubr.msk.f32.gmra.mrb[150].mxu1 %vm326_vm3, %v8256_v47 }
0x2368   :  { %12040 = vmatprep.mubr.msk.f32.mxu1 %vm12966_vm2, %v12965_v7  ;;  %12045 = vmatprep.mubr.msk.f32.mxu0 %vm12966_vm2, %v12965_v7 }
0x236a   :  { %v8376_v22 = vpop.trf.xlu1  ;;  %v8257_v36 = vpop.trf.xlu0 }
0x236b   :  { %12041 = vmatmul.mubr.msk.f32.gmra.mrb[152].mxu1 %vm326_vm3, %v8257_v36  ;;  %12046 = vmatmul.mubr.msk.f32.vlgmr.msra.gmra.mrb[142].mxu0 %vm326_vm3, %v8376_v22 }
0x236c   :  { %12048 = vmatprep.mubr.msk.f32.mxu0 %vm12966_vm2, %v12965_v7  ;;  %12066 = vmatpush3.msra.mxu0 %v8082_v26 }
0x236d   :  { %12056 = vmatprep.mubr.msk.f32.mxu1 %vm12966_vm2, %v12965_v7  ;;  %12087 = vmatprep.subr.mxu0 %v12965_v7 }
0x236e   :  { %v8377_v30 = vpop.trf.xlu1 }
0x236f   :  { %12049 = vmatmul.mubr.msk.f32.gmra.mrb[144].mxu0 %vm326_vm3, %v8377_v30 }
0x2370   :  { %12051 = vmatprep.mubr.msk.f32.mxu0 %vm12966_vm2, %v12965_v7 }
0x2372   :  { %v8378_v2 = vpop.trf.xlu1 }
0x2373   :  { %12052 = vmatmul.mubr.msk.f32.gmra.mrb[146].mxu0 %vm326_vm3, %v8378_v2 }
0x2374   :  { %12067 = vmatprep.mubr.msk.f32.mxu0 %vm12966_vm2, %v12965_v7 }
0x2376   :  { %v8497_v48 = vpop.trf.xlu1 }
0x2377   :  { %12057 = vmatmul.mubr.msk.f32.vlgmr.msra.gmra.mrb[154].mxu1 %vm326_vm3, %v8497_v48 }
0x2378   :  { %12077 = vmatpush3.msra.mxu1 %v8083_v50  ;;  %12059 = vmatprep.mubr.msk.f32.mxu1 %vm12966_vm2, %v12965_v7 }
0x2379   :  { %12098 = vmatprep.subr.mxu1 %v12965_v7 }
0x237a   :  { %v8498_v46 = vpop.trf.xlu1 }
0x237b   :  { %12060 = vmatmul.mubr.msk.f32.gmra.mrb[156].mxu1 %vm326_vm3, %v8498_v46 }
0x237c   :  { %12062 = vmatprep.mubr.msk.f32.mxu1 %vm12966_vm2, %v12965_v7 }
0x237e   :  { %v8499_v35 = vpop.trf.xlu1 }
0x237f   :  { %12063 = vmatmul.mubr.msk.f32.gmra.mrb[158].mxu1 %vm326_vm3, %v8499_v35 }
0x2380   :  { %12078 = vmatprep.mubr.msk.f32.mxu1 %vm12966_vm2, %v12965_v7 }
0x2382   :  { %v8618_v1 = vpop.trf.xlu1 }
0x2383   :  { %12068 = vmatmul.mubr.msk.f32.vlgmr.msra.gmra.mrb[148].mxu0 %vm326_vm3, %v8618_v1 }
0x2384   :  { %12088 = vmatpush3.msra.mxu0 %v8084_v44  ;;  %12070 = vmatprep.mubr.msk.f32.mxu0 %vm12966_vm2, %v12965_v7 }
0x2385   :  { %12289 = vmatprep.subr.bf16.mxu0 %v12968_v24 }
0x2386   :  { %v8619_v31 = vpop.trf.xlu1 }
0x2387   :  { %12071 = vmatmul.mubr.msk.f32.gmra.mrb[150].mxu0 %vm326_vm3, %v8619_v31 }
0x2388   :  { %12073 = vmatprep.mubr.msk.f32.mxu0 %vm12966_vm2, %v12965_v7 }
0x238a   :  { %v8620_v58 = vpop.trf.xlu1 }
0x238b   :  { %12074 = vmatmul.mubr.msk.f32.gmra.mrb[152].mxu0 %vm326_vm3, %v8620_v58 }
0x238c   :  { %12089 = vmatprep.mubr.msk.f32.mxu0 %vm12966_vm2, %v12965_v7 }
0x238e   :  { %v8739_v37 = vpop.trf.xlu1 }
0x238f   :  { %12079 = vmatmul.mubr.msk.f32.vlgmr.msra.gmra.mrb[160].mxu1 %vm326_vm3, %v8739_v37 }
0x2390   :  { %12099 = vmatpush3.msra.mxu1 %v8085_v17  ;;  %12081 = vmatprep.mubr.msk.f32.mxu1 %vm12966_vm2, %v12965_v7 }
0x2391   :  { %12293 = vmatprep.subr.bf16.mxu1 %v12968_v24 }
0x2392   :  { %v8740_v42 = vpop.trf.xlu1 }
0x2393   :  { %12082 = vmatmul.mubr.msk.f32.gmra.mrb[162].mxu1 %vm326_vm3, %v8740_v42 }
0x2394   :  { %12084 = vmatprep.mubr.msk.f32.mxu1 %vm12966_vm2, %v12965_v7 }
0x2396   :  { %v8741_v3 = vpop.trf.xlu1 }
0x2397   :  { %12085 = vmatmul.mubr.msk.f32.gmra.mrb[164].mxu1 %vm326_vm3, %v8741_v3 }
0x2398   :  { %12100 = vmatprep.mubr.msk.f32.mxu1 %vm12966_vm2, %v12965_v7 }
0x239a   :  { %v8860_v33 = vpop.trf.xlu1 }
0x239b   :  { %12090 = vmatmul.mubr.msk.f32.vlgmr.msra.gmra.mrb[154].mxu0 %vm326_vm3, %v8860_v33 }
0x239c   :  { %12092 = vmatprep.mubr.msk.f32.mxu0 %vm12966_vm2, %v12965_v7 }
0x239e   :  { %v8861_v41 = vpop.trf.xlu1 }
0x239f   :  { %12093 = vmatmul.mubr.msk.f32.gmra.mrb[156].mxu0 %vm326_vm3, %v8861_v41 }
0x23a0   :  { %12095 = vmatprep.mubr.msk.f32.mxu0 %vm12966_vm2, %v12965_v7 }
0x23a2   :  { %v8862_v62 = vpop.trf.xlu1 }
0x23a3   :  { %12096 = vmatmul.mubr.msk.f32.gmra.mrb[158].mxu0 %vm326_vm3, %v8862_v62 }
0x23a4   :  { %12115 = vmatprep.mubr.msk.f32.mxu0 %vm12966_vm2, %v12965_v7 }
0x23a6   :  { %v8981_v38 = vpop.trf.xlu1 }
0x23a7   :  { %12101 = vmatmul.mubr.msk.f32.vlgmr.msra.gmra.mrb[166].mxu1 %vm326_vm3, %v8981_v38 }
0x23a8   :  { %12103 = vmatprep.mubr.msk.f32.mxu1 %vm12966_vm2, %v12965_v7 }
0x23aa   :  { %v8982_v16 = vpop.trf.xlu1 }
0x23ab   :  { %12104 = vmatmul.mubr.msk.f32.gmra.mrb[168].mxu1 %vm326_vm3, %v8982_v16 }
0x23ac   :  { %12106 = vmatprep.mubr.msk.f32.mxu1 %vm12966_vm2, %v12965_v7 }
0x23ae   :  { %v8983_v20 = vpop.trf.xlu1 }
0x23af   :  { %12107 = vmatmul.mubr.msk.f32.gmra.mrb[170].mxu1 %vm326_vm3, %v8983_v20 }
0x23b0   :  { %12124 = vmatprep.mubr.msk.f32.mxu1 %vm12966_vm2, %v12965_v7 }
0x2432   :  { %v8225_v27 = vpop.f32.mrb[136].mxu0 }
0x2433   :  { %v15062_v51 = vadd.f32 %v8225_v27, %v13165_v55  ;;  %v12025_v5 = vpop.f32.mrb[137].mxu0 }
0x2435   :  { %v9086_v34 = vsel %vm1263_vm13, %v15062_v51, -inf }
0x2436   :  { %9087 = vmax.xlane.f32.xlu0 %v9086_v34  ;;  %v8230_v49 = vpop.f32.mrb[138].mxu0  ;;  %v8346_v52 = vpop.f32.mrb[148].mxu1 }
0x2437   :  { %v15067_v12 = vadd.f32 %v8230_v49, %v13170_v63  ;;  %v12028_v56 = vpop.f32.mrb[139].mxu0  ;;  %v15070_v11 = vadd.f32 %v8346_v52, %v13165_v55  ;;  %v12036_v39 = vpop.f32.mrb[149].mxu1 }
0x2439   :  { %v9089_v61 = vsel %vm1263_vm13, %v15067_v12, -inf  ;;  %v9095_v60 = vsel %vm1263_vm13, %v15070_v11, -inf }
0x243a   :  { %9090 = vmax.xlane.f32.xlu1 %v9089_v61  ;;  %v8235_v9 = vpop.f32.mrb[140].mxu0  ;;  %v8351_v4 = vpop.f32.mrb[150].mxu1 }
0x243b   :  { %v15075_v43 = vadd.f32 %v8351_v4, %v13170_v63  ;;  %v12031_v45 = vpop.f32.mrb[141].mxu0  ;;  %v12039_v25 = vpop.f32.mrb[151].mxu1  ;;  %v15080_v40 = vadd.f32 %v8235_v9, %v13178_v6 }
0x243d   :  { %v9098_v15 = vsel %vm1263_vm13, %v15075_v43, -inf  ;;  %v9092_v8 = vsel %vm1270_vm15, %v15080_v40, -inf }
0x243e   :  { %v8467_v28 = vpop.f32.mrb[142].mxu0  ;;  %9096 = vmax.xlane.f32.xlu1 %v9095_v60  ;;  %9099 = vmax.xlane.f32.xlu0 %v9098_v15  ;;  %v8356_v26 = vpop.f32.mrb[152].mxu1 }
0x243f   :  { %v15085_v50 = vadd.f32 %v8356_v26, %v13178_v6  ;;  %v12047_v44 = vpop.f32.mrb[143].mxu0  ;;  %v12042_v17 = vpop.f32.mrb[153].mxu1  ;;  %v15088_v10 = vadd.f32 %v8467_v28, %v13165_v55 }
0x2441   :  { %v9101_v32 = vsel %vm1270_vm15, %v15085_v50, -inf  ;;  %v9104_v36 = vsel %vm1263_vm13, %v15088_v10, -inf }
0x2442   :  { %v8472_v18 = vpop.f32.mrb[144].mxu0  ;;  %9093 = vmax.xlane.f32.xlu1 %v9092_v8  ;;  %9102 = vmax.xlane.f32.xlu0 %v9101_v32 }
0x2443   :  { %v15095_v47 = vadd.f32 %v8472_v18, %v13170_v63  ;;  %v12050_v22 = vpop.f32.mrb[145].mxu0 }
0x2445   :  { %v9107_v30 = vsel %vm1263_vm13, %v15095_v47, -inf }
0x2446   :  { %v8477_v2 = vpop.f32.mrb[146].mxu0  ;;  %9105 = vmax.xlane.f32.xlu1 %v9104_v36  ;;  %9108 = vmax.xlane.f32.xlu0 %v9107_v30 }
0x2447   :  { %v12053_v48 = vpop.f32.mrb[147].mxu0  ;;  %v15105_v31 = vadd.f32 %v8477_v2, %v13178_v6 }
0x2449   :  { %v9110_v33 = vsel %vm1270_vm15, %v15105_v31, -inf }
0x244a   :  { %v8588_v46 = vpop.f32.mrb[154].mxu1 }
0x244b   :  { %v15102_v35 = vadd.f32 %v8588_v46, %v13165_v55  ;;  %v12058_v1 = vpop.f32.mrb[155].mxu1 }
0x244d   :  { %v9113_v58 = vsel %vm1263_vm13, %v15102_v35, -inf }
0x244e   :  { %9114 = vmax.xlane.f32.xlu1 %v9113_v58  ;;  %v8593_v37 = vpop.f32.mrb[156].mxu1 }
0x244f   :  { %v15110_v42 = vadd.f32 %v8593_v37, %v13170_v63  ;;  %v12061_v3 = vpop.f32.mrb[157].mxu1 }
0x2451   :  { %v9116_v41 = vsel %vm1263_vm13, %v15110_v42, -inf }
0x2452   :  { %9111 = vmax.xlane.f32.xlu1 %v9110_v33  ;;  %9117 = vmax.xlane.f32.xlu0 %v9116_v41  ;;  %v8598_v62 = vpop.f32.mrb[158].mxu1 }
0x2453   :  { %v15117_v38 = vadd.f32 %v8598_v62, %v13178_v6  ;;  %v12064_v16 = vpop.f32.mrb[159].mxu1 }
0x2455   :  { %v9119_v20 = vsel %vm1270_vm15, %v15117_v38, -inf }
0x2456   :  { %v8709_v27 = vpop.f32.mrb[148].mxu0  ;;  %9120 = vmax.xlane.f32.xlu0 %v9119_v20 }
0x2457   :  { %v15122_v5 = vadd.f32 %v8709_v27, %v13165_v55  ;;  %v12069_v34 = vpop.f32.mrb[149].mxu0 }
0x2459   :  { %v9122_v49 = vsel %vm1263_vm13, %v15122_v5, -inf }
0x245a   :  { %v8714_v52 = vpop.f32.mrb[150].mxu0  ;;  %9123 = vmax.xlane.f32.xlu1 %v9122_v49 }
0x245b   :  { %v15127_v56 = vadd.f32 %v8714_v52, %v13170_v63  ;;  %v12072_v39 = vpop.f32.mrb[151].mxu0 }
0x245d   :  { %v9125_v61 = vsel %vm1263_vm13, %v15127_v56, -inf }
0x245e   :  { %v8719_v9 = vpop.f32.mrb[152].mxu0  ;;  %9126 = vmax.xlane.f32.xlu0 %v9125_v61 }
0x245f   :  { %v12075_v4 = vpop.f32.mrb[153].mxu0  ;;  %v15135_v15 = vadd.f32 %v8719_v9, %v13178_v6 }
0x2461   :  { %v9128_v8 = vsel %vm1270_vm15, %v15135_v15, -inf }
0x2462   :  { %v8830_v45 = vpop.f32.mrb[160].mxu1 }
0x2463   :  { %v15132_v25 = vadd.f32 %v8830_v45, %v13165_v55  ;;  %v12080_v60 = vpop.f32.mrb[161].mxu1 }
0x2465   :  { %v9131_v28 = vsel %vm1263_vm13, %v15132_v25, -inf }
0x2466   :  { %9132 = vmax.xlane.f32.xlu1 %v9131_v28  ;;  %v8835_v26 = vpop.f32.mrb[162].mxu1 }
0x2467   :  { %v15140_v44 = vadd.f32 %v8835_v26, %v13170_v63  ;;  %v12083_v17 = vpop.f32.mrb[163].mxu1 }
0x2469   :  { %v9134_v32 = vsel %vm1263_vm13, %v15140_v44, -inf }
0x246a   :  { %9129 = vmax.xlane.f32.xlu1 %v9128_v8  ;;  %9135 = vmax.xlane.f32.xlu0 %v9134_v32  ;;  %v8840_v18 = vpop.f32.mrb[164].mxu1 }
0x246b   :  { %v15147_v22 = vadd.f32 %v8840_v18, %v13178_v6  ;;  %v12086_v36 = vpop.f32.mrb[165].mxu1 }
0x246d   :  { %v9137_v30 = vsel %vm1270_vm15, %v15147_v22, -inf }
0x246e   :  { %v8951_v2 = vpop.f32.mrb[154].mxu0  ;;  %9138 = vmax.xlane.f32.xlu0 %v9137_v30 }
0x246f   :  { %v15152_v48 = vadd.f32 %v8951_v2, %v13165_v55  ;;  %v12091_v46 = vpop.f32.mrb[155].mxu0 }
0x2471   :  { %v9140_v1 = vsel %vm1263_vm13, %v15152_v48, -inf }
0x2472   :  { %v8956_v58 = vpop.f32.mrb[156].mxu0  ;;  %9141 = vmax.xlane.f32.xlu1 %v9140_v1 }
0x2473   :  { %v15157_v37 = vadd.f32 %v8956_v58, %v13170_v63  ;;  %v12094_v3 = vpop.f32.mrb[157].mxu0 }
0x2475   :  { %v9143_v33 = vsel %vm1263_vm13, %v15157_v37, -inf }
0x2476   :  { %v8961_v41 = vpop.f32.mrb[158].mxu0  ;;  %9144 = vmax.xlane.f32.xlu0 %v9143_v33 }
0x2477   :  { %v12097_v62 = vpop.f32.mrb[159].mxu0  ;;  %v15165_v34 = vadd.f32 %v8961_v41, %v13178_v6 }
0x2479   :  { %v9146_v9 = vsel %vm1270_vm15, %v15165_v34, -inf }
0x247a   :  { %v9072_v16 = vpop.f32.mrb[166].mxu1 }
0x247b   :  { %v15162_v20 = vadd.f32 %v9072_v16, %v13165_v55  ;;  %v12102_v27 = vpop.f32.mrb[167].mxu1 }
0x247d   :  { %v9149_v49 = vsel %vm1263_vm13, %v15162_v20, -inf }
0x247e   :  { %9150 = vmax.xlane.f32.xlu1 %v9149_v49  ;;  %v9077_v52 = vpop.f32.mrb[168].mxu1 }
0x247f   :  { %v15170_v39 = vadd.f32 %v9077_v52, %v13170_v63  ;;  %v12105_v61 = vpop.f32.mrb[169].mxu1 }
0x2481   :  { %v9152_v55 = vsel %vm1263_vm13, %v15170_v39, -inf }
0x2482   :  { %9147 = vmax.xlane.f32.xlu1 %v9146_v9  ;;  %9153 = vmax.xlane.f32.xlu0 %v9152_v55  ;;  %v9082_v4 = vpop.f32.mrb[170].mxu1 }
0x2483   :  { %v15177_v45 = vadd.f32 %v9082_v4, %v13178_v6  ;;  %v12108_v60 = vpop.f32.mrb[171].mxu1 }
0x2485   :  { %v9155_v28 = vsel %vm1270_vm15, %v15177_v45, -inf }
0x2486   :  { %9156 = vmax.xlane.f32.xlu0 %v9155_v28 }
0x24c3   :  { %v9088_v63 = vpop.xlane.xlu0 %9087 }
0x24c4   :  { %v9158_v26 = vsub.f32 %v15062_v51, %v9088_v63 }
0x24c6   :  { %v9182_v17 = vmul.f32 1.442695, %v9158_v26 }
0x24c7   :  { %v9091_v8 = vpop.xlane.xlu1 %9090 }
0x24c8   :  { %12833 = vpow2.f32 %v9182_v17  ;;  %v9159_v32 = vsub.f32 %v15067_v12, %v9091_v8 }
0x24ca   :  { %v9184_v18 = vmul.f32 1.442695, %v9159_v32 }
0x24cb   :  { %v9097_v36 = vpop.xlane.xlu1 %9096  ;;  %v9100_v30 = vpop.xlane.xlu0 %9099 }
0x24cc   :  { %12835 = vpow2.f32 %v9184_v18  ;;  %v9161_v6 = vsub.f32 %v15070_v11, %v9097_v36  ;;  %v9162_v2 = vsub.f32 %v15075_v43, %v9100_v30 }
0x24ce   :  { %v9188_v46 = vmul.f32 1.442695, %v9161_v6  ;;  %v9190_v1 = vmul.f32 1.442695, %v9162_v2 }
0x24cf   :  { %v9094_v58 = vpop.xlane.xlu1 %9093  ;;  %v9103_v3 = vpop.xlane.xlu0 %9102 }
0x24d0   :  { %12837 = vpow2.f32 %v9188_v46  ;;  %v9160_v51 = vsub.f32 %v15080_v40, %v9094_v58  ;;  %v9163_v33 = vsub.f32 %v15085_v50, %v9103_v3 }
0x24d1   :  { %12839 = vpow2.f32 %v9190_v1 }
0x24d2   :  { %v15187_v41 = vpop.eup %12833  ;;  %v9186_v12 = vmul.f32 1.442695, %v9160_v51  ;;  %v9192_v62 = vmul.f32 1.442695, %v9163_v33 }
0x24d3   :  { %v9106_v16 = vpop.xlane.xlu1 %9105  ;;  %v9109_v27 = vpop.xlane.xlu0 %9108  ;;  %v9230_v11 = vsel %vm1263_vm13, %v15187_v41, 0.0 }
0x24d4   :  { %12841 = vpow2.f32 %v9186_v12  ;;  %v9164_v43 = vsub.f32 %v15088_v10, %v9106_v16  ;;  %v9165_v49 = vsub.f32 %v15095_v47, %v9109_v27  ;;  %9231 = vadd.xlane.f32.xlu1 %v9230_v11 }
0x24d5   :  { %12843 = vpow2.f32 %v9192_v62 }
0x24d6   :  { %v15193_v40 = vpop.eup %12835  ;;  %v9194_v50 = vmul.f32 1.442695, %v9164_v43  ;;  %v9196_v52 = vmul.f32 1.442695, %v9165_v49 }
0x24d7   :  { %v9233_v61 = vsel %vm1263_vm13, %v15193_v40, 0.0 }
0x24d8   :  { %12845 = vpow2.f32 %v9194_v50  ;;  %9234 = vadd.xlane.f32.xlu0 %v9233_v61 }
0x24d9   :  { %12847 = vpow2.f32 %v9196_v52 }
0x24da   :  { %v15197_v9 = vpop.eup %12837 }
0x24db   :  { %v15199_v55 = vpop.eup %12839  ;;  %v9115_v4 = vpop.xlane.xlu1 %9114  ;;  %v9239_v10 = vsel %vm1263_vm13, %v15197_v9, 0.0 }
0x24dc   :  { %v9167_v47 = vsub.f32 %v15102_v35, %v9115_v4  ;;  %9240 = vadd.xlane.f32.xlu1 %v9239_v10  ;;  %v9242_v60 = vsel %vm1263_vm13, %v15199_v55, 0.0 }
0x24dd   :  { %9243 = vadd.xlane.f32.xlu0 %v9242_v60 }
0x24de   :  { %v15206_v28 = vpop.eup %12841  ;;  %v9200_v63 = vmul.f32 1.442695, %v9167_v47 }
0x24df   :  { %v15208_v26 = vpop.eup %12843  ;;  %v9112_v17 = vpop.xlane.xlu1 %9111  ;;  %v9236_v32 = vsel %vm1270_vm15, %v15206_v28, 0.0 }
0x24e0   :  { %v9118_v8 = vpop.xlane.xlu0 %9117  ;;  %12849 = vpow2.f32 %v9200_v63  ;;  %v9166_v18 = vsub.f32 %v15105_v31, %v9112_v17  ;;  %9237 = vadd.xlane.f32.xlu1 %v9236_v32  ;;  %v9245_v36 = vsel %vm1270_vm15, %v15208_v26, 0.0 }
0x24e1   :  { %v9168_v35 = vsub.f32 %v15110_v42, %v9118_v8  ;;  %9246 = vadd.xlane.f32.xlu0 %v9245_v36 }
0x24e2   :  { %v15216_v30 = vpop.eup %12845  ;;  %v9198_v6 = vmul.f32 1.442695, %v9166_v18 }
0x24e3   :  { %v9202_v2 = vmul.f32 1.442695, %v9168_v35  ;;  %v15218_v46 = vpop.eup %12847  ;;  %v9248_v58 = vsel %vm1263_vm13, %v15216_v30, 0.0 }
0x24e4   :  { %v9121_v1 = vpop.xlane.xlu0 %9120  ;;  %12851 = vpow2.f32 %v9198_v6  ;;  %9249 = vadd.xlane.f32.xlu1 %v9248_v58  ;;  %v9251_v42 = vsel %vm1263_vm13, %v15218_v46, 0.0 }
0x24e5   :  { %v9169_v31 = vsub.f32 %v15117_v38, %v9121_v1  ;;  %12853 = vpow2.f32 %v9202_v2  ;;  %9252 = vadd.xlane.f32.xlu0 %v9251_v42 }
0x24e7   :  { %v9204_v3 = vmul.f32 1.442695, %v9169_v31  ;;  %v9124_v51 = vpop.xlane.xlu1 %9123 }
0x24e8   :  { %v9170_v33 = vsub.f32 %v15122_v5, %v9124_v51 }
0x24e9   :  { %12855 = vpow2.f32 %v9204_v3 }
0x24ea   :  { %v15226_v12 = vpop.eup %12849  ;;  %v9206_v62 = vmul.f32 1.442695, %v9170_v33 }
0x24eb   :  { %v9127_v16 = vpop.xlane.xlu0 %9126  ;;  %v9257_v27 = vsel %vm1263_vm13, %v15226_v12, 0.0 }
0x24ec   :  { %12857 = vpow2.f32 %v9206_v62  ;;  %v9171_v38 = vsub.f32 %v15127_v56, %v9127_v16  ;;  %9258 = vadd.xlane.f32.xlu1 %v9257_v27 }
0x24ee   :  { %v15231_v11 = vpop.eup %12851  ;;  %v9208_v43 = vmul.f32 1.442695, %v9171_v38 }
0x24ef   :  { %v15233_v49 = vpop.eup %12853  ;;  %v9254_v50 = vsel %vm1270_vm15, %v15231_v11, 0.0 }
0x24f0   :  { %12859 = vpow2.f32 %v9208_v43  ;;  %9255 = vadd.xlane.f32.xlu1 %v9254_v50  ;;  %v9260_v5 = vsel %vm1263_vm13, %v15233_v49, 0.0 }
0x24f1   :  { %9261 = vadd.xlane.f32.xlu0 %v9260_v5 }
0x24f3   :  { %v15239_v52 = vpop.eup %12855  ;;  %v9133_v61 = vpop.xlane.xlu1 %9132 }
0x24f4   :  { %v9263_v56 = vsel %vm1270_vm15, %v15239_v52, 0.0  ;;  %v9173_v4 = vsub.f32 %v15132_v25, %v9133_v61 }
0x24f5   :  { %9264 = vadd.xlane.f32.xlu0 %v9263_v56 }
0x24f6   :  { %v15244_v10 = vpop.eup %12857  ;;  %v9212_v47 = vmul.f32 1.442695, %v9173_v4 }
0x24f7   :  { %v9130_v60 = vpop.xlane.xlu1 %9129  ;;  %v9136_v63 = vpop.xlane.xlu0 %9135  ;;  %v9266_v17 = vsel %vm1263_vm13, %v15244_v10, 0.0 }
0x24f8   :  { %12861 = vpow2.f32 %v9212_v47  ;;  %v9172_v8 = vsub.f32 %v15135_v15, %v9130_v60  ;;  %v9174_v32 = vsub.f32 %v15140_v44, %v9136_v63  ;;  %9267 = vadd.xlane.f32.xlu1 %v9266_v17 }
0x24fa   :  { %v15250_v18 = vpop.eup %12859  ;;  %v9210_v35 = vmul.f32 1.442695, %v9172_v8  ;;  %v9214_v36 = vmul.f32 1.442695, %v9174_v32 }
0x24fb   :  { %v9139_v25 = vpop.xlane.xlu0 %9138  ;;  %v9269_v6 = vsel %vm1263_vm13, %v15250_v18, 0.0 }
0x24fc   :  { %12863 = vpow2.f32 %v9210_v35  ;;  %v9175_v2 = vsub.f32 %v15147_v22, %v9139_v25  ;;  %9270 = vadd.xlane.f32.xlu0 %v9269_v6 }
0x24fd   :  { %12865 = vpow2.f32 %v9214_v36 }
0x24fe   :  { %v9216_v1 = vmul.f32 1.442695, %v9175_v2 }
0x24ff   :  { %v9142_v58 = vpop.xlane.xlu1 %9141 }
0x2500   :  { %12867 = vpow2.f32 %v9216_v1  ;;  %v9176_v15 = vsub.f32 %v15152_v48, %v9142_v58 }
0x2502   :  { %v15256_v44 = vpop.eup %12861  ;;  %v9218_v31 = vmul.f32 1.442695, %v9176_v15  ;;  %v7954_v15 = vrot.slane %v14971_v13, %v13415_v19 }
0x2503   :  { %v9145_v42 = vpop.xlane.xlu0 %9144  ;;  %v9275_v3 = vsel %vm1263_vm13, %v15256_v44, 0.0 }
0x2504   :  { %12869 = vpow2.f32 %v9218_v31  ;;  %v9177_v51 = vsub.f32 %v15157_v37, %v9145_v42  ;;  %9276 = vadd.xlane.f32.xlu1 %v9275_v3  ;;  %v8040_v31 = vadd.f32 %v14975_v53, %v7954_v15  ;;  %v8044_v42 = vadd.f32 %v14977_v59, %v7954_v15 }
0x2505   :  { %v8050_v3 = vadd.f32 %v14979_v14, %v7954_v15 }
0x2506   :  { %v15261_v33 = vpop.eup %12863  ;;  %v9220_v22 = vmul.f32 1.442695, %v9177_v51 }
0x2507   :  { %v15263_v62 = vpop.eup %12865  ;;  %v9272_v16 = vsel %vm1270_vm15, %v15261_v33, 0.0 }
0x2508   :  { %12871 = vpow2.f32 %v9220_v22  ;;  %9273 = vadd.xlane.f32.xlu1 %v9272_v16  ;;  %v9278_v48 = vsel %vm1263_vm13, %v15263_v62, 0.0 }
0x2509   :  { %9279 = vadd.xlane.f32.xlu0 %v9278_v48 }
0x250a   :  { %v15269_v27 = vpop.eup %12867 }
0x250b   :  { %v9151_v38 = vpop.xlane.xlu1 %9150  ;;  %v9281_v37 = vsel %vm1270_vm15, %v15269_v27, 0.0 }
0x250c   :  { %v9179_v43 = vsub.f32 %v15162_v20, %v9151_v38 }
0x250d   :  { %9282 = vadd.xlane.f32.xlu0 %v9281_v37 }
0x250e   :  { %v15274_v50 = vpop.eup %12869  ;;  %v9224_v5 = vmul.f32 1.442695, %v9179_v43 }
0x250f   :  { %v9148_v61 = vpop.xlane.xlu1 %9147  ;;  %v9154_v56 = vpop.xlane.xlu0 %9153  ;;  %v9284_v4 = vsel %vm1263_vm13, %v15274_v50, 0.0 }
0x2510   :  { %12873 = vpow2.f32 %v9224_v5  ;;  %v9178_v47 = vsub.f32 %v15165_v34, %v9148_v61  ;;  %v9180_v60 = vsub.f32 %v15170_v39, %v9154_v56  ;;  %9285 = vadd.xlane.f32.xlu1 %v9284_v4 }
0x2512   :  { %v15280_v63 = vpop.eup %12871  ;;  %v9222_v17 = vmul.f32 1.442695, %v9178_v47  ;;  %v9226_v8 = vmul.f32 1.442695, %v9180_v60 }
0x2513   :  { %v9157_v20 = vpop.xlane.xlu0 %9156  ;;  %v9287_v32 = vsel %vm1263_vm13, %v15280_v63, 0.0 }
0x2514   :  { %12875 = vpow2.f32 %v9222_v17  ;;  %v9181_v35 = vsub.f32 %v15177_v45, %v9157_v20  ;;  %9288 = vadd.xlane.f32.xlu0 %v9287_v32 }
0x2515   :  { %12877 = vpow2.f32 %v9226_v8 }
0x2516   :  { %v9228_v36 = vmul.f32 1.442695, %v9181_v35 }
0x2518   :  { %12879 = vpow2.f32 %v9228_v36 }
0x251a   :  { %v15285_v25 = vpop.eup %12873 }
0x251b   :  { %v9293_v34 = vsel %vm1263_vm13, %v15285_v25, 0.0 }
0x251c   :  { %9294 = vadd.xlane.f32.xlu1 %v9293_v34 }
0x251e   :  { %v15289_v39 = vpop.eup %12875 }
0x251f   :  { %v15291_v6 = vpop.eup %12877  ;;  %v9290_v2 = vsel %vm1270_vm15, %v15289_v39, 0.0 }
0x2520   :  { %9291 = vadd.xlane.f32.xlu1 %v9290_v2  ;;  %v9296_v45 = vsel %vm1263_vm13, %v15291_v6, 0.0 }
0x2521   :  { %9297 = vadd.xlane.f32.xlu0 %v9296_v45 }
0x2522   :  { %v15297_v1 = vpop.eup %12879 }
0x2523   :  { %v9299_v58 = vsel %vm1270_vm15, %v15297_v1, 0.0 }
0x2525   :  { %9300 = vadd.xlane.f32.xlu0 %v9299_v58 }
0x2553   :  { %8086 = vxpose.xlu1.b32.start [1/3] (short) (narrow) %v8040_v31, 64 }
0x2557   :  { %8087 = vxpose.xlu1.b32.cont [2/3] (short) (narrow) %v8044_v42, 64 }
0x255b   :  { %8088 = vxpose.xlu1.b32.end [3/3] (short) (narrow) %v8050_v3, 64 }
0x2561   :  { %v9232_v51 = vpop.xlane.xlu1 %9231 }
0x2562   :  { %12881 = vrcp.f32 %v9232_v51 }
0x2565   :  { %v9235_v22 = vpop.xlane.xlu0 %9234 }
0x2566   :  { %12883 = vrcp.f32 %v9235_v22 }
0x2569   :  { %v9241_v16 = vpop.xlane.xlu1 %9240 }
0x256a   :  { %12885 = vrcp.f32 %v9241_v16  ;;  %v9244_v48 = vpop.xlane.xlu0 %9243 }
0x256b   :  { %12887 = vrcp.f32 %v9244_v48 }
0x256c   :  { %v12882_v37 = vpop.eup %12881 }
0x256d   :  { %v9238_v38 = vpop.xlane.xlu1 %9237  ;;  %v9326_v43 = vmul.f32 %v12882_v37, %v15187_v41 }
0x256e   :  { %12889 = vrcp.f32 %v9238_v38  ;;  %v9247_v53 = vpop.xlane.xlu0 %9246 }
0x256f   :  { %12891 = vrcp.f32 %v9247_v53 }
0x2570   :  { %v12884_v13 = vpop.eup %12883 }
0x2571   :  { %v9327_v59 = vmul.f32 %v12884_v13, %v15193_v40 }
0x2572   :  { %v9253_v32 = vpop.xlane.xlu0 %9252 }
0x2573   :  { %v12290_v14 = vpack.c.bf16 %v9327_v59, %v9326_v43 }
0x2574   :  { %v12886_v5 = vpop.eup %12885 }
0x2575   :  { %v12888_v61 = vpop.eup %12887  ;;  %v9329_v56 = vmul.f32 %v12886_v5, %v15197_v9  ;;  %12292 = vmatpush3.bf16.xpose.msk.msra.mxu0 %vm13426_vm4, %v12290_v14 }
0x2576   :  { %v9330_v4 = vmul.f32 %v12888_v61, %v15199_v55  ;;  %12113 = vmatprep.subr.mxu0 %v12965_v7  ;;  %v9250_v55 = vpop.xlane.xlu1 %9249 }
0x2577   :  { %12893 = vrcp.f32 %v9250_v55 }
0x2578   :  { %v12890_v47 = vpop.eup %12889  ;;  %v12294_v60 = vpack.c.bf16 %v9330_v4, %v9329_v56  ;;  %12895 = vrcp.f32 %v9253_v32 }
0x2579   :  { %v9328_v41 = vmul.f32 %v12890_v47, %v15206_v28  ;;  %v12892_v40 = vpop.eup %12891 }
0x257a   :  { %12296 = vmatpush3.bf16.xpose.msk.msra.mxu1 %vm13426_vm4, %v12294_v60  ;;  %v9331_v9 = vmul.f32 %v12892_v40, %v15208_v26  ;;  %v9259_v17 = vpop.xlane.xlu1 %9258 }
0x257b   :  { %12122 = vmatprep.subr.mxu1 %v12965_v7 }
0x257d   :  { %12114 = vmatpush3.xpose.msk.msra.mxu0 %vm1263_vm13, %v9328_v41 }
0x257e   :  { %12297 = vmatprep.subr.bf16.mxu0 %v12968_v24  ;;  %v9256_v8 = vpop.xlane.xlu1 %9255  ;;  %v9262_v28 = vpop.xlane.xlu0 %9261 }
0x257f   :  { %12897 = vrcp.f32 %v9262_v28 }
0x2580   :  { %12899 = vrcp.f32 %v9259_v17 }
0x2581   :  { %v12894_v58 = vpop.eup %12893  ;;  %12901 = vrcp.f32 %v9256_v8 }
0x2582   :  { %12123 = vmatpush3.xpose.msk.msra.mxu1 %vm1263_vm13, %v9331_v9  ;;  %v9265_v34 = vpop.xlane.xlu0 %9264  ;;  %v12896_v15 = vpop.eup %12895  ;;  %v9332_v42 = vmul.f32 %v12894_v58, %v15216_v30 }
0x2583   :  { %12301 = vmatprep.subr.bf16.mxu1 %v12968_v24  ;;  %v9333_v3 = vmul.f32 %v12896_v15, %v15218_v46 }
0x2585   :  { %v9268_v20 = vpop.xlane.xlu1 %9267  ;;  %v12298_v13 = vpack.c.bf16 %v9333_v3, %v9332_v42 }
0x2589   :  { %v9271_v45 = vpop.xlane.xlu0 %9270  ;;  %v12898_v22 = vpop.eup %12897 }
0x258a   :  { %12903 = vrcp.f32 %v9271_v45  ;;  %v12900_v16 = vpop.eup %12899  ;;  %v9336_v48 = vmul.f32 %v12898_v22, %v15233_v49  ;;  %v12473_v22 = vld [vmem:[%s15553_s3 + $0x70] sm:$0xff]  }
0x258b   :  { %12905 = vrcp.f32 %v9268_v20  ;;  %v9335_v53 = vmul.f32 %v12900_v16, %v15226_v12  ;;  %v12902_v30 = vpop.eup %12901 }
0x258c   :  { %12907 = vrcp.f32 %v9265_v34  ;;  %v9334_v5 = vmul.f32 %v12902_v30, %v15231_v11 }
0x258d   :  { %v12302_v49 = vpack.c.bf16 %v9336_v48, %v9335_v53 }
0x2591   :  { %v9277_v35 = vpop.xlane.xlu1 %9276 }
0x2594   :  { %v12904_v59 = vpop.eup %12903 }
0x2595   :  { %v9274_v36 = vpop.xlane.xlu1 %9273  ;;  %v12906_v12 = vpop.eup %12905  ;;  %v9339_v61 = vmul.f32 %v12904_v59, %v15250_v18 }
0x2596   :  { %v9280_v31 = vpop.xlane.xlu0 %9279  ;;  %v12908_v14 = vpop.eup %12907  ;;  %v9338_v60 = vmul.f32 %v12906_v12, %v15244_v10 }
0x2597   :  { %12909 = vrcp.f32 %v9280_v31  ;;  %v9337_v40 = vmul.f32 %v12908_v14, %v15239_v52 }
0x2598   :  { %12911 = vrcp.f32 %v9277_v35  ;;  %v12306_v11 = vpack.c.bf16 %v9339_v61, %v9338_v60 }
0x2599   :  { %12913 = vrcp.f32 %v9274_v36 }
0x259a   :  { %v9283_v38 = vpop.xlane.xlu0 %9282 }
0x259d   :  { %v9286_v2 = vpop.xlane.xlu1 %9285 }
0x25a1   :  { %v9289_v46 = vpop.xlane.xlu0 %9288  ;;  %v12910_v47 = vpop.eup %12909 }
0x25a2   :  { %12915 = vrcp.f32 %v9289_v46  ;;  %v12912_v41 = vpop.eup %12911  ;;  %v9342_v9 = vmul.f32 %v12910_v47, %v15263_v62 }
0x25a3   :  { %12917 = vrcp.f32 %v9286_v2  ;;  %v9341_v18 = vmul.f32 %v12912_v41, %v15256_v44  ;;  %v12914_v55 = vpop.eup %12913 }
0x25a4   :  { %12919 = vrcp.f32 %v9283_v38  ;;  %v9340_v8 = vmul.f32 %v12914_v55, %v15261_v33  ;;  %v12474_v38 = vld [vmem:[%s15553_s3 + $0x78] sm:$0xff]  }
0x25a5   :  { %v12310_v52 = vpack.c.bf16 %v9342_v9, %v9341_v18 }
0x25a9   :  { %v9295_v26 = vpop.xlane.xlu1 %9294 }
0x25ac   :  { %v12916_v62 = vpop.eup %12915 }
0x25ad   :  { %v9292_v51 = vpop.xlane.xlu1 %9291  ;;  %v12918_v44 = vpop.eup %12917  ;;  %v9345_v20 = vmul.f32 %v12916_v62, %v15280_v63 }
0x25ae   :  { %v9298_v56 = vpop.xlane.xlu0 %9297  ;;  %v12920_v17 = vpop.eup %12919  ;;  %v9344_v36 = vmul.f32 %v12918_v44, %v15274_v50 }
0x25af   :  { %12921 = vrcp.f32 %v9298_v56  ;;  %v9343_v2 = vmul.f32 %v12920_v17, %v15269_v27 }
0x25b0   :  { %12923 = vrcp.f32 %v9295_v26  ;;  %v12314_v26 = vpack.c.bf16 %v9345_v20, %v9344_v36 }
0x25b1   :  { %12925 = vrcp.f32 %v9292_v51 }
0x25b2   :  { %v9301_v32 = vpop.xlane.xlu0 %9300 }
0x25b3   :  { %12927 = vrcp.f32 %v9301_v32 }
0x25b9   :  { %v12922_v28 = vpop.eup %12921 }
0x25ba   :  { %v12924_v34 = vpop.eup %12923  ;;  %v9348_v45 = vmul.f32 %v12922_v28, %v15291_v6 }
0x25bb   :  { %v9347_v33 = vmul.f32 %v12924_v34, %v15285_v25  ;;  %v12926_v27 = vpop.eup %12925 }
0x25bc   :  { %v9346_v25 = vmul.f32 %v12926_v27, %v15289_v39  ;;  %v12475_v27 = vld [vmem:[%s15554_s4 + $0xc0] ss:$8 sps:$4 sm:$0xff]  }
0x25bd   :  { %v12318_v63 = vpack.c.bf16 %v9348_v45, %v9347_v33  ;;  %v12928_v6 = vpop.eup %12927 }
0x25be   :  { %v9349_v58 = vmul.f32 %v12928_v6, %v15297_v1  ;;  %v12483_v6 = vld [vmem:[%s15554_s4 + $0xe4] ss:$8 sps:$4 sm:$0xff]  }
0x25d3   :  { %v8102_v37 = vpop.trf.xlu1 }
0x25d4   :  { %12116 = vmatmul.mubr.msk.f32.vlgmr.msra.gmra.mrb[160].mxu0 %vm1263_vm13, %v8102_v37 }
0x25d5   :  { %12300 = vmatpush3.bf16.xpose.msk.msra.mxu0 %vm13426_vm4, %v12298_v13  ;;  %12133 = vmatprep.mubr.msk.f32.mxu0 %vm12966_vm2, %v12965_v7 }
0x25d6   :  { %12131 = vmatprep.subr.mxu0 %v12965_v7 }
0x25d7   :  { %v8103_v43 = vpop.trf.xlu1 }
0x25d8   :  { %12125 = vmatmul.mubr.msk.f32.vlgmr.msra.gmra.mrb[172].mxu1 %vm1263_vm13, %v8103_v43 }
0x25d9   :  { %12304 = vmatpush3.bf16.xpose.msk.msra.mxu1 %vm13426_vm4, %v12302_v49  ;;  %12142 = vmatprep.mubr.msk.f32.mxu1 %vm12966_vm2, %v12965_v7 }
0x25da   :  { %12140 = vmatprep.subr.mxu1 %v12965_v7 }
0x25db   :  { %v8104_v4 = vpop.trf.xlu1 }
0x25dd   :  { %12132 = vmatpush3.xpose.msk.msra.mxu0 %vm1263_vm13, %v9334_v5 }
0x25de   :  { %12305 = vmatprep.subr.bf16.mxu0 %v12968_v24 }
0x25df   :  { %v8105_v10 = vpop.trf.xlu1 }
0x25e0   :  { %12134 = vmatmul.mubr.msk.f32.vlgmr.msra.gmra.mrb[162].mxu0 %vm1263_vm13, %v8104_v4  ;;  %v10953_v4 = vld [vmem:[%s15551_s1 + $0x63] ss:$0 sm:$0xff] }
0x25e1   :  { %12141 = vmatpush3.xpose.msk.msra.mxu1 %vm1263_vm13, %v9337_v40  ;;  %12308 = vmatpush3.bf16.xpose.msk.msra.mxu0 %vm13426_vm4, %v12306_v11 }
0x25e2   :  { %12309 = vmatprep.subr.bf16.mxu1 %v12968_v24  ;;  %12149 = vmatprep.subr.mxu0 %v12965_v7 }
0x25e3   :  { %12151 = vmatprep.mubr.msk.f32.mxu0 %vm12966_vm2, %v12965_v7  ;;  %v8106_v35 = vpop.trf.xlu1 }
0x25e4   :  { %12143 = vmatmul.mubr.msk.f32.vlgmr.msra.gmra.mrb[174].mxu1 %vm1263_vm13, %v8105_v10 }
0x25e5   :  { %12312 = vmatpush3.bf16.xpose.msk.msra.mxu1 %vm13426_vm4, %v12310_v52  ;;  %12160 = vmatprep.mubr.msk.f32.mxu1 %vm12966_vm2, %v12965_v7 }
0x25e6   :  { %12158 = vmatprep.subr.mxu1 %v12965_v7 }
0x25e7   :  { %v8107_v50 = vpop.trf.xlu1 }
0x25e9   :  { %12150 = vmatpush3.xpose.msk.msra.mxu0 %vm1263_vm13, %v9340_v8 }
0x25ea   :  { %12313 = vmatprep.subr.bf16.mxu0 %v12968_v24 }
0x25ec   :  { %12152 = vmatmul.mubr.msk.f32.vlgmr.msra.gmra.mrb[164].mxu0 %vm1263_vm13, %v8106_v35 }
0x25ed   :  { %12159 = vmatpush3.xpose.msk.msra.mxu1 %vm1263_vm13, %v9343_v2  ;;  %12316 = vmatpush3.bf16.xpose.msk.msra.mxu0 %vm13426_vm4, %v12314_v26 }
0x25ee   :  { %12317 = vmatprep.subr.bf16.mxu1 %v12968_v24  ;;  %12167 = vmatprep.subr.mxu0 %v12965_v7  ;;  %v8108_v24 = vpop.trf.xlu1 }
0x25ef   :  { %12169 = vmatprep.mubr.msk.f32.mxu0 %vm12966_vm2, %v12965_v7 }
0x25f0   :  { %12161 = vmatmul.mubr.msk.f32.vlgmr.msra.gmra.mrb[176].mxu1 %vm1263_vm13, %v8107_v50 }
0x25f1   :  { %12320 = vmatpush3.bf16.xpose.msk.msra.mxu1 %vm13426_vm4, %v12318_v63  ;;  %12178 = vmatprep.mubr.msk.f32.mxu1 %vm12966_vm2, %v12965_v7  ;;  %v12477_v63 = vld [vmem:[%s15554_s4 + $0xc4] ss:$8 sps:$4 sm:$0xff]  }
0x25f2   :  { %12176 = vmatprep.subr.mxu1 %v12965_v7  ;;  %v8109_v15 = vpop.trf.xlu1  ;;  %v12471_v7 = vld [vmem:[%s15553_s3 + $0x60] sm:$0xff]  }
0x25f5   :  { %12168 = vmatpush3.xpose.msk.msra.mxu0 %vm1263_vm13, %v9346_v25  ;;  %v12480_v25 = vld [vmem:[%s15554_s4 + $0xd4] ss:$8 sps:$4 sm:$0xff]  }
0x25f6   :  { %12181 = vmatprep.subr.bf16.mxu0 %v12471_v7 }
0x25f8   :  { %12170 = vmatmul.mubr.msk.f32.vlgmr.msra.gmra.mrb[166].mxu0 %vm1263_vm13, %v8108_v24  ;;  %v12478_v24 = vld [vmem:[%s15554_s4 + $0xd0] ss:$8 sps:$4 sm:$0xff]  }
0x25f9   :  { %12177 = vmatpush3.xpose.msk.msra.mxu1 %vm1263_vm13, %v9349_v58  ;;  %12182 = vmatpush3.bf16.msra.mxu0 %v12471_v7  ;;  %v12481_v58 = vld [vmem:[%s15554_s4 + $0xe0] ss:$8 sps:$4 sm:$0xff]   ;;  %v12486_v7 = vld [vmem:[%s15554_s4 + $0xf4] ss:$8 sps:$4 sm:$0xff]  }
0x25fa   :  { %12183 = vmatprep.subr.bf16.mxu0 %v12472_v0  ;;  %10243 = vmatprep.subr.bf16.mxu1 %v12477_v63 }
0x25fc   :  { %12179 = vmatmul.mubr.msk.f32.vlgmr.msra.gmra.mrb[178].mxu1 %vm1263_vm13, %v8109_v15  ;;  %v12484_v15 = vld [vmem:[%s15554_s4 + $0xf0] ss:$8 sps:$4 sm:$0xff]  }
0x25fd   :  { %10275 = vmatprep.mubr.bf16.mxu1 %v12964_v29  ;;  %12184 = vmatpush3.bf16.msra.mxu0 %v12472_v0  ;;  %v12487_v0 = vld [vmem:[%s15555_s5 + $0x1c0] sm:$0xff]  }
0x25fe   :  { %12185 = vmatprep.subr.bf16.mxu0 %v12473_v22  ;;  %10244 = vmatpush1.bf16.msra.mxu1 %v12475_v27 }
0x25ff   :  { %10245 = vmatprep.subr.bf16.mxu1 %v12480_v25 }
0x2601   :  { %12186 = vmatpush3.bf16.msra.mxu0 %v12473_v22  ;;  %v12494_v22 = vld [vmem:[%s15555_s5 + $0x198] sm:$0xff]  }
0x2602   :  { %12187 = vmatprep.subr.bf16.mxu0 %v12474_v38  ;;  %10246 = vmatpush1.bf16.msra.mxu1 %v12478_v24 }
0x2603   :  { %10247 = vmatprep.subr.bf16.mxu1 %v12483_v6 }
0x2605   :  { %12188 = vmatpush3.bf16.msra.mxu0 %v12474_v38  ;;  %v12497_v38 = vld [vmem:[%s15555_s5 + $0x1e8] sm:$0xff]  }
0x2606   :  { %10248 = vmatpush1.bf16.msra.mxu1 %v12481_v58  ;;  %11477 = vmatprep.subr.bf16.mxu0 %v12487_v0 }
0x2607   :  { %10249 = vmatprep.subr.bf16.mxu1 %v12486_v7 }
0x260a   :  { %10250 = vmatpush1.bf16.msra.mxu1 %v12484_v15 }
0x26a7   :  { %v9428_v39 = vpop.f32.mrb[160].mxu0 }
0x26a8   :  { %10006 = vxpose.xlu0.b32.start [1/8] (short) (narrow) %v9428_v39, 24  ;;  %v12117_v1 = vpop.f32.mrb[161].mxu0  ;;  %v12488_v39 = vld [vmem:[%s15555_s5 + $0x180] sm:$0xff]  }
0x26a9   :  { %v12489_v1 = vld [vmem:[%s15555_s5 + $0x1c8] sm:$0xff]  }
0x26ab   :  { %v9510_v31 = vpop.f32.mrb[172].mxu1 }
0x26ac   :  { %10007 = vxpose.xlu0.b32.cont [2/8] (short) (narrow) %v9510_v31, 24  ;;  %v12126_v42 = vpop.f32.mrb[173].mxu1  ;;  %v12490_v31 = vld [vmem:[%s15555_s5 + $0x188] sm:$0xff]  }
0x26ad   :  { %v12491_v42 = vld [vmem:[%s15555_s5 + $0x1d0] sm:$0xff]  }
0x26b3   :  { %v9592_v3 = vpop.f32.mrb[162].mxu0 }
0x26b4   :  { %v12135_v51 = vpop.f32.mrb[163].mxu0  ;;  %10008 = vxpose.xlu0.b32.cont [3/8] (short) (narrow) %v9592_v3, 24  ;;  %v12492_v3 = vld [vmem:[%s15555_s5 + $0x190] sm:$0xff]  }
0x26b5   :  { %v12493_v51 = vld [vmem:[%s15555_s5 + $0x1d8] sm:$0xff]  }
0x26b7   :  { %v9674_v16 = vpop.f32.mrb[174].mxu1 }
0x26b8   :  { %v12144_v48 = vpop.f32.mrb[175].mxu1  ;;  %10009 = vxpose.xlu0.b32.cont [4/8] (short) (narrow) %v9674_v16, 24  ;;  %v12495_v16 = vld [vmem:[%s15555_s5 + $0x1e0] sm:$0xff]  }
0x26b9   :  { %v12496_v48 = vld [vmem:[%s15555_s5 + $0x1a0] sm:$0xff]  }
0x26bf   :  { %v9756_v37 = vpop.f32.mrb[164].mxu0 }
0x26c0   :  { %v12153_v13 = vpop.f32.mrb[165].mxu0  ;;  %10010 = vxpose.xlu0.b32.cont [5/8] (short) (narrow) %v9756_v37, 24 }
0x26c3   :  { %v9838_v53 = vpop.f32.mrb[176].mxu1 }
0x26c4   :  { %v12162_v30 = vpop.f32.mrb[177].mxu1  ;;  %10011 = vxpose.xlu0.b32.cont [6/8] (short) (narrow) %v9838_v53, 24 }
0x26cb   :  { %v9920_v46 = vpop.f32.mrb[166].mxu0 }
0x26cc   :  { %10012 = vxpose.xlu0.b32.cont [7/8] (short) (narrow) %v9920_v46, 24  ;;  %v12171_v43 = vpop.f32.mrb[167].mxu0 }
0x26cf   :  { %v10002_v49 = vpop.f32.mrb[178].mxu1 }
0x26d0   :  { %10013 = vxpose.xlu0.b32.end [8/8] (short) (narrow) %v10002_v49, 24  ;;  %v12180_v59 = vpop.f32.mrb[179].mxu1 }
0x2734   :  { %v10022_v12 = vpop.trf.xlu0 }
0x2738   :  { %v10023_v14 = vpop.trf.xlu0 }
0x2739   :  { %v10038_v5 = vpack.c.bf16 %v10023_v14, %v10022_v12 }
0x273b   :  { %12189 = vmatprep.mubr.msk.bf16.mxu0 %vm64_vm0, %v10038_v5  ;;  %v10954_v5 = vld [vmem:[%s15551_s1 + $0x64] ss:$0 sm:$0xff] }
0x273c   :  { %v10024_v61 = vpop.trf.xlu0 }
0x273d   :  { %v10039_v56 = vpack.c.bf16 %v10024_v61, %v10024_v61 }
0x273f   :  { %12190 = vmatmul.mubr.msk.bf16.vlgmr.msra.gmra.mrb[168].mxu0 %vm64_vm0, %v10039_v56 }
0x2740   :  { %11478 = vmatpush3.bf16.msra.mxu0 %v12488_v39 }
0x2741   :  { %11479 = vmatprep.subr.bf16.mxu0 %v12489_v1 }
0x2744   :  { %11480 = vmatpush3.bf16.msra.mxu0 %v12490_v31 }
0x2745   :  { %11481 = vmatprep.subr.bf16.mxu0 %v12491_v42 }
0x2748   :  { %11482 = vmatpush3.bf16.msra.mxu0 %v12492_v3 }
0x2749   :  { %11483 = vmatprep.subr.bf16.mxu0 %v12493_v51 }
0x274c   :  { %11484 = vmatpush3.bf16.msra.mxu0 %v12494_v22 }
0x274d   :  { %11485 = vmatprep.subr.bf16.mxu0 %v12495_v16 }
0x2750   :  { %11486 = vmatpush3.bf16.msra.mxu0 %v12496_v48 }
0x2751   :  { %11487 = vmatprep.subr.bf16.mxu0 %v12497_v38 }
0x2812   :  { %v12191_v47 = vpop.f32.mrb[168].mxu0 }
0x2813   :  { %v10113_v60 = vpop.f32.mrb[169].mxu0  ;;  %v10122_v41 = vadd.f32 %v12191_v47, %v10953_v4 }
0x2814   :  { %v10114_v40 = vadd.f32 %v10953_v4, %v10113_v60  ;;  %v12192_v9 = vpop.f32.mrb[170].mxu0 }
0x2815   :  { %v10116_v11 = vpop.f32.mrb[171].mxu0  ;;  %v15408_v55 = vadd.f32 %v10122_v41, %v14922_v54  ;;  %v10955_v41 = vld [vmem:[%s15551_s1 + $0x65] ss:$0 sm:$0xff] }
0x2816   :  { %v10127_v18 = vadd.f32 %v10114_v40, %v14912_v23  ;;  %v10117_v10 = vadd.f32 %v10953_v4, %v10116_v11 }
0x2817   :  { %v10136_v17 = vsel %vm71_vm1, %v15408_v55, 0.0 }
0x2818   :  { %v15411_v52 = vadd.f32 %v10117_v10, %v14915_v21  ;;  %v10130_v62 = vsel %vm64_vm0, %v10127_v18, 0.0 }
0x2819   :  { %10131 = vadd.xlane.f32.xlu1 %v10130_v62 }
0x281a   :  { %v10133_v44 = vsel %vm64_vm0, %v15411_v52, 0.0 }
0x281b   :  { %10134 = vadd.xlane.f32.xlu0 %v10133_v44 }
0x281d   :  { %10137 = vadd.xlane.f32.xlu1 %v10136_v17 }
0x28a6   :  { %v10132_v8 = vpop.xlane.xlu1 %10131 }
0x28a7   :  { %v10139_v23 = vmul.f32 0.015625, %v10132_v8  ;;  %v12498_v8 = vld [vmem:[%s15555_s5 + $0x1a8] sm:$0xff]  }
0x28a8   :  { %v10135_v20 = vpop.xlane.xlu0 %10134  ;;  %11488 = vmatpush3.bf16.msra.mxu0 %v12498_v8 }
0x28a9   :  { %v15418_v32 = vsub.f32 %v10127_v18, %v10139_v23  ;;  %v10140_v54 = vmul.f32 0.015625, %v10135_v20  ;;  %v12499_v23 = vld [vmem:[%s15555_s5 + $0x1f0] sm:$0xff]  }
0x28aa   :  { %v10138_v35 = vpop.xlane.xlu1 %10137  ;;  %v12500_v20 = vld [vmem:[%s15555_s5 + $0x1b0] sm:$0xff]   ;;  %11489 = vmatprep.subr.bf16.mxu0 %v12499_v23 }
0x28ab   :  { %v15421_v21 = vsub.f32 %v15411_v52, %v10140_v54  ;;  %v10141_v28 = vmul.f32 0.015625, %v10138_v35  ;;  %v10145_v36 = vmul.f32 %v15418_v32, %v15418_v32  ;;  %v10956_v54 = vld [vmem:[%s15551_s1 + $0x66] ss:$8 sm:$0x3] }
0x28ac   :  { %11490 = vmatpush3.bf16.msra.mxu0 %v12500_v20  ;;  %v10190_v35 = vrot.slane %v10956_v54, %v13058_v57 }
0x28ad   :  { %v15426_v34 = vsub.f32 %v15408_v55, %v10141_v28  ;;  %v10148_v2 = vsel %vm64_vm0, %v10145_v36, 0.0  ;;  %v10146_v45 = vmul.f32 %v15421_v21, %v15421_v21 }
0x28ae   :  { %10149 = vadd.xlane.f32.xlu0 %v10148_v2 }
0x28af   :  { %v10151_v26 = vsel %vm64_vm0, %v10146_v45, 0.0  ;;  %v10147_v33 = vmul.f32 %v15426_v34, %v15426_v34 }
0x28b0   :  { %10152 = vadd.xlane.f32.xlu1 %v10151_v26 }
0x28b1   :  { %v10154_v50 = vsel %vm71_vm1, %v10147_v33, 0.0 }
0x28b2   :  { %10155 = vadd.xlane.f32.xlu0 %v10154_v50 }
0x293b   :  { %v10150_v37 = vpop.xlane.xlu0 %10149 }
0x293c   :  { %v10157_v13 = vmul.f32 0.015625, %v10150_v37 }
0x293d   :  { %v10153_v53 = vpop.xlane.xlu1 %10152 }
0x293e   :  { %v10160_v30 = vadd.f32 1e-05, %v10157_v13  ;;  %v10158_v46 = vmul.f32 0.015625, %v10153_v53 }
0x293f   :  { %v10156_v43 = vpop.xlane.xlu0 %10155 }
0x2940   :  { %12929 = vrsqrt.f32 %v10160_v30  ;;  %v10161_v49 = vadd.f32 1e-05, %v10158_v46  ;;  %v10159_v59 = vmul.f32 0.015625, %v10156_v43  ;;  %v10957_v43 = vld [vmem:[%s15551_s1 + $0x67] ss:$0 sm:$0xff] }
0x2942   :  { %12931 = vrsqrt.f32 %v10161_v49  ;;  %v10162_v12 = vadd.f32 1e-05, %v10159_v59 }
0x2944   :  { %12933 = vrsqrt.f32 %v10162_v12 }
0x294a   :  { %v12930_v14 = vpop.eup %12929 }
0x294b   :  { %v10166_v61 = vmul.f32 %v12930_v14, %v15418_v32  ;;  %v12502_v32 = vld [vmem:[%s15555_s5 + $0x1b8] sm:$0xff]  }
0x294c   :  { %v12932_v56 = vpop.eup %12931 }
0x294d   :  { %v10169_v4 = vmul.f32 %v10954_v5, %v10166_v61  ;;  %v10167_v47 = vmul.f32 %v12932_v56, %v15421_v21  ;;  %v10194_v21 = vrot.slane %v10956_v54, %v13415_v19 }
0x294e   :  { %v12934_v60 = vpop.eup %12933 }
0x294f   :  { %v10170_v40 = vmul.f32 %v10954_v5, %v10167_v47  ;;  %v10168_v9 = vmul.f32 %v12934_v60, %v15426_v34  ;;  %v10172_v11 = vadd.f32 %v10955_v41, %v10169_v4 }
0x2951   :  { %v10173_v18 = vadd.f32 %v10955_v41, %v10170_v40  ;;  %v10171_v62 = vmul.f32 %v10954_v5, %v10168_v9 }
0x2953   :  { %v10175_v10 = vpack.c.bf16 %v10173_v18, %v10172_v11  ;;  %v10174_v44 = vadd.f32 %v10955_v41, %v10171_v62 }
0x2955   :  { %11062 = vmatmul.mubr.msk.bf16.vlgmr.msra.gmra.mrb[180].mxu1 %vm64_vm0, %v10175_v10  ;;  %v10176_v17 = vpack.c.bf16 %v10174_v44, %v10174_v44  ;;  %v10487_v10 = vld [vmem:[%s15551_s1 + $0x11] ss:$0 sm:$0xff] }
0x2956   :  { %10285 = vmatprep.mubr.bf16.mxu1 %v12964_v29  ;;  %v12501_v29 = vld [vmem:[%s15555_s5 + $0x1f8] sm:$0xff]  }
0x2957   :  { %11491 = vmatprep.subr.bf16.mxu0 %v12501_v29 }
0x2958   :  { %11492 = vmatpush3.bf16.msra.mxu0 %v12502_v32 }
0x295d   :  { %11063 = vmatmul.mubr.msk.bf16.gmra.mrb[184].mxu1 %vm64_vm0, %v10176_v17  ;;  %vm10484_vm0 = vcmask 1040384  }
0x2a28   :  { %v10277_v28 = vpop.f32.mrb[180].mxu1 }
0x2a29   :  { %v10278_v36 = vadd.f32 %v10277_v28, %v10190_v35  ;;  %v10279_v34 = vpop.f32.mrb[181].mxu1 }
0x2a2a   :  { %v10280_v2 = vadd.f32 %v10279_v34, %v10194_v21  ;;  %v10281_v45 = vpop.f32.mrb[182].mxu1 }
0x2a2b   :  { %v10282_v26 = vadd.f32 %v10281_v45, %v10190_v35  ;;  %v10283_v33 = vpop.f32.mrb[183].mxu1  ;;  %v10294_v63 = vmax.f32 %v10278_v36, 0.0 }
0x2a2c   :  { %v10284_v50 = vadd.f32 %v10283_v33, %v10194_v21  ;;  %v10295_v25 = vmax.f32 %v10280_v2, 0.0 }
0x2a2d   :  { %v10296_v27 = vmax.f32 %v10282_v26, 0.0 }
0x2a2e   :  { %v10297_v24 = vmax.f32 %v10284_v50, 0.0 }
0x2a2f   :  { %v10300_v6 = vpack.c.bf16 %v10296_v27, %v10294_v63 }
0x2a30   :  { %v10301_v58 = vpack.c.bf16 %v10297_v24, %v10295_v25  ;;  %v10287_v15 = vpop.f32.mrb[184].mxu1 }
0x2a31   :  { %v10288_v7 = vadd.f32 %v10287_v15, %v10190_v35  ;;  %v10289_v0 = vpop.f32.mrb[185].mxu1 }
0x2a32   :  { %v10290_v57 = vadd.f32 %v10289_v0, %v10194_v21  ;;  %v10291_v39 = vpop.f32.mrb[186].mxu1  ;;  %10465 = vmatprep.mubr.bf16.mxu0 %v10301_v58 }
0x2a33   :  { %v10292_v19 = vpop.f32.mrb[187].mxu1  ;;  %10466 = vmatmul.mubr.bf16.vlgmr.msra.gmra.mrb[172].mxu0 %v10300_v6  ;;  %v10298_v31 = vmax.f32 %v10288_v7, 0.0 }
0x2a34   :  { %v10299_v1 = vmax.f32 %v10290_v57, 0.0 }
0x2a35   :  { %v10302_v3 = vpack.c.bf16 %v10298_v31, %v10298_v31 }
0x2a36   :  { %v10303_v42 = vpack.c.bf16 %v10299_v1, %v10299_v1 }
0x2a38   :  { %10472 = vmatprep.mubr.bf16.mxu0 %v10303_v42 }
0x2a3b   :  { %10473 = vmatmul.mubr.bf16.gmra.mrb[176].mxu0 %v10302_v3 }
0x2b06   :  { %v11493_v51 = vpop.f32.mrb[172].mxu0 }
0x2b07   :  { %v11494_v22 = vpop.f32.mrb[173].mxu0 }
0x2b08   :  { %v11496_v16 = vpop.f32.mrb[174].mxu0 }
0x2b09   :  { %v11497_v48 = vpop.f32.mrb[175].mxu0 }
0x2b0a   :  { %v11498_v38 = vadd.f32 %v11497_v48, %v11496_v16 }
0x2b0c   :  { %v10480_v53 = vadd.f32 %v11498_v38, %v15411_v52 }
0x2b0e   :  { %v11499_v37 = vpop.f32.mrb[176].mxu0  ;;  %v10482_v12 = vadd.f32 %v10957_v43, %v10480_v53 }
0x2b0f   :  { %v11500_v13 = vpop.f32.mrb[177].mxu0 }
0x2b10   :  { %v11501_v30 = vadd.f32 %v11500_v13, %v11499_v37  ;;  %v11502_v46 = vpop.f32.mrb[178].mxu0 }
0x2b11   :  { %v11503_v49 = vpop.f32.mrb[179].mxu0 }
0x2b12   :  { %v10481_v59 = vadd.f32 %v11501_v30, %v15408_v55  ;;  %v10486_v55 = vld [vmem:[%s15551_s1 + $0x10] ss:$0 sm:$0xff] }
0x2b14   :  { %v10483_v14 = vadd.f32 %v10957_v43, %v10481_v59 }
0x2b16   :  { %v10485_v5 = vsel %vm10484_vm0, %v10482_v12, %v10483_v14 }
0x2b17   :  { %v10488_v61 = vsel %vm71_vm1, %v10485_v5, 0.0 }
0x2b18   :  { %10489 = vadd.xlane.f32.xlu1 %v10488_v61 }
0x2ba5   :  { %v10490_v56 = vpop.xlane.xlu1 %10489 }
0x2ba6   :  { %v10491_v4 = vmul.f32 0.015625, %v10490_v56 }
0x2ba8   :  { %v10492_v47 = vsub.f32 %v10485_v5, %v10491_v4 }
0x2baa   :  { %v10493_v52 = vmul.f32 %v10492_v47, %v10492_v47 }
0x2bac   :  { %v10494_v60 = vsel %vm71_vm1, %v10493_v52, 0.0 }
0x2bad   :  { %10495 = vadd.xlane.f32.xlu0 %v10494_v60 }
0x2c3a   :  { %v10496_v41 = vpop.xlane.xlu0 %10495 }
0x2c3b   :  { %v10497_v40 = vmul.f32 0.015625, %v10496_v41 }
0x2c3d   :  { %v10498_v9 = vadd.f32 1e-05, %v10497_v40 }
0x2c3f   :  { %12935 = vrsqrt.f32 %v10498_v9 }
0x2c49   :  { %v12936_v11 = vpop.eup %12935 }
0x2c4a   :  { %v10500_v18 = vmul.f32 %v12936_v11, %v10492_v47 }
0x2c4c   :  { %v10501_v62 = vmul.f32 %v10500_v18, %v10486_v55 }
0x2c4e   :  { %v10502_v44 = vadd.f32 %v10501_v62, %v10487_v10 }
0x2c50   :  { %10503 = vst.msk [vmem:[#allocation2] sm:$0x3] %vm71_vm1, %v10502_v44 }
0x2c51   :  { %12951 = shalt.err (!%p12948_p4)
}
0x2c52   :  { %s12952_s12 = scalar_lea.hbm %s15556_s6, 32 }
0x2c53   :  { %p12953_p5 = scmp.ne.s32.totalorder %s15556_s6, %s12952_s12  ;;  %p12956_p6 = scmp.lt.u32.totalorder %s12952_s12, %s15556_s6 }
0x2c55   :  { %p12958_p7 = pnand %p12956_p6, %p12953_p5 }
0x2c57   :  { %12961 = shalt.err (!%p12958_p7)
}
0x2c58   :  { %10513 = dma.vmem_to_hbm [thread:$0]  %s10511_s8, 32, %s15556_s6, [#allocation3]  }
0x2c59   :  { %12962 = dma.done.wait [#allocation3], 32  }
0x2c5a   :  { %12963 = vsyncadd [#allocation3], 4294967264 }
0x2c5b   :  { %10517 = vsyncpa [#allocation3], 1 }

</bundles_post_ra>
